<compile_context>
chip_gen: v5e
topology: v5e:2x2
jax: 0.10.0
libtpu: 0.0.40
codegen_flags: <defaults>
</compile_context>

<pallas_src>
import math
from functools import partial

import numpy as np
import jax
import jax.numpy as jnp
from jax.experimental import pallas as pl
from jax.experimental.pallas import tpu as pltpu


# ----------------------------------------------------------------------------
# in-kernel helpers
# ----------------------------------------------------------------------------
def _gelu_tanh(x):
    # TODO(synk): nn.GELU() uses the exact erf form; erf has no clean Mosaic
    # lowering, so the kernel uses the tanh approximation (|err| < ~1e-3).
    c = math.sqrt(2.0 / math.pi)
    return 0.5 * x * (1.0 + jnp.tanh(c * (x + 0.044715 * x * x * x)))


def _group_norm(v, gamma, beta, count, eps=1e-5):
    # GroupNorm(1, C): normalize over all (C, N) elements of this sample.
    s = jnp.sum(v, axis=1, keepdims=True)
    s = jnp.sum(s, axis=0, keepdims=True)
    mean = s * (1.0 / count)
    s2 = jnp.sum(v * v, axis=1, keepdims=True)
    s2 = jnp.sum(s2, axis=0, keepdims=True)
    var = s2 * (1.0 / count) - mean * mean
    return (v - mean) * jax.lax.rsqrt(var + eps) * gamma + beta


def _convnext_kernel(x_ref, te_ref, tc_ref, m7_ref, m3_ref, m5_ref,
                     wds_ref, bds_ref, wmlp_ref, bmlp_ref,
                     wtc_ref, btc_ref, wtmlp_ref, btmlp_ref,
                     g1_ref, be1_ref, w1_ref, b1_ref,
                     g2_ref, be2_ref, w2_ref, b2_ref,
                     wres_ref, bres_ref,
                     o_ref,
                     xpad, tpad, hpad1, pat1, hpad2, pat2, *,
                     n, g2n, offs7, offs3, offs5, pad7, pad3, pad5,
                     c_in, c_hid, c_out):
    f32 = jnp.float32
    x = x_ref[0]                                           # (c_in, n)

    # ---- depthwise 7x7 conv: 49 masked shifted taps (VPU) -------------------
    xpad[...] = jnp.zeros(xpad.shape, f32)
    xpad[:, pad7:pad7 + n] = x
    h = jnp.zeros((c_in, n), f32)
    for t, off in enumerate(offs7):
        sh = xpad[:, pad7 + off: pad7 + off + n]           # (c_in, n), zero-padded
        h = h + wds_ref[:, t:t + 1] * (sh * m7_ref[t:t + 1, :])
    h = h + bds_ref[...]                                   # (c_in, 1) bias

    # ---- time-embedding conditioning: GELU -> Linear(T, dim) ---------------
    cond = jnp.sum(wmlp_ref[...] * _gelu_tanh(te_ref[0]), axis=1, keepdims=True)
    cond = cond + bmlp_ref[...]                            # (c_in, 1)

    # ---- traffic conditioning: 5x5 conv -> GELU -> Linear(G*G, dim) --------
    tpad[...] = jnp.zeros(tpad.shape, f32)
    tpad[:, pad5:pad5 + g2n] = tc_ref[0]                   # (1, g2n)
    tacc = jnp.zeros((1, g2n), f32)
    for t, off in enumerate(offs5):
        sh = tpad[:, pad5 + off: pad5 + off + g2n]
        tacc = tacc + wtc_ref[:, t:t + 1] * (sh * m5_ref[t:t + 1, :])
    tacc = tacc + btc_ref[...]                             # (1, 1) bias
    tcond = jnp.sum(wtmlp_ref[...] * _gelu_tanh(tacc), axis=1, keepdims=True)
    tcond = tcond + btmlp_ref[...]                         # (c_in, 1)

    h = h + cond + tcond

    # ---- net: GN -> 3x3 conv (one K=9*Cin matmul) -> GELU -> GN -> 3x3 conv -
    h = _group_norm(h, g1_ref[...], be1_ref[...], c_in * n)

    hpad1[...] = jnp.zeros(hpad1.shape, f32)
    hpad1[:, pad3:pad3 + n] = h
    for t, off in enumerate(offs3):
        pat1[t * c_in:(t + 1) * c_in, :] = (
            hpad1[:, pad3 + off: pad3 + off + n] * m3_ref[t:t + 1, :])
    z = jnp.dot(w1_ref[...], pat1[...], preferred_element_type=f32) + b1_ref[...]
    z = _gelu_tanh(z)
    z = _group_norm(z, g2_ref[...], be2_ref[...], c_hid * n)

    hpad2[...] = jnp.zeros(hpad2.shape, f32)
    hpad2[:, pad3:pad3 + n] = z
    for t, off in enumerate(offs3):
        pat2[t * c_hid:(t + 1) * c_hid, :] = (
            hpad2[:, pad3 + off: pad3 + off + n] * m3_ref[t:t + 1, :])
    z = jnp.dot(w2_ref[...], pat2[...], preferred_element_type=f32) + b2_ref[...]

    # ---- residual 1x1 conv and output (lane-dense (c_out, n) store) --------
    res = jnp.dot(wres_ref[...], x, preferred_element_type=f32) + bres_ref[...]
    o_ref[0] = (z + res).astype(o_ref.dtype)


# ----------------------------------------------------------------------------
# host-side helpers (one-time, numpy)
# ----------------------------------------------------------------------------
def _col_masks(width, ksize, npix):
    """Per-tap {0,1} masks marking flat positions whose column does not wrap."""
    pad = ksize // 2
    col = np.arange(npix) % width
    masks = []
    for dy in range(ksize):
        for dx in range(ksize):
            dxo = dx - pad
            ok = (col + dxo >= 0) & (col + dxo < width)
            masks.append(ok.astype(np.float32))
    return np.stack(masks)


def _flat_offsets(width, ksize):
    pad = ksize // 2
    return tuple((dy - pad) * width + (dx - pad)
                 for dy in range(ksize) for dx in range(ksize))


# ----------------------------------------------------------------------------
# wrapper
# ----------------------------------------------------------------------------
def convnext_block_pallas(x, time_emb, traffic, params):
    """x: (B, dim, H, W); time_emb: (B, T); traffic: (B, 1, G, G) -> (B, dim_out, H, W)."""
    B, c_in, H, W = x.shape
    n = H * W
    T = time_emb.shape[-1]
    G = traffic.shape[-1]
    g2n = G * G
    w1 = params["w1"]                          # (hidden, dim, 3, 3)
    w2 = params["w2"]                          # (dim_out, hidden, 3, 3)
    c_hid, c_out = w1.shape[0], w2.shape[0]

    pad7, pad3, pad5 = 3 * W + 3, W + 1, 2 * G + 2
    offs7, offs3, offs5 = _flat_offsets(W, 7), _flat_offsets(W, 3), _flat_offsets(G, 5)
    m7 = jnp.asarray(_col_masks(W, 7, n))
    m3 = jnp.asarray(_col_masks(W, 3, n))
    m5 = jnp.asarray(_col_masks(G, 5, g2n))

    col = lambda v: v.reshape(-1, 1).astype(jnp.float32)
    wds = params["w_ds"].reshape(c_in, 49)                                  # (dim, 49)
    w1f = jnp.transpose(w1, (0, 2, 3, 1)).reshape(c_hid, 9 * c_in)          # tap-major, ch-minor
    w2f = jnp.transpose(w2, (0, 2, 3, 1)).reshape(c_out, 9 * c_hid)
    wtc = params["w_tcov"].reshape(1, 25)
    if params.get("w_res") is None:                                         # dim == dim_out case
        wres = jnp.eye(c_out, dtype=jnp.float32)
        bres = jnp.zeros((c_out, 1), jnp.float32)
    else:
        wres = params["w_res"].reshape(c_out, c_in)
        bres = col(params["b_res"])

    x_f = x.reshape(B, c_in, n)            # free reshape, lane-dense blocks
    te_f = time_emb.reshape(B, 1, T)
    tc_f = traffic.reshape(B, 1, g2n)

    kern = partial(_convnext_kernel, n=n, g2n=g2n, offs7=offs7, offs3=offs3,
                   offs5=offs5, pad7=pad7, pad3=pad3, pad5=pad5,
                   c_in=c_in, c_hid=c_hid, c_out=c_out)

    in_arrays = [
        x_f, te_f, tc_f, m7, m3, m5,
        wds, col(params["b_ds"]), params["w_mlp"], col(params["b_mlp"]),
        wtc, params["b_tcov"].reshape(1, 1), params["w_tmlp"], col(params["b_tmlp"]),
        col(params["gn1_w"]), col(params["gn1_b"]), w1f, col(params["b1"]),
        col(params["gn2_w"]), col(params["gn2_b"]), w2f, col(params["b2"]),
        wres, bres,
    ]
    full = lambda a: pl.BlockSpec(a.shape, lambda b: (0,) * a.ndim)
    in_specs = [
        pl.BlockSpec((1, c_in, n), lambda b: (b, 0, 0)),
        pl.BlockSpec((1, 1, T), lambda b: (b, 0, 0)),
        pl.BlockSpec((1, 1, g2n), lambda b: (b, 0, 0)),
    ] + [full(a) for a in in_arrays[3:]]

    out = pl.pallas_call(
        kern,
        out_shape=jax.ShapeDtypeStruct((B, c_out, n), x.dtype),
        grid_spec=pltpu.PrefetchScalarGridSpec(
            num_scalar_prefetch=0,
            grid=(B,),
            in_specs=in_specs,
            out_specs=pl.BlockSpec((1, c_out, n), lambda b: (b, 0, 0)),
            scratch_shapes=[
                pltpu.VMEM((c_in, n + 2 * pad7), jnp.float32),   # padded x (7x7)
                pltpu.VMEM((1, g2n + 2 * pad5), jnp.float32),    # padded traffic (5x5)
                pltpu.VMEM((c_in, n + 2 * pad3), jnp.float32),   # padded h (3x3 #1)
                pltpu.VMEM((9 * c_in, n), jnp.float32),          # im2col stack #1
                pltpu.VMEM((c_hid, n + 2 * pad3), jnp.float32),  # padded h (3x3 #2)
                pltpu.VMEM((9 * c_hid, n), jnp.float32),         # im2col stack #2
            ]),
        compiler_params=pltpu.CompilerParams(
            dimension_semantics=("parallel",)),
    )(*in_arrays)

    return out.reshape(B, c_out, H, W)


# ----------------------------------------------------------------------------
# pure-JAX reference (exact PyTorch semantics, incl. exact erf GELU)
# ----------------------------------------------------------------------------
def convnext_block_ref(x, time_emb, traffic, p, eps=1e-5):
    hp = jax.lax.Precision.HIGHEST
    dn = ("NCHW", "OIHW", "NCHW")

    def conv(v, w, b, pad, groups=1):
        out = jax.lax.conv_general_dilated(
            v, w, (1, 1), ((pad, pad), (pad, pad)),
            dimension_numbers=dn, feature_group_count=groups, precision=hp)
        return out + b.reshape(1, -1, 1, 1)

    def gelu(t):
        return 0.5 * t * (1.0 + jax.lax.erf(t * (1.0 / math.sqrt(2.0))))

    def gn(v, g, b):
        mean = jnp.mean(v, axis=(1, 2, 3), keepdims=True)
        var = jnp.mean((v - mean) ** 2, axis=(1, 2, 3), keepdims=True)
        return ((v - mean) / jnp.sqrt(var + eps) * g.reshape(1, -1, 1, 1)
                + b.reshape(1, -1, 1, 1))

    B = x.shape[0]
    h = conv(x, p["w_ds"], p["b_ds"], 3, groups=x.shape[1])
    cond = jnp.dot(gelu(time_emb), p["w_mlp"].T, precision=hp) + p["b_mlp"]
    tcv = conv(traffic, p["w_tcov"], p["b_tcov"], 2)
    tcond = jnp.dot(gelu(tcv.reshape(B, -1)), p["w_tmlp"].T, precision=hp) + p["b_tmlp"]
    h = h + cond[:, :, None, None] + tcond[:, :, None, None]
    h = gn(h, p["gn1_w"], p["gn1_b"])
    h = conv(h, p["w1"], p["b1"], 1)
    h = gelu(h)
    h = gn(h, p["gn2_w"], p["gn2_b"])
    h = conv(h, p["w2"], p["b2"], 1)
    res = conv(x, p["w_res"][:, :, None, None], p["b_res"], 0)
    return h + res


if __name__ == "__main__":
    B, dim, H, W = 2, 4, 16, 16
    dim_out, mult = 8, 2
    hidden = dim_out * mult            # 16
    time_emb_dim = 8
    grid_num = 16

    key = jax.random.PRNGKey(0)
    ks = jax.random.split(key, 21)
    normal = lambda k, shp, scale=1.0: scale * jax.random.normal(k, shp, jnp.float32)

    x = normal(ks[0], (B, dim, H, W))
    time_emb = normal(ks[1], (B, time_emb_dim))
    traffic = normal(ks[2], (B, 1, grid_num, grid_num))

    params = dict(
        w_ds=normal(ks[3], (dim, 1, 7, 7), 1.0 / 7.0),
        b_ds=normal(ks[4], (dim,), 0.1),
        w_mlp=normal(ks[5], (dim, time_emb_dim), 1.0 / math.sqrt(time_emb_dim)),
        b_mlp=normal(ks[6], (dim,), 0.1),
        w_tcov=normal(ks[7], (1, 1, 5, 5), 1.0 / 5.0),
        b_tcov=normal(ks[8], (1,), 0.1),
        w_tmlp=normal(ks[9], (dim, grid_num * grid_num), 1.0 / grid_num),
        b_tmlp=normal(ks[10], (dim,), 0.1),
        gn1_w=1.0 + 0.1 * jax.random.normal(ks[11], (dim,), jnp.float32),
        gn1_b=normal(ks[12], (dim,), 0.1),
        w1=normal(ks[13], (hidden, dim, 3, 3), 1.0 / math.sqrt(9 * dim)),
        b1=normal(ks[14], (hidden,), 0.1),
        gn2_w=1.0 + 0.1 * jax.random.normal(ks[15], (hidden,), jnp.float32),
        gn2_b=normal(ks[16], (hidden,), 0.1),
        w2=normal(ks[17], (dim_out, hidden, 3, 3), 1.0 / math.sqrt(9 * hidden)),
        b2=normal(ks[18], (dim_out,), 0.1),
        w_res=normal(ks[19], (dim_out, dim), 1.0 / math.sqrt(dim)),
        b_res=normal(ks[20], (dim_out,), 0.1),
    )

    y = convnext_block_pallas(x, time_emb, traffic, params)
    y = jax.block_until_ready(y)

    y_ref = convnext_block_ref(x, time_emb, traffic, params)
    if not bool(jnp.allclose(y, y_ref, rtol=2e-2, atol=2e-2)):
        err = float(jnp.max(jnp.abs(y - y_ref)))
        raise AssertionError(
            f"Pallas ConvNextBlock kernel does not match reference (max abs err {err:.3e})")
    print("KERNEL_OK")
</pallas_src>

<mosaic_0001>
module attributes {stable_mosaic.version = 11 : i64} {
  func.func @_convnext_kernel(%arg0: i32, %arg1: memref<1x4x256xf32, #tpu.memory_space<vmem>>, %arg2: memref<1x1x8xf32, #tpu.memory_space<vmem>>, %arg3: memref<1x1x256xf32, #tpu.memory_space<vmem>>, %arg4: memref<49x256xf32, #tpu.memory_space<vmem>>, %arg5: memref<9x256xf32, #tpu.memory_space<vmem>>, %arg6: memref<25x256xf32, #tpu.memory_space<vmem>>, %arg7: memref<4x49xf32, #tpu.memory_space<vmem>>, %arg8: memref<4x1xf32, #tpu.memory_space<vmem>>, %arg9: memref<4x8xf32, #tpu.memory_space<vmem>>, %arg10: memref<4x1xf32, #tpu.memory_space<vmem>>, %arg11: memref<1x25xf32, #tpu.memory_space<vmem>>, %arg12: memref<1x1xf32, #tpu.memory_space<vmem>>, %arg13: memref<4x256xf32, #tpu.memory_space<vmem>>, %arg14: memref<4x1xf32, #tpu.memory_space<vmem>>, %arg15: memref<4x1xf32, #tpu.memory_space<vmem>>, %arg16: memref<4x1xf32, #tpu.memory_space<vmem>>, %arg17: memref<16x36xf32, #tpu.memory_space<vmem>>, %arg18: memref<16x1xf32, #tpu.memory_space<vmem>>, %arg19: memref<16x1xf32, #tpu.memory_space<vmem>>, %arg20: memref<16x1xf32, #tpu.memory_space<vmem>>, %arg21: memref<8x144xf32, #tpu.memory_space<vmem>>, %arg22: memref<8x1xf32, #tpu.memory_space<vmem>>, %arg23: memref<8x4xf32, #tpu.memory_space<vmem>>, %arg24: memref<8x1xf32, #tpu.memory_space<vmem>>, %arg25: memref<1x8x256xf32, #tpu.memory_space<vmem>>, %arg26: memref<4x358xf32, #tpu.memory_space<vmem>>, %arg27: memref<1x324xf32, #tpu.memory_space<vmem>>, %arg28: memref<4x290xf32, #tpu.memory_space<vmem>>, %arg29: memref<36x256xf32, #tpu.memory_space<vmem>>, %arg30: memref<16x290xf32, #tpu.memory_space<vmem>>, %arg31: memref<144x256xf32, #tpu.memory_space<vmem>>) attributes {dimension_semantics = [#tpu.dimension_semantics<parallel>], iteration_bounds = array<i64: 2>, scalar_prefetch = 0 : i64, scratch_operands = 6 : i64, tpu.core_type = #tpu.core_type<tc>, window_params = [{transform_indices = @transform_0, window_bounds = array<i64: 1, 4, 256>}, {transform_indices = @transform_1, window_bounds = array<i64: 1, 1, 8>}, {transform_indices = @transform_2, window_bounds = array<i64: 1, 1, 256>}, {pipeline_mode = #tpu.pipeline_mode<synchronous>, transform_indices = @transform_3, window_bounds = array<i64: 49, 256>}, {pipeline_mode = #tpu.pipeline_mode<synchronous>, transform_indices = @transform_4, window_bounds = array<i64: 9, 256>}, {pipeline_mode = #tpu.pipeline_mode<synchronous>, transform_indices = @transform_5, window_bounds = array<i64: 25, 256>}, {pipeline_mode = #tpu.pipeline_mode<synchronous>, transform_indices = @transform_6, window_bounds = array<i64: 4, 49>}, {pipeline_mode = #tpu.pipeline_mode<synchronous>, transform_indices = @transform_7, window_bounds = array<i64: 4, 1>}, {pipeline_mode = #tpu.pipeline_mode<synchronous>, transform_indices = @transform_8, window_bounds = array<i64: 4, 8>}, {pipeline_mode = #tpu.pipeline_mode<synchronous>, transform_indices = @transform_9, window_bounds = array<i64: 4, 1>}, {pipeline_mode = #tpu.pipeline_mode<synchronous>, transform_indices = @transform_10, window_bounds = array<i64: 1, 25>}, {pipeline_mode = #tpu.pipeline_mode<synchronous>, transform_indices = @transform_11, window_bounds = array<i64: 1, 1>}, {pipeline_mode = #tpu.pipeline_mode<synchronous>, transform_indices = @transform_12, window_bounds = array<i64: 4, 256>}, {pipeline_mode = #tpu.pipeline_mode<synchronous>, transform_indices = @transform_13, window_bounds = array<i64: 4, 1>}, {pipeline_mode = #tpu.pipeline_mode<synchronous>, transform_indices = @transform_14, window_bounds = array<i64: 4, 1>}, {pipeline_mode = #tpu.pipeline_mode<synchronous>, transform_indices = @transform_15, window_bounds = array<i64: 4, 1>}, {pipeline_mode = #tpu.pipeline_mode<synchronous>, transform_indices = @transform_16, window_bounds = array<i64: 16, 36>}, {pipeline_mode = #tpu.pipeline_mode<synchronous>, transform_indices = @transform_17, window_bounds = array<i64: 16, 1>}, {pipeline_mode = #tpu.pipeline_mode<synchronous>, transform_indices = @transform_18, window_bounds = array<i64: 16, 1>}, {pipeline_mode = #tpu.pipeline_mode<synchronous>, transform_indices = @transform_19, window_bounds = array<i64: 16, 1>}, {pipeline_mode = #tpu.pipeline_mode<synchronous>, transform_indices = @transform_20, window_bounds = array<i64: 8, 144>}, {pipeline_mode = #tpu.pipeline_mode<synchronous>, transform_indices = @transform_21, window_bounds = array<i64: 8, 1>}, {pipeline_mode = #tpu.pipeline_mode<synchronous>, transform_indices = @transform_22, window_bounds = array<i64: 8, 4>}, {pipeline_mode = #tpu.pipeline_mode<synchronous>, transform_indices = @transform_23, window_bounds = array<i64: 8, 1>}, {transform_indices = @transform_24, window_bounds = array<i64: 1, 8, 256>}]} {
    %c0 = arith.constant 0 : index
    %c0_0 = arith.constant 0 : index
    %c0_1 = arith.constant 0 : index
    %0 = vector.load %arg1[%c0, %c0_0, %c0_1] : memref<1x4x256xf32, #tpu.memory_space<vmem>>, vector<1x4x256xf32>
    %1 = vector.shape_cast %0 : vector<1x4x256xf32> to vector<4x256xf32>
    %cst = arith.constant 0.000000e+00 : f32
    %2 = vector.broadcast %cst : f32 to vector<4x358xf32>
    %c0_2 = arith.constant 0 : index
    %c0_3 = arith.constant 0 : index
    %3 = vector.load %arg26[%c0_2, %c0_3] : memref<4x358xf32, #tpu.memory_space<vmem>>, vector<4x358xf32>
    tpu.vector_store %arg26[%c0_2, %c0_3], %2 {strides = array<i32>} : memref<4x358xf32, #tpu.memory_space<vmem>>, vector<4x358xf32>,
    %c0_4 = arith.constant 0 : index
    %c51 = arith.constant 51 : index
    %4 = vector.load %arg26[%c0_4, %c51] : memref<4x358xf32, #tpu.memory_space<vmem>>, vector<4x256xf32>
    tpu.vector_store %arg26[%c0_4, %c51], %1 {strides = array<i32>} : memref<4x358xf32, #tpu.memory_space<vmem>>, vector<4x256xf32>,
    %cst_5 = arith.constant 0.000000e+00 : f32
    %5 = vector.broadcast %cst_5 : f32 to vector<4x256xf32>
    %c0_6 = arith.constant 0 : index
    %c0_7 = arith.constant 0 : index
    %6 = vector.load %arg26[%c0_6, %c0_7] : memref<4x358xf32, #tpu.memory_space<vmem>>, vector<4x256xf32>
    %c0_8 = arith.constant 0 : index
    %c0_9 = arith.constant 0 : index
    %7 = vector.load %arg7[%c0_8, %c0_9] : memref<4x49xf32, #tpu.memory_space<vmem>>, vector<4x1xf32>
    %c0_10 = arith.constant 0 : index
    %c0_11 = arith.constant 0 : index
    %8 = vector.load %arg4[%c0_10, %c0_11] : memref<49x256xf32, #tpu.memory_space<vmem>>, vector<1x256xf32>
    %9 = vector.broadcast %8 : vector<1x256xf32> to vector<4x256xf32>
    %10 = arith.mulf %6, %9 : vector<4x256xf32>
    %11 = vector.broadcast %7 : vector<4x1xf32> to vector<4x256xf32>
    %12 = arith.mulf %11, %10 : vector<4x256xf32>
    %13 = arith.addf %5, %12 : vector<4x256xf32>
    %c0_12 = arith.constant 0 : index
    %c1 = arith.constant 1 : index
    %14 = vector.load %arg26[%c0_12, %c1] : memref<4x358xf32, #tpu.memory_space<vmem>>, vector<4x256xf32>
    %c0_13 = arith.constant 0 : index
    %c1_14 = arith.constant 1 : index
    %15 = vector.load %arg7[%c0_13, %c1_14] : memref<4x49xf32, #tpu.memory_space<vmem>>, vector<4x1xf32>
    %c1_15 = arith.constant 1 : index
    %c0_16 = arith.constant 0 : index
    %16 = vector.load %arg4[%c1_15, %c0_16] : memref<49x256xf32, #tpu.memory_space<vmem>>, vector<1x256xf32>
    %17 = vector.broadcast %16 : vector<1x256xf32> to vector<4x256xf32>
    %18 = arith.mulf %14, %17 : vector<4x256xf32>
    %19 = vector.broadcast %15 : vector<4x1xf32> to vector<4x256xf32>
    %20 = arith.mulf %19, %18 : vector<4x256xf32>
    %21 = arith.addf %13, %20 : vector<4x256xf32>
    %c0_17 = arith.constant 0 : index
    %c2 = arith.constant 2 : index
    %22 = vector.load %arg26[%c0_17, %c2] : memref<4x358xf32, #tpu.memory_space<vmem>>, vector<4x256xf32>
    %c0_18 = arith.constant 0 : index
    %c2_19 = arith.constant 2 : index
    %23 = vector.load %arg7[%c0_18, %c2_19] : memref<4x49xf32, #tpu.memory_space<vmem>>, vector<4x1xf32>
    %c2_20 = arith.constant 2 : index
    %c0_21 = arith.constant 0 : index
    %24 = vector.load %arg4[%c2_20, %c0_21] : memref<49x256xf32, #tpu.memory_space<vmem>>, vector<1x256xf32>
    %25 = vector.broadcast %24 : vector<1x256xf32> to vector<4x256xf32>
    %26 = arith.mulf %22, %25 : vector<4x256xf32>
    %27 = vector.broadcast %23 : vector<4x1xf32> to vector<4x256xf32>
    %28 = arith.mulf %27, %26 : vector<4x256xf32>
    %29 = arith.addf %21, %28 : vector<4x256xf32>
    %c0_22 = arith.constant 0 : index
    %c3 = arith.constant 3 : index
    %30 = vector.load %arg26[%c0_22, %c3] : memref<4x358xf32, #tpu.memory_space<vmem>>, vector<4x256xf32>
    %c0_23 = arith.constant 0 : index
    %c3_24 = arith.constant 3 : index
    %31 = vector.load %arg7[%c0_23, %c3_24] : memref<4x49xf32, #tpu.memory_space<vmem>>, vector<4x1xf32>
    %c3_25 = arith.constant 3 : index
    %c0_26 = arith.constant 0 : index
    %32 = vector.load %arg4[%c3_25, %c0_26] : memref<49x256xf32, #tpu.memory_space<vmem>>, vector<1x256xf32>
    %33 = vector.broadcast %32 : vector<1x256xf32> to vector<4x256xf32>
    %34 = arith.mulf %30, %33 : vector<4x256xf32>
    %35 = vector.broadcast %31 : vector<4x1xf32> to vector<4x256xf32>
    %36 = arith.mulf %35, %34 : vector<4x256xf32>
    %37 = arith.addf %29, %36 : vector<4x256xf32>
    %c0_27 = arith.constant 0 : index
    %c4 = arith.constant 4 : index
    %38 = vector.load %arg26[%c0_27, %c4] : memref<4x358xf32, #tpu.memory_space<vmem>>, vector<4x256xf32>
    %c0_28 = arith.constant 0 : index
    %c4_29 = arith.constant 4 : index
    %39 = vector.load %arg7[%c0_28, %c4_29] : memref<4x49xf32, #tpu.memory_space<vmem>>, vector<4x1xf32>
    %c4_30 = arith.constant 4 : index
    %c0_31 = arith.constant 0 : index
    %40 = vector.load %arg4[%c4_30, %c0_31] : memref<49x256xf32, #tpu.memory_space<vmem>>, vector<1x256xf32>
    %41 = vector.broadcast %40 : vector<1x256xf32> to vector<4x256xf32>
    %42 = arith.mulf %38, %41 : vector<4x256xf32>
    %43 = vector.broadcast %39 : vector<4x1xf32> to vector<4x256xf32>
    %44 = arith.mulf %43, %42 : vector<4x256xf32>
    %45 = arith.addf %37, %44 : vector<4x256xf32>
    %c0_32 = arith.constant 0 : index
    %c5 = arith.constant 5 : index
    %46 = vector.load %arg26[%c0_32, %c5] : memref<4x358xf32, #tpu.memory_space<vmem>>, vector<4x256xf32>
    %c0_33 = arith.constant 0 : index
    %c5_34 = arith.constant 5 : index
    %47 = vector.load %arg7[%c0_33, %c5_34] : memref<4x49xf32, #tpu.memory_space<vmem>>, vector<4x1xf32>
    %c5_35 = arith.constant 5 : index
    %c0_36 = arith.constant 0 : index
    %48 = vector.load %arg4[%c5_35, %c0_36] : memref<49x256xf32, #tpu.memory_space<vmem>>, vector<1x256xf32>
    %49 = vector.broadcast %48 : vector<1x256xf32> to vector<4x256xf32>
    %50 = arith.mulf %46, %49 : vector<4x256xf32>
    %51 = vector.broadcast %47 : vector<4x1xf32> to vector<4x256xf32>
    %52 = arith.mulf %51, %50 : vector<4x256xf32>
    %53 = arith.addf %45, %52 : vector<4x256xf32>
    %c0_37 = arith.constant 0 : index
    %c6 = arith.constant 6 : index
    %54 = vector.load %arg26[%c0_37, %c6] : memref<4x358xf32, #tpu.memory_space<vmem>>, vector<4x256xf32>
    %c0_38 = arith.constant 0 : index
    %c6_39 = arith.constant 6 : index
    %55 = vector.load %arg7[%c0_38, %c6_39] : memref<4x49xf32, #tpu.memory_space<vmem>>, vector<4x1xf32>
    %c6_40 = arith.constant 6 : index
    %c0_41 = arith.constant 0 : index
    %56 = vector.load %arg4[%c6_40, %c0_41] : memref<49x256xf32, #tpu.memory_space<vmem>>, vector<1x256xf32>
    %57 = vector.broadcast %56 : vector<1x256xf32> to vector<4x256xf32>
    %58 = arith.mulf %54, %57 : vector<4x256xf32>
    %59 = vector.broadcast %55 : vector<4x1xf32> to vector<4x256xf32>
    %60 = arith.mulf %59, %58 : vector<4x256xf32>
    %61 = arith.addf %53, %60 : vector<4x256xf32>
    %c0_42 = arith.constant 0 : index
    %c16 = arith.constant 16 : index
    %62 = vector.load %arg26[%c0_42, %c16] : memref<4x358xf32, #tpu.memory_space<vmem>>, vector<4x256xf32>
    %c0_43 = arith.constant 0 : index
    %c7 = arith.constant 7 : index
    %63 = vector.load %arg7[%c0_43, %c7] : memref<4x49xf32, #tpu.memory_space<vmem>>, vector<4x1xf32>
    %c7_44 = arith.constant 7 : index
    %c0_45 = arith.constant 0 : index
    %64 = vector.load %arg4[%c7_44, %c0_45] : memref<49x256xf32, #tpu.memory_space<vmem>>, vector<1x256xf32>
    %65 = vector.broadcast %64 : vector<1x256xf32> to vector<4x256xf32>
    %66 = arith.mulf %62, %65 : vector<4x256xf32>
    %67 = vector.broadcast %63 : vector<4x1xf32> to vector<4x256xf32>
    %68 = arith.mulf %67, %66 : vector<4x256xf32>
    %69 = arith.addf %61, %68 : vector<4x256xf32>
    %c0_46 = arith.constant 0 : index
    %c17 = arith.constant 17 : index
    %70 = vector.load %arg26[%c0_46, %c17] : memref<4x358xf32, #tpu.memory_space<vmem>>, vector<4x256xf32>
    %c0_47 = arith.constant 0 : index
    %c8 = arith.constant 8 : index
    %71 = vector.load %arg7[%c0_47, %c8] : memref<4x49xf32, #tpu.memory_space<vmem>>, vector<4x1xf32>
    %c8_48 = arith.constant 8 : index
    %c0_49 = arith.constant 0 : index
    %72 = vector.load %arg4[%c8_48, %c0_49] : memref<49x256xf32, #tpu.memory_space<vmem>>, vector<1x256xf32>
    %73 = vector.broadcast %72 : vector<1x256xf32> to vector<4x256xf32>
    %74 = arith.mulf %70, %73 : vector<4x256xf32>
    %75 = vector.broadcast %71 : vector<4x1xf32> to vector<4x256xf32>
    %76 = arith.mulf %75, %74 : vector<4x256xf32>
    %77 = arith.addf %69, %76 : vector<4x256xf32>
    %c0_50 = arith.constant 0 : index
    %c18 = arith.constant 18 : index
    %78 = vector.load %arg26[%c0_50, %c18] : memref<4x358xf32, #tpu.memory_space<vmem>>, vector<4x256xf32>
    %c0_51 = arith.constant 0 : index
    %c9 = arith.constant 9 : index
    %79 = vector.load %arg7[%c0_51, %c9] : memref<4x49xf32, #tpu.memory_space<vmem>>, vector<4x1xf32>
    %c9_52 = arith.constant 9 : index
    %c0_53 = arith.constant 0 : index
    %80 = vector.load %arg4[%c9_52, %c0_53] : memref<49x256xf32, #tpu.memory_space<vmem>>, vector<1x256xf32>
    %81 = vector.broadcast %80 : vector<1x256xf32> to vector<4x256xf32>
    %82 = arith.mulf %78, %81 : vector<4x256xf32>
    %83 = vector.broadcast %79 : vector<4x1xf32> to vector<4x256xf32>
    %84 = arith.mulf %83, %82 : vector<4x256xf32>
    %85 = arith.addf %77, %84 : vector<4x256xf32>
    %c0_54 = arith.constant 0 : index
    %c19 = arith.constant 19 : index
    %86 = vector.load %arg26[%c0_54, %c19] : memref<4x358xf32, #tpu.memory_space<vmem>>, vector<4x256xf32>
    %c0_55 = arith.constant 0 : index
    %c10 = arith.constant 10 : index
    %87 = vector.load %arg7[%c0_55, %c10] : memref<4x49xf32, #tpu.memory_space<vmem>>, vector<4x1xf32>
    %c10_56 = arith.constant 10 : index
    %c0_57 = arith.constant 0 : index
    %88 = vector.load %arg4[%c10_56, %c0_57] : memref<49x256xf32, #tpu.memory_space<vmem>>, vector<1x256xf32>
    %89 = vector.broadcast %88 : vector<1x256xf32> to vector<4x256xf32>
    %90 = arith.mulf %86, %89 : vector<4x256xf32>
    %91 = vector.broadcast %87 : vector<4x1xf32> to vector<4x256xf32>
    %92 = arith.mulf %91, %90 : vector<4x256xf32>
    %93 = arith.addf %85, %92 : vector<4x256xf32>
    %c0_58 = arith.constant 0 : index
    %c20 = arith.constant 20 : index
    %94 = vector.load %arg26[%c0_58, %c20] : memref<4x358xf32, #tpu.memory_space<vmem>>, vector<4x256xf32>
    %c0_59 = arith.constant 0 : index
    %c11 = arith.constant 11 : index
    %95 = vector.load %arg7[%c0_59, %c11] : memref<4x49xf32, #tpu.memory_space<vmem>>, vector<4x1xf32>
    %c11_60 = arith.constant 11 : index
    %c0_61 = arith.constant 0 : index
    %96 = vector.load %arg4[%c11_60, %c0_61] : memref<49x256xf32, #tpu.memory_space<vmem>>, vector<1x256xf32>
    %97 = vector.broadcast %96 : vector<1x256xf32> to vector<4x256xf32>
    %98 = arith.mulf %94, %97 : vector<4x256xf32>
    %99 = vector.broadcast %95 : vector<4x1xf32> to vector<4x256xf32>
    %100 = arith.mulf %99, %98 : vector<4x256xf32>
    %101 = arith.addf %93, %100 : vector<4x256xf32>
    %c0_62 = arith.constant 0 : index
    %c21 = arith.constant 21 : index
    %102 = vector.load %arg26[%c0_62, %c21] : memref<4x358xf32, #tpu.memory_space<vmem>>, vector<4x256xf32>
    %c0_63 = arith.constant 0 : index
    %c12 = arith.constant 12 : index
    %103 = vector.load %arg7[%c0_63, %c12] : memref<4x49xf32, #tpu.memory_space<vmem>>, vector<4x1xf32>
    %c12_64 = arith.constant 12 : index
    %c0_65 = arith.constant 0 : index
    %104 = vector.load %arg4[%c12_64, %c0_65] : memref<49x256xf32, #tpu.memory_space<vmem>>, vector<1x256xf32>
    %105 = vector.broadcast %104 : vector<1x256xf32> to vector<4x256xf32>
    %106 = arith.mulf %102, %105 : vector<4x256xf32>
    %107 = vector.broadcast %103 : vector<4x1xf32> to vector<4x256xf32>
    %108 = arith.mulf %107, %106 : vector<4x256xf32>
    %109 = arith.addf %101, %108 : vector<4x256xf32>
    %c0_66 = arith.constant 0 : index
    %c22 = arith.constant 22 : index
    %110 = vector.load %arg26[%c0_66, %c22] : memref<4x358xf32, #tpu.memory_space<vmem>>, vector<4x256xf32>
    %c0_67 = arith.constant 0 : index
    %c13 = arith.constant 13 : index
    %111 = vector.load %arg7[%c0_67, %c13] : memref<4x49xf32, #tpu.memory_space<vmem>>, vector<4x1xf32>
    %c13_68 = arith.constant 13 : index
    %c0_69 = arith.constant 0 : index
    %112 = vector.load %arg4[%c13_68, %c0_69] : memref<49x256xf32, #tpu.memory_space<vmem>>, vector<1x256xf32>
    %113 = vector.broadcast %112 : vector<1x256xf32> to vector<4x256xf32>
    %114 = arith.mulf %110, %113 : vector<4x256xf32>
    %115 = vector.broadcast %111 : vector<4x1xf32> to vector<4x256xf32>
    %116 = arith.mulf %115, %114 : vector<4x256xf32>
    %117 = arith.addf %109, %116 : vector<4x256xf32>
    %c0_70 = arith.constant 0 : index
    %c32 = arith.constant 32 : index
    %118 = vector.load %arg26[%c0_70, %c32] : memref<4x358xf32, #tpu.memory_space<vmem>>, vector<4x256xf32>
    %c0_71 = arith.constant 0 : index
    %c14 = arith.constant 14 : index
    %119 = vector.load %arg7[%c0_71, %c14] : memref<4x49xf32, #tpu.memory_space<vmem>>, vector<4x1xf32>
    %c14_72 = arith.constant 14 : index
    %c0_73 = arith.constant 0 : index
    %120 = vector.load %arg4[%c14_72, %c0_73] : memref<49x256xf32, #tpu.memory_space<vmem>>, vector<1x256xf32>
    %121 = vector.broadcast %120 : vector<1x256xf32> to vector<4x256xf32>
    %122 = arith.mulf %118, %121 : vector<4x256xf32>
    %123 = vector.broadcast %119 : vector<4x1xf32> to vector<4x256xf32>
    %124 = arith.mulf %123, %122 : vector<4x256xf32>
    %125 = arith.addf %117, %124 : vector<4x256xf32>
    %c0_74 = arith.constant 0 : index
    %c33 = arith.constant 33 : index
    %126 = vector.load %arg26[%c0_74, %c33] : memref<4x358xf32, #tpu.memory_space<vmem>>, vector<4x256xf32>
    %c0_75 = arith.constant 0 : index
    %c15 = arith.constant 15 : index
    %127 = vector.load %arg7[%c0_75, %c15] : memref<4x49xf32, #tpu.memory_space<vmem>>, vector<4x1xf32>
    %c15_76 = arith.constant 15 : index
    %c0_77 = arith.constant 0 : index
    %128 = vector.load %arg4[%c15_76, %c0_77] : memref<49x256xf32, #tpu.memory_space<vmem>>, vector<1x256xf32>
    %129 = vector.broadcast %128 : vector<1x256xf32> to vector<4x256xf32>
    %130 = arith.mulf %126, %129 : vector<4x256xf32>
    %131 = vector.broadcast %127 : vector<4x1xf32> to vector<4x256xf32>
    %132 = arith.mulf %131, %130 : vector<4x256xf32>
    %133 = arith.addf %125, %132 : vector<4x256xf32>
    %c0_78 = arith.constant 0 : index
    %c34 = arith.constant 34 : index
    %134 = vector.load %arg26[%c0_78, %c34] : memref<4x358xf32, #tpu.memory_space<vmem>>, vector<4x256xf32>
    %c0_79 = arith.constant 0 : index
    %c16_80 = arith.constant 16 : index
    %135 = vector.load %arg7[%c0_79, %c16_80] : memref<4x49xf32, #tpu.memory_space<vmem>>, vector<4x1xf32>
    %c16_81 = arith.constant 16 : index
    %c0_82 = arith.constant 0 : index
    %136 = vector.load %arg4[%c16_81, %c0_82] : memref<49x256xf32, #tpu.memory_space<vmem>>, vector<1x256xf32>
    %137 = vector.broadcast %136 : vector<1x256xf32> to vector<4x256xf32>
    %138 = arith.mulf %134, %137 : vector<4x256xf32>
    %139 = vector.broadcast %135 : vector<4x1xf32> to vector<4x256xf32>
    %140 = arith.mulf %139, %138 : vector<4x256xf32>
    %141 = arith.addf %133, %140 : vector<4x256xf32>
    %c0_83 = arith.constant 0 : index
    %c35 = arith.constant 35 : index
    %142 = vector.load %arg26[%c0_83, %c35] : memref<4x358xf32, #tpu.memory_space<vmem>>, vector<4x256xf32>
    %c0_84 = arith.constant 0 : index
    %c17_85 = arith.constant 17 : index
    %143 = vector.load %arg7[%c0_84, %c17_85] : memref<4x49xf32, #tpu.memory_space<vmem>>, vector<4x1xf32>
    %c17_86 = arith.constant 17 : index
    %c0_87 = arith.constant 0 : index
    %144 = vector.load %arg4[%c17_86, %c0_87] : memref<49x256xf32, #tpu.memory_space<vmem>>, vector<1x256xf32>
    %145 = vector.broadcast %144 : vector<1x256xf32> to vector<4x256xf32>
    %146 = arith.mulf %142, %145 : vector<4x256xf32>
    %147 = vector.broadcast %143 : vector<4x1xf32> to vector<4x256xf32>
    %148 = arith.mulf %147, %146 : vector<4x256xf32>
    %149 = arith.addf %141, %148 : vector<4x256xf32>
    %c0_88 = arith.constant 0 : index
    %c36 = arith.constant 36 : index
    %150 = vector.load %arg26[%c0_88, %c36] : memref<4x358xf32, #tpu.memory_space<vmem>>, vector<4x256xf32>
    %c0_89 = arith.constant 0 : index
    %c18_90 = arith.constant 18 : index
    %151 = vector.load %arg7[%c0_89, %c18_90] : memref<4x49xf32, #tpu.memory_space<vmem>>, vector<4x1xf32>
    %c18_91 = arith.constant 18 : index
    %c0_92 = arith.constant 0 : index
    %152 = vector.load %arg4[%c18_91, %c0_92] : memref<49x256xf32, #tpu.memory_space<vmem>>, vector<1x256xf32>
    %153 = vector.broadcast %152 : vector<1x256xf32> to vector<4x256xf32>
    %154 = arith.mulf %150, %153 : vector<4x256xf32>
    %155 = vector.broadcast %151 : vector<4x1xf32> to vector<4x256xf32>
    %156 = arith.mulf %155, %154 : vector<4x256xf32>
    %157 = arith.addf %149, %156 : vector<4x256xf32>
    %c0_93 = arith.constant 0 : index
    %c37 = arith.constant 37 : index
    %158 = vector.load %arg26[%c0_93, %c37] : memref<4x358xf32, #tpu.memory_space<vmem>>, vector<4x256xf32>
    %c0_94 = arith.constant 0 : index
    %c19_95 = arith.constant 19 : index
    %159 = vector.load %arg7[%c0_94, %c19_95] : memref<4x49xf32, #tpu.memory_space<vmem>>, vector<4x1xf32>
    %c19_96 = arith.constant 19 : index
    %c0_97 = arith.constant 0 : index
    %160 = vector.load %arg4[%c19_96, %c0_97] : memref<49x256xf32, #tpu.memory_space<vmem>>, vector<1x256xf32>
    %161 = vector.broadcast %160 : vector<1x256xf32> to vector<4x256xf32>
    %162 = arith.mulf %158, %161 : vector<4x256xf32>
    %163 = vector.broadcast %159 : vector<4x1xf32> to vector<4x256xf32>
    %164 = arith.mulf %163, %162 : vector<4x256xf32>
    %165 = arith.addf %157, %164 : vector<4x256xf32>
    %c0_98 = arith.constant 0 : index
    %c38 = arith.constant 38 : index
    %166 = vector.load %arg26[%c0_98, %c38] : memref<4x358xf32, #tpu.memory_space<vmem>>, vector<4x256xf32>
    %c0_99 = arith.constant 0 : index
    %c20_100 = arith.constant 20 : index
    %167 = vector.load %arg7[%c0_99, %c20_100] : memref<4x49xf32, #tpu.memory_space<vmem>>, vector<4x1xf32>
    %c20_101 = arith.constant 20 : index
    %c0_102 = arith.constant 0 : index
    %168 = vector.load %arg4[%c20_101, %c0_102] : memref<49x256xf32, #tpu.memory_space<vmem>>, vector<1x256xf32>
    %169 = vector.broadcast %168 : vector<1x256xf32> to vector<4x256xf32>
    %170 = arith.mulf %166, %169 : vector<4x256xf32>
    %171 = vector.broadcast %167 : vector<4x1xf32> to vector<4x256xf32>
    %172 = arith.mulf %171, %170 : vector<4x256xf32>
    %173 = arith.addf %165, %172 : vector<4x256xf32>
    %c0_103 = arith.constant 0 : index
    %c48 = arith.constant 48 : index
    %174 = vector.load %arg26[%c0_103, %c48] : memref<4x358xf32, #tpu.memory_space<vmem>>, vector<4x256xf32>
    %c0_104 = arith.constant 0 : index
    %c21_105 = arith.constant 21 : index
    %175 = vector.load %arg7[%c0_104, %c21_105] : memref<4x49xf32, #tpu.memory_space<vmem>>, vector<4x1xf32>
    %c21_106 = arith.constant 21 : index
    %c0_107 = arith.constant 0 : index
    %176 = vector.load %arg4[%c21_106, %c0_107] : memref<49x256xf32, #tpu.memory_space<vmem>>, vector<1x256xf32>
    %177 = vector.broadcast %176 : vector<1x256xf32> to vector<4x256xf32>
    %178 = arith.mulf %174, %177 : vector<4x256xf32>
    %179 = vector.broadcast %175 : vector<4x1xf32> to vector<4x256xf32>
    %180 = arith.mulf %179, %178 : vector<4x256xf32>
    %181 = arith.addf %173, %180 : vector<4x256xf32>
    %c0_108 = arith.constant 0 : index
    %c49 = arith.constant 49 : index
    %182 = vector.load %arg26[%c0_108, %c49] : memref<4x358xf32, #tpu.memory_space<vmem>>, vector<4x256xf32>
    %c0_109 = arith.constant 0 : index
    %c22_110 = arith.constant 22 : index
    %183 = vector.load %arg7[%c0_109, %c22_110] : memref<4x49xf32, #tpu.memory_space<vmem>>, vector<4x1xf32>
    %c22_111 = arith.constant 22 : index
    %c0_112 = arith.constant 0 : index
    %184 = vector.load %arg4[%c22_111, %c0_112] : memref<49x256xf32, #tpu.memory_space<vmem>>, vector<1x256xf32>
    %185 = vector.broadcast %184 : vector<1x256xf32> to vector<4x256xf32>
    %186 = arith.mulf %182, %185 : vector<4x256xf32>
    %187 = vector.broadcast %183 : vector<4x1xf32> to vector<4x256xf32>
    %188 = arith.mulf %187, %186 : vector<4x256xf32>
    %189 = arith.addf %181, %188 : vector<4x256xf32>
    %c0_113 = arith.constant 0 : index
    %c50 = arith.constant 50 : index
    %190 = vector.load %arg26[%c0_113, %c50] : memref<4x358xf32, #tpu.memory_space<vmem>>, vector<4x256xf32>
    %c0_114 = arith.constant 0 : index
    %c23 = arith.constant 23 : index
    %191 = vector.load %arg7[%c0_114, %c23] : memref<4x49xf32, #tpu.memory_space<vmem>>, vector<4x1xf32>
    %c23_115 = arith.constant 23 : index
    %c0_116 = arith.constant 0 : index
    %192 = vector.load %arg4[%c23_115, %c0_116] : memref<49x256xf32, #tpu.memory_space<vmem>>, vector<1x256xf32>
    %193 = vector.broadcast %192 : vector<1x256xf32> to vector<4x256xf32>
    %194 = arith.mulf %190, %193 : vector<4x256xf32>
    %195 = vector.broadcast %191 : vector<4x1xf32> to vector<4x256xf32>
    %196 = arith.mulf %195, %194 : vector<4x256xf32>
    %197 = arith.addf %189, %196 : vector<4x256xf32>
    %c0_117 = arith.constant 0 : index
    %c51_118 = arith.constant 51 : index
    %198 = vector.load %arg26[%c0_117, %c51_118] : memref<4x358xf32, #tpu.memory_space<vmem>>, vector<4x256xf32>
    %c0_119 = arith.constant 0 : index
    %c24 = arith.constant 24 : index
    %199 = vector.load %arg7[%c0_119, %c24] : memref<4x49xf32, #tpu.memory_space<vmem>>, vector<4x1xf32>
    %c24_120 = arith.constant 24 : index
    %c0_121 = arith.constant 0 : index
    %200 = vector.load %arg4[%c24_120, %c0_121] : memref<49x256xf32, #tpu.memory_space<vmem>>, vector<1x256xf32>
    %201 = vector.broadcast %200 : vector<1x256xf32> to vector<4x256xf32>
    %202 = arith.mulf %198, %201 : vector<4x256xf32>
    %203 = vector.broadcast %199 : vector<4x1xf32> to vector<4x256xf32>
    %204 = arith.mulf %203, %202 : vector<4x256xf32>
    %205 = arith.addf %197, %204 : vector<4x256xf32>
    %c0_122 = arith.constant 0 : index
    %c52 = arith.constant 52 : index
    %206 = vector.load %arg26[%c0_122, %c52] : memref<4x358xf32, #tpu.memory_space<vmem>>, vector<4x256xf32>
    %c0_123 = arith.constant 0 : index
    %c25 = arith.constant 25 : index
    %207 = vector.load %arg7[%c0_123, %c25] : memref<4x49xf32, #tpu.memory_space<vmem>>, vector<4x1xf32>
    %c25_124 = arith.constant 25 : index
    %c0_125 = arith.constant 0 : index
    %208 = vector.load %arg4[%c25_124, %c0_125] : memref<49x256xf32, #tpu.memory_space<vmem>>, vector<1x256xf32>
    %209 = vector.broadcast %208 : vector<1x256xf32> to vector<4x256xf32>
    %210 = arith.mulf %206, %209 : vector<4x256xf32>
    %211 = vector.broadcast %207 : vector<4x1xf32> to vector<4x256xf32>
    %212 = arith.mulf %211, %210 : vector<4x256xf32>
    %213 = arith.addf %205, %212 : vector<4x256xf32>
    %c0_126 = arith.constant 0 : index
    %c53 = arith.constant 53 : index
    %214 = vector.load %arg26[%c0_126, %c53] : memref<4x358xf32, #tpu.memory_space<vmem>>, vector<4x256xf32>
    %c0_127 = arith.constant 0 : index
    %c26 = arith.constant 26 : index
    %215 = vector.load %arg7[%c0_127, %c26] : memref<4x49xf32, #tpu.memory_space<vmem>>, vector<4x1xf32>
    %c26_128 = arith.constant 26 : index
    %c0_129 = arith.constant 0 : index
    %216 = vector.load %arg4[%c26_128, %c0_129] : memref<49x256xf32, #tpu.memory_space<vmem>>, vector<1x256xf32>
    %217 = vector.broadcast %216 : vector<1x256xf32> to vector<4x256xf32>
    %218 = arith.mulf %214, %217 : vector<4x256xf32>
    %219 = vector.broadcast %215 : vector<4x1xf32> to vector<4x256xf32>
    %220 = arith.mulf %219, %218 : vector<4x256xf32>
    %221 = arith.addf %213, %220 : vector<4x256xf32>
    %c0_130 = arith.constant 0 : index
    %c54 = arith.constant 54 : index
    %222 = vector.load %arg26[%c0_130, %c54] : memref<4x358xf32, #tpu.memory_space<vmem>>, vector<4x256xf32>
    %c0_131 = arith.constant 0 : index
    %c27 = arith.constant 27 : index
    %223 = vector.load %arg7[%c0_131, %c27] : memref<4x49xf32, #tpu.memory_space<vmem>>, vector<4x1xf32>
    %c27_132 = arith.constant 27 : index
    %c0_133 = arith.constant 0 : index
    %224 = vector.load %arg4[%c27_132, %c0_133] : memref<49x256xf32, #tpu.memory_space<vmem>>, vector<1x256xf32>
    %225 = vector.broadcast %224 : vector<1x256xf32> to vector<4x256xf32>
    %226 = arith.mulf %222, %225 : vector<4x256xf32>
    %227 = vector.broadcast %223 : vector<4x1xf32> to vector<4x256xf32>
    %228 = arith.mulf %227, %226 : vector<4x256xf32>
    %229 = arith.addf %221, %228 : vector<4x256xf32>
    %c0_134 = arith.constant 0 : index
    %c64 = arith.constant 64 : index
    %230 = vector.load %arg26[%c0_134, %c64] : memref<4x358xf32, #tpu.memory_space<vmem>>, vector<4x256xf32>
    %c0_135 = arith.constant 0 : index
    %c28 = arith.constant 28 : index
    %231 = vector.load %arg7[%c0_135, %c28] : memref<4x49xf32, #tpu.memory_space<vmem>>, vector<4x1xf32>
    %c28_136 = arith.constant 28 : index
    %c0_137 = arith.constant 0 : index
    %232 = vector.load %arg4[%c28_136, %c0_137] : memref<49x256xf32, #tpu.memory_space<vmem>>, vector<1x256xf32>
    %233 = vector.broadcast %232 : vector<1x256xf32> to vector<4x256xf32>
    %234 = arith.mulf %230, %233 : vector<4x256xf32>
    %235 = vector.broadcast %231 : vector<4x1xf32> to vector<4x256xf32>
    %236 = arith.mulf %235, %234 : vector<4x256xf32>
    %237 = arith.addf %229, %236 : vector<4x256xf32>
    %c0_138 = arith.constant 0 : index
    %c65 = arith.constant 65 : index
    %238 = vector.load %arg26[%c0_138, %c65] : memref<4x358xf32, #tpu.memory_space<vmem>>, vector<4x256xf32>
    %c0_139 = arith.constant 0 : index
    %c29 = arith.constant 29 : index
    %239 = vector.load %arg7[%c0_139, %c29] : memref<4x49xf32, #tpu.memory_space<vmem>>, vector<4x1xf32>
    %c29_140 = arith.constant 29 : index
    %c0_141 = arith.constant 0 : index
    %240 = vector.load %arg4[%c29_140, %c0_141] : memref<49x256xf32, #tpu.memory_space<vmem>>, vector<1x256xf32>
    %241 = vector.broadcast %240 : vector<1x256xf32> to vector<4x256xf32>
    %242 = arith.mulf %238, %241 : vector<4x256xf32>
    %243 = vector.broadcast %239 : vector<4x1xf32> to vector<4x256xf32>
    %244 = arith.mulf %243, %242 : vector<4x256xf32>
    %245 = arith.addf %237, %244 : vector<4x256xf32>
    %c0_142 = arith.constant 0 : index
    %c66 = arith.constant 66 : index
    %246 = vector.load %arg26[%c0_142, %c66] : memref<4x358xf32, #tpu.memory_space<vmem>>, vector<4x256xf32>
    %c0_143 = arith.constant 0 : index
    %c30 = arith.constant 30 : index
    %247 = vector.load %arg7[%c0_143, %c30] : memref<4x49xf32, #tpu.memory_space<vmem>>, vector<4x1xf32>
    %c30_144 = arith.constant 30 : index
    %c0_145 = arith.constant 0 : index
    %248 = vector.load %arg4[%c30_144, %c0_145] : memref<49x256xf32, #tpu.memory_space<vmem>>, vector<1x256xf32>
    %249 = vector.broadcast %248 : vector<1x256xf32> to vector<4x256xf32>
    %250 = arith.mulf %246, %249 : vector<4x256xf32>
    %251 = vector.broadcast %247 : vector<4x1xf32> to vector<4x256xf32>
    %252 = arith.mulf %251, %250 : vector<4x256xf32>
    %253 = arith.addf %245, %252 : vector<4x256xf32>
    %c0_146 = arith.constant 0 : index
    %c67 = arith.constant 67 : index
    %254 = vector.load %arg26[%c0_146, %c67] : memref<4x358xf32, #tpu.memory_space<vmem>>, vector<4x256xf32>
    %c0_147 = arith.constant 0 : index
    %c31 = arith.constant 31 : index
    %255 = vector.load %arg7[%c0_147, %c31] : memref<4x49xf32, #tpu.memory_space<vmem>>, vector<4x1xf32>
    %c31_148 = arith.constant 31 : index
    %c0_149 = arith.constant 0 : index
    %256 = vector.load %arg4[%c31_148, %c0_149] : memref<49x256xf32, #tpu.memory_space<vmem>>, vector<1x256xf32>
    %257 = vector.broadcast %256 : vector<1x256xf32> to vector<4x256xf32>
    %258 = arith.mulf %254, %257 : vector<4x256xf32>
    %259 = vector.broadcast %255 : vector<4x1xf32> to vector<4x256xf32>
    %260 = arith.mulf %259, %258 : vector<4x256xf32>
    %261 = arith.addf %253, %260 : vector<4x256xf32>
    %c0_150 = arith.constant 0 : index
    %c68 = arith.constant 68 : index
    %262 = vector.load %arg26[%c0_150, %c68] : memref<4x358xf32, #tpu.memory_space<vmem>>, vector<4x256xf32>
    %c0_151 = arith.constant 0 : index
    %c32_152 = arith.constant 32 : index
    %263 = vector.load %arg7[%c0_151, %c32_152] : memref<4x49xf32, #tpu.memory_space<vmem>>, vector<4x1xf32>
    %c32_153 = arith.constant 32 : index
    %c0_154 = arith.constant 0 : index
    %264 = vector.load %arg4[%c32_153, %c0_154] : memref<49x256xf32, #tpu.memory_space<vmem>>, vector<1x256xf32>
    %265 = vector.broadcast %264 : vector<1x256xf32> to vector<4x256xf32>
    %266 = arith.mulf %262, %265 : vector<4x256xf32>
    %267 = vector.broadcast %263 : vector<4x1xf32> to vector<4x256xf32>
    %268 = arith.mulf %267, %266 : vector<4x256xf32>
    %269 = arith.addf %261, %268 : vector<4x256xf32>
    %c0_155 = arith.constant 0 : index
    %c69 = arith.constant 69 : index
    %270 = vector.load %arg26[%c0_155, %c69] : memref<4x358xf32, #tpu.memory_space<vmem>>, vector<4x256xf32>
    %c0_156 = arith.constant 0 : index
    %c33_157 = arith.constant 33 : index
    %271 = vector.load %arg7[%c0_156, %c33_157] : memref<4x49xf32, #tpu.memory_space<vmem>>, vector<4x1xf32>
    %c33_158 = arith.constant 33 : index
    %c0_159 = arith.constant 0 : index
    %272 = vector.load %arg4[%c33_158, %c0_159] : memref<49x256xf32, #tpu.memory_space<vmem>>, vector<1x256xf32>
    %273 = vector.broadcast %272 : vector<1x256xf32> to vector<4x256xf32>
    %274 = arith.mulf %270, %273 : vector<4x256xf32>
    %275 = vector.broadcast %271 : vector<4x1xf32> to vector<4x256xf32>
    %276 = arith.mulf %275, %274 : vector<4x256xf32>
    %277 = arith.addf %269, %276 : vector<4x256xf32>
    %c0_160 = arith.constant 0 : index
    %c70 = arith.constant 70 : index
    %278 = vector.load %arg26[%c0_160, %c70] : memref<4x358xf32, #tpu.memory_space<vmem>>, vector<4x256xf32>
    %c0_161 = arith.constant 0 : index
    %c34_162 = arith.constant 34 : index
    %279 = vector.load %arg7[%c0_161, %c34_162] : memref<4x49xf32, #tpu.memory_space<vmem>>, vector<4x1xf32>
    %c34_163 = arith.constant 34 : index
    %c0_164 = arith.constant 0 : index
    %280 = vector.load %arg4[%c34_163, %c0_164] : memref<49x256xf32, #tpu.memory_space<vmem>>, vector<1x256xf32>
    %281 = vector.broadcast %280 : vector<1x256xf32> to vector<4x256xf32>
    %282 = arith.mulf %278, %281 : vector<4x256xf32>
    %283 = vector.broadcast %279 : vector<4x1xf32> to vector<4x256xf32>
    %284 = arith.mulf %283, %282 : vector<4x256xf32>
    %285 = arith.addf %277, %284 : vector<4x256xf32>
    %c0_165 = arith.constant 0 : index
    %c80 = arith.constant 80 : index
    %286 = vector.load %arg26[%c0_165, %c80] : memref<4x358xf32, #tpu.memory_space<vmem>>, vector<4x256xf32>
    %c0_166 = arith.constant 0 : index
    %c35_167 = arith.constant 35 : index
    %287 = vector.load %arg7[%c0_166, %c35_167] : memref<4x49xf32, #tpu.memory_space<vmem>>, vector<4x1xf32>
    %c35_168 = arith.constant 35 : index
    %c0_169 = arith.constant 0 : index
    %288 = vector.load %arg4[%c35_168, %c0_169] : memref<49x256xf32, #tpu.memory_space<vmem>>, vector<1x256xf32>
    %289 = vector.broadcast %288 : vector<1x256xf32> to vector<4x256xf32>
    %290 = arith.mulf %286, %289 : vector<4x256xf32>
    %291 = vector.broadcast %287 : vector<4x1xf32> to vector<4x256xf32>
    %292 = arith.mulf %291, %290 : vector<4x256xf32>
    %293 = arith.addf %285, %292 : vector<4x256xf32>
    %c0_170 = arith.constant 0 : index
    %c81 = arith.constant 81 : index
    %294 = vector.load %arg26[%c0_170, %c81] : memref<4x358xf32, #tpu.memory_space<vmem>>, vector<4x256xf32>
    %c0_171 = arith.constant 0 : index
    %c36_172 = arith.constant 36 : index
    %295 = vector.load %arg7[%c0_171, %c36_172] : memref<4x49xf32, #tpu.memory_space<vmem>>, vector<4x1xf32>
    %c36_173 = arith.constant 36 : index
    %c0_174 = arith.constant 0 : index
    %296 = vector.load %arg4[%c36_173, %c0_174] : memref<49x256xf32, #tpu.memory_space<vmem>>, vector<1x256xf32>
    %297 = vector.broadcast %296 : vector<1x256xf32> to vector<4x256xf32>
    %298 = arith.mulf %294, %297 : vector<4x256xf32>
    %299 = vector.broadcast %295 : vector<4x1xf32> to vector<4x256xf32>
    %300 = arith.mulf %299, %298 : vector<4x256xf32>
    %301 = arith.addf %293, %300 : vector<4x256xf32>
    %c0_175 = arith.constant 0 : index
    %c82 = arith.constant 82 : index
    %302 = vector.load %arg26[%c0_175, %c82] : memref<4x358xf32, #tpu.memory_space<vmem>>, vector<4x256xf32>
    %c0_176 = arith.constant 0 : index
    %c37_177 = arith.constant 37 : index
    %303 = vector.load %arg7[%c0_176, %c37_177] : memref<4x49xf32, #tpu.memory_space<vmem>>, vector<4x1xf32>
    %c37_178 = arith.constant 37 : index
    %c0_179 = arith.constant 0 : index
    %304 = vector.load %arg4[%c37_178, %c0_179] : memref<49x256xf32, #tpu.memory_space<vmem>>, vector<1x256xf32>
    %305 = vector.broadcast %304 : vector<1x256xf32> to vector<4x256xf32>
    %306 = arith.mulf %302, %305 : vector<4x256xf32>
    %307 = vector.broadcast %303 : vector<4x1xf32> to vector<4x256xf32>
    %308 = arith.mulf %307, %306 : vector<4x256xf32>
    %309 = arith.addf %301, %308 : vector<4x256xf32>
    %c0_180 = arith.constant 0 : index
    %c83 = arith.constant 83 : index
    %310 = vector.load %arg26[%c0_180, %c83] : memref<4x358xf32, #tpu.memory_space<vmem>>, vector<4x256xf32>
    %c0_181 = arith.constant 0 : index
    %c38_182 = arith.constant 38 : index
    %311 = vector.load %arg7[%c0_181, %c38_182] : memref<4x49xf32, #tpu.memory_space<vmem>>, vector<4x1xf32>
    %c38_183 = arith.constant 38 : index
    %c0_184 = arith.constant 0 : index
    %312 = vector.load %arg4[%c38_183, %c0_184] : memref<49x256xf32, #tpu.memory_space<vmem>>, vector<1x256xf32>
    %313 = vector.broadcast %312 : vector<1x256xf32> to vector<4x256xf32>
    %314 = arith.mulf %310, %313 : vector<4x256xf32>
    %315 = vector.broadcast %311 : vector<4x1xf32> to vector<4x256xf32>
    %316 = arith.mulf %315, %314 : vector<4x256xf32>
    %317 = arith.addf %309, %316 : vector<4x256xf32>
    %c0_185 = arith.constant 0 : index
    %c84 = arith.constant 84 : index
    %318 = vector.load %arg26[%c0_185, %c84] : memref<4x358xf32, #tpu.memory_space<vmem>>, vector<4x256xf32>
    %c0_186 = arith.constant 0 : index
    %c39 = arith.constant 39 : index
    %319 = vector.load %arg7[%c0_186, %c39] : memref<4x49xf32, #tpu.memory_space<vmem>>, vector<4x1xf32>
    %c39_187 = arith.constant 39 : index
    %c0_188 = arith.constant 0 : index
    %320 = vector.load %arg4[%c39_187, %c0_188] : memref<49x256xf32, #tpu.memory_space<vmem>>, vector<1x256xf32>
    %321 = vector.broadcast %320 : vector<1x256xf32> to vector<4x256xf32>
    %322 = arith.mulf %318, %321 : vector<4x256xf32>
    %323 = vector.broadcast %319 : vector<4x1xf32> to vector<4x256xf32>
    %324 = arith.mulf %323, %322 : vector<4x256xf32>
    %325 = arith.addf %317, %324 : vector<4x256xf32>
    %c0_189 = arith.constant 0 : index
    %c85 = arith.constant 85 : index
    %326 = vector.load %arg26[%c0_189, %c85] : memref<4x358xf32, #tpu.memory_space<vmem>>, vector<4x256xf32>
    %c0_190 = arith.constant 0 : index
    %c40 = arith.constant 40 : index
    %327 = vector.load %arg7[%c0_190, %c40] : memref<4x49xf32, #tpu.memory_space<vmem>>, vector<4x1xf32>
    %c40_191 = arith.constant 40 : index
    %c0_192 = arith.constant 0 : index
    %328 = vector.load %arg4[%c40_191, %c0_192] : memref<49x256xf32, #tpu.memory_space<vmem>>, vector<1x256xf32>
    %329 = vector.broadcast %328 : vector<1x256xf32> to vector<4x256xf32>
    %330 = arith.mulf %326, %329 : vector<4x256xf32>
    %331 = vector.broadcast %327 : vector<4x1xf32> to vector<4x256xf32>
    %332 = arith.mulf %331, %330 : vector<4x256xf32>
    %333 = arith.addf %325, %332 : vector<4x256xf32>
    %c0_193 = arith.constant 0 : index
    %c86 = arith.constant 86 : index
    %334 = vector.load %arg26[%c0_193, %c86] : memref<4x358xf32, #tpu.memory_space<vmem>>, vector<4x256xf32>
    %c0_194 = arith.constant 0 : index
    %c41 = arith.constant 41 : index
    %335 = vector.load %arg7[%c0_194, %c41] : memref<4x49xf32, #tpu.memory_space<vmem>>, vector<4x1xf32>
    %c41_195 = arith.constant 41 : index
    %c0_196 = arith.constant 0 : index
    %336 = vector.load %arg4[%c41_195, %c0_196] : memref<49x256xf32, #tpu.memory_space<vmem>>, vector<1x256xf32>
    %337 = vector.broadcast %336 : vector<1x256xf32> to vector<4x256xf32>
    %338 = arith.mulf %334, %337 : vector<4x256xf32>
    %339 = vector.broadcast %335 : vector<4x1xf32> to vector<4x256xf32>
    %340 = arith.mulf %339, %338 : vector<4x256xf32>
    %341 = arith.addf %333, %340 : vector<4x256xf32>
    %c0_197 = arith.constant 0 : index
    %c96 = arith.constant 96 : index
    %342 = vector.load %arg26[%c0_197, %c96] : memref<4x358xf32, #tpu.memory_space<vmem>>, vector<4x256xf32>
    %c0_198 = arith.constant 0 : index
    %c42 = arith.constant 42 : index
    %343 = vector.load %arg7[%c0_198, %c42] : memref<4x49xf32, #tpu.memory_space<vmem>>, vector<4x1xf32>
    %c42_199 = arith.constant 42 : index
    %c0_200 = arith.constant 0 : index
    %344 = vector.load %arg4[%c42_199, %c0_200] : memref<49x256xf32, #tpu.memory_space<vmem>>, vector<1x256xf32>
    %345 = vector.broadcast %344 : vector<1x256xf32> to vector<4x256xf32>
    %346 = arith.mulf %342, %345 : vector<4x256xf32>
    %347 = vector.broadcast %343 : vector<4x1xf32> to vector<4x256xf32>
    %348 = arith.mulf %347, %346 : vector<4x256xf32>
    %349 = arith.addf %341, %348 : vector<4x256xf32>
    %c0_201 = arith.constant 0 : index
    %c97 = arith.constant 97 : index
    %350 = vector.load %arg26[%c0_201, %c97] : memref<4x358xf32, #tpu.memory_space<vmem>>, vector<4x256xf32>
    %c0_202 = arith.constant 0 : index
    %c43 = arith.constant 43 : index
    %351 = vector.load %arg7[%c0_202, %c43] : memref<4x49xf32, #tpu.memory_space<vmem>>, vector<4x1xf32>
    %c43_203 = arith.constant 43 : index
    %c0_204 = arith.constant 0 : index
    %352 = vector.load %arg4[%c43_203, %c0_204] : memref<49x256xf32, #tpu.memory_space<vmem>>, vector<1x256xf32>
    %353 = vector.broadcast %352 : vector<1x256xf32> to vector<4x256xf32>
    %354 = arith.mulf %350, %353 : vector<4x256xf32>
    %355 = vector.broadcast %351 : vector<4x1xf32> to vector<4x256xf32>
    %356 = arith.mulf %355, %354 : vector<4x256xf32>
    %357 = arith.addf %349, %356 : vector<4x256xf32>
    %c0_205 = arith.constant 0 : index
    %c98 = arith.constant 98 : index
    %358 = vector.load %arg26[%c0_205, %c98] : memref<4x358xf32, #tpu.memory_space<vmem>>, vector<4x256xf32>
    %c0_206 = arith.constant 0 : index
    %c44 = arith.constant 44 : index
    %359 = vector.load %arg7[%c0_206, %c44] : memref<4x49xf32, #tpu.memory_space<vmem>>, vector<4x1xf32>
    %c44_207 = arith.constant 44 : index
    %c0_208 = arith.constant 0 : index
    %360 = vector.load %arg4[%c44_207, %c0_208] : memref<49x256xf32, #tpu.memory_space<vmem>>, vector<1x256xf32>
    %361 = vector.broadcast %360 : vector<1x256xf32> to vector<4x256xf32>
    %362 = arith.mulf %358, %361 : vector<4x256xf32>
    %363 = vector.broadcast %359 : vector<4x1xf32> to vector<4x256xf32>
    %364 = arith.mulf %363, %362 : vector<4x256xf32>
    %365 = arith.addf %357, %364 : vector<4x256xf32>
    %c0_209 = arith.constant 0 : index
    %c99 = arith.constant 99 : index
    %366 = vector.load %arg26[%c0_209, %c99] : memref<4x358xf32, #tpu.memory_space<vmem>>, vector<4x256xf32>
    %c0_210 = arith.constant 0 : index
    %c45 = arith.constant 45 : index
    %367 = vector.load %arg7[%c0_210, %c45] : memref<4x49xf32, #tpu.memory_space<vmem>>, vector<4x1xf32>
    %c45_211 = arith.constant 45 : index
    %c0_212 = arith.constant 0 : index
    %368 = vector.load %arg4[%c45_211, %c0_212] : memref<49x256xf32, #tpu.memory_space<vmem>>, vector<1x256xf32>
    %369 = vector.broadcast %368 : vector<1x256xf32> to vector<4x256xf32>
    %370 = arith.mulf %366, %369 : vector<4x256xf32>
    %371 = vector.broadcast %367 : vector<4x1xf32> to vector<4x256xf32>
    %372 = arith.mulf %371, %370 : vector<4x256xf32>
    %373 = arith.addf %365, %372 : vector<4x256xf32>
    %c0_213 = arith.constant 0 : index
    %c100 = arith.constant 100 : index
    %374 = vector.load %arg26[%c0_213, %c100] : memref<4x358xf32, #tpu.memory_space<vmem>>, vector<4x256xf32>
    %c0_214 = arith.constant 0 : index
    %c46 = arith.constant 46 : index
    %375 = vector.load %arg7[%c0_214, %c46] : memref<4x49xf32, #tpu.memory_space<vmem>>, vector<4x1xf32>
    %c46_215 = arith.constant 46 : index
    %c0_216 = arith.constant 0 : index
    %376 = vector.load %arg4[%c46_215, %c0_216] : memref<49x256xf32, #tpu.memory_space<vmem>>, vector<1x256xf32>
    %377 = vector.broadcast %376 : vector<1x256xf32> to vector<4x256xf32>
    %378 = arith.mulf %374, %377 : vector<4x256xf32>
    %379 = vector.broadcast %375 : vector<4x1xf32> to vector<4x256xf32>
    %380 = arith.mulf %379, %378 : vector<4x256xf32>
    %381 = arith.addf %373, %380 : vector<4x256xf32>
    %c0_217 = arith.constant 0 : index
    %c101 = arith.constant 101 : index
    %382 = vector.load %arg26[%c0_217, %c101] : memref<4x358xf32, #tpu.memory_space<vmem>>, vector<4x256xf32>
    %c0_218 = arith.constant 0 : index
    %c47 = arith.constant 47 : index
    %383 = vector.load %arg7[%c0_218, %c47] : memref<4x49xf32, #tpu.memory_space<vmem>>, vector<4x1xf32>
    %c47_219 = arith.constant 47 : index
    %c0_220 = arith.constant 0 : index
    %384 = vector.load %arg4[%c47_219, %c0_220] : memref<49x256xf32, #tpu.memory_space<vmem>>, vector<1x256xf32>
    %385 = vector.broadcast %384 : vector<1x256xf32> to vector<4x256xf32>
    %386 = arith.mulf %382, %385 : vector<4x256xf32>
    %387 = vector.broadcast %383 : vector<4x1xf32> to vector<4x256xf32>
    %388 = arith.mulf %387, %386 : vector<4x256xf32>
    %389 = arith.addf %381, %388 : vector<4x256xf32>
    %c0_221 = arith.constant 0 : index
    %c102 = arith.constant 102 : index
    %390 = vector.load %arg26[%c0_221, %c102] : memref<4x358xf32, #tpu.memory_space<vmem>>, vector<4x256xf32>
    %c0_222 = arith.constant 0 : index
    %c48_223 = arith.constant 48 : index
    %391 = vector.load %arg7[%c0_222, %c48_223] : memref<4x49xf32, #tpu.memory_space<vmem>>, vector<4x1xf32>
    %c48_224 = arith.constant 48 : index
    %c0_225 = arith.constant 0 : index
    %392 = vector.load %arg4[%c48_224, %c0_225] : memref<49x256xf32, #tpu.memory_space<vmem>>, vector<1x256xf32>
    %393 = vector.broadcast %392 : vector<1x256xf32> to vector<4x256xf32>
    %394 = arith.mulf %390, %393 : vector<4x256xf32>
    %395 = vector.broadcast %391 : vector<4x1xf32> to vector<4x256xf32>
    %396 = arith.mulf %395, %394 : vector<4x256xf32>
    %397 = arith.addf %389, %396 : vector<4x256xf32>
    %c0_226 = arith.constant 0 : index
    %c0_227 = arith.constant 0 : index
    %398 = vector.load %arg8[%c0_226, %c0_227] : memref<4x1xf32, #tpu.memory_space<vmem>>, vector<4x1xf32>
    %399 = vector.broadcast %398 : vector<4x1xf32> to vector<4x256xf32>
    %400 = arith.addf %397, %399 : vector<4x256xf32>
    %c0_228 = arith.constant 0 : index
    %c0_229 = arith.constant 0 : index
    %401 = vector.load %arg9[%c0_228, %c0_229] : memref<4x8xf32, #tpu.memory_space<vmem>>, vector<4x8xf32>
    %c0_230 = arith.constant 0 : index
    %c0_231 = arith.constant 0 : index
    %c0_232 = arith.constant 0 : index
    %402 = vector.load %arg2[%c0_230, %c0_231, %c0_232] : memref<1x1x8xf32, #tpu.memory_space<vmem>>, vector<1x1x8xf32>
    %403 = vector.shape_cast %402 : vector<1x1x8xf32> to vector<1x8xf32>
    %cst_233 = arith.constant 5.000000e-01 : f32
    %404 = vector.broadcast %cst_233 : f32 to vector<1x8xf32>
    %405 = arith.mulf %404, %403 : vector<1x8xf32>
    %cst_234 = arith.constant 4.471500e-02 : f32
    %406 = vector.broadcast %cst_234 : f32 to vector<1x8xf32>
    %407 = arith.mulf %406, %403 : vector<1x8xf32>
    %408 = arith.mulf %407, %403 : vector<1x8xf32>
    %409 = arith.mulf %408, %403 : vector<1x8xf32>
    %410 = arith.addf %403, %409 : vector<1x8xf32>
    %cst_235 = arith.constant 0.797884583 : f32
    %411 = vector.broadcast %cst_235 : f32 to vector<1x8xf32>
    %412 = arith.mulf %411, %410 : vector<1x8xf32>
    %413 = math.tanh %412 : vector<1x8xf32>
    %cst_236 = arith.constant 1.000000e+00 : f32
    %414 = vector.broadcast %cst_236 : f32 to vector<1x8xf32>
    %415 = arith.addf %414, %413 : vector<1x8xf32>
    %416 = arith.mulf %405, %415 : vector<1x8xf32>
    %417 = vector.broadcast %416 : vector<1x8xf32> to vector<4x8xf32>
    %418 = arith.mulf %401, %417 : vector<4x8xf32>
    %cst_237 = arith.constant dense<0.000000e+00> : vector<4xf32>
    %419 = vector.multi_reduction <add>, %418, %cst_237 [1] : vector<4x8xf32> to vector<4xf32>
    %420 = vector.shape_cast %419 : vector<4xf32> to vector<4x1xf32>
    %c0_238 = arith.constant 0 : index
    %c0_239 = arith.constant 0 : index
    %421 = vector.load %arg10[%c0_238, %c0_239] : memref<4x1xf32, #tpu.memory_space<vmem>>, vector<4x1xf32>
    %422 = arith.addf %420, %421 : vector<4x1xf32>
    %cst_240 = arith.constant 0.000000e+00 : f32
    %423 = vector.broadcast %cst_240 : f32 to vector<1x324xf32>
    %c0_241 = arith.constant 0 : index
    %c0_242 = arith.constant 0 : index
    %424 = vector.load %arg27[%c0_241, %c0_242] : memref<1x324xf32, #tpu.memory_space<vmem>>, vector<1x324xf32>
    tpu.vector_store %arg27[%c0_241, %c0_242], %423 {strides = array<i32>} : memref<1x324xf32, #tpu.memory_space<vmem>>, vector<1x324xf32>,
    %c0_243 = arith.constant 0 : index
    %c0_244 = arith.constant 0 : index
    %c0_245 = arith.constant 0 : index
    %425 = vector.load %arg3[%c0_243, %c0_244, %c0_245] : memref<1x1x256xf32, #tpu.memory_space<vmem>>, vector<1x1x256xf32>
    %426 = vector.shape_cast %425 : vector<1x1x256xf32> to vector<1x256xf32>
    %c0_246 = arith.constant 0 : index
    %c34_247 = arith.constant 34 : index
    %427 = vector.load %arg27[%c0_246, %c34_247] : memref<1x324xf32, #tpu.memory_space<vmem>>, vector<1x256xf32>
    tpu.vector_store %arg27[%c0_246, %c34_247], %426 {strides = array<i32>} : memref<1x324xf32, #tpu.memory_space<vmem>>, vector<1x256xf32>,
    %cst_248 = arith.constant 0.000000e+00 : f32
    %428 = vector.broadcast %cst_248 : f32 to vector<1x256xf32>
    %c0_249 = arith.constant 0 : index
    %c0_250 = arith.constant 0 : index
    %429 = vector.load %arg27[%c0_249, %c0_250] : memref<1x324xf32, #tpu.memory_space<vmem>>, vector<1x256xf32>
    %c0_251 = arith.constant 0 : index
    %c0_252 = arith.constant 0 : index
    %430 = vector.load %arg11[%c0_251, %c0_252] : memref<1x25xf32, #tpu.memory_space<vmem>>, vector<1x1xf32>
    %c0_253 = arith.constant 0 : index
    %c0_254 = arith.constant 0 : index
    %431 = vector.load %arg6[%c0_253, %c0_254] : memref<25x256xf32, #tpu.memory_space<vmem>>, vector<1x256xf32>
    %432 = arith.mulf %429, %431 : vector<1x256xf32>
    %433 = vector.broadcast %430 : vector<1x1xf32> to vector<1x256xf32>
    %434 = arith.mulf %433, %432 : vector<1x256xf32>
    %435 = arith.addf %428, %434 : vector<1x256xf32>
    %c0_255 = arith.constant 0 : index
    %c1_256 = arith.constant 1 : index
    %436 = vector.load %arg27[%c0_255, %c1_256] : memref<1x324xf32, #tpu.memory_space<vmem>>, vector<1x256xf32>
    %c0_257 = arith.constant 0 : index
    %c1_258 = arith.constant 1 : index
    %437 = vector.load %arg11[%c0_257, %c1_258] : memref<1x25xf32, #tpu.memory_space<vmem>>, vector<1x1xf32>
    %c1_259 = arith.constant 1 : index
    %c0_260 = arith.constant 0 : index
    %438 = vector.load %arg6[%c1_259, %c0_260] : memref<25x256xf32, #tpu.memory_space<vmem>>, vector<1x256xf32>
    %439 = arith.mulf %436, %438 : vector<1x256xf32>
    %440 = vector.broadcast %437 : vector<1x1xf32> to vector<1x256xf32>
    %441 = arith.mulf %440, %439 : vector<1x256xf32>
    %442 = arith.addf %435, %441 : vector<1x256xf32>
    %c0_261 = arith.constant 0 : index
    %c2_262 = arith.constant 2 : index
    %443 = vector.load %arg27[%c0_261, %c2_262] : memref<1x324xf32, #tpu.memory_space<vmem>>, vector<1x256xf32>
    %c0_263 = arith.constant 0 : index
    %c2_264 = arith.constant 2 : index
    %444 = vector.load %arg11[%c0_263, %c2_264] : memref<1x25xf32, #tpu.memory_space<vmem>>, vector<1x1xf32>
    %c2_265 = arith.constant 2 : index
    %c0_266 = arith.constant 0 : index
    %445 = vector.load %arg6[%c2_265, %c0_266] : memref<25x256xf32, #tpu.memory_space<vmem>>, vector<1x256xf32>
    %446 = arith.mulf %443, %445 : vector<1x256xf32>
    %447 = vector.broadcast %444 : vector<1x1xf32> to vector<1x256xf32>
    %448 = arith.mulf %447, %446 : vector<1x256xf32>
    %449 = arith.addf %442, %448 : vector<1x256xf32>
    %c0_267 = arith.constant 0 : index
    %c3_268 = arith.constant 3 : index
    %450 = vector.load %arg27[%c0_267, %c3_268] : memref<1x324xf32, #tpu.memory_space<vmem>>, vector<1x256xf32>
    %c0_269 = arith.constant 0 : index
    %c3_270 = arith.constant 3 : index
    %451 = vector.load %arg11[%c0_269, %c3_270] : memref<1x25xf32, #tpu.memory_space<vmem>>, vector<1x1xf32>
    %c3_271 = arith.constant 3 : index
    %c0_272 = arith.constant 0 : index
    %452 = vector.load %arg6[%c3_271, %c0_272] : memref<25x256xf32, #tpu.memory_space<vmem>>, vector<1x256xf32>
    %453 = arith.mulf %450, %452 : vector<1x256xf32>
    %454 = vector.broadcast %451 : vector<1x1xf32> to vector<1x256xf32>
    %455 = arith.mulf %454, %453 : vector<1x256xf32>
    %456 = arith.addf %449, %455 : vector<1x256xf32>
    %c0_273 = arith.constant 0 : index
    %c4_274 = arith.constant 4 : index
    %457 = vector.load %arg27[%c0_273, %c4_274] : memref<1x324xf32, #tpu.memory_space<vmem>>, vector<1x256xf32>
    %c0_275 = arith.constant 0 : index
    %c4_276 = arith.constant 4 : index
    %458 = vector.load %arg11[%c0_275, %c4_276] : memref<1x25xf32, #tpu.memory_space<vmem>>, vector<1x1xf32>
    %c4_277 = arith.constant 4 : index
    %c0_278 = arith.constant 0 : index
    %459 = vector.load %arg6[%c4_277, %c0_278] : memref<25x256xf32, #tpu.memory_space<vmem>>, vector<1x256xf32>
    %460 = arith.mulf %457, %459 : vector<1x256xf32>
    %461 = vector.broadcast %458 : vector<1x1xf32> to vector<1x256xf32>
    %462 = arith.mulf %461, %460 : vector<1x256xf32>
    %463 = arith.addf %456, %462 : vector<1x256xf32>
    %c0_279 = arith.constant 0 : index
    %c16_280 = arith.constant 16 : index
    %464 = vector.load %arg27[%c0_279, %c16_280] : memref<1x324xf32, #tpu.memory_space<vmem>>, vector<1x256xf32>
    %c0_281 = arith.constant 0 : index
    %c5_282 = arith.constant 5 : index
    %465 = vector.load %arg11[%c0_281, %c5_282] : memref<1x25xf32, #tpu.memory_space<vmem>>, vector<1x1xf32>
    %c5_283 = arith.constant 5 : index
    %c0_284 = arith.constant 0 : index
    %466 = vector.load %arg6[%c5_283, %c0_284] : memref<25x256xf32, #tpu.memory_space<vmem>>, vector<1x256xf32>
    %467 = arith.mulf %464, %466 : vector<1x256xf32>
    %468 = vector.broadcast %465 : vector<1x1xf32> to vector<1x256xf32>
    %469 = arith.mulf %468, %467 : vector<1x256xf32>
    %470 = arith.addf %463, %469 : vector<1x256xf32>
    %c0_285 = arith.constant 0 : index
    %c17_286 = arith.constant 17 : index
    %471 = vector.load %arg27[%c0_285, %c17_286] : memref<1x324xf32, #tpu.memory_space<vmem>>, vector<1x256xf32>
    %c0_287 = arith.constant 0 : index
    %c6_288 = arith.constant 6 : index
    %472 = vector.load %arg11[%c0_287, %c6_288] : memref<1x25xf32, #tpu.memory_space<vmem>>, vector<1x1xf32>
    %c6_289 = arith.constant 6 : index
    %c0_290 = arith.constant 0 : index
    %473 = vector.load %arg6[%c6_289, %c0_290] : memref<25x256xf32, #tpu.memory_space<vmem>>, vector<1x256xf32>
    %474 = arith.mulf %471, %473 : vector<1x256xf32>
    %475 = vector.broadcast %472 : vector<1x1xf32> to vector<1x256xf32>
    %476 = arith.mulf %475, %474 : vector<1x256xf32>
    %477 = arith.addf %470, %476 : vector<1x256xf32>
    %c0_291 = arith.constant 0 : index
    %c18_292 = arith.constant 18 : index
    %478 = vector.load %arg27[%c0_291, %c18_292] : memref<1x324xf32, #tpu.memory_space<vmem>>, vector<1x256xf32>
    %c0_293 = arith.constant 0 : index
    %c7_294 = arith.constant 7 : index
    %479 = vector.load %arg11[%c0_293, %c7_294] : memref<1x25xf32, #tpu.memory_space<vmem>>, vector<1x1xf32>
    %c7_295 = arith.constant 7 : index
    %c0_296 = arith.constant 0 : index
    %480 = vector.load %arg6[%c7_295, %c0_296] : memref<25x256xf32, #tpu.memory_space<vmem>>, vector<1x256xf32>
    %481 = arith.mulf %478, %480 : vector<1x256xf32>
    %482 = vector.broadcast %479 : vector<1x1xf32> to vector<1x256xf32>
    %483 = arith.mulf %482, %481 : vector<1x256xf32>
    %484 = arith.addf %477, %483 : vector<1x256xf32>
    %c0_297 = arith.constant 0 : index
    %c19_298 = arith.constant 19 : index
    %485 = vector.load %arg27[%c0_297, %c19_298] : memref<1x324xf32, #tpu.memory_space<vmem>>, vector<1x256xf32>
    %c0_299 = arith.constant 0 : index
    %c8_300 = arith.constant 8 : index
    %486 = vector.load %arg11[%c0_299, %c8_300] : memref<1x25xf32, #tpu.memory_space<vmem>>, vector<1x1xf32>
    %c8_301 = arith.constant 8 : index
    %c0_302 = arith.constant 0 : index
    %487 = vector.load %arg6[%c8_301, %c0_302] : memref<25x256xf32, #tpu.memory_space<vmem>>, vector<1x256xf32>
    %488 = arith.mulf %485, %487 : vector<1x256xf32>
    %489 = vector.broadcast %486 : vector<1x1xf32> to vector<1x256xf32>
    %490 = arith.mulf %489, %488 : vector<1x256xf32>
    %491 = arith.addf %484, %490 : vector<1x256xf32>
    %c0_303 = arith.constant 0 : index
    %c20_304 = arith.constant 20 : index
    %492 = vector.load %arg27[%c0_303, %c20_304] : memref<1x324xf32, #tpu.memory_space<vmem>>, vector<1x256xf32>
    %c0_305 = arith.constant 0 : index
    %c9_306 = arith.constant 9 : index
    %493 = vector.load %arg11[%c0_305, %c9_306] : memref<1x25xf32, #tpu.memory_space<vmem>>, vector<1x1xf32>
    %c9_307 = arith.constant 9 : index
    %c0_308 = arith.constant 0 : index
    %494 = vector.load %arg6[%c9_307, %c0_308] : memref<25x256xf32, #tpu.memory_space<vmem>>, vector<1x256xf32>
    %495 = arith.mulf %492, %494 : vector<1x256xf32>
    %496 = vector.broadcast %493 : vector<1x1xf32> to vector<1x256xf32>
    %497 = arith.mulf %496, %495 : vector<1x256xf32>
    %498 = arith.addf %491, %497 : vector<1x256xf32>
    %c0_309 = arith.constant 0 : index
    %c32_310 = arith.constant 32 : index
    %499 = vector.load %arg27[%c0_309, %c32_310] : memref<1x324xf32, #tpu.memory_space<vmem>>, vector<1x256xf32>
    %c0_311 = arith.constant 0 : index
    %c10_312 = arith.constant 10 : index
    %500 = vector.load %arg11[%c0_311, %c10_312] : memref<1x25xf32, #tpu.memory_space<vmem>>, vector<1x1xf32>
    %c10_313 = arith.constant 10 : index
    %c0_314 = arith.constant 0 : index
    %501 = vector.load %arg6[%c10_313, %c0_314] : memref<25x256xf32, #tpu.memory_space<vmem>>, vector<1x256xf32>
    %502 = arith.mulf %499, %501 : vector<1x256xf32>
    %503 = vector.broadcast %500 : vector<1x1xf32> to vector<1x256xf32>
    %504 = arith.mulf %503, %502 : vector<1x256xf32>
    %505 = arith.addf %498, %504 : vector<1x256xf32>
    %c0_315 = arith.constant 0 : index
    %c33_316 = arith.constant 33 : index
    %506 = vector.load %arg27[%c0_315, %c33_316] : memref<1x324xf32, #tpu.memory_space<vmem>>, vector<1x256xf32>
    %c0_317 = arith.constant 0 : index
    %c11_318 = arith.constant 11 : index
    %507 = vector.load %arg11[%c0_317, %c11_318] : memref<1x25xf32, #tpu.memory_space<vmem>>, vector<1x1xf32>
    %c11_319 = arith.constant 11 : index
    %c0_320 = arith.constant 0 : index
    %508 = vector.load %arg6[%c11_319, %c0_320] : memref<25x256xf32, #tpu.memory_space<vmem>>, vector<1x256xf32>
    %509 = arith.mulf %506, %508 : vector<1x256xf32>
    %510 = vector.broadcast %507 : vector<1x1xf32> to vector<1x256xf32>
    %511 = arith.mulf %510, %509 : vector<1x256xf32>
    %512 = arith.addf %505, %511 : vector<1x256xf32>
    %c0_321 = arith.constant 0 : index
    %c34_322 = arith.constant 34 : index
    %513 = vector.load %arg27[%c0_321, %c34_322] : memref<1x324xf32, #tpu.memory_space<vmem>>, vector<1x256xf32>
    %c0_323 = arith.constant 0 : index
    %c12_324 = arith.constant 12 : index
    %514 = vector.load %arg11[%c0_323, %c12_324] : memref<1x25xf32, #tpu.memory_space<vmem>>, vector<1x1xf32>
    %c12_325 = arith.constant 12 : index
    %c0_326 = arith.constant 0 : index
    %515 = vector.load %arg6[%c12_325, %c0_326] : memref<25x256xf32, #tpu.memory_space<vmem>>, vector<1x256xf32>
    %516 = arith.mulf %513, %515 : vector<1x256xf32>
    %517 = vector.broadcast %514 : vector<1x1xf32> to vector<1x256xf32>
    %518 = arith.mulf %517, %516 : vector<1x256xf32>
    %519 = arith.addf %512, %518 : vector<1x256xf32>
    %c0_327 = arith.constant 0 : index
    %c35_328 = arith.constant 35 : index
    %520 = vector.load %arg27[%c0_327, %c35_328] : memref<1x324xf32, #tpu.memory_space<vmem>>, vector<1x256xf32>
    %c0_329 = arith.constant 0 : index
    %c13_330 = arith.constant 13 : index
    %521 = vector.load %arg11[%c0_329, %c13_330] : memref<1x25xf32, #tpu.memory_space<vmem>>, vector<1x1xf32>
    %c13_331 = arith.constant 13 : index
    %c0_332 = arith.constant 0 : index
    %522 = vector.load %arg6[%c13_331, %c0_332] : memref<25x256xf32, #tpu.memory_space<vmem>>, vector<1x256xf32>
    %523 = arith.mulf %520, %522 : vector<1x256xf32>
    %524 = vector.broadcast %521 : vector<1x1xf32> to vector<1x256xf32>
    %525 = arith.mulf %524, %523 : vector<1x256xf32>
    %526 = arith.addf %519, %525 : vector<1x256xf32>
    %c0_333 = arith.constant 0 : index
    %c36_334 = arith.constant 36 : index
    %527 = vector.load %arg27[%c0_333, %c36_334] : memref<1x324xf32, #tpu.memory_space<vmem>>, vector<1x256xf32>
    %c0_335 = arith.constant 0 : index
    %c14_336 = arith.constant 14 : index
    %528 = vector.load %arg11[%c0_335, %c14_336] : memref<1x25xf32, #tpu.memory_space<vmem>>, vector<1x1xf32>
    %c14_337 = arith.constant 14 : index
    %c0_338 = arith.constant 0 : index
    %529 = vector.load %arg6[%c14_337, %c0_338] : memref<25x256xf32, #tpu.memory_space<vmem>>, vector<1x256xf32>
    %530 = arith.mulf %527, %529 : vector<1x256xf32>
    %531 = vector.broadcast %528 : vector<1x1xf32> to vector<1x256xf32>
    %532 = arith.mulf %531, %530 : vector<1x256xf32>
    %533 = arith.addf %526, %532 : vector<1x256xf32>
    %c0_339 = arith.constant 0 : index
    %c48_340 = arith.constant 48 : index
    %534 = vector.load %arg27[%c0_339, %c48_340] : memref<1x324xf32, #tpu.memory_space<vmem>>, vector<1x256xf32>
    %c0_341 = arith.constant 0 : index
    %c15_342 = arith.constant 15 : index
    %535 = vector.load %arg11[%c0_341, %c15_342] : memref<1x25xf32, #tpu.memory_space<vmem>>, vector<1x1xf32>
    %c15_343 = arith.constant 15 : index
    %c0_344 = arith.constant 0 : index
    %536 = vector.load %arg6[%c15_343, %c0_344] : memref<25x256xf32, #tpu.memory_space<vmem>>, vector<1x256xf32>
    %537 = arith.mulf %534, %536 : vector<1x256xf32>
    %538 = vector.broadcast %535 : vector<1x1xf32> to vector<1x256xf32>
    %539 = arith.mulf %538, %537 : vector<1x256xf32>
    %540 = arith.addf %533, %539 : vector<1x256xf32>
    %c0_345 = arith.constant 0 : index
    %c49_346 = arith.constant 49 : index
    %541 = vector.load %arg27[%c0_345, %c49_346] : memref<1x324xf32, #tpu.memory_space<vmem>>, vector<1x256xf32>
    %c0_347 = arith.constant 0 : index
    %c16_348 = arith.constant 16 : index
    %542 = vector.load %arg11[%c0_347, %c16_348] : memref<1x25xf32, #tpu.memory_space<vmem>>, vector<1x1xf32>
    %c16_349 = arith.constant 16 : index
    %c0_350 = arith.constant 0 : index
    %543 = vector.load %arg6[%c16_349, %c0_350] : memref<25x256xf32, #tpu.memory_space<vmem>>, vector<1x256xf32>
    %544 = arith.mulf %541, %543 : vector<1x256xf32>
    %545 = vector.broadcast %542 : vector<1x1xf32> to vector<1x256xf32>
    %546 = arith.mulf %545, %544 : vector<1x256xf32>
    %547 = arith.addf %540, %546 : vector<1x256xf32>
    %c0_351 = arith.constant 0 : index
    %c50_352 = arith.constant 50 : index
    %548 = vector.load %arg27[%c0_351, %c50_352] : memref<1x324xf32, #tpu.memory_space<vmem>>, vector<1x256xf32>
    %c0_353 = arith.constant 0 : index
    %c17_354 = arith.constant 17 : index
    %549 = vector.load %arg11[%c0_353, %c17_354] : memref<1x25xf32, #tpu.memory_space<vmem>>, vector<1x1xf32>
    %c17_355 = arith.constant 17 : index
    %c0_356 = arith.constant 0 : index
    %550 = vector.load %arg6[%c17_355, %c0_356] : memref<25x256xf32, #tpu.memory_space<vmem>>, vector<1x256xf32>
    %551 = arith.mulf %548, %550 : vector<1x256xf32>
    %552 = vector.broadcast %549 : vector<1x1xf32> to vector<1x256xf32>
    %553 = arith.mulf %552, %551 : vector<1x256xf32>
    %554 = arith.addf %547, %553 : vector<1x256xf32>
    %c0_357 = arith.constant 0 : index
    %c51_358 = arith.constant 51 : index
    %555 = vector.load %arg27[%c0_357, %c51_358] : memref<1x324xf32, #tpu.memory_space<vmem>>, vector<1x256xf32>
    %c0_359 = arith.constant 0 : index
    %c18_360 = arith.constant 18 : index
    %556 = vector.load %arg11[%c0_359, %c18_360] : memref<1x25xf32, #tpu.memory_space<vmem>>, vector<1x1xf32>
    %c18_361 = arith.constant 18 : index
    %c0_362 = arith.constant 0 : index
    %557 = vector.load %arg6[%c18_361, %c0_362] : memref<25x256xf32, #tpu.memory_space<vmem>>, vector<1x256xf32>
    %558 = arith.mulf %555, %557 : vector<1x256xf32>
    %559 = vector.broadcast %556 : vector<1x1xf32> to vector<1x256xf32>
    %560 = arith.mulf %559, %558 : vector<1x256xf32>
    %561 = arith.addf %554, %560 : vector<1x256xf32>
    %c0_363 = arith.constant 0 : index
    %c52_364 = arith.constant 52 : index
    %562 = vector.load %arg27[%c0_363, %c52_364] : memref<1x324xf32, #tpu.memory_space<vmem>>, vector<1x256xf32>
    %c0_365 = arith.constant 0 : index
    %c19_366 = arith.constant 19 : index
    %563 = vector.load %arg11[%c0_365, %c19_366] : memref<1x25xf32, #tpu.memory_space<vmem>>, vector<1x1xf32>
    %c19_367 = arith.constant 19 : index
    %c0_368 = arith.constant 0 : index
    %564 = vector.load %arg6[%c19_367, %c0_368] : memref<25x256xf32, #tpu.memory_space<vmem>>, vector<1x256xf32>
    %565 = arith.mulf %562, %564 : vector<1x256xf32>
    %566 = vector.broadcast %563 : vector<1x1xf32> to vector<1x256xf32>
    %567 = arith.mulf %566, %565 : vector<1x256xf32>
    %568 = arith.addf %561, %567 : vector<1x256xf32>
    %c0_369 = arith.constant 0 : index
    %c64_370 = arith.constant 64 : index
    %569 = vector.load %arg27[%c0_369, %c64_370] : memref<1x324xf32, #tpu.memory_space<vmem>>, vector<1x256xf32>
    %c0_371 = arith.constant 0 : index
    %c20_372 = arith.constant 20 : index
    %570 = vector.load %arg11[%c0_371, %c20_372] : memref<1x25xf32, #tpu.memory_space<vmem>>, vector<1x1xf32>
    %c20_373 = arith.constant 20 : index
    %c0_374 = arith.constant 0 : index
    %571 = vector.load %arg6[%c20_373, %c0_374] : memref<25x256xf32, #tpu.memory_space<vmem>>, vector<1x256xf32>
    %572 = arith.mulf %569, %571 : vector<1x256xf32>
    %573 = vector.broadcast %570 : vector<1x1xf32> to vector<1x256xf32>
    %574 = arith.mulf %573, %572 : vector<1x256xf32>
    %575 = arith.addf %568, %574 : vector<1x256xf32>
    %c0_375 = arith.constant 0 : index
    %c65_376 = arith.constant 65 : index
    %576 = vector.load %arg27[%c0_375, %c65_376] : memref<1x324xf32, #tpu.memory_space<vmem>>, vector<1x256xf32>
    %c0_377 = arith.constant 0 : index
    %c21_378 = arith.constant 21 : index
    %577 = vector.load %arg11[%c0_377, %c21_378] : memref<1x25xf32, #tpu.memory_space<vmem>>, vector<1x1xf32>
    %c21_379 = arith.constant 21 : index
    %c0_380 = arith.constant 0 : index
    %578 = vector.load %arg6[%c21_379, %c0_380] : memref<25x256xf32, #tpu.memory_space<vmem>>, vector<1x256xf32>
    %579 = arith.mulf %576, %578 : vector<1x256xf32>
    %580 = vector.broadcast %577 : vector<1x1xf32> to vector<1x256xf32>
    %581 = arith.mulf %580, %579 : vector<1x256xf32>
    %582 = arith.addf %575, %581 : vector<1x256xf32>
    %c0_381 = arith.constant 0 : index
    %c66_382 = arith.constant 66 : index
    %583 = vector.load %arg27[%c0_381, %c66_382] : memref<1x324xf32, #tpu.memory_space<vmem>>, vector<1x256xf32>
    %c0_383 = arith.constant 0 : index
    %c22_384 = arith.constant 22 : index
    %584 = vector.load %arg11[%c0_383, %c22_384] : memref<1x25xf32, #tpu.memory_space<vmem>>, vector<1x1xf32>
    %c22_385 = arith.constant 22 : index
    %c0_386 = arith.constant 0 : index
    %585 = vector.load %arg6[%c22_385, %c0_386] : memref<25x256xf32, #tpu.memory_space<vmem>>, vector<1x256xf32>
    %586 = arith.mulf %583, %585 : vector<1x256xf32>
    %587 = vector.broadcast %584 : vector<1x1xf32> to vector<1x256xf32>
    %588 = arith.mulf %587, %586 : vector<1x256xf32>
    %589 = arith.addf %582, %588 : vector<1x256xf32>
    %c0_387 = arith.constant 0 : index
    %c67_388 = arith.constant 67 : index
    %590 = vector.load %arg27[%c0_387, %c67_388] : memref<1x324xf32, #tpu.memory_space<vmem>>, vector<1x256xf32>
    %c0_389 = arith.constant 0 : index
    %c23_390 = arith.constant 23 : index
    %591 = vector.load %arg11[%c0_389, %c23_390] : memref<1x25xf32, #tpu.memory_space<vmem>>, vector<1x1xf32>
    %c23_391 = arith.constant 23 : index
    %c0_392 = arith.constant 0 : index
    %592 = vector.load %arg6[%c23_391, %c0_392] : memref<25x256xf32, #tpu.memory_space<vmem>>, vector<1x256xf32>
    %593 = arith.mulf %590, %592 : vector<1x256xf32>
    %594 = vector.broadcast %591 : vector<1x1xf32> to vector<1x256xf32>
    %595 = arith.mulf %594, %593 : vector<1x256xf32>
    %596 = arith.addf %589, %595 : vector<1x256xf32>
    %c0_393 = arith.constant 0 : index
    %c68_394 = arith.constant 68 : index
    %597 = vector.load %arg27[%c0_393, %c68_394] : memref<1x324xf32, #tpu.memory_space<vmem>>, vector<1x256xf32>
    %c0_395 = arith.constant 0 : index
    %c24_396 = arith.constant 24 : index
    %598 = vector.load %arg11[%c0_395, %c24_396] : memref<1x25xf32, #tpu.memory_space<vmem>>, vector<1x1xf32>
    %c24_397 = arith.constant 24 : index
    %c0_398 = arith.constant 0 : index
    %599 = vector.load %arg6[%c24_397, %c0_398] : memref<25x256xf32, #tpu.memory_space<vmem>>, vector<1x256xf32>
    %600 = arith.mulf %597, %599 : vector<1x256xf32>
    %601 = vector.broadcast %598 : vector<1x1xf32> to vector<1x256xf32>
    %602 = arith.mulf %601, %600 : vector<1x256xf32>
    %603 = arith.addf %596, %602 : vector<1x256xf32>
    %c0_399 = arith.constant 0 : index
    %c0_400 = arith.constant 0 : index
    %604 = vector.load %arg12[%c0_399, %c0_400] : memref<1x1xf32, #tpu.memory_space<vmem>>, vector<1x1xf32>
    %605 = vector.broadcast %604 : vector<1x1xf32> to vector<1x256xf32>
    %606 = arith.addf %603, %605 : vector<1x256xf32>
    %c0_401 = arith.constant 0 : index
    %c0_402 = arith.constant 0 : index
    %607 = vector.load %arg13[%c0_401, %c0_402] : memref<4x256xf32, #tpu.memory_space<vmem>>, vector<4x256xf32>
    %cst_403 = arith.constant 5.000000e-01 : f32
    %608 = vector.broadcast %cst_403 : f32 to vector<1x256xf32>
    %609 = arith.mulf %608, %606 : vector<1x256xf32>
    %cst_404 = arith.constant 4.471500e-02 : f32
    %610 = vector.broadcast %cst_404 : f32 to vector<1x256xf32>
    %611 = arith.mulf %610, %606 : vector<1x256xf32>
    %612 = arith.mulf %611, %606 : vector<1x256xf32>
    %613 = arith.mulf %612, %606 : vector<1x256xf32>
    %614 = arith.addf %606, %613 : vector<1x256xf32>
    %cst_405 = arith.constant 0.797884583 : f32
    %615 = vector.broadcast %cst_405 : f32 to vector<1x256xf32>
    %616 = arith.mulf %615, %614 : vector<1x256xf32>
    %617 = math.tanh %616 : vector<1x256xf32>
    %cst_406 = arith.constant 1.000000e+00 : f32
    %618 = vector.broadcast %cst_406 : f32 to vector<1x256xf32>
    %619 = arith.addf %618, %617 : vector<1x256xf32>
    %620 = arith.mulf %609, %619 : vector<1x256xf32>
    %621 = vector.broadcast %620 : vector<1x256xf32> to vector<4x256xf32>
    %622 = arith.mulf %607, %621 : vector<4x256xf32>
    %cst_407 = arith.constant dense<0.000000e+00> : vector<4xf32>
    %623 = vector.multi_reduction <add>, %622, %cst_407 [1] : vector<4x256xf32> to vector<4xf32>
    %624 = vector.shape_cast %623 : vector<4xf32> to vector<4x1xf32>
    %c0_408 = arith.constant 0 : index
    %c0_409 = arith.constant 0 : index
    %625 = vector.load %arg14[%c0_408, %c0_409] : memref<4x1xf32, #tpu.memory_space<vmem>>, vector<4x1xf32>
    %626 = arith.addf %624, %625 : vector<4x1xf32>
    %627 = vector.broadcast %422 : vector<4x1xf32> to vector<4x256xf32>
    %628 = arith.addf %400, %627 : vector<4x256xf32>
    %629 = vector.broadcast %626 : vector<4x1xf32> to vector<4x256xf32>
    %630 = arith.addf %628, %629 : vector<4x256xf32>
    %c0_410 = arith.constant 0 : index
    %c0_411 = arith.constant 0 : index
    %631 = vector.load %arg15[%c0_410, %c0_411] : memref<4x1xf32, #tpu.memory_space<vmem>>, vector<4x1xf32>
    %c0_412 = arith.constant 0 : index
    %c0_413 = arith.constant 0 : index
    %632 = vector.load %arg16[%c0_412, %c0_413] : memref<4x1xf32, #tpu.memory_space<vmem>>, vector<4x1xf32>
    %cst_414 = arith.constant dense<0.000000e+00> : vector<4xf32>
    %633 = vector.multi_reduction <add>, %630, %cst_414 [1] : vector<4x256xf32> to vector<4xf32>
    %634 = vector.shape_cast %633 : vector<4xf32> to vector<4x1xf32>
    %cst_415 = arith.constant dense<0.000000e+00> : vector<1xf32>
    %635 = vector.multi_reduction <add>, %634, %cst_415 [0] : vector<4x1xf32> to vector<1xf32>
    %636 = vector.shape_cast %635 : vector<1xf32> to vector<1x1xf32>
    %cst_416 = arith.constant 9.765625E-4 : f32
    %637 = vector.broadcast %cst_416 : f32 to vector<1x1xf32>
    %638 = arith.mulf %636, %637 : vector<1x1xf32>
    %639 = arith.mulf %630, %630 : vector<4x256xf32>
    %cst_417 = arith.constant dense<0.000000e+00> : vector<4xf32>
    %640 = vector.multi_reduction <add>, %639, %cst_417 [1] : vector<4x256xf32> to vector<4xf32>
    %641 = vector.shape_cast %640 : vector<4xf32> to vector<4x1xf32>
    %cst_418 = arith.constant dense<0.000000e+00> : vector<1xf32>
    %642 = vector.multi_reduction <add>, %641, %cst_418 [0] : vector<4x1xf32> to vector<1xf32>
    %643 = vector.shape_cast %642 : vector<1xf32> to vector<1x1xf32>
    %cst_419 = arith.constant 9.765625E-4 : f32
    %644 = vector.broadcast %cst_419 : f32 to vector<1x1xf32>
    %645 = arith.mulf %643, %644 : vector<1x1xf32>
    %646 = arith.mulf %638, %638 : vector<1x1xf32>
    %647 = arith.subf %645, %646 : vector<1x1xf32>
    %648 = vector.broadcast %638 : vector<1x1xf32> to vector<4x256xf32>
    %649 = arith.subf %630, %648 : vector<4x256xf32>
    %cst_420 = arith.constant 9.99999974E-6 : f32
    %650 = vector.broadcast %cst_420 : f32 to vector<1x1xf32>
    %651 = arith.addf %647, %650 : vector<1x1xf32>
    %652 = math.rsqrt %651 : vector<1x1xf32>
    %653 = vector.broadcast %652 : vector<1x1xf32> to vector<4x256xf32>
    %654 = arith.mulf %649, %653 : vector<4x256xf32>
    %655 = vector.broadcast %631 : vector<4x1xf32> to vector<4x256xf32>
    %656 = arith.mulf %654, %655 : vector<4x256xf32>
    %657 = vector.broadcast %632 : vector<4x1xf32> to vector<4x256xf32>
    %658 = arith.addf %656, %657 : vector<4x256xf32>
    %cst_421 = arith.constant 0.000000e+00 : f32
    %659 = vector.broadcast %cst_421 : f32 to vector<4x290xf32>
    %c0_422 = arith.constant 0 : index
    %c0_423 = arith.constant 0 : index
    %660 = vector.load %arg28[%c0_422, %c0_423] : memref<4x290xf32, #tpu.memory_space<vmem>>, vector<4x290xf32>
    tpu.vector_store %arg28[%c0_422, %c0_423], %659 {strides = array<i32>} : memref<4x290xf32, #tpu.memory_space<vmem>>, vector<4x290xf32>,
    %c0_424 = arith.constant 0 : index
    %c17_425 = arith.constant 17 : index
    %661 = vector.load %arg28[%c0_424, %c17_425] : memref<4x290xf32, #tpu.memory_space<vmem>>, vector<4x256xf32>
    tpu.vector_store %arg28[%c0_424, %c17_425], %658 {strides = array<i32>} : memref<4x290xf32, #tpu.memory_space<vmem>>, vector<4x256xf32>,
    %c0_426 = arith.constant 0 : index
    %c0_427 = arith.constant 0 : index
    %662 = vector.load %arg28[%c0_426, %c0_427] : memref<4x290xf32, #tpu.memory_space<vmem>>, vector<4x256xf32>
    %c0_428 = arith.constant 0 : index
    %c0_429 = arith.constant 0 : index
    %663 = vector.load %arg5[%c0_428, %c0_429] : memref<9x256xf32, #tpu.memory_space<vmem>>, vector<1x256xf32>
    %664 = vector.broadcast %663 : vector<1x256xf32> to vector<4x256xf32>
    %665 = arith.mulf %662, %664 : vector<4x256xf32>
    %c0_430 = arith.constant 0 : index
    %c0_431 = arith.constant 0 : index
    %666 = vector.load %arg29[%c0_430, %c0_431] : memref<36x256xf32, #tpu.memory_space<vmem>>, vector<4x256xf32>
    tpu.vector_store %arg29[%c0_430, %c0_431], %665 {strides = array<i32>} : memref<36x256xf32, #tpu.memory_space<vmem>>, vector<4x256xf32>,
    %c0_432 = arith.constant 0 : index
    %c1_433 = arith.constant 1 : index
    %667 = vector.load %arg28[%c0_432, %c1_433] : memref<4x290xf32, #tpu.memory_space<vmem>>, vector<4x256xf32>
    %c1_434 = arith.constant 1 : index
    %c0_435 = arith.constant 0 : index
    %668 = vector.load %arg5[%c1_434, %c0_435] : memref<9x256xf32, #tpu.memory_space<vmem>>, vector<1x256xf32>
    %669 = vector.broadcast %668 : vector<1x256xf32> to vector<4x256xf32>
    %670 = arith.mulf %667, %669 : vector<4x256xf32>
    %c4_436 = arith.constant 4 : index
    %c0_437 = arith.constant 0 : index
    %671 = vector.load %arg29[%c4_436, %c0_437] : memref<36x256xf32, #tpu.memory_space<vmem>>, vector<4x256xf32>
    tpu.vector_store %arg29[%c4_436, %c0_437], %670 {strides = array<i32>} : memref<36x256xf32, #tpu.memory_space<vmem>>, vector<4x256xf32>,
    %c0_438 = arith.constant 0 : index
    %c2_439 = arith.constant 2 : index
    %672 = vector.load %arg28[%c0_438, %c2_439] : memref<4x290xf32, #tpu.memory_space<vmem>>, vector<4x256xf32>
    %c2_440 = arith.constant 2 : index
    %c0_441 = arith.constant 0 : index
    %673 = vector.load %arg5[%c2_440, %c0_441] : memref<9x256xf32, #tpu.memory_space<vmem>>, vector<1x256xf32>
    %674 = vector.broadcast %673 : vector<1x256xf32> to vector<4x256xf32>
    %675 = arith.mulf %672, %674 : vector<4x256xf32>
    %c8_442 = arith.constant 8 : index
    %c0_443 = arith.constant 0 : index
    %676 = vector.load %arg29[%c8_442, %c0_443] : memref<36x256xf32, #tpu.memory_space<vmem>>, vector<4x256xf32>
    tpu.vector_store %arg29[%c8_442, %c0_443], %675 {strides = array<i32>} : memref<36x256xf32, #tpu.memory_space<vmem>>, vector<4x256xf32>,
    %c0_444 = arith.constant 0 : index
    %c16_445 = arith.constant 16 : index
    %677 = vector.load %arg28[%c0_444, %c16_445] : memref<4x290xf32, #tpu.memory_space<vmem>>, vector<4x256xf32>
    %c3_446 = arith.constant 3 : index
    %c0_447 = arith.constant 0 : index
    %678 = vector.load %arg5[%c3_446, %c0_447] : memref<9x256xf32, #tpu.memory_space<vmem>>, vector<1x256xf32>
    %679 = vector.broadcast %678 : vector<1x256xf32> to vector<4x256xf32>
    %680 = arith.mulf %677, %679 : vector<4x256xf32>
    %c12_448 = arith.constant 12 : index
    %c0_449 = arith.constant 0 : index
    %681 = vector.load %arg29[%c12_448, %c0_449] : memref<36x256xf32, #tpu.memory_space<vmem>>, vector<4x256xf32>
    tpu.vector_store %arg29[%c12_448, %c0_449], %680 {strides = array<i32>} : memref<36x256xf32, #tpu.memory_space<vmem>>, vector<4x256xf32>,
    %c0_450 = arith.constant 0 : index
    %c17_451 = arith.constant 17 : index
    %682 = vector.load %arg28[%c0_450, %c17_451] : memref<4x290xf32, #tpu.memory_space<vmem>>, vector<4x256xf32>
    %c4_452 = arith.constant 4 : index
    %c0_453 = arith.constant 0 : index
    %683 = vector.load %arg5[%c4_452, %c0_453] : memref<9x256xf32, #tpu.memory_space<vmem>>, vector<1x256xf32>
    %684 = vector.broadcast %683 : vector<1x256xf32> to vector<4x256xf32>
    %685 = arith.mulf %682, %684 : vector<4x256xf32>
    %c16_454 = arith.constant 16 : index
    %c0_455 = arith.constant 0 : index
    %686 = vector.load %arg29[%c16_454, %c0_455] : memref<36x256xf32, #tpu.memory_space<vmem>>, vector<4x256xf32>
    tpu.vector_store %arg29[%c16_454, %c0_455], %685 {strides = array<i32>} : memref<36x256xf32, #tpu.memory_space<vmem>>, vector<4x256xf32>,
    %c0_456 = arith.constant 0 : index
    %c18_457 = arith.constant 18 : index
    %687 = vector.load %arg28[%c0_456, %c18_457] : memref<4x290xf32, #tpu.memory_space<vmem>>, vector<4x256xf32>
    %c5_458 = arith.constant 5 : index
    %c0_459 = arith.constant 0 : index
    %688 = vector.load %arg5[%c5_458, %c0_459] : memref<9x256xf32, #tpu.memory_space<vmem>>, vector<1x256xf32>
    %689 = vector.broadcast %688 : vector<1x256xf32> to vector<4x256xf32>
    %690 = arith.mulf %687, %689 : vector<4x256xf32>
    %c20_460 = arith.constant 20 : index
    %c0_461 = arith.constant 0 : index
    %691 = vector.load %arg29[%c20_460, %c0_461] : memref<36x256xf32, #tpu.memory_space<vmem>>, vector<4x256xf32>
    tpu.vector_store %arg29[%c20_460, %c0_461], %690 {strides = array<i32>} : memref<36x256xf32, #tpu.memory_space<vmem>>, vector<4x256xf32>,
    %c0_462 = arith.constant 0 : index
    %c32_463 = arith.constant 32 : index
    %692 = vector.load %arg28[%c0_462, %c32_463] : memref<4x290xf32, #tpu.memory_space<vmem>>, vector<4x256xf32>
    %c6_464 = arith.constant 6 : index
    %c0_465 = arith.constant 0 : index
    %693 = vector.load %arg5[%c6_464, %c0_465] : memref<9x256xf32, #tpu.memory_space<vmem>>, vector<1x256xf32>
    %694 = vector.broadcast %693 : vector<1x256xf32> to vector<4x256xf32>
    %695 = arith.mulf %692, %694 : vector<4x256xf32>
    %c24_466 = arith.constant 24 : index
    %c0_467 = arith.constant 0 : index
    %696 = vector.load %arg29[%c24_466, %c0_467] : memref<36x256xf32, #tpu.memory_space<vmem>>, vector<4x256xf32>
    tpu.vector_store %arg29[%c24_466, %c0_467], %695 {strides = array<i32>} : memref<36x256xf32, #tpu.memory_space<vmem>>, vector<4x256xf32>,
    %c0_468 = arith.constant 0 : index
    %c33_469 = arith.constant 33 : index
    %697 = vector.load %arg28[%c0_468, %c33_469] : memref<4x290xf32, #tpu.memory_space<vmem>>, vector<4x256xf32>
    %c7_470 = arith.constant 7 : index
    %c0_471 = arith.constant 0 : index
    %698 = vector.load %arg5[%c7_470, %c0_471] : memref<9x256xf32, #tpu.memory_space<vmem>>, vector<1x256xf32>
    %699 = vector.broadcast %698 : vector<1x256xf32> to vector<4x256xf32>
    %700 = arith.mulf %697, %699 : vector<4x256xf32>
    %c28_472 = arith.constant 28 : index
    %c0_473 = arith.constant 0 : index
    %701 = vector.load %arg29[%c28_472, %c0_473] : memref<36x256xf32, #tpu.memory_space<vmem>>, vector<4x256xf32>
    tpu.vector_store %arg29[%c28_472, %c0_473], %700 {strides = array<i32>} : memref<36x256xf32, #tpu.memory_space<vmem>>, vector<4x256xf32>,
    %c0_474 = arith.constant 0 : index
    %c34_475 = arith.constant 34 : index
    %702 = vector.load %arg28[%c0_474, %c34_475] : memref<4x290xf32, #tpu.memory_space<vmem>>, vector<4x256xf32>
    %c8_476 = arith.constant 8 : index
    %c0_477 = arith.constant 0 : index
    %703 = vector.load %arg5[%c8_476, %c0_477] : memref<9x256xf32, #tpu.memory_space<vmem>>, vector<1x256xf32>
    %704 = vector.broadcast %703 : vector<1x256xf32> to vector<4x256xf32>
    %705 = arith.mulf %702, %704 : vector<4x256xf32>
    %c32_478 = arith.constant 32 : index
    %c0_479 = arith.constant 0 : index
    %706 = vector.load %arg29[%c32_478, %c0_479] : memref<36x256xf32, #tpu.memory_space<vmem>>, vector<4x256xf32>
    tpu.vector_store %arg29[%c32_478, %c0_479], %705 {strides = array<i32>} : memref<36x256xf32, #tpu.memory_space<vmem>>, vector<4x256xf32>,
    %c0_480 = arith.constant 0 : index
    %c0_481 = arith.constant 0 : index
    %707 = vector.load %arg17[%c0_480, %c0_481] : memref<16x36xf32, #tpu.memory_space<vmem>>, vector<16x36xf32>
    %c0_482 = arith.constant 0 : index
    %c0_483 = arith.constant 0 : index
    %708 = vector.load %arg29[%c0_482, %c0_483] : memref<36x256xf32, #tpu.memory_space<vmem>>, vector<36x256xf32>
    %cst_484 = arith.constant dense<0.000000e+00> : vector<16x256xf32>
    %709 = tpu.matmul %707, %708, %cst_484 {dimension_numbers = #tpu.dot_dimension_numbers<[1], [0], [0], [1], [0, 0, 1, 1], [], []>} : vector<16x36xf32>, vector<36x256xf32>, vector<16x256xf32> -> vector<16x256xf32>
    %c0_485 = arith.constant 0 : index
    %c0_486 = arith.constant 0 : index
    %710 = vector.load %arg18[%c0_485, %c0_486] : memref<16x1xf32, #tpu.memory_space<vmem>>, vector<16x1xf32>
    %711 = vector.broadcast %710 : vector<16x1xf32> to vector<16x256xf32>
    %712 = arith.addf %709, %711 : vector<16x256xf32>
    %cst_487 = arith.constant 5.000000e-01 : f32
    %713 = vector.broadcast %cst_487 : f32 to vector<16x256xf32>
    %714 = arith.mulf %713, %712 : vector<16x256xf32>
    %cst_488 = arith.constant 4.471500e-02 : f32
    %715 = vector.broadcast %cst_488 : f32 to vector<16x256xf32>
    %716 = arith.mulf %715, %712 : vector<16x256xf32>
    %717 = arith.mulf %716, %712 : vector<16x256xf32>
    %718 = arith.mulf %717, %712 : vector<16x256xf32>
    %719 = arith.addf %712, %718 : vector<16x256xf32>
    %cst_489 = arith.constant 0.797884583 : f32
    %720 = vector.broadcast %cst_489 : f32 to vector<16x256xf32>
    %721 = arith.mulf %720, %719 : vector<16x256xf32>
    %722 = math.tanh %721 : vector<16x256xf32>
    %cst_490 = arith.constant 1.000000e+00 : f32
    %723 = vector.broadcast %cst_490 : f32 to vector<16x256xf32>
    %724 = arith.addf %723, %722 : vector<16x256xf32>
    %725 = arith.mulf %714, %724 : vector<16x256xf32>
    %c0_491 = arith.constant 0 : index
    %c0_492 = arith.constant 0 : index
    %726 = vector.load %arg19[%c0_491, %c0_492] : memref<16x1xf32, #tpu.memory_space<vmem>>, vector<16x1xf32>
    %c0_493 = arith.constant 0 : index
    %c0_494 = arith.constant 0 : index
    %727 = vector.load %arg20[%c0_493, %c0_494] : memref<16x1xf32, #tpu.memory_space<vmem>>, vector<16x1xf32>
    %cst_495 = arith.constant dense<0.000000e+00> : vector<16xf32>
    %728 = vector.multi_reduction <add>, %725, %cst_495 [1] : vector<16x256xf32> to vector<16xf32>
    %729 = vector.shape_cast %728 : vector<16xf32> to vector<16x1xf32>
    %cst_496 = arith.constant dense<0.000000e+00> : vector<1xf32>
    %730 = vector.multi_reduction <add>, %729, %cst_496 [0] : vector<16x1xf32> to vector<1xf32>
    %731 = vector.shape_cast %730 : vector<1xf32> to vector<1x1xf32>
    %cst_497 = arith.constant 2.44140625E-4 : f32
    %732 = vector.broadcast %cst_497 : f32 to vector<1x1xf32>
    %733 = arith.mulf %731, %732 : vector<1x1xf32>
    %734 = arith.mulf %725, %725 : vector<16x256xf32>
    %cst_498 = arith.constant dense<0.000000e+00> : vector<16xf32>
    %735 = vector.multi_reduction <add>, %734, %cst_498 [1] : vector<16x256xf32> to vector<16xf32>
    %736 = vector.shape_cast %735 : vector<16xf32> to vector<16x1xf32>
    %cst_499 = arith.constant dense<0.000000e+00> : vector<1xf32>
    %737 = vector.multi_reduction <add>, %736, %cst_499 [0] : vector<16x1xf32> to vector<1xf32>
    %738 = vector.shape_cast %737 : vector<1xf32> to vector<1x1xf32>
    %cst_500 = arith.constant 2.44140625E-4 : f32
    %739 = vector.broadcast %cst_500 : f32 to vector<1x1xf32>
    %740 = arith.mulf %738, %739 : vector<1x1xf32>
    %741 = arith.mulf %733, %733 : vector<1x1xf32>
    %742 = arith.subf %740, %741 : vector<1x1xf32>
    %743 = vector.broadcast %733 : vector<1x1xf32> to vector<16x256xf32>
    %744 = arith.subf %725, %743 : vector<16x256xf32>
    %cst_501 = arith.constant 9.99999974E-6 : f32
    %745 = vector.broadcast %cst_501 : f32 to vector<1x1xf32>
    %746 = arith.addf %742, %745 : vector<1x1xf32>
    %747 = math.rsqrt %746 : vector<1x1xf32>
    %748 = vector.broadcast %747 : vector<1x1xf32> to vector<16x256xf32>
    %749 = arith.mulf %744, %748 : vector<16x256xf32>
    %750 = vector.broadcast %726 : vector<16x1xf32> to vector<16x256xf32>
    %751 = arith.mulf %749, %750 : vector<16x256xf32>
    %752 = vector.broadcast %727 : vector<16x1xf32> to vector<16x256xf32>
    %753 = arith.addf %751, %752 : vector<16x256xf32>
    %cst_502 = arith.constant 0.000000e+00 : f32
    %754 = vector.broadcast %cst_502 : f32 to vector<16x290xf32>
    %c0_503 = arith.constant 0 : index
    %c0_504 = arith.constant 0 : index
    %755 = vector.load %arg30[%c0_503, %c0_504] : memref<16x290xf32, #tpu.memory_space<vmem>>, vector<16x290xf32>
    tpu.vector_store %arg30[%c0_503, %c0_504], %754 {strides = array<i32>} : memref<16x290xf32, #tpu.memory_space<vmem>>, vector<16x290xf32>,
    %c0_505 = arith.constant 0 : index
    %c17_506 = arith.constant 17 : index
    %756 = vector.load %arg30[%c0_505, %c17_506] : memref<16x290xf32, #tpu.memory_space<vmem>>, vector<16x256xf32>
    tpu.vector_store %arg30[%c0_505, %c17_506], %753 {strides = array<i32>} : memref<16x290xf32, #tpu.memory_space<vmem>>, vector<16x256xf32>,
    %c0_507 = arith.constant 0 : index
    %c0_508 = arith.constant 0 : index
    %757 = vector.load %arg30[%c0_507, %c0_508] : memref<16x290xf32, #tpu.memory_space<vmem>>, vector<16x256xf32>
    %c0_509 = arith.constant 0 : index
    %c0_510 = arith.constant 0 : index
    %758 = vector.load %arg5[%c0_509, %c0_510] : memref<9x256xf32, #tpu.memory_space<vmem>>, vector<1x256xf32>
    %759 = vector.broadcast %758 : vector<1x256xf32> to vector<16x256xf32>
    %760 = arith.mulf %757, %759 : vector<16x256xf32>
    %c0_511 = arith.constant 0 : index
    %c0_512 = arith.constant 0 : index
    %761 = vector.load %arg31[%c0_511, %c0_512] : memref<144x256xf32, #tpu.memory_space<vmem>>, vector<16x256xf32>
    tpu.vector_store %arg31[%c0_511, %c0_512], %760 {strides = array<i32>} : memref<144x256xf32, #tpu.memory_space<vmem>>, vector<16x256xf32>,
    %c0_513 = arith.constant 0 : index
    %c1_514 = arith.constant 1 : index
    %762 = vector.load %arg30[%c0_513, %c1_514] : memref<16x290xf32, #tpu.memory_space<vmem>>, vector<16x256xf32>
    %c1_515 = arith.constant 1 : index
    %c0_516 = arith.constant 0 : index
    %763 = vector.load %arg5[%c1_515, %c0_516] : memref<9x256xf32, #tpu.memory_space<vmem>>, vector<1x256xf32>
    %764 = vector.broadcast %763 : vector<1x256xf32> to vector<16x256xf32>
    %765 = arith.mulf %762, %764 : vector<16x256xf32>
    %c16_517 = arith.constant 16 : index
    %c0_518 = arith.constant 0 : index
    %766 = vector.load %arg31[%c16_517, %c0_518] : memref<144x256xf32, #tpu.memory_space<vmem>>, vector<16x256xf32>
    tpu.vector_store %arg31[%c16_517, %c0_518], %765 {strides = array<i32>} : memref<144x256xf32, #tpu.memory_space<vmem>>, vector<16x256xf32>,
    %c0_519 = arith.constant 0 : index
    %c2_520 = arith.constant 2 : index
    %767 = vector.load %arg30[%c0_519, %c2_520] : memref<16x290xf32, #tpu.memory_space<vmem>>, vector<16x256xf32>
    %c2_521 = arith.constant 2 : index
    %c0_522 = arith.constant 0 : index
    %768 = vector.load %arg5[%c2_521, %c0_522] : memref<9x256xf32, #tpu.memory_space<vmem>>, vector<1x256xf32>
    %769 = vector.broadcast %768 : vector<1x256xf32> to vector<16x256xf32>
    %770 = arith.mulf %767, %769 : vector<16x256xf32>
    %c32_523 = arith.constant 32 : index
    %c0_524 = arith.constant 0 : index
    %771 = vector.load %arg31[%c32_523, %c0_524] : memref<144x256xf32, #tpu.memory_space<vmem>>, vector<16x256xf32>
    tpu.vector_store %arg31[%c32_523, %c0_524], %770 {strides = array<i32>} : memref<144x256xf32, #tpu.memory_space<vmem>>, vector<16x256xf32>,
    %c0_525 = arith.constant 0 : index
    %c16_526 = arith.constant 16 : index
    %772 = vector.load %arg30[%c0_525, %c16_526] : memref<16x290xf32, #tpu.memory_space<vmem>>, vector<16x256xf32>
    %c3_527 = arith.constant 3 : index
    %c0_528 = arith.constant 0 : index
    %773 = vector.load %arg5[%c3_527, %c0_528] : memref<9x256xf32, #tpu.memory_space<vmem>>, vector<1x256xf32>
    %774 = vector.broadcast %773 : vector<1x256xf32> to vector<16x256xf32>
    %775 = arith.mulf %772, %774 : vector<16x256xf32>
    %c48_529 = arith.constant 48 : index
    %c0_530 = arith.constant 0 : index
    %776 = vector.load %arg31[%c48_529, %c0_530] : memref<144x256xf32, #tpu.memory_space<vmem>>, vector<16x256xf32>
    tpu.vector_store %arg31[%c48_529, %c0_530], %775 {strides = array<i32>} : memref<144x256xf32, #tpu.memory_space<vmem>>, vector<16x256xf32>,
    %c0_531 = arith.constant 0 : index
    %c17_532 = arith.constant 17 : index
    %777 = vector.load %arg30[%c0_531, %c17_532] : memref<16x290xf32, #tpu.memory_space<vmem>>, vector<16x256xf32>
    %c4_533 = arith.constant 4 : index
    %c0_534 = arith.constant 0 : index
    %778 = vector.load %arg5[%c4_533, %c0_534] : memref<9x256xf32, #tpu.memory_space<vmem>>, vector<1x256xf32>
    %779 = vector.broadcast %778 : vector<1x256xf32> to vector<16x256xf32>
    %780 = arith.mulf %777, %779 : vector<16x256xf32>
    %c64_535 = arith.constant 64 : index
    %c0_536 = arith.constant 0 : index
    %781 = vector.load %arg31[%c64_535, %c0_536] : memref<144x256xf32, #tpu.memory_space<vmem>>, vector<16x256xf32>
    tpu.vector_store %arg31[%c64_535, %c0_536], %780 {strides = array<i32>} : memref<144x256xf32, #tpu.memory_space<vmem>>, vector<16x256xf32>,
    %c0_537 = arith.constant 0 : index
    %c18_538 = arith.constant 18 : index
    %782 = vector.load %arg30[%c0_537, %c18_538] : memref<16x290xf32, #tpu.memory_space<vmem>>, vector<16x256xf32>
    %c5_539 = arith.constant 5 : index
    %c0_540 = arith.constant 0 : index
    %783 = vector.load %arg5[%c5_539, %c0_540] : memref<9x256xf32, #tpu.memory_space<vmem>>, vector<1x256xf32>
    %784 = vector.broadcast %783 : vector<1x256xf32> to vector<16x256xf32>
    %785 = arith.mulf %782, %784 : vector<16x256xf32>
    %c80_541 = arith.constant 80 : index
    %c0_542 = arith.constant 0 : index
    %786 = vector.load %arg31[%c80_541, %c0_542] : memref<144x256xf32, #tpu.memory_space<vmem>>, vector<16x256xf32>
    tpu.vector_store %arg31[%c80_541, %c0_542], %785 {strides = array<i32>} : memref<144x256xf32, #tpu.memory_space<vmem>>, vector<16x256xf32>,
    %c0_543 = arith.constant 0 : index
    %c32_544 = arith.constant 32 : index
    %787 = vector.load %arg30[%c0_543, %c32_544] : memref<16x290xf32, #tpu.memory_space<vmem>>, vector<16x256xf32>
    %c6_545 = arith.constant 6 : index
    %c0_546 = arith.constant 0 : index
    %788 = vector.load %arg5[%c6_545, %c0_546] : memref<9x256xf32, #tpu.memory_space<vmem>>, vector<1x256xf32>
    %789 = vector.broadcast %788 : vector<1x256xf32> to vector<16x256xf32>
    %790 = arith.mulf %787, %789 : vector<16x256xf32>
    %c96_547 = arith.constant 96 : index
    %c0_548 = arith.constant 0 : index
    %791 = vector.load %arg31[%c96_547, %c0_548] : memref<144x256xf32, #tpu.memory_space<vmem>>, vector<16x256xf32>
    tpu.vector_store %arg31[%c96_547, %c0_548], %790 {strides = array<i32>} : memref<144x256xf32, #tpu.memory_space<vmem>>, vector<16x256xf32>,
    %c0_549 = arith.constant 0 : index
    %c33_550 = arith.constant 33 : index
    %792 = vector.load %arg30[%c0_549, %c33_550] : memref<16x290xf32, #tpu.memory_space<vmem>>, vector<16x256xf32>
    %c7_551 = arith.constant 7 : index
    %c0_552 = arith.constant 0 : index
    %793 = vector.load %arg5[%c7_551, %c0_552] : memref<9x256xf32, #tpu.memory_space<vmem>>, vector<1x256xf32>
    %794 = vector.broadcast %793 : vector<1x256xf32> to vector<16x256xf32>
    %795 = arith.mulf %792, %794 : vector<16x256xf32>
    %c112 = arith.constant 112 : index
    %c0_553 = arith.constant 0 : index
    %796 = vector.load %arg31[%c112, %c0_553] : memref<144x256xf32, #tpu.memory_space<vmem>>, vector<16x256xf32>
    tpu.vector_store %arg31[%c112, %c0_553], %795 {strides = array<i32>} : memref<144x256xf32, #tpu.memory_space<vmem>>, vector<16x256xf32>,
    %c0_554 = arith.constant 0 : index
    %c34_555 = arith.constant 34 : index
    %797 = vector.load %arg30[%c0_554, %c34_555] : memref<16x290xf32, #tpu.memory_space<vmem>>, vector<16x256xf32>
    %c8_556 = arith.constant 8 : index
    %c0_557 = arith.constant 0 : index
    %798 = vector.load %arg5[%c8_556, %c0_557] : memref<9x256xf32, #tpu.memory_space<vmem>>, vector<1x256xf32>
    %799 = vector.broadcast %798 : vector<1x256xf32> to vector<16x256xf32>
    %800 = arith.mulf %797, %799 : vector<16x256xf32>
    %c128 = arith.constant 128 : index
    %c0_558 = arith.constant 0 : index
    %801 = vector.load %arg31[%c128, %c0_558] : memref<144x256xf32, #tpu.memory_space<vmem>>, vector<16x256xf32>
    tpu.vector_store %arg31[%c128, %c0_558], %800 {strides = array<i32>} : memref<144x256xf32, #tpu.memory_space<vmem>>, vector<16x256xf32>,
    %c0_559 = arith.constant 0 : index
    %c0_560 = arith.constant 0 : index
    %802 = vector.load %arg21[%c0_559, %c0_560] : memref<8x144xf32, #tpu.memory_space<vmem>>, vector<8x144xf32>
    %c0_561 = arith.constant 0 : index
    %c0_562 = arith.constant 0 : index
    %803 = vector.load %arg31[%c0_561, %c0_562] : memref<144x256xf32, #tpu.memory_space<vmem>>, vector<144x256xf32>
    %cst_563 = arith.constant dense<0.000000e+00> : vector<8x256xf32>
    %804 = tpu.matmul %802, %803, %cst_563 {dimension_numbers = #tpu.dot_dimension_numbers<[1], [0], [0], [1], [0, 0, 1, 1], [], []>} : vector<8x144xf32>, vector<144x256xf32>, vector<8x256xf32> -> vector<8x256xf32>
    %c0_564 = arith.constant 0 : index
    %c0_565 = arith.constant 0 : index
    %805 = vector.load %arg22[%c0_564, %c0_565] : memref<8x1xf32, #tpu.memory_space<vmem>>, vector<8x1xf32>
    %806 = vector.broadcast %805 : vector<8x1xf32> to vector<8x256xf32>
    %807 = arith.addf %804, %806 : vector<8x256xf32>
    %c0_566 = arith.constant 0 : index
    %c0_567 = arith.constant 0 : index
    %808 = vector.load %arg23[%c0_566, %c0_567] : memref<8x4xf32, #tpu.memory_space<vmem>>, vector<8x4xf32>
    %cst_568 = arith.constant dense<0.000000e+00> : vector<8x256xf32>
    %809 = tpu.matmul %808, %1, %cst_568 {dimension_numbers = #tpu.dot_dimension_numbers<[1], [0], [0], [1], [0, 0, 1, 1], [], []>} : vector<8x4xf32>, vector<4x256xf32>, vector<8x256xf32> -> vector<8x256xf32>
    %c0_569 = arith.constant 0 : index
    %c0_570 = arith.constant 0 : index
    %810 = vector.load %arg24[%c0_569, %c0_570] : memref<8x1xf32, #tpu.memory_space<vmem>>, vector<8x1xf32>
    %811 = vector.broadcast %810 : vector<8x1xf32> to vector<8x256xf32>
    %812 = arith.addf %809, %811 : vector<8x256xf32>
    %813 = arith.addf %807, %812 : vector<8x256xf32>
    %c0_571 = arith.constant 0 : index
    %c0_572 = arith.constant 0 : index
    %c0_573 = arith.constant 0 : index
    %814 = vector.load %arg25[%c0_571, %c0_572, %c0_573] : memref<1x8x256xf32, #tpu.memory_space<vmem>>, vector<1x8x256xf32>
    %815 = vector.shape_cast %814 : vector<1x8x256xf32> to vector<8x256xf32>
    %816 = vector.shape_cast %813 : vector<8x256xf32> to vector<1x8x256xf32>
    tpu.vector_store %arg25[%c0_571, %c0_572, %c0_573], %816 {strides = array<i32>} : memref<1x8x256xf32, #tpu.memory_space<vmem>>, vector<1x8x256xf32>,
    return
  }
  func.func @transform_0(%arg0: i32) -> (i32, i32, i32) {
    %c0_i32 = arith.constant 0 : i32
    %c0_i32_0 = arith.constant 0 : i32
    %c0_i32_1 = arith.constant 0 : i32
    return %arg0, %c0_i32, %c0_i32_0 : i32, i32, i32
  }
  func.func @transform_1(%arg0: i32) -> (i32, i32, i32) {
    %c0_i32 = arith.constant 0 : i32
    %c0_i32_0 = arith.constant 0 : i32
    %c0_i32_1 = arith.constant 0 : i32
    return %arg0, %c0_i32, %c0_i32_0 : i32, i32, i32
  }
  func.func @transform_2(%arg0: i32) -> (i32, i32, i32) {
    %c0_i32 = arith.constant 0 : i32
    %c0_i32_0 = arith.constant 0 : i32
    %c0_i32_1 = arith.constant 0 : i32
    return %arg0, %c0_i32, %c0_i32_0 : i32, i32, i32
  }
  func.func @transform_3(%arg0: i32) -> (i32, i32) {
    %c0_i32 = arith.constant 0 : i32
    %c0_i32_0 = arith.constant 0 : i32
    %c0_i32_1 = arith.constant 0 : i32
    return %c0_i32, %c0_i32_0 : i32, i32
  }
  func.func @transform_4(%arg0: i32) -> (i32, i32) {
    %c0_i32 = arith.constant 0 : i32
    %c0_i32_0 = arith.constant 0 : i32
    %c0_i32_1 = arith.constant 0 : i32
    return %c0_i32, %c0_i32_0 : i32, i32
  }
  func.func @transform_5(%arg0: i32) -> (i32, i32) {
    %c0_i32 = arith.constant 0 : i32
    %c0_i32_0 = arith.constant 0 : i32
    %c0_i32_1 = arith.constant 0 : i32
    return %c0_i32, %c0_i32_0 : i32, i32
  }
  func.func @transform_6(%arg0: i32) -> (i32, i32) {
    %c0_i32 = arith.constant 0 : i32
    %c0_i32_0 = arith.constant 0 : i32
    %c0_i32_1 = arith.constant 0 : i32
    return %c0_i32, %c0_i32_0 : i32, i32
  }
  func.func @transform_7(%arg0: i32) -> (i32, i32) {
    %c0_i32 = arith.constant 0 : i32
    %c0_i32_0 = arith.constant 0 : i32
    %c0_i32_1 = arith.constant 0 : i32
    return %c0_i32, %c0_i32_0 : i32, i32
  }
  func.func @transform_8(%arg0: i32) -> (i32, i32) {
    %c0_i32 = arith.constant 0 : i32
    %c0_i32_0 = arith.constant 0 : i32
    %c0_i32_1 = arith.constant 0 : i32
    return %c0_i32, %c0_i32_0 : i32, i32
  }
  func.func @transform_9(%arg0: i32) -> (i32, i32) {
    %c0_i32 = arith.constant 0 : i32
    %c0_i32_0 = arith.constant 0 : i32
    %c0_i32_1 = arith.constant 0 : i32
    return %c0_i32, %c0_i32_0 : i32, i32
  }
  func.func @transform_10(%arg0: i32) -> (i32, i32) {
    %c0_i32 = arith.constant 0 : i32
    %c0_i32_0 = arith.constant 0 : i32
    %c0_i32_1 = arith.constant 0 : i32
    return %c0_i32, %c0_i32_0 : i32, i32
  }
  func.func @transform_11(%arg0: i32) -> (i32, i32) {
    %c0_i32 = arith.constant 0 : i32
    %c0_i32_0 = arith.constant 0 : i32
    %c0_i32_1 = arith.constant 0 : i32
    return %c0_i32, %c0_i32_0 : i32, i32
  }
  func.func @transform_12(%arg0: i32) -> (i32, i32) {
    %c0_i32 = arith.constant 0 : i32
    %c0_i32_0 = arith.constant 0 : i32
    %c0_i32_1 = arith.constant 0 : i32
    return %c0_i32, %c0_i32_0 : i32, i32
  }
  func.func @transform_13(%arg0: i32) -> (i32, i32) {
    %c0_i32 = arith.constant 0 : i32
    %c0_i32_0 = arith.constant 0 : i32
    %c0_i32_1 = arith.constant 0 : i32
    return %c0_i32, %c0_i32_0 : i32, i32
  }
  func.func @transform_14(%arg0: i32) -> (i32, i32) {
    %c0_i32 = arith.constant 0 : i32
    %c0_i32_0 = arith.constant 0 : i32
    %c0_i32_1 = arith.constant 0 : i32
    return %c0_i32, %c0_i32_0 : i32, i32
  }
  func.func @transform_15(%arg0: i32) -> (i32, i32) {
    %c0_i32 = arith.constant 0 : i32
    %c0_i32_0 = arith.constant 0 : i32
    %c0_i32_1 = arith.constant 0 : i32
    return %c0_i32, %c0_i32_0 : i32, i32
  }
  func.func @transform_16(%arg0: i32) -> (i32, i32) {
    %c0_i32 = arith.constant 0 : i32
    %c0_i32_0 = arith.constant 0 : i32
    %c0_i32_1 = arith.constant 0 : i32
    return %c0_i32, %c0_i32_0 : i32, i32
  }
  func.func @transform_17(%arg0: i32) -> (i32, i32) {
    %c0_i32 = arith.constant 0 : i32
    %c0_i32_0 = arith.constant 0 : i32
    %c0_i32_1 = arith.constant 0 : i32
    return %c0_i32, %c0_i32_0 : i32, i32
  }
  func.func @transform_18(%arg0: i32) -> (i32, i32) {
    %c0_i32 = arith.constant 0 : i32
    %c0_i32_0 = arith.constant 0 : i32
    %c0_i32_1 = arith.constant 0 : i32
    return %c0_i32, %c0_i32_0 : i32, i32
  }
  func.func @transform_19(%arg0: i32) -> (i32, i32) {
    %c0_i32 = arith.constant 0 : i32
    %c0_i32_0 = arith.constant 0 : i32
    %c0_i32_1 = arith.constant 0 : i32
    return %c0_i32, %c0_i32_0 : i32, i32
  }
  func.func @transform_20(%arg0: i32) -> (i32, i32) {
    %c0_i32 = arith.constant 0 : i32
    %c0_i32_0 = arith.constant 0 : i32
    %c0_i32_1 = arith.constant 0 : i32
    return %c0_i32, %c0_i32_0 : i32, i32
  }
  func.func @transform_21(%arg0: i32) -> (i32, i32) {
    %c0_i32 = arith.constant 0 : i32
    %c0_i32_0 = arith.constant 0 : i32
    %c0_i32_1 = arith.constant 0 : i32
    return %c0_i32, %c0_i32_0 : i32, i32
  }
  func.func @transform_22(%arg0: i32) -> (i32, i32) {
    %c0_i32 = arith.constant 0 : i32
    %c0_i32_0 = arith.constant 0 : i32
    %c0_i32_1 = arith.constant 0 : i32
    return %c0_i32, %c0_i32_0 : i32, i32
  }
  func.func @transform_23(%arg0: i32) -> (i32, i32) {
    %c0_i32 = arith.constant 0 : i32
    %c0_i32_0 = arith.constant 0 : i32
    %c0_i32_1 = arith.constant 0 : i32
    return %c0_i32, %c0_i32_0 : i32, i32
  }
  func.func @transform_24(%arg0: i32) -> (i32, i32, i32) {
    %c0_i32 = arith.constant 0 : i32
    %c0_i32_0 = arith.constant 0 : i32
    %c0_i32_1 = arith.constant 0 : i32
    return %arg0, %c0_i32, %c0_i32_0 : i32, i32, i32
  }
}

</mosaic_0001>

<bundles_post_ra>
// kernel: tpu_custom_call.1
= control target key start
LH: loop header
LB: loop body
LE: loop exit
PB: predicated region body
PF: predicated region fallthrough
CT: control target
= control target key end

     0   :  { %s8185_s0 = inlined_call_operand.vmem [shape: f32[2,4,256], index: 0, kind: input, shape index: {}]   ;;  %s8186_s1 = inlined_call_operand.vmem [shape: f32[2,1,8], index: 1, kind: input, shape index: {}]   ;;  %s8187_s2 = inlined_call_operand.vmem [shape: f32[2,1,256], index: 2, kind: input, shape index: {}]   ;;  %s8188_s3 = inlined_call_operand.hbm [shape: f32[49,256], index: 3, kind: input, shape index: {}]   ;;  %s8189_s4 = inlined_call_operand.vmem [shape: f32[9,256], index: 4, kind: input, shape index: {}]   ;;  %s8190_s5 = inlined_call_operand.hbm [shape: f32[25,256], index: 5, kind: input, shape index: {}]   ;;  %s8191_s6 = inlined_call_operand.vmem [shape: f32[4,49], index: 6, kind: input, shape index: {}]   ;;  %s8192_s7 = inlined_call_operand.vmem [shape: f32[4,1], index: 7, kind: input, shape index: {}]   ;;  %s8193_s8 = inlined_call_operand.vmem [shape: f32[4,8], index: 8, kind: input, shape index: {}]   ;;  %s8194_s9 = inlined_call_operand.vmem [shape: f32[4,1], index: 9, kind: input, shape index: {}]   ;;  %s8195_s10 = inlined_call_operand.vmem [shape: f32[1,25], index: 10, kind: input, shape index: {}]   ;;  %s8196_s11 = inlined_call_operand.<no memory space> [shape: f32[1,1], index: 11, kind: input, shape index: {}]   ;;  %s8197_s12 = inlined_call_operand.vmem [shape: f32[4,256], index: 12, kind: input, shape index: {}]   ;;  %s8198_s13 = inlined_call_operand.vmem [shape: f32[4,1], index: 13, kind: input, shape index: {}]   ;;  %s8199_s14 = inlined_call_operand.vmem [shape: f32[4,1], index: 14, kind: input, shape index: {}]   ;;  %s8200_s15 = inlined_call_operand.vmem [shape: f32[4,1], index: 15, kind: input, shape index: {}]   ;;  %s8201_s16 = inlined_call_operand.vmem [shape: f32[16,36], index: 16, kind: input, shape index: {}]   ;;  %s8202_s17 = inlined_call_operand.vmem [shape: f32[16,1], index: 17, kind: input, shape index: {}]   ;;  %s8203_s18 = inlined_call_operand.vmem [shape: f32[16,1], index: 18, kind: input, shape index: {}]   ;;  %s8204_s19 = inlined_call_operand.vmem [shape: f32[16,1], index: 19, kind: input, shape index: {}]   ;;  %s8205_s20 = inlined_call_operand.vmem [shape: f32[8,144], index: 20, kind: input, shape index: {}]   ;;  %s8206_s21 = inlined_call_operand.vmem [shape: f32[8,1], index: 21, kind: input, shape index: {}]   ;;  %s8207_s22 = inlined_call_operand.vmem [shape: f32[8,4], index: 22, kind: input, shape index: {}]   ;;  %s8208_s23 = inlined_call_operand.vmem [shape: f32[8,1], index: 23, kind: input, shape index: {}]   ;;  %s8209_s24 = inlined_call_operand.hbm [shape: f32[2,8,256], index: 24, kind: output, shape index: {}]  }
   0x1   :  { %8407 = sst [smem:[#allocation153_spill]] %s8185_s0  ;;  %v29_v0 = vstv %s8196_s11 }
   0x2   :  { %8408 = sst [smem:[#allocation154_spill]] %s8186_s1  ;;  %30 = vst [vmem:[#allocation8] sm:$0x1] %v29_v0 }
   0x3   :  { %8409 = sst [smem:[#allocation155_spill]] %s8187_s2 }
   0x4   :  { %8410 = sst [smem:[#allocation156_spill]] %s8188_s3 }
   0x5   :  { %8411 = sst [smem:[#allocation157_spill]] %s8189_s4 }
   0x6   :  { %8412 = sst [smem:[#allocation158_spill]] %s8190_s5 }
   0x7   :  { %8413 = sst [smem:[#allocation159_spill]] %s8191_s6 }
   0x8   :  { %8414 = sst [smem:[#allocation160_spill]] %s8192_s7 }
   0x9   :  { %8415 = sst [smem:[#allocation161_spill]] %s8193_s8 }
   0xa   :  { %8416 = sst [smem:[#allocation162_spill]] %s8194_s9 }
   0xb   :  { %8417 = sst [smem:[#allocation163_spill]] %s8195_s10 }
   0xc   :  { %8418 = sst [smem:[#allocation164_spill]] %s8197_s12 }
   0xd   :  { %8419 = sst [smem:[#allocation165_spill]] %s8198_s13 }
   0xe   :  { %8420 = sst [smem:[#allocation166_spill]] %s8199_s14 }
   0xf   :  { %8421 = sst [smem:[#allocation167_spill]] %s8200_s15 }
  0x10   :  { %8422 = sst [smem:[#allocation168_spill]] %s8205_s20 }
  0x11   :  { %8423 = sst [smem:[#allocation169_spill]] %s8207_s22 }
  0x12   :  { %8424 = sst [smem:[#allocation170_spill]] %s8208_s23 }
  0x13   :  { %8425 = sst [smem:[#allocation171_spill]] %s8209_s24 }
  0x14   :  { %31 = vsyncpa [#allocation10], 0 }
  0x15   :  { %32 = vsyncpa [#allocation13], 0 }
  0x16   :  { %33 = vsyncpa [#allocation11], 0 }
  0x17   :  { %35 = vsyncpa [#allocation11 + $0x1], 0  ;;  %s5993_s27 = smov 0   ;;  %s5995_s28 = smov 0  }
  0x18   :  { %s5997_s6 = smov 0   ;;  %s5999_s2 = smov 0  }
  0x19 LB: > { %8426 = sst [smem:[#allocation18_spill]] %s5706_s27  ;;  %s6014_s11 = sadd.s32 4294967295, %s5718_s2   ;;  %s5718_s2 = sphi %s5999_s2, %s8864_s2   ;;  %s5714_s6 = sphi %s5997_s6, %s8867_s6   ;;  %s5710_s28 = sphi %s5995_s28, %s8866_s28   ;;  %s5706_s27 = sphi %s5993_s27, %s8865_s27  }
  0x1a   : > { %8427 = sst [smem:[#allocation19_spill]] %s5710_s28  ;;  %s5124_s29 = sadd.s32 4294967294, %s5718_s2  }
  0x1b   : > { %8428 = sst [smem:[#allocation20_spill]] %s5714_s6  ;;  %s6018_s0 = sadd.s32 1, %s5718_s2  }
  0x1c   : > { %8429 = sst [smem:[#allocation21_spill]] %s5718_s2  ;;  %s567_s7 = sadd.s32 1, %s5714_s6 }
  0x1d   : > { %8430 = sst [smem:[#allocation22_spill]] %s6014_s11  ;;  %s564_s30 = ssub.s32 %s5718_s2, %s6018_s0 }
  0x1e   : > { %8431 = sst [smem:[#allocation23_spill]] %s6018_s0  ;;  %p577_p0 = scmp.ne.s32.totalorder %s5714_s6, %s5710_s28 }
  0x1f   : > { %p565_p1 = scmp.eq.s32.totalorder %s564_s30, 0  ;;  %p578_p2 = scmp.eq.s32.totalorder %s6014_s11, 1 }
  0x20   : > { %p583_p3 = scmp.ne.s32.totalorder %s5710_s28, %s5706_s27  ;;  %p584_p4 = scmp.eq.s32.totalorder %s5124_s29, 1 }
  0x21   : > { %s6029_s3 = scalar_select %p565_p1, %s5714_s6, %s567_s7  }
  0x22   : > { %p6031_p5 = por %p578_p2, %p577_p0  ;;  %p6035_p6 = por %p584_p4, %p583_p3 }
  0x23   : > { %8432 = sst [smem:[#allocation24_spill]] %s6029_s3  ;;  %p5125_p7 = scmp.ge.s32.totalorder %s5718_s2, 1 }
  0x24   : > { %s8433_s25 = scalar_select %p6031_p5, 1, 0 }
  0x25   : > { %s8435_s8 = scalar_select %p6035_p6, 1, 0 }
  0x26   : > { %8434 = sst [smem:[#allocation25_spill]] %s8433_s25  ;;  %p591_p8 = scmp.lt.s32.totalorder %s5718_s2, 3 }
  0x27   : > { %8436 = sst [smem:[#allocation26_spill]] %s8435_s8  ;;  %p5192_p9 = scmp.eq.s32.totalorder %s6014_s11, 0 }
  0x28   : > { %p6042_p10 = pnand %p5125_p7, %p591_p8  ;;  %s8438_s26 = sld [smem:[#allocation156_spill]] }
  0x29   : > { %s5720_s7 = smov [#allocation9]   ;;  %s8439_s0 = sld [smem:[#allocation158_spill]] }
  0x2a   : > { %p5181_p11 = pneg %p6042_p10  ;;  %s604_s30 = sshll.u32 %s5720_s7, 4  ;;  %s605_s30 = int_to_ptr.vmem [resolvable:$true] %s604_s30 }
  0x2b   : > { %s5721_s27 = smov 256   ;;  %s5722_s2 = smov 16  }
  0x2c   : > { %p5182_p12 = pnand %p5192_p9, %p5181_p11  ;;  %s5723_s25 = smov [#allocation12]  }
  0x2d   : > { %s621_s1 = sshll.u32 %s5723_s25, 4  ;;  %712 = sbr.rel (%p6042_p10) target bundleno = 3982 (0xf8e), region = 116  ;;  %s622_s1 = int_to_ptr.vmem [resolvable:$true] %s621_s1 }
  0x2e   : > { %s602_s29 = sshll.u32 %s8438_s26, 4  ;;  %s603_s29 = int_to_ptr.hbm [resolvable:$true] %s602_s29 }
  0x2f   : > { %s619_s8 = sshll.u32 %s8439_s0, 4  ;;  %s620_s8 = int_to_ptr.hbm [resolvable:$true] %s619_s8 }
  0x30   : > { %5184 = dma.hbm_to_vmem [thread:$0]  (!%p5182_p12), %s603_s29, 1792, %s605_s30, [#allocation10], %s5721_s27, %s5721_s27, %s5722_s2  }
  0x31   : > { %5187 = dma.hbm_to_vmem [thread:$0]  (!%p5182_p12), %s620_s8, 1024, %s622_s1, [#allocation13], %s5721_s27, %s5721_s27, %s5722_s2  }
  0x32   : > { %5693 = dma.done.wait (%p5192_p9), [#allocation10], 1792  }
  0x33   : > { %5695 = vsyncadd (%p5192_p9), [#allocation10], 4294965504 }
  0x34   : > { %5697 = dma.done.wait (%p5192_p9), [#allocation13], 1024  }
  0x35   : > { %5699 = vsyncadd (%p5192_p9), [#allocation13], 4294966272  ;;  %p791_p13 = scmp.lt.s32.totalorder %s6014_s11, 1  ;;  %v5724_v1 = vmov 1   ;;  %v5725_v2 = vmov 2   ;;  %s8440_s3 = sld [smem:[#allocation153_spill]] }
  0x36   : > { %5374 = vset.pattern.permute.xlu1 %v5724_v1  ;;  %5375 = vset.pattern.permute.xlu0 %v5725_v2  ;;  %s8441_s5 = sld [smem:[#allocation159_spill]]  ;;  %s8247_s26 = smov 51   ;;  %v898_v5 = vld [vmem:[#allocation9 + $0x2] ss:$8 sm:$0x3]  ;;  %vm828_vm0 = vcmask 1043456  }
  0x37   : > { %s6069_s27 = scalar_select %p791_p13, %s6014_s11, 1  ;;  %5406 = vset.pattern.permute.xlu2 %v5725_v2  ;;  %v851_v6 = vld [vmem:[#allocation9 + $0x1] ss:$8 sm:$0x3]  ;;  %v900_v7 = vperm.slane %v898_v5, 0  ;;  %v901_v8 = vperm.slane %v898_v5, 1 }
  0x38   : > { %v853_v9 = vperm.slane %v851_v6, 0  ;;  %v854_v10 = vperm.slane %v851_v6, 1  ;;  %v945_v11 = vld [vmem:[#allocation9 + $0x3] ss:$8 sm:$0x3]  ;;  %s8222_s30 = smov 2  }
  0x39   : > { %s5169_s6 = sshll.u32 %s6069_s27, 3  ;;  %v902_v12 = vrot.slane %v901_v8, 4  ;;  %v948_v14 = vperm.slane %v945_v11, 1  ;;  %v947_v18 = vperm.slane %v945_v11, 0  ;;  %s8238_s1 = smov 1   ;;  %v5729_v21 = vmov 4  }
  0x3a   : > { %v855_v13 = vrot.slane %v854_v10, 4  ;;  %v992_v20 = vld [vmem:[#allocation9 + $0x4] ss:$8 sm:$0x3]  ;;  %v8289_v27 = vmov 3   ;;  %s5733_s4 = smov 5  }
  0x3b   : > { %s795_s25 = scalar_lea.vmem %s8440_s3, %s5169_s6  ;;  %v903_v15 = vsel %vm828_vm0, %v900_v7, %v902_v12  ;;  %v949_v19 = vrot.slane %v948_v14, 4  ;;  %v995_v23 = vperm.slane %v992_v20, 1  ;;  %s8237_s6 = smov 3   ;;  %v994_v25 = vperm.slane %v992_v20, 0 }
  0x3c   : > { %v849_v3 = vld [vmem:[%s8441_s5] sm:$0xf]  ;;  %v856_v16 = vsel %vm828_vm0, %v853_v9, %v855_v13  ;;  %904 = vrot.lane.b32.xlu2 %v903_v15, %s8222_s30  ;;  %v1039_v28 = vld [vmem:[#allocation9 + $0x5] ss:$8 sm:$0x3]  ;;  %s8230_s3 = smov 4  }
  0x3d   : > { %v6078_v4 = vld [vmem:[%s795_s25] sm:$0xff]  ;;  %868 = vperm.xlu1 %5374, %v849_v3   ;;  %v950_v22 = vsel %vm828_vm0, %v947_v18, %v949_v19  ;;  %v996_v26 = vrot.slane %v995_v23, 4  ;;  %v1042_v30 = vperm.slane %v1039_v28, 1  ;;  %v1041_v32 = vperm.slane %v1039_v28, 0  ;;  %s5735_s2 = smov 6   ;;  %s8252_s8 = smov 16  }
  0x3e   : > { %8442 = vst [vmem:[#allocation27_spill] sm:$0xff] %v6078_v4  ;;  %808 = vrot.lane.b32.xlu0 %v6078_v4, %s8247_s26  ;;  %v896_v17 = vld [vmem:[%s8441_s5] sm:$0xf]  ;;  %v1086_v34 = vld [vmem:[#allocation9 + $0x6] ss:$8 sm:$0x3] }
  0x3f   : > { %v943_v24 = vld [vmem:[%s8441_s5] sm:$0xf]  ;;  %v997_v29 = vsel %vm828_vm0, %v994_v25, %v996_v26  ;;  %v1043_v33 = vrot.slane %v1042_v30, 4  ;;  %v1089_v36 = vperm.slane %v1086_v34, 1  ;;  %v1088_v37 = vperm.slane %v1086_v34, 0  ;;  %s8254_s7 = smov 17  }
  0x40   : > { %v990_v31 = vld [vmem:[%s8441_s5] sm:$0xf]  ;;  %v1133_v40 = vld [vmem:[#allocation9 + $0x7] ss:$8 sm:$0x3]  ;;  %v8295_v41 = vmov 5  }
  0x41   : > { %v1044_v35 = vsel %vm828_vm0, %v1041_v32, %v1043_v33  ;;  %v1090_v38 = vrot.slane %v1089_v36, 4  ;;  %v1037_v39 = vld [vmem:[%s8441_s5] sm:$0xf]  ;;  %v1136_v43 = vperm.slane %v1133_v40, 1  ;;  %v1135_v44 = vperm.slane %v1133_v40, 0  ;;  %s8220_s25 = smov 18  }
  0x42   : > { %v1180_v46 = vld [vmem:[#allocation9 + $0x10] ss:$8 sm:$0x3]  ;;  %v1131_v47 = vld [vmem:[%s8441_s5] sm:$0xf]  ;;  %v8287_v48 = vmov 7  }
  0x43   : > { %v1091_v42 = vsel %vm828_vm0, %v1088_v37, %v1090_v38  ;;  %v1137_v45 = vrot.slane %v1136_v43, 4  ;;  %v1183_v50 = vperm.slane %v1180_v46, 1  ;;  %v1182_v51 = vperm.slane %v1180_v46, 0  ;;  %v1227_v53 = vld [vmem:[#allocation9 + $0x11] ss:$8 sm:$0x3] }
  0x44   : > { %951 = vrot.lane.b32.xlu2 %v950_v22, %s8237_s6  ;;  %v1178_v54 = vld [vmem:[%s8441_s5] sm:$0xf]  ;;  %v1230_v56 = vperm.slane %v1227_v53, 1  ;;  %v8284_v57 = vmov 8   ;;  %v1229_v58 = vperm.slane %v1227_v53, 0  ;;  %v8283_v0 = vmov 9  }
  0x45   : > { %857 = vrot.lane.b32.xlu1 %v856_v16, %s8238_s1  ;;  %v1138_v49 = vsel %vm828_vm0, %v1135_v44, %v1137_v45  ;;  %v1184_v52 = vrot.slane %v1183_v50, 4  ;;  %v1274_v60 = vld [vmem:[#allocation9 + $0x12] ss:$8 sm:$0x3]  ;;  %v1225_v62 = vld [vmem:[%s8441_s5] sm:$0xf] }
  0x46   : > { %915 = vperm.xlu0 %5375, %v896_v17   ;;  %5408 = vset.pattern.permute.xlu1 %v5729_v21  ;;  %v1231_v59 = vrot.slane %v1230_v56, 4  ;;  %v1277_v63 = vperm.slane %v1274_v60, 1  ;;  %v1276_v2 = vperm.slane %v1274_v60, 0  ;;  %v1321_v5 = vld [vmem:[#allocation9 + $0x13] ss:$8 sm:$0x3] }
  0x47   : > { %v1185_v55 = vsel %vm828_vm0, %v1182_v51, %v1184_v52  ;;  %v1324_v7 = vperm.slane %v1321_v5, 1  ;;  %v1272_v8 = vld [vmem:[%s8441_s5] sm:$0xf]  ;;  %v8292_v9 = vmov 10   ;;  %v1323_v10 = vperm.slane %v1321_v5, 0  ;;  %s8226_s30 = smov 20  }
  0x48   : > { %v1232_v61 = vsel %vm828_vm0, %v1229_v58, %v1231_v59  ;;  %v1278_v3 = vrot.slane %v1277_v63, 4  ;;  %v1368_v12 = vld [vmem:[#allocation9 + $0x14] ss:$8 sm:$0x3]  ;;  %v8281_v16 = vmov 12   ;;  %vm805_vm1 = vcmask 830464  }
  0x49   : > { %v1325_v11 = vrot.slane %v1324_v7, 4  ;;  %v1371_v14 = vperm.slane %v1368_v12, 1  ;;  %v1366_v15 = vld [vmem:[%s8441_s5] sm:$0xf]  ;;  %v1370_v17 = vperm.slane %v1368_v12, 0  ;;  %v5746_v22 = vmov 0.0  }
  0x4a   : > { %v1279_v6 = vsel %vm828_vm0, %v1276_v2, %v1278_v3  ;;  %v1415_v19 = vld [vmem:[#allocation9 + $0x15] ss:$8 sm:$0x3]  ;;  %804 = vst [vmem:[#allocation2] sm:$0xff] %v5746_v22  ;;  %v8278_v26 = vmov 14   ;;  %s5749_s0 = smov 22  }
  0x4b   : > { %v1326_v13 = vsel %vm828_vm0, %v1323_v10, %v1325_v11  ;;  %v1372_v18 = vrot.slane %v1371_v14, 4  ;;  %806 = vst.msk [vmem:[#allocation2 + $0x8] sm:$0xf] %vm805_vm1, %v5746_v22  ;;  %v1460_v23 = vld [vmem:[%s8441_s5] sm:$0xf]  ;;  %v8275_v36 = vmov 15  }
  0x4c   : > { %998 = vrot.lane.b32.xlu2 %v997_v29, %s8230_s3  ;;  %3796 = vst [vmem:[#allocation4] sm:$0xff] %v5746_v22  ;;  %v1462_v28 = vld [vmem:[#allocation9 + $0x16] ss:$8 sm:$0x3]  ;;  %s8224_s29 = smov 32   ;;  %v8291_v45 = vmov 16  }
  0x4d   : > { %v1373_v20 = vsel %vm828_vm0, %v1370_v17, %v1372_v18  ;;  %4334 = vst [vmem:[#allocation6] sm:$0xff] %v5746_v22  ;;  %v1465_v30 = vperm.slane %v1462_v28, 1  ;;  %v1464_v32 = vperm.slane %v1462_v28, 0  ;;  %v1554_v43 = vld [vmem:[%s8441_s5] sm:$0xf]  ;;  %vm815_vm2 = vcmask 1043864  }
  0x4e   : > { %5376 = vset.pattern.permute.xlu0 %v8289_v27  ;;  %4337 = vst [vmem:[#allocation6 + $0x18] sm:$0xff] %v5746_v22  ;;  %v1556_v44 = vld [vmem:[#allocation9 + $0x20] ss:$8 sm:$0x3]  ;;  %vm8244_vm3 = vcmask 1047556   ;;  %vm8348_vm4 = vcmask 416768  }
  0x4f   : > { %962 = vperm.xlu0 %5376, %v943_v24   ;;  %v1417_v24 = vperm.slane %v1415_v19, 0  ;;  %v1466_v33 = vrot.slane %v1465_v30, 4  ;;  %v1603_v52 = vld [vmem:[#allocation9 + $0x21] ss:$8 sm:$0x3]  ;;  %vm819_vm5 = vcmask 412672   ;;  %vm817_vm6 = vmor %vm8244_vm3, %vm815_vm2 }
  0x50   : > { %v1601_v53 = vld [vmem:[%s8441_s5] sm:$0xf]  ;;  %v8288_v59 = vmov 17   ;;  %v1605_v2 = vperm.slane %v1603_v52, 0  ;;  %v8273_v17 = vmov 19   ;;  %vm8392_vm7 = vcmask 7168  }
  0x51   : > { %v1467_v37 = vsel %vm828_vm0, %v1464_v32, %v1466_v33  ;;  %v1695_v11 = vld [vmem:[%s8441_s5] sm:$0xf]  ;;  %v1697_v28 = vld [vmem:[#allocation9 + $0x23] ss:$8 sm:$0x3]  ;;  %vm8391_vm8 = vcmask 15360  }
  0x52   : > { %v1742_v30 = vld [vmem:[%s8441_s5] sm:$0xf]  ;;  %vm954_vm9 = vcmask 23552   ;;  %vm8386_vm10 = vcmask 31744   ;;  %vm1048_vm11 = vcmask 39936   ;;  %vm1095_vm12 = vcmask 48128  }
  0x53   : > { %vm8390_vm13 = vcmask 130048   ;;  %vm8387_vm14 = vcmask 277504   ;;  %vm8393_vm15 = vcmask 138240   ;;  %vm8389_vm1 = vcmask 146432   ;;  %s8245_s6 = smov 111   ;;  %s8259_s1 = smov 108  }
  0x54   : > { %1045 = vrot.lane.b32.xlu2 %v1044_v35, %s5733_s4  ;;  %v1509_v35 = vld [vmem:[#allocation9 + $0x17] ss:$8 sm:$0x3]  ;;  %s8262_s4 = smov 33   ;;  %4336 = vst.msk [vmem:[#allocation6 + $0x10] sm:$0xff] %vm8387_vm14, %v5746_v22  ;;  %vm1283_vm2 = vcmask 154624  }
  0x55   : > { %v1512_v38 = vperm.slane %v1509_v35, 1  ;;  %4339 = vst.msk [vmem:[#allocation6 + $0x28] sm:$0xff] %vm8387_vm14, %v5746_v22  ;;  %v5771_v22 = vmov 26   ;;  %vm8354_vm3 = vcmask 293888   ;;  %s8443_s10 = sld [smem:[#allocation163_spill]]  ;;  %s8250_s26 = smov 95  }
  0x56   : > { %s8293_s3 = smov 92   ;;  %s5832_s24 = smov 85  }
  0x57   : > { %5377 = vset.pattern.permute.xlu0 %v5729_v21  ;;  %v1418_v21 = vperm.slane %v1415_v19, 1  ;;  %v1513_v40 = vrot.slane %v1512_v38, 4  ;;  %s8619_s22 = smov 92   ;;  %s8624_s11 = smov 94  }
  0x58   : > { %1009 = vperm.xlu0 %5377, %v990_v31   ;;  %v1507_v31 = vld [vmem:[%s8441_s5] sm:$0xf]  ;;  %s8640_s20 = sld [smem:[#allocation154_spill]]  ;;  %s5838_s28 = smov 102  }
  0x59   : > { %v1419_v25 = vrot.slane %v1418_v21, 4  ;;  %s8646_s12 = sld [smem:[#allocation164_spill]] }
  0x5a   : > { %s8669_s9 = sld [smem:[#allocation162_spill]] }
  0x5b   : > { %v1420_v29 = vsel %vm828_vm0, %v1417_v24, %v1419_v25  ;;  %s8762_s13 = sld [smem:[#allocation165_spill]] }
  0x5c   : > { %1092 = vrot.lane.b32.xlu2 %v1091_v42, %s5735_s2  ;;  %s8229_s2 = smov 19   ;;  %s8792_s14 = sld [smem:[#allocation166_spill]] }
  0x5d   : > { %s8802_s15 = sld [smem:[#allocation167_spill]] }
  0x5e   : > { %s798_s23 = scalar_lea.vmem %s8640_s20, %s6069_s27  ;;  %s5836_s20 = smov 101  }
  0x60   : > { %5378 = vset.pattern.permute.xlu0 %v8295_v41 }
  0x61   : > { %1056 = vperm.xlu0 %5378, %v1037_v39   ;;  %v1511_v39 = vperm.slane %v1509_v35, 0  ;;  %v8272_v35 = vmov 20  }
  0x63   : > { %v1514_v46 = vsel %vm828_vm0, %v1511_v39, %v1513_v40  ;;  %v1699_v39 = vperm.slane %v1697_v28, 0 }
  0x64   : > { %1139 = vrot.lane.b32.xlu2 %v1138_v49, %s8252_s8  ;;  %v1558_v49 = vperm.slane %v1556_v44, 0 }
  0x69   : > { %5379 = vset.pattern.permute.xlu0 %v8287_v48 }
  0x6a   : > { %1150 = vperm.xlu0 %5379, %v1131_v47   ;;  %v1559_v47 = vperm.slane %v1556_v44, 1 }
  0x6c   : > { %1186 = vrot.lane.b32.xlu2 %v1185_v55, %s8254_s7  ;;  %v1560_v50 = vrot.slane %v1559_v47, 4 }
  0x6e   : > { %v1561_v60 = vsel %vm828_vm0, %v1558_v49, %v1560_v50 }
  0x72   : > { %5380 = vset.pattern.permute.xlu0 %v8284_v57  ;;  %v2259_v57 = vld [vmem:[#allocation9 + $0x37] ss:$8 sm:$0x3] }
  0x73   : > { %1197 = vperm.xlu0 %5380, %v1178_v54   ;;  %v823_v54 = vld [vmem:[#allocation9] ss:$8 sm:$0x3]  ;;  %v2262_v48 = vperm.slane %v2259_v57, 1 }
  0x74   : > { %1233 = vrot.lane.b32.xlu2 %v1232_v61, %s8220_s25  ;;  %s5747_s25 = smov 21   ;;  %v1606_v61 = vperm.slane %v1603_v52, 1  ;;  %v1789_v52 = vld [vmem:[%s8441_s5] sm:$0xf] }
  0x76   : > { %v1607_v3 = vrot.slane %v1606_v61, 4 }
  0x7b   : > { %5381 = vset.pattern.permute.xlu0 %v8283_v0 }
  0x7c   : > { %1244 = vperm.xlu0 %5381, %v1225_v62   ;;  %1280 = vrot.lane.b32.xlu2 %v1279_v6, %s8229_s2  ;;  %v826_v62 = vperm.slane %v823_v54, 1  ;;  %v825_v6 = vperm.slane %v823_v54, 0  ;;  %s5761_s2 = smov 37  }
  0x7e   : > { %v827_v7 = vrot.slane %v826_v62, 4 }
  0x84   : > { %5382 = vset.pattern.permute.xlu0 %v8292_v9  ;;  %1327 = vrot.lane.b32.xlu2 %v1326_v13, %s8226_s30  ;;  %v1608_v13 = vsel %vm828_vm0, %v1605_v2, %v1607_v3  ;;  %s8227_s30 = smov 35   ;;  %v2263_v9 = vrot.slane %v2262_v48, 4 }
  0x85   : > { %1291 = vperm.xlu0 %5382, %v1272_v8   ;;  %v1650_v8 = vld [vmem:[#allocation9 + $0x22] ss:$8 sm:$0x3] }
  0x86   : > { %v1653_v14 = vperm.slane %v1650_v8, 1 }
  0x88   : > { %v1654_v24 = vrot.slane %v1653_v14, 4 }
  0x8c   : > { %1374 = vrot.lane.b32.xlu2 %v1373_v20, %s5747_s25  ;;  %s8256_s25 = smov 110  }
  0x8d   : > { %5383 = vset.pattern.permute.xlu0 %v8281_v16 }
  0x8e   : > { %1385 = vperm.xlu0 %5383, %v1366_v15   ;;  %v829_v15 = vsel %vm828_vm0, %v825_v6, %v827_v7  ;;  %v1836_v6 = vld [vmem:[%s8441_s5] sm:$0xf] }
  0x94   : > { %1421 = vrot.lane.b32.xlu2 %v1420_v29, %s5749_s0  ;;  %s8240_s0 = smov 34  }
  0x96   : > { %5384 = vset.pattern.permute.xlu0 %v8278_v26  ;;  %v6150_v34 = vpop.permute.xlu2 %904 }
  0x97   : > { %1479 = vperm.xlu0 %5384, %v1460_v23   ;;  %v1652_v23 = vperm.slane %v1650_v8, 0 }
  0x99   : > { %v1655_v29 = vsel %vm828_vm0, %v1652_v23, %v1654_v24  ;;  %v1883_v23 = vld [vmem:[%s8441_s5] sm:$0xf] }
  0x9c   : > { %1468 = vrot.lane.b32.xlu2 %v1467_v37, %s8224_s29  ;;  %v906_v37 = vrot.slane %v6150_v34, 4  ;;  %s8234_s29 = smov 127  }
  0x9e   : > { %v6155_v42 = vpop.permute.xlu2 %951  ;;  %v908_v54 = vsel %vm8391_vm8, %v906_v37, %v6150_v34 }
  0x9f   : > { %5385 = vset.pattern.permute.xlu0 %v8275_v36 }
  0xa0   : > { %1526 = vperm.xlu0 %5385, %v1507_v31   ;;  %v1700_v31 = vperm.slane %v1697_v28, 1 }
  0xa2   : > { %v1701_v40 = vrot.slane %v1700_v31, 4 }
  0xa4   : > { %1515 = vrot.lane.b32.xlu2 %v1514_v46, %s8262_s4  ;;  %v1702_v50 = vsel %vm828_vm0, %v1699_v39, %v1701_v40  ;;  %v1930_v40 = vld [vmem:[%s8441_s5] sm:$0xf] }
  0xa6   : > { %v6163_v51 = vpop.permute.xlu2 %998 }
  0xa7   : > { %v1000_v8 = vrot.slane %v6163_v51, 4 }
  0xa8   : > { %5386 = vset.pattern.permute.xlu0 %v8291_v45  ;;  %v2261_v45 = vperm.slane %v2259_v57, 0 }
  0xa9   : > { %1573 = vperm.xlu0 %5386, %v1554_v43  }
  0xac   : > { %1562 = vrot.lane.b32.xlu2 %v1561_v60, %s8240_s0  ;;  %s5786_s0 = smov 106  }
  0xae   : > { %v6175_v5 = vpop.permute.xlu2 %1045 }
  0xaf   : > { %v6168_v55 = vpop.permute.xlu1 %868 }
  0xb0   : > { %v809_v56 = vpop.permute.xlu0 %808 }
  0xb1   : > { %v810_v58 = vrot.slane %v809_v56, 4  ;;  %5387 = vset.pattern.permute.xlu0 %v8288_v59 }
  0xb2   : > { %1620 = vperm.xlu0 %5387, %v1601_v53  }
  0xb3   : > { %v812_v63 = vsel %vm8348_vm4, %v810_v58, %v809_v56  ;;  %820 = vst.msk [vmem:[#allocation2 + $0x8] sm:$0xf] %vm819_vm5, %v810_v58  ;;  %v953_v56 = vrot.slane %v6155_v42, 4  ;;  %v8271_v58 = vmov 21   ;;  %vm1330_vm5 = vcmask 162816  }
  0xb4   : > { %818 = vst.msk [vmem:[#allocation2] sm:$0xff] %vm817_vm6, %v812_v63  ;;  %1609 = vrot.lane.b32.xlu2 %v1608_v13, %s8227_s30  ;;  %s8228_s30 = smov 36   ;;  %vm1377_vm6 = vcmask 171008  }
  0xb5   : > { %v955_v7 = vsel %vm954_vm9, %v953_v56, %v6155_v42 }
  0xb6   : > { %v6187_v25 = vpop.permute.xlu2 %1092 }
  0xb7   : > { %v858_v10 = vpop.permute.xlu1 %857 }
  0xb8   : > { %v859_v12 = vrot.slane %v858_v10, 4 }
  0xba   : > { %5388 = vset.pattern.permute.xlu0 %v8273_v17  ;;  %v848_v19 = vld [vmem:[#allocation2 + $0x8] sm:$0xf]  ;;  %v861_v32 = vsel %vm8392_vm7, %v859_v12, %v858_v10 }
  0xbb   : > { %v6183_v18 = vld [vmem:[#allocation2] sm:$0xff]  ;;  %1714 = vperm.xlu0 %5388, %v1695_v11   ;;  %v865_v21 = vmul.f32 %v859_v12, %v848_v19  ;;  %v895_v33 = vld [vmem:[#allocation2 + $0x8] sm:$0xf]  ;;  %v8270_v11 = vmov 22  }
  0xbc   : > { %v831_v20 = vmul.f32 %v6183_v18, %v829_v15  ;;  %1656 = vrot.lane.b32.xlu2 %v1655_v29, %s8228_s30  ;;  %v864_v38 = vmul.f32 %v6183_v18, %v861_v32  ;;  %v912_v43 = vmul.f32 %v906_v37, %v895_v33  ;;  %v942_v53 = vld [vmem:[#allocation2 + $0x8] sm:$0xf]  ;;  %v911_v60 = vmul.f32 %v908_v54, %v6183_v18  ;;  %s8231_s30 = smov 126   ;;  %v6697_v4 = vld [vmem:[#allocation2] sm:$0xff] }
  0xbd   : > { %875 = vst [vmem:[#allocation1 + $0x10] ss:$2 sm:$0xff] %v865_v21  ;;  %v959_v61 = vmul.f32 %v953_v56, %v942_v53  ;;  %v989_v34 = vld [vmem:[#allocation2 + $0x8] sm:$0xf]  ;;  %v958_v10 = vmul.f32 %v955_v7, %v6183_v18  ;;  %v1047_v21 = vrot.slane %v6175_v5, 4  ;;  %v8269_v32 = vmov 23  }
  0xbe   : > { %838 = vst [vmem:[#allocation1] ss:$2 sm:$0xff] %v831_v20  ;;  %v6202_v47 = vpop.permute.xlu2 %1139  ;;  %v1006_v12 = vmul.f32 %v1000_v8, %v989_v34  ;;  %v1036_v42 = vld [vmem:[#allocation2 + $0x8] sm:$0xf]  ;;  %v1002_v20 = vsel %vm8386_vm10, %v1000_v8, %v6163_v51  ;;  %v1094_v33 = vrot.slane %v6187_v25, 4  ;;  %v8282_v54 = vmov 24  }
  0xbf   : > { %v1005_v24 = vmul.f32 %v1002_v20, %v6183_v18  ;;  %v1053_v28 = vmul.f32 %v1047_v21, %v1036_v42  ;;  %v1083_v37 = vld [vmem:[#allocation2 + $0x8] sm:$0xf]  ;;  %v1141_v56 = vrot.slane %v6202_v47, 4 }
  0xc0   : > { %v2256_v41 = vld [vmem:[#allocation2 + $0x8] sm:$0xf] }
  0xc1   : > { %v1143_v8 = vsel %vm8390_vm13, %v1141_v56, %v6202_v47 }
  0xc3   : > { %5389 = vset.pattern.permute.xlu0 %v8272_v35 }
  0xc4   : > { %1761 = vperm.xlu0 %5389, %v1742_v30   ;;  %v878_v49 = vld.sshfl [vmem:[#allocation1 + $0x10] sm:$0xff pattern:$0x75316420]  ;;  %1703 = vrot.lane.b32.xlu2 %v1702_v50, %s5761_s2  ;;  %s8233_s2 = smov 125   ;;  %v1100_v50 = vmul.f32 %v1094_v33, %v1083_v37 }
  0xc5   : > { %v6198_v44 = vld.sshfl [vmem:[#allocation1] sm:$0xff pattern:$0x75316420]  ;;  %v6200_v46 = vld.sshfl [vmem:[#allocation1 + $0x8] sm:$0xff pattern:$0x75316420]  ;;  %883 = vrot.lane.b32.xlu1 %v878_v49, %s8234_s29 }
  0xc6   : > { %873 = vst [vmem:[#allocation1] ss:$2 sm:$0xff] %v864_v38  ;;  %v6214_v2 = vpop.permute.xlu2 %1186  ;;  %v1049_v38 = vsel %vm1048_vm11, %v1047_v21, %v6175_v5  ;;  %v1096_v5 = vsel %vm1095_vm12, %v1094_v33, %v6187_v25  ;;  %v5769_v25 = vmov 25   ;;  %vm1424_vm11 = vcmask 179200  }
  0xc7   : > { %922 = vst [vmem:[#allocation1 + $0x10] ss:$2 sm:$0xff] %v912_v43  ;;  %v1052_v39 = vmul.f32 %v1049_v38, %v6183_v18  ;;  %vm8249_vm12 = vcmask 261120  }
  0xcc   : > { %5390 = vset.pattern.permute.xlu0 %v8271_v58 }
  0xcd   : > { %1808 = vperm.xlu0 %5390, %v1789_v52   ;;  %v876_v62 = vld.sshfl [vmem:[#allocation1] sm:$0xff pattern:$0x75316420]  ;;  %v877_v63 = vld.sshfl [vmem:[#allocation1 + $0x8] sm:$0xff pattern:$0x75316420] }
  0xce   : > { %920 = vst [vmem:[#allocation1] ss:$2 sm:$0xff] %v911_v60  ;;  %v925_v3 = vld.sshfl [vmem:[#allocation1 + $0x10] sm:$0xff pattern:$0x75316420]  ;;  %879 = vrot.lane.b32.xlu2 %v876_v62, %s8234_s29  ;;  %v6226_v15 = vpop.permute.xlu2 %1233  ;;  %v1099_v60 = vmul.f32 %v1096_v5, %v6183_v18 }
  0xcf   : > { %969 = vst [vmem:[#allocation1 + $0x10] ss:$2 sm:$0xff] %v959_v61  ;;  %930 = vrot.lane.b32.xlu1 %v925_v3, %s8231_s30  ;;  %v1130_v61 = vld [vmem:[#allocation2 + $0x8] sm:$0xf]  ;;  %v1976_v62 = vld [vmem:[%s8441_s5] sm:$0xf] }
  0xd0   : > { %v1147_v34 = vmul.f32 %v1141_v56, %v1130_v61 }
  0xd5   : > { %5391 = vset.pattern.permute.xlu0 %v8270_v11  ;;  %v923_v13 = vld.sshfl [vmem:[#allocation1] sm:$0xff pattern:$0x75316420]  ;;  %v924_v14 = vld.sshfl [vmem:[#allocation1 + $0x8] sm:$0xff pattern:$0x75316420] }
  0xd6   : > { %1855 = vperm.xlu0 %5391, %v1836_v6   ;;  %967 = vst [vmem:[#allocation1] ss:$2 sm:$0xff] %v958_v10  ;;  %v972_v19 = vld.sshfl [vmem:[#allocation1 + $0x10] sm:$0xff pattern:$0x75316420]  ;;  %881 = vrot.lane.b32.xlu2 %v877_v63, %s8234_s29  ;;  %v6237_v31 = vpop.permute.xlu2 %1280  ;;  %v1188_v10 = vrot.slane %v6214_v2, 4 }
  0xd7   : > { %1016 = vst [vmem:[#allocation1 + $0x10] ss:$2 sm:$0xff] %v1006_v12  ;;  %977 = vrot.lane.b32.xlu1 %v972_v19, %s8233_s2  ;;  %v1146_v12 = vmul.f32 %v1143_v8, %v6183_v18  ;;  %s5773_s29 = smov 122   ;;  %v1318_v8 = vld [vmem:[#allocation2 + $0x8] sm:$0xf] }
  0xdd   : > { %v970_v29 = vld.sshfl [vmem:[#allocation1] sm:$0xff pattern:$0x75316420]  ;;  %v971_v30 = vld.sshfl [vmem:[#allocation1 + $0x8] sm:$0xff pattern:$0x75316420] }
  0xde   : > { %5392 = vset.pattern.permute.xlu0 %v8269_v32  ;;  %1014 = vst [vmem:[#allocation1] ss:$2 sm:$0xff] %v1005_v24  ;;  %v1019_v51 = vld.sshfl [vmem:[#allocation1 + $0x10] sm:$0xff pattern:$0x75316420]  ;;  %928 = vrot.lane.b32.xlu2 %v924_v14, %s8231_s30  ;;  %v6250_v52 = vpop.permute.xlu2 %1327  ;;  %v1235_v24 = vrot.slane %v6226_v15, 4 }
  0xdf   : > { %1902 = vperm.xlu0 %5392, %v1883_v23   ;;  %1063 = vst [vmem:[#allocation1 + $0x10] ss:$2 sm:$0xff] %v1053_v28  ;;  %926 = vrot.lane.b32.xlu1 %v923_v13, %s8231_s30  ;;  %s8236_s30 = smov 124   ;;  %v1177_v13 = vld [vmem:[#allocation2 + $0x8] sm:$0xf]  ;;  %v1190_v23 = vsel %vm8393_vm15, %v1188_v10, %v6214_v2 }
  0xe0   : > { %v2023_v14 = vld [vmem:[%s8441_s5] sm:$0xf]  ;;  %v1194_v42 = vmul.f32 %v1188_v10, %v1177_v13  ;;  %v1193_v28 = vmul.f32 %v1190_v23, %v6183_v18 }
  0xe1   : > { %v2070_v2 = vld [vmem:[%s8441_s5] sm:$0xf] }
  0xe5   : > { %v6248_v43 = vld.sshfl [vmem:[#allocation1] sm:$0xff pattern:$0x75316420]  ;;  %v1018_v49 = vld.sshfl [vmem:[#allocation1 + $0x8] sm:$0xff pattern:$0x75316420] }
  0xe6   : > { %1061 = vst [vmem:[#allocation1] ss:$2 sm:$0xff] %v1052_v39  ;;  %v1066_v53 = vld.sshfl [vmem:[#allocation1 + $0x10] sm:$0xff pattern:$0x75316420]  ;;  %975 = vrot.lane.b32.xlu2 %v971_v30, %s8233_s2  ;;  %v6263_v6 = vpop.permute.xlu2 %1374  ;;  %v1237_v39 = vsel %vm8389_vm1, %v1235_v24, %v6226_v15 }
  0xe7   : > { %5393 = vset.pattern.permute.xlu0 %v8282_v54  ;;  %1110 = vst [vmem:[#allocation1 + $0x10] ss:$2 sm:$0xff] %v1100_v50  ;;  %1024 = vrot.lane.b32.xlu1 %v1019_v51, %s8236_s30  ;;  %v1240_v50 = vmul.f32 %v1237_v39, %v6183_v18  ;;  %v2117_v15 = vld [vmem:[%s8441_s5] sm:$0xf] }
  0xe8   : > { %1948 = vperm.xlu0 %5393, %v1930_v40   ;;  %v1282_v40 = vrot.slane %v6237_v31, 4  ;;  %v2210_v39 = vld [vmem:[%s8441_s5] sm:$0xf] }
  0xed   : > { %v6261_v63 = vld.sshfl [vmem:[#allocation1] sm:$0xff pattern:$0x75316420]  ;;  %v1065_v3 = vld.sshfl [vmem:[#allocation1 + $0x8] sm:$0xff pattern:$0x75316420] }
  0xee   : > { %1108 = vst [vmem:[#allocation1] ss:$2 sm:$0xff] %v1099_v60  ;;  %v1113_v7 = vld.sshfl [vmem:[#allocation1 + $0x10] sm:$0xff pattern:$0x75316420]  ;;  %1022 = vrot.lane.b32.xlu2 %v1018_v49, %s8236_s30  ;;  %v6280_v20 = vpop.permute.xlu2 %1421  ;;  %v5772_v49 = vmov 27  }
  0xef   : > { %1157 = vst [vmem:[#allocation1 + $0x10] ss:$2 sm:$0xff] %v1147_v34  ;;  %973 = vrot.lane.b32.xlu1 %v970_v29, %s8233_s2  ;;  %s5770_s2 = smov 123   ;;  %v1224_v29 = vld [vmem:[#allocation2 + $0x8] sm:$0xf]  ;;  %v5774_v34 = vmov 28  }
  0xf0   : > { %5394 = vset.pattern.permute.xlu0 %v5769_v25  ;;  %v1241_v33 = vmul.f32 %v1235_v24, %v1224_v29  ;;  %v1365_v24 = vld [vmem:[#allocation2 + $0x8] sm:$0xf] }
  0xf1   : > { %1995 = vperm.xlu0 %5394, %v1976_v62   ;;  %v1284_v62 = vsel %vm1283_vm2, %v1282_v40, %v6237_v31 }
  0xf2   : > { %v1287_v25 = vmul.f32 %v1284_v62, %v6183_v18 }
  0xf5   : > { %v6278_v19 = vld.sshfl [vmem:[#allocation1] sm:$0xff pattern:$0x75316420]  ;;  %v1112_v47 = vld.sshfl [vmem:[#allocation1 + $0x8] sm:$0xff pattern:$0x75316420] }
  0xf6   : > { %1155 = vst [vmem:[#allocation1] ss:$2 sm:$0xff] %v1146_v12  ;;  %v6282_v21 = vld.sshfl [vmem:[#allocation1 + $0x10] sm:$0xff pattern:$0x75316420]  ;;  %1069 = vrot.lane.b32.xlu2 %v1065_v3, %s5770_s2  ;;  %v6292_v37 = vpop.permute.xlu2 %1468  ;;  %v1329_v3 = vrot.slane %v6250_v52, 4 }
  0xf7   : > { %1204 = vst [vmem:[#allocation1 + $0x10] ss:$2 sm:$0xff] %v1194_v42  ;;  %1071 = vrot.lane.b32.xlu1 %v1066_v53, %s5770_s2  ;;  %v1271_v53 = vld [vmem:[#allocation2 + $0x8] sm:$0xf]  ;;  %v2163_v42 = vld [vmem:[%s8441_s5] sm:$0xf] }
  0xf8   : > { %v1288_v56 = vmul.f32 %v1282_v40, %v1271_v53  ;;  %v1335_v12 = vmul.f32 %v1329_v3, %v1318_v8  ;;  %v1331_v31 = vsel %vm1330_vm5, %v1329_v3, %v6250_v52  ;;  %v1470_v62 = vrot.slane %v6292_v37, 4  ;;  %v2257_v3 = vld [vmem:[%s8441_s5] sm:$0xf] }
  0xf9   : > { %5395 = vset.pattern.permute.xlu0 %v5771_v22  ;;  %v5777_v22 = vmov 29   ;;  %v1334_v23 = vmul.f32 %v1331_v31, %v6183_v18 }
  0xfa   : > { %2042 = vperm.xlu0 %5395, %v2023_v14  }
  0xfd   : > { %v6290_v30 = vld.sshfl [vmem:[#allocation1] sm:$0xff pattern:$0x75316420]  ;;  %v1159_v51 = vld.sshfl [vmem:[#allocation1 + $0x8] sm:$0xff pattern:$0x75316420] }
  0xfe   : > { %1202 = vst [vmem:[#allocation1] ss:$2 sm:$0xff] %v1193_v28  ;;  %v6294_v38 = vld.sshfl [vmem:[#allocation1 + $0x10] sm:$0xff pattern:$0x75316420]  ;;  %1116 = vrot.lane.b32.xlu2 %v1112_v47, %s5773_s29  ;;  %v6308_v60 = vpop.permute.xlu2 %1515  ;;  %v1376_v47 = vrot.slane %v6263_v6, 4 }
  0xff   : > { %1251 = vst [vmem:[#allocation1 + $0x10] ss:$2 sm:$0xff] %v1241_v33  ;;  %1020 = vrot.lane.b32.xlu1 %v6248_v43, %s8236_s30  ;;  %s8242_s30 = smov 112  }
 0x100   : > { %v1382_v29 = vmul.f32 %v1376_v47, %v1365_v24  ;;  %v1378_v33 = vsel %vm1377_vm6, %v1376_v47, %v6263_v6  ;;  %v1472_v47 = vsel %vm8249_vm12, %v1470_v62, %v6292_v37  ;;  %v2304_v24 = vld [vmem:[%s8441_s5] sm:$0xf]  ;;  %vm8388_vm6 = vcmask 269312  }
 0x101   : > { %v1381_v40 = vmul.f32 %v1378_v33, %v6183_v18  ;;  %vm1706_vm12 = vcmask 302080  }
 0x102   : > { %5396 = vset.pattern.permute.xlu0 %v5772_v49  ;;  %v1412_v49 = vld [vmem:[#allocation2 + $0x8] sm:$0xf] }
 0x103   : > { %2089 = vperm.xlu0 %5396, %v2070_v2   ;;  %v1423_v2 = vrot.slane %v6280_v20, 4 }
 0x105   : > { %v6306_v5 = vld.sshfl [vmem:[#allocation1] sm:$0xff pattern:$0x75316420]  ;;  %v1206_v43 = vld.sshfl [vmem:[#allocation1 + $0x8] sm:$0xff pattern:$0x75316420] }
 0x106   : > { %1249 = vst [vmem:[#allocation1] ss:$2 sm:$0xff] %v1240_v50  ;;  %v6310_v61 = vld.sshfl [vmem:[#allocation1 + $0x10] sm:$0xff pattern:$0x75316420]  ;;  %1163 = vrot.lane.b32.xlu2 %v1159_v51, %s8242_s30  ;;  %v6323_v13 = vpop.permute.xlu2 %1562  ;;  %v5779_v50 = vmov 30  }
 0x107   : > { %1298 = vst [vmem:[#allocation1 + $0x10] ss:$2 sm:$0xff] %v1288_v56  ;;  %1118 = vrot.lane.b32.xlu1 %v1113_v7, %s5773_s29 }
 0x10b   : > { %5397 = vset.pattern.permute.xlu0 %v5774_v34 }
 0x10c   : > { %2136 = vperm.xlu0 %5397, %v2117_v15   ;;  %v1425_v15 = vsel %vm1424_vm11, %v1423_v2, %v6280_v20  ;;  %vm1612_vm11 = vcmask 285696  }
 0x10d   : > { %v6321_v10 = vld.sshfl [vmem:[#allocation1] sm:$0xff pattern:$0x75316420]  ;;  %v1253_v7 = vld.sshfl [vmem:[#allocation1 + $0x8] sm:$0xff pattern:$0x75316420]  ;;  %v1428_v34 = vmul.f32 %v1425_v15, %v6183_v18 }
 0x10e   : > { %1296 = vst [vmem:[#allocation1] ss:$2 sm:$0xff] %v1287_v25  ;;  %v6325_v14 = vld.sshfl [vmem:[#allocation1 + $0x10] sm:$0xff pattern:$0x75316420]  ;;  %1210 = vrot.lane.b32.xlu2 %v1206_v43, %s8245_s6  ;;  %v6339_v52 = vpop.permute.xlu2 %1609 }
 0x10f   : > { %1345 = vst [vmem:[#allocation1 + $0x10] ss:$2 sm:$0xff] %v1335_v12  ;;  %1067 = vrot.lane.b32.xlu1 %v6261_v63, %s5770_s2  ;;  %s8258_s2 = smov 109   ;;  %v1459_v25 = vld [vmem:[#allocation2 + $0x8] sm:$0xf] }
 0x110   : > { %v1476_v12 = vmul.f32 %v1470_v62, %v1459_v25  ;;  %v1611_v25 = vrot.slane %v6339_v52, 4 }
 0x114   : > { %5398 = vset.pattern.permute.xlu0 %v5777_v22  ;;  %v1475_v22 = vmul.f32 %v1472_v47, %v6183_v18 }
 0x115   : > { %2182 = vperm.xlu0 %5398, %v2163_v42   ;;  %v6337_v28 = vld.sshfl [vmem:[#allocation1] sm:$0xff pattern:$0x75316420]  ;;  %v1300_v63 = vld.sshfl [vmem:[#allocation1 + $0x8] sm:$0xff pattern:$0x75316420] }
 0x116   : > { %1343 = vst [vmem:[#allocation1] ss:$2 sm:$0xff] %v1334_v23  ;;  %v6341_v51 = vld.sshfl [vmem:[#allocation1 + $0x10] sm:$0xff pattern:$0x75316420]  ;;  %1257 = vrot.lane.b32.xlu2 %v1253_v7, %s8256_s25  ;;  %v6354_v56 = vpop.permute.xlu2 %1656  ;;  %v1517_v42 = vrot.slane %v6308_v60, 4 }
 0x117   : > { %1392 = vst [vmem:[#allocation1 + $0x10] ss:$2 sm:$0xff] %v1382_v29  ;;  %1165 = vrot.lane.b32.xlu1 %v6282_v21, %s8242_s30  ;;  %v1429_v21 = vmul.f32 %v1423_v2, %v1412_v49  ;;  %v1506_v23 = vld [vmem:[#allocation2 + $0x8] sm:$0xf]  ;;  %v5783_v2 = vmov 32  }
 0x118   : > { %v1523_v33 = vmul.f32 %v1517_v42, %v1506_v23 }
 0x11d   : > { %5399 = vset.pattern.permute.xlu0 %v5779_v50  ;;  %v6352_v53 = vld.sshfl [vmem:[#allocation1] sm:$0xff pattern:$0x75316420]  ;;  %v1347_v43 = vld.sshfl [vmem:[#allocation1 + $0x8] sm:$0xff pattern:$0x75316420] }
 0x11e   : > { %2229 = vperm.xlu0 %5399, %v2210_v39   ;;  %1390 = vst [vmem:[#allocation1] ss:$2 sm:$0xff] %v1381_v40  ;;  %v6356_v6 = vld.sshfl [vmem:[#allocation1 + $0x10] sm:$0xff pattern:$0x75316420]  ;;  %1304 = vrot.lane.b32.xlu2 %v1300_v63, %s8258_s2  ;;  %v6369_v31 = vpop.permute.xlu2 %1703  ;;  %v1519_v39 = vsel %vm8388_vm6, %v1517_v42, %v6308_v60  ;;  %v1564_v40 = vrot.slane %v6323_v13, 4 }
 0x11f   : > { %1439 = vst [vmem:[#allocation1 + $0x10] ss:$2 sm:$0xff] %v1429_v21  ;;  %1114 = vrot.lane.b32.xlu1 %v6278_v19, %s5773_s29  ;;  %v5781_v19 = vmov 31   ;;  %s5784_s29 = smov 107   ;;  %v1522_v49 = vmul.f32 %v1519_v39, %v6183_v18  ;;  %v1553_v50 = vld [vmem:[#allocation2 + $0x8] sm:$0xf] }
 0x120   : > { %v5785_v60 = vmov 33  }
 0x125   : > { %v6367_v8 = vld.sshfl [vmem:[#allocation1] sm:$0xff pattern:$0x75316420]  ;;  %v1394_v7 = vld.sshfl [vmem:[#allocation1 + $0x8] sm:$0xff pattern:$0x75316420] }
 0x126   : > { %5400 = vset.pattern.permute.xlu0 %v5781_v19  ;;  %1437 = vst [vmem:[#allocation1] ss:$2 sm:$0xff] %v1428_v34  ;;  %v6371_v20 = vld.sshfl [vmem:[#allocation1 + $0x10] sm:$0xff pattern:$0x75316420]  ;;  %1351 = vrot.lane.b32.xlu2 %v1347_v43, %s8259_s1  ;;  %v1566_v34 = vsel %vm8387_vm14, %v1564_v40, %v6323_v13  ;;  %v5787_v13 = vmov 34  }
 0x127   : > { %2276 = vperm.xlu0 %5400, %v2257_v3   ;;  %1486 = vst [vmem:[#allocation1 + $0x10] ss:$2 sm:$0xff] %v1476_v12  ;;  %1212 = vrot.lane.b32.xlu1 %v6294_v38, %s8245_s6  ;;  %v2351_v43 = vld [vmem:[%s8441_s5] sm:$0xf]  ;;  %v1600_v12 = vld [vmem:[#allocation2 + $0x8] sm:$0xf] }
 0x128   : > { %v6385_v38 = vpop.permute.xlu2 %879  ;;  %v2398_v19 = vld [vmem:[%s8441_s5] sm:$0xf]  ;;  %v1617_v47 = vmul.f32 %v1611_v25, %v1600_v12 }
 0x12d   : > { %v6383_v63 = vld.sshfl [vmem:[#allocation1] sm:$0xff pattern:$0x75316420]  ;;  %v1441_v29 = vld.sshfl [vmem:[#allocation1 + $0x8] sm:$0xff pattern:$0x75316420] }
 0x12e   : > { %1484 = vst [vmem:[#allocation1] ss:$2 sm:$0xff] %v1475_v22  ;;  %v6387_v37 = vld.sshfl [vmem:[#allocation1 + $0x10] sm:$0xff pattern:$0x75316420]  ;;  %1398 = vrot.lane.b32.xlu2 %v1394_v7, %s5784_s29  ;;  %v1569_v7 = vmul.f32 %v1566_v34, %v6183_v18 }
 0x12f   : > { %5401 = vset.pattern.permute.xlu0 %v5783_v2  ;;  %1533 = vst [vmem:[#allocation1 + $0x10] ss:$2 sm:$0xff] %v1523_v33  ;;  %1161 = vrot.lane.b32.xlu1 %v6290_v30, %s8242_s30  ;;  %v1570_v30 = vmul.f32 %v1564_v40, %v1553_v50  ;;  %s8317_s30 = smov 96   ;;  %v1647_v2 = vld [vmem:[#allocation2 + $0x8] sm:$0xf] }
 0x130   : > { %2323 = vperm.xlu0 %5401, %v2304_v24   ;;  %v6401_v62 = vpop.permute.xlu2 %881  ;;  %v1613_v24 = vsel %vm1612_vm11, %v1611_v25, %v6339_v52  ;;  %v6439_v52 = vld [vmem:[%s8443_s10] sm:$0x1] }
 0x131   : > { %v1616_v33 = vmul.f32 %v1613_v24, %v6183_v18 }
 0x135   : > { %v6399_v21 = vld.sshfl [vmem:[#allocation1] sm:$0xff pattern:$0x75316420]  ;;  %v1488_v15 = vld.sshfl [vmem:[#allocation1 + $0x8] sm:$0xff pattern:$0x75316420] }
 0x136   : > { %v6403_v3 = vld.sshfl [vmem:[#allocation1 + $0x10] sm:$0xff pattern:$0x75316420]  ;;  %1531 = vst [vmem:[#allocation1] ss:$2 sm:$0xff] %v1522_v49  ;;  %1445 = vrot.lane.b32.xlu2 %v1441_v29, %s5786_s0  ;;  %v1658_v29 = vrot.slane %v6354_v56, 4 }
 0x137   : > { %1580 = vst [vmem:[#allocation1 + $0x10] ss:$2 sm:$0xff] %v1570_v30  ;;  %1259 = vrot.lane.b32.xlu1 %v6310_v61, %s8256_s25 }
 0x138   : > { %5402 = vset.pattern.permute.xlu0 %v5785_v60  ;;  %v6415_v61 = vpop.permute.xlu2 %928  ;;  %v1664_v39 = vmul.f32 %v1658_v29, %v1647_v2 }
 0x139   : > { %2370 = vperm.xlu0 %5402, %v2351_v43   ;;  %v1660_v43 = vsel %vm8354_vm3, %v1658_v29, %v6354_v56 }
 0x13a   : > { %v1663_v30 = vmul.f32 %v1660_v43, %v6183_v18  ;;  %v2492_v43 = vld [vmem:[#allocation9 + $0x44] ss:$8 sm:$0x3] }
 0x13d   : > { %v1535_v42 = vld.sshfl [vmem:[#allocation1 + $0x8] sm:$0xff pattern:$0x75316420]  ;;  %v6417_v22 = vld.sshfl [vmem:[#allocation1] sm:$0xff pattern:$0x75316420] }
 0x13e   : > { %v6419_v23 = vld.sshfl [vmem:[#allocation1 + $0x10] sm:$0xff pattern:$0x75316420]  ;;  %1578 = vst [vmem:[#allocation1] ss:$2 sm:$0xff] %v1569_v7  ;;  %1492 = vrot.lane.b32.xlu2 %v1488_v15, %s8317_s30  ;;  %v1705_v15 = vrot.slane %v6369_v31, 4 }
 0x13f   : > { %1627 = vst [vmem:[#allocation1 + $0x10] ss:$2 sm:$0xff] %v1617_v47  ;;  %1208 = vrot.lane.b32.xlu1 %v6306_v5, %s8245_s6  ;;  %s8309_s6 = smov 93  }
 0x140   : > { %v6428_v40 = vpop.permute.xlu2 %975  ;;  %v1707_v56 = vsel %vm1706_vm12, %v1705_v15, %v6369_v31  ;;  %vm1753_vm12 = vcmask 310272  }
 0x141   : > { %5403 = vset.pattern.permute.xlu0 %v5787_v13  ;;  %v1710_v47 = vmul.f32 %v1707_v56, %v6183_v18  ;;  %v3266_v18 = vld [vmem:[#allocation12 + $0x6] ss:$8 sm:$0x3] }
 0x142   : > { %2417 = vperm.xlu0 %5403, %v2398_v19   ;;  %v5790_v19 = vmov 6  }
 0x145   : > { %v1582_v49 = vld.sshfl [vmem:[#allocation1 + $0x8] sm:$0xff pattern:$0x75316420]  ;;  %v6430_v50 = vld.sshfl [vmem:[#allocation1] sm:$0xff pattern:$0x75316420] }
 0x146   : > { %v6432_v5 = vld.sshfl [vmem:[#allocation1 + $0x10] sm:$0xff pattern:$0x75316420]  ;;  %1625 = vst [vmem:[#allocation1] ss:$2 sm:$0xff] %v1616_v33  ;;  %1539 = vrot.lane.b32.xlu2 %v1535_v42, %s8250_s26  ;;  %s8276_s26 = smov 94  }
 0x147   : > { %1674 = vst [vmem:[#allocation1 + $0x10] ss:$2 sm:$0xff] %v1664_v39  ;;  %1306 = vrot.lane.b32.xlu1 %v6325_v14, %s8258_s2  ;;  %v1694_v14 = vld [vmem:[#allocation2 + $0x8] sm:$0xf] }
 0x148   : > { %v1711_v60 = vmul.f32 %v1705_v15, %v1694_v14  ;;  %v6448_v34 = vpop.permute.xlu2 %1022  ;;  %v5796_v14 = vmov 11  }
 0x149   : > { %8444 = vst [vmem:[#allocation28_spill] sm:$0xff] %v6448_v34 }
 0x14a   : > { %5404 = vset.pattern.permute.xlu0 %v5724_v1  ;;  %v1084_v1 = vld [vmem:[%s8441_s5] sm:$0xf] }
 0x14b   : > { %3165 = vperm.xlu0 %5404, %v6439_v52  }
 0x14d   : > { %v1629_v25 = vld.sshfl [vmem:[#allocation1 + $0x8] sm:$0xff pattern:$0x75316420]  ;;  %v6450_v7 = vld.sshfl [vmem:[#allocation1] sm:$0xff pattern:$0x75316420] }
 0x14e   : > { %v6452_v12 = vld.sshfl [vmem:[#allocation1 + $0x10] sm:$0xff pattern:$0x75316420]  ;;  %1672 = vst [vmem:[#allocation1] ss:$2 sm:$0xff] %v1663_v30  ;;  %1586 = vrot.lane.b32.xlu2 %v1582_v49, %s8276_s26  ;;  %v2495_v30 = vperm.slane %v2492_v43, 1 }
 0x14f   : > { %1721 = vst [vmem:[#allocation1 + $0x10] ss:$2 sm:$0xff] %v1711_v60  ;;  %1255 = vrot.lane.b32.xlu1 %v6321_v10, %s8256_s25  ;;  %v3244_v10 = vld [vmem:[#allocation12 + $0x5] ss:$8 sm:$0x3]  ;;  %s5803_s25 = smov 90  }
 0x150   : > { %v6462_v42 = vpop.permute.xlu2 %1069 }
 0x151   : > { %8445 = vst [vmem:[#allocation29_spill] sm:$0xff] %v6462_v42 }
 0x153   : > { %5405 = vset.pattern.permute.xlu0 %v5790_v19  ;;  %v3376_v19 = vld [vmem:[#allocation12 + $0x13] ss:$8 sm:$0x3] }
 0x154   : > { %1103 = vperm.xlu0 %5405, %v1084_v1   ;;  %v2496_v1 = vrot.slane %v2495_v30, 4 }
 0x155   : > { %v1676_v13 = vld.sshfl [vmem:[#allocation1 + $0x8] sm:$0xff pattern:$0x75316420]  ;;  %v6464_v24 = vld.sshfl [vmem:[#allocation1] sm:$0xff pattern:$0x75316420] }
 0x156   : > { %1719 = vst [vmem:[#allocation1] ss:$2 sm:$0xff] %v1710_v47  ;;  %1633 = vrot.lane.b32.xlu2 %v1629_v25, %s8309_s6  ;;  %v2494_v25 = vperm.slane %v2492_v43, 0 }
 0x157   : > { %1353 = vrot.lane.b32.xlu1 %v6341_v51, %s8259_s1  ;;  %v1744_v51 = vld [vmem:[#allocation9 + $0x24] ss:$8 sm:$0x3] }
 0x158   : > { %v6470_v31 = vpop.permute.xlu2 %1116  ;;  %v1747_v33 = vperm.slane %v1744_v51, 1 }
 0x159   : > { %8446 = vst [vmem:[#allocation30_spill] sm:$0xff] %v6470_v31 }
 0x15a   : > { %v1748_v39 = vrot.slane %v1747_v33, 4 }
 0x15c   : > { %3246 = vrot.lane.b32.xlu0 %v3244_v10, %s8252_s8  ;;  %s5794_s8 = smov 91  }
 0x15d   : > { %v1723_v2 = vld.sshfl [vmem:[#allocation1 + $0x8] sm:$0xff pattern:$0x75316420] }
 0x15e   : > { %1680 = vrot.lane.b32.xlu2 %v1676_v13, %s8293_s3  ;;  %v1413_v13 = vld [vmem:[%s8441_s5] sm:$0xf] }
 0x15f   : > { %1302 = vrot.lane.b32.xlu1 %v6337_v28, %s8258_s2  ;;  %v1746_v28 = vperm.slane %v1744_v51, 0  ;;  %s5795_s2 = smov 38   ;;  %v5799_v51 = vmov 18  }
 0x160   : > { %v6476_v29 = vpop.permute.xlu2 %1163 }
 0x161   : > { %8447 = vst [vmem:[#allocation31_spill] sm:$0xff] %v6476_v29  ;;  %v1749_v15 = vsel %vm828_vm0, %v1746_v28, %v1748_v39 }
 0x164   : > { %3268 = vrot.lane.b32.xlu0 %v3266_v18, %s8254_s7  ;;  %s8459_s7 = smov 51  }
 0x166   : > { %1727 = vrot.lane.b32.xlu2 %v1723_v2, %s5794_s8 }
 0x167   : > { %1400 = vrot.lane.b32.xlu1 %v6356_v6, %s5784_s29  ;;  %v1319_v6 = vld [vmem:[%s8441_s5] sm:$0xf] }
 0x168   : > { %v6482_v49 = vpop.permute.xlu2 %1210 }
 0x169   : > { %8448 = vst [vmem:[#allocation32_spill] sm:$0xff] %v6482_v49 }
 0x16c   : > { %3275 = vperm.xlu0 %5405, %v6439_v52  }
 0x16e   : > { %1750 = vrot.lane.b32.xlu2 %v1749_v15, %s5795_s2  ;;  %s8454_s2 = smov 95   ;;  %v8285_v15 = vmov 0  }
 0x16f   : > { %1349 = vrot.lane.b32.xlu1 %v6352_v53, %s8259_s1  ;;  %v2497_v53 = vsel %vm828_vm0, %v2494_v25, %v2496_v1  ;;  %s5797_s1 = smov 81   ;;  %v6554_v25 = vld [vmem:[#allocation2] sm:$0xff] }
 0x170   : > { %v6490_v60 = vpop.permute.xlu2 %1257 }
 0x171   : > { %8449 = vst [vmem:[#allocation33_spill] sm:$0xff] %v6490_v60 }
 0x174   : > { %5410 = vset.pattern.permute.xlu0 %v5796_v14  ;;  %v1741_v14 = vld [vmem:[#allocation2 + $0x8] sm:$0xf] }
 0x175   : > { %1338 = vperm.xlu0 %5410, %v1319_v6  }
 0x177   : > { %1447 = vrot.lane.b32.xlu1 %v6371_v20, %s5786_s0 }
 0x178   : > { %v6495_v56 = vpop.permute.xlu2 %1304 }
 0x179   : > { %8450 = vst [vmem:[#allocation34_spill] sm:$0xff] %v6495_v56 }
 0x17d   : > { %2498 = vrot.lane.b32.xlu0 %v2497_v53, %s5797_s1  ;;  %s8358_s1 = smov 48  }
 0x17f   : > { %1396 = vrot.lane.b32.xlu1 %v6367_v8, %s5784_s29  ;;  %v5798_v8 = vmov 13   ;;  %s5802_s29 = smov 84  }
 0x180   : > { %v6500_v47 = vpop.permute.xlu2 %1351 }
 0x181   : > { %8451 = vst [vmem:[#allocation35_spill] sm:$0xff] %v6500_v47 }
 0x185   : > { %3378 = vrot.lane.b32.xlu0 %v3376_v19, %s8262_s4  ;;  %v1724_v19 = vld.sshfl [vmem:[#allocation1 + $0x10] sm:$0xff pattern:$0x75316420]  ;;  %s8266_s4 = smov 77  }
 0x187   : > { %1494 = vrot.lane.b32.xlu1 %v6387_v37, %s8317_s30 }
 0x188   : > { %v6505_v20 = vpop.permute.xlu2 %1398 }
 0x189   : > { %8452 = vst [vmem:[#allocation36_spill] sm:$0xff] %v6505_v20 }
 0x18d   : > { %3385 = vperm.xlu0 %5410, %v6439_v52  }
 0x18f   : > { %1443 = vrot.lane.b32.xlu1 %v6383_v63, %s5786_s0  ;;  %v1648_v63 = vld [vmem:[%s8441_s5] sm:$0xf]  ;;  %s5800_s0 = smov 50  }
 0x190   : > { %v6512_v10 = vpop.permute.xlu2 %1445 }
 0x191   : > { %8453 = vst [vmem:[#allocation37_spill] sm:$0xff] %v6512_v10 }
 0x195   : > { %5415 = vset.pattern.permute.xlu0 %v5798_v8  ;;  %v1791_v8 = vld [vmem:[#allocation9 + $0x25] ss:$8 sm:$0x3] }
 0x196   : > { %1432 = vperm.xlu0 %5415, %v1413_v13   ;;  %v1722_v13 = vld.sshfl [vmem:[#allocation1] sm:$0xff pattern:$0x75316420] }
 0x197   : > { %1541 = vrot.lane.b32.xlu1 %v6403_v3, %s8454_s2  ;;  %v3508_v3 = vld [vmem:[#allocation12 + $0x21] ss:$8 sm:$0x3] }
 0x198   : > { %v6516_v37 = vpop.permute.xlu2 %1492 }
 0x199   : > { %8455 = vst [vmem:[#allocation38_spill] sm:$0xff] %v6516_v37 }
 0x19e   : > { %3429 = vperm.xlu0 %5415, %v6439_v52  }
 0x19f   : > { %1490 = vrot.lane.b32.xlu1 %v6399_v21, %s8317_s30  ;;  %v3530_v21 = vld [vmem:[#allocation12 + $0x22] ss:$8 sm:$0x3]  ;;  %s5825_s30 = smov 69  }
 0x1a0   : > { %v6524_v18 = vpop.permute.xlu2 %1539 }
 0x1a1   : > { %8456 = vst [vmem:[#allocation39_spill] sm:$0xff] %v6524_v18 }
 0x1a6   : > { %5417 = vset.pattern.permute.xlu0 %v5799_v51 }
 0x1a7   : > { %1667 = vperm.xlu0 %5417, %v1648_v63   ;;  %1588 = vrot.lane.b32.xlu1 %v6419_v23, %s8276_s26  ;;  %v2633_v23 = vld [vmem:[#allocation9 + $0x47] ss:$8 sm:$0x3]  ;;  %v1794_v63 = vperm.slane %v1791_v8, 1 }
 0x1a8   : > { %v6528_v33 = vpop.permute.xlu2 %1586  ;;  %v2636_v39 = vperm.slane %v2633_v23, 1 }
 0x1a9   : > { %8457 = vst [vmem:[#allocation40_spill] sm:$0xff] %v6528_v33 }
 0x1af   : > { %3510 = vrot.lane.b32.xlu0 %v3508_v3, %s5800_s0  ;;  %1537 = vrot.lane.b32.xlu1 %v6417_v22, %s8454_s2  ;;  %v822_v22 = vld [vmem:[%s8441_s5] sm:$0xf]  ;;  %v1795_v3 = vrot.slane %v1794_v63, 4 }
 0x1b0   : > { %v6533_v2 = vpop.permute.xlu2 %1633 }
 0x1b1   : > { %8458 = vst [vmem:[#allocation41_spill] sm:$0xff] %v6533_v2 }
 0x1b7   : > { %3532 = vrot.lane.b32.xlu0 %v3530_v21, %s8459_s7  ;;  %1635 = vrot.lane.b32.xlu1 %v6432_v5, %s8309_s6  ;;  %v2635_v5 = vperm.slane %v2633_v23, 0 }
 0x1b8   : > { %v6538_v28 = vpop.permute.xlu2 %1680 }
 0x1b9   : > { %8460 = vst [vmem:[#allocation42_spill] sm:$0xff] %v6538_v28 }
 0x1bf   : > { %3539 = vperm.xlu0 %5417, %v6439_v52   ;;  %1584 = vrot.lane.b32.xlu1 %v6430_v50, %s8276_s26  ;;  %v2637_v52 = vrot.slane %v2636_v39, 4  ;;  %s8290_s26 = smov 63  }
 0x1c0   : > { %v6546_v43 = vpop.permute.xlu2 %1727 }
 0x1c1   : > { %8461 = vst [vmem:[#allocation43_spill] sm:$0xff] %v6546_v43  ;;  %v2638_v6 = vsel %vm828_vm0, %v2635_v5, %v2637_v52  ;;  %v1788_v52 = vld [vmem:[#allocation2 + $0x8] sm:$0xf] }
 0x1c7   : > { %5422 = vset.pattern.permute.xlu0 %v8285_v15  ;;  %1682 = vrot.lane.b32.xlu1 %v6452_v12, %s8293_s3 }
 0x1c8   : > { %834 = vperm.xlu0 %5422, %v822_v22   ;;  %v1751_v50 = vpop.permute.xlu2 %1750 }
 0x1c9   : > { %v1752_v30 = vrot.slane %v1751_v50, 4 }
 0x1cb   : > { %v1754_v1 = vsel %vm1753_vm12, %v1752_v30, %v1751_v50  ;;  %v1758_v53 = vmul.f32 %v1752_v30, %v1741_v14  ;;  %vm8260_vm12 = vcmask 392192   ;;  %v1838_v14 = vld [vmem:[#allocation9 + $0x26] ss:$8 sm:$0x3] }
 0x1cc   : > { %v1757_v12 = vmul.f32 %v1754_v1, %v6554_v25  ;;  %v1841_v1 = vperm.slane %v1838_v14, 1 }
 0x1cd   : > { %1768 = vst [vmem:[#allocation1 + $0x10] ss:$2 sm:$0xff] %v1758_v53 }
 0x1ce   : > { %1766 = vst [vmem:[#allocation1] ss:$2 sm:$0xff] %v1757_v12  ;;  %v1840_v12 = vperm.slane %v1838_v14, 0 }
 0x1cf   : > { %1631 = vrot.lane.b32.xlu1 %v6450_v7, %s8309_s6  ;;  %v1793_v7 = vperm.slane %v1791_v8, 0  ;;  %s8331_s6 = smov 68  }
 0x1d0   : > { %2639 = vrot.lane.b32.xlu0 %v2638_v6, %s5802_s29  ;;  %s8338_s29 = smov 49  }
 0x1d1   : > { %v1796_v21 = vsel %vm828_vm0, %v1793_v7, %v1795_v3 }
 0x1d4   : > { %v1771_v22 = vld.sshfl [vmem:[#allocation1 + $0x10] sm:$0xff pattern:$0x75316420] }
 0x1d5   : > { %v1770_v51 = vld.sshfl [vmem:[#allocation1 + $0x8] sm:$0xff pattern:$0x75316420]  ;;  %v1769_v23 = vld.sshfl [vmem:[#allocation1] sm:$0xff pattern:$0x75316420] }
 0x1d6   : > { %1774 = vrot.lane.b32.xlu2 %v1770_v51, %s5803_s25 }
 0x1d7   : > { %1678 = vrot.lane.b32.xlu1 %v6464_v24, %s8293_s3  ;;  %s5821_s3 = smov 67  }
 0x1de   : > { %1797 = vrot.lane.b32.xlu2 %v1796_v21, %s8358_s1  ;;  %v1835_v21 = vld [vmem:[#allocation2 + $0x8] sm:$0xf] }
 0x1df   : > { %1725 = vrot.lane.b32.xlu1 %v1722_v13, %s5794_s8  ;;  %v1842_v13 = vrot.slane %v1841_v1, 4 }
 0x1e1   : > { %v1843_v8 = vsel %vm828_vm0, %v1840_v12, %v1842_v13 }
 0x1e7   : > { %1729 = vrot.lane.b32.xlu1 %v1724_v19, %s5794_s8  ;;  %s8336_s8 = smov 80  }
 0x1ef   : > { %1772 = vrot.lane.b32.xlu1 %v1769_v23, %s5803_s25 }
 0x1f7   : > { %1776 = vrot.lane.b32.xlu1 %v1771_v22, %s5803_s25  ;;  %s8279_s25 = smov 79  }
 0x230   : > { %v6563_v24 = vpop.permute.xlu2 %1774 }
 0x231   : > { %8462 = vst [vmem:[#allocation44_spill] sm:$0xff] %v6563_v24 }
 0x238   : > { %v1798_v39 = vpop.permute.xlu2 %1797 }
 0x239   : > { %v1799_v5 = vrot.slane %v1798_v39, 4 }
 0x23b   : > { %v1801_v6 = vsel %vm8260_vm12, %v1799_v5, %v1798_v39  ;;  %v1805_v50 = vmul.f32 %v1799_v5, %v1788_v52  ;;  %vm8261_vm12 = vcmask 400384   ;;  %v1885_v5 = vld [vmem:[#allocation9 + $0x27] ss:$8 sm:$0x3] }
 0x23c   : > { %v1804_v30 = vmul.f32 %v1801_v6, %v6554_v25  ;;  %v1888_v52 = vperm.slane %v1885_v5, 1 }
 0x23d   : > { %1815 = vst [vmem:[#allocation1 + $0x10] ss:$2 sm:$0xff] %v1805_v50 }
 0x23e   : > { %1813 = vst [vmem:[#allocation1] ss:$2 sm:$0xff] %v1804_v30  ;;  %v1887_v30 = vperm.slane %v1885_v5, 0  ;;  %v1889_v14 = vrot.slane %v1888_v52, 4 }
 0x240   : > { %v1890_v1 = vsel %vm828_vm0, %v1887_v30, %v1889_v14 }
 0x244   : > { %v1818_v63 = vld.sshfl [vmem:[#allocation1 + $0x10] sm:$0xff pattern:$0x75316420] }
 0x245   : > { %v1817_v53 = vld.sshfl [vmem:[#allocation1 + $0x8] sm:$0xff pattern:$0x75316420]  ;;  %v1816_v19 = vld.sshfl [vmem:[#allocation1] sm:$0xff pattern:$0x75316420] }
 0x246   : > { %1821 = vrot.lane.b32.xlu2 %v1817_v53, %s8336_s8  ;;  %1819 = vrot.lane.b32.xlu1 %v1816_v19, %s8336_s8 }
 0x24e   : > { %1844 = vrot.lane.b32.xlu2 %v1843_v8, %s8338_s29  ;;  %1823 = vrot.lane.b32.xlu1 %v1818_v63, %s8336_s8  ;;  %v1882_v8 = vld [vmem:[#allocation2 + $0x8] sm:$0xf]  ;;  %s8540_s8 = smov 34   ;;  %s8543_s29 = smov 1  }
 0x2a0   : > { %v6572_v51 = vpop.permute.xlu2 %1821 }
 0x2a1   : > { %8463 = vst [vmem:[#allocation45_spill] sm:$0xff] %v6572_v51 }
 0x2a8   : > { %v1845_v7 = vpop.permute.xlu2 %1844 }
 0x2a9   : > { %v1846_v3 = vrot.slane %v1845_v7, 4 }
 0x2ab   : > { %v1848_v23 = vsel %vm8261_vm12, %v1846_v3, %v1845_v7  ;;  %v1852_v22 = vmul.f32 %v1846_v3, %v1835_v21  ;;  %vm8264_vm12 = vcmask 408576   ;;  %v1932_v21 = vld [vmem:[#allocation9 + $0x30] ss:$8 sm:$0x3] }
 0x2ac   : > { %v1851_v39 = vmul.f32 %v1848_v23, %v6554_v25  ;;  %v1935_v23 = vperm.slane %v1932_v21, 1  ;;  %v1934_v5 = vperm.slane %v1932_v21, 0 }
 0x2ad   : > { %1862 = vst [vmem:[#allocation1 + $0x10] ss:$2 sm:$0xff] %v1852_v22 }
 0x2ae   : > { %1860 = vst [vmem:[#allocation1] ss:$2 sm:$0xff] %v1851_v39  ;;  %v1936_v52 = vrot.slane %v1935_v23, 4 }
 0x2b4   : > { %v1865_v53 = vld.sshfl [vmem:[#allocation1 + $0x10] sm:$0xff pattern:$0x75316420] }
 0x2b5   : > { %v1864_v6 = vld.sshfl [vmem:[#allocation1 + $0x8] sm:$0xff pattern:$0x75316420]  ;;  %v1863_v50 = vld.sshfl [vmem:[#allocation1] sm:$0xff pattern:$0x75316420] }
 0x2b6   : > { %1868 = vrot.lane.b32.xlu2 %v1864_v6, %s8279_s25  ;;  %1866 = vrot.lane.b32.xlu1 %v1863_v50, %s8279_s25  ;;  %v1937_v6 = vsel %vm828_vm0, %v1934_v5, %v1936_v52 }
 0x2be   : > { %1891 = vrot.lane.b32.xlu2 %v1890_v1, %s5800_s0  ;;  %1870 = vrot.lane.b32.xlu1 %v1865_v53, %s8279_s25  ;;  %s8265_s0 = smov 78   ;;  %v1929_v53 = vld [vmem:[#allocation2 + $0x8] sm:$0xf]  ;;  %s8332_s25 = smov 66  }
 0x310   : > { %v6581_v19 = vpop.permute.xlu2 %1868 }
 0x311   : > { %8464 = vst [vmem:[#allocation46_spill] sm:$0xff] %v6581_v19 }
 0x318   : > { %v1892_v12 = vpop.permute.xlu2 %1891 }
 0x319   : > { %v1893_v13 = vrot.slane %v1892_v12, 4 }
 0x31b   : > { %v1895_v63 = vsel %vm8264_vm12, %v1893_v13, %v1892_v12  ;;  %v1899_v7 = vmul.f32 %v1893_v13, %v1882_v8  ;;  %vm8267_vm12 = vcmask 424960  }
 0x31c   : > { %v1898_v3 = vmul.f32 %v1895_v63, %v6554_v25  ;;  %v1978_v63 = vld [vmem:[#allocation9 + $0x31] ss:$8 sm:$0x3] }
 0x31d   : > { %1909 = vst [vmem:[#allocation1 + $0x10] ss:$2 sm:$0xff] %v1899_v7  ;;  %v1981_v7 = vperm.slane %v1978_v63, 1  ;;  %v1980_v23 = vperm.slane %v1978_v63, 0 }
 0x31e   : > { %1907 = vst [vmem:[#allocation1] ss:$2 sm:$0xff] %v1898_v3 }
 0x324   : > { %v1912_v50 = vld.sshfl [vmem:[#allocation1 + $0x10] sm:$0xff pattern:$0x75316420] }
 0x325   : > { %v1911_v22 = vld.sshfl [vmem:[#allocation1 + $0x8] sm:$0xff pattern:$0x75316420]  ;;  %v1910_v39 = vld.sshfl [vmem:[#allocation1] sm:$0xff pattern:$0x75316420] }
 0x326   : > { %1915 = vrot.lane.b32.xlu2 %v1911_v22, %s8265_s0  ;;  %1913 = vrot.lane.b32.xlu1 %v1910_v39, %s8265_s0  ;;  %v1982_v22 = vrot.slane %v1981_v7, 4 }
 0x328   : > { %v1983_v39 = vsel %vm828_vm0, %v1980_v23, %v1982_v22 }
 0x32e   : > { %1938 = vrot.lane.b32.xlu2 %v1937_v6, %s8459_s7  ;;  %1917 = vrot.lane.b32.xlu1 %v1912_v50, %s8265_s0  ;;  %s8330_s7 = smov 52   ;;  %s8268_s0 = smov 76  }
 0x380   : > { %v6590_v30 = vpop.permute.xlu2 %1915 }
 0x381   : > { %8465 = vst [vmem:[#allocation47_spill] sm:$0xff] %v6590_v30 }
 0x388   : > { %v1939_v14 = vpop.permute.xlu2 %1938 }
 0x389   : > { %v1940_v1 = vrot.slane %v1939_v14, 4 }
 0x38b   : > { %v1941_v12 = vsel %vm8348_vm4, %v1940_v1, %v1939_v14  ;;  %v1945_v13 = vmul.f32 %v1940_v1, %v1929_v53  ;;  %v1975_v14 = vld [vmem:[#allocation2 + $0x8] sm:$0xf] }
 0x38c   : > { %v1944_v8 = vmul.f32 %v1941_v12, %v6554_v25 }
 0x38d   : > { %1955 = vst [vmem:[#allocation1 + $0x10] ss:$2 sm:$0xff] %v1945_v13  ;;  %v2025_v13 = vld [vmem:[#allocation9 + $0x32] ss:$8 sm:$0x3] }
 0x38e   : > { %1953 = vst [vmem:[#allocation1] ss:$2 sm:$0xff] %v1944_v8  ;;  %v2028_v8 = vperm.slane %v2025_v13, 1 }
 0x394   : > { %v1958_v5 = vld.sshfl [vmem:[#allocation1 + $0x10] sm:$0xff pattern:$0x75316420] }
 0x395   : > { %v1957_v3 = vld.sshfl [vmem:[#allocation1 + $0x8] sm:$0xff pattern:$0x75316420]  ;;  %v1956_v21 = vld.sshfl [vmem:[#allocation1] sm:$0xff pattern:$0x75316420] }
 0x396   : > { %1961 = vrot.lane.b32.xlu2 %v1957_v3, %s8266_s4  ;;  %1959 = vrot.lane.b32.xlu1 %v1956_v21, %s8266_s4  ;;  %v2027_v3 = vperm.slane %v2025_v13, 0  ;;  %v2029_v21 = vrot.slane %v2028_v8, 4  ;;  %v6610_v8 = vpop.permute.xlu1 %883 }
 0x398   : > { %v2030_v23 = vsel %vm828_vm0, %v2027_v3, %v2029_v21 }
 0x39e   : > { %1984 = vrot.lane.b32.xlu2 %v1983_v39, %s8330_s7  ;;  %1963 = vrot.lane.b32.xlu1 %v1958_v5, %s8266_s4  ;;  %s5812_s4 = smov 53   ;;  %s5827_s7 = smov 70  }
 0x3f0   : > { %v6599_v52 = vpop.permute.xlu2 %1961 }
 0x3f1   : > { %8466 = vst [vmem:[#allocation48_spill] sm:$0xff] %v6599_v52 }
 0x3f8   : > { %v1985_v6 = vpop.permute.xlu2 %1984 }
 0x3f9   : > { %v1986_v50 = vrot.slane %v1985_v6, 4 }
 0x3fb   : > { %v1988_v1 = vsel %vm8267_vm12, %v1986_v50, %v1985_v6  ;;  %v1992_v53 = vmul.f32 %v1986_v50, %v1975_v14  ;;  %vm2034_vm12 = vcmask 433152   ;;  %v2022_v50 = vld [vmem:[#allocation2 + $0x8] sm:$0xf] }
 0x3fc   : > { %v1991_v12 = vmul.f32 %v1988_v1, %v6554_v25 }
 0x3fd   : > { %2002 = vst [vmem:[#allocation1 + $0x10] ss:$2 sm:$0xff] %v1992_v53 }
 0x3fe   : > { %2000 = vst [vmem:[#allocation1] ss:$2 sm:$0xff] %v1991_v12  ;;  %v2072_v12 = vld [vmem:[#allocation9 + $0x33] ss:$8 sm:$0x3] }
 0x3ff   : > { %v2075_v13 = vperm.slane %v2072_v12, 1  ;;  %v2074_v3 = vperm.slane %v2072_v12, 0  ;;  %v2119_v12 = vld [vmem:[#allocation9 + $0x34] ss:$8 sm:$0x3] }
 0x401   : > { %v2076_v21 = vrot.slane %v2075_v13, 4  ;;  %v2122_v13 = vperm.slane %v2119_v12, 1 }
 0x404   : > { %v2005_v22 = vld.sshfl [vmem:[#allocation1 + $0x10] sm:$0xff pattern:$0x75316420] }
 0x405   : > { %v2004_v63 = vld.sshfl [vmem:[#allocation1 + $0x8] sm:$0xff pattern:$0x75316420]  ;;  %v2003_v7 = vld.sshfl [vmem:[#allocation1] sm:$0xff pattern:$0x75316420] }
 0x406   : > { %2008 = vrot.lane.b32.xlu2 %v2004_v63, %s8268_s0  ;;  %2006 = vrot.lane.b32.xlu1 %v2003_v7, %s8268_s0 }
 0x40e   : > { %2031 = vrot.lane.b32.xlu2 %v2030_v23, %s5812_s4  ;;  %2010 = vrot.lane.b32.xlu1 %v2005_v22, %s8268_s0  ;;  %s5813_s4 = smov 75   ;;  %v2077_v23 = vsel %vm828_vm0, %v2074_v3, %v2076_v21  ;;  %s5814_s0 = smov 54  }
 0x460   : > { %v6607_v39 = vpop.permute.xlu2 %2008 }
 0x461   : > { %8467 = vst [vmem:[#allocation49_spill] sm:$0xff] %v6607_v39  ;;  %v2306_v39 = vld [vmem:[#allocation9 + $0x40] ss:$8 sm:$0x3] }
 0x462   : > { %v2309_v52 = vperm.slane %v2306_v39, 1  ;;  %v2308_v19 = vperm.slane %v2306_v39, 0  ;;  %v6722_v39 = vpop.permute.xlu0 %915 }
 0x464   : > { %v2310_v51 = vrot.slane %v2309_v52, 4 }
 0x468   : > { %v2032_v5 = vpop.permute.xlu2 %2031 }
 0x469   : > { %v2033_v6 = vrot.slane %v2032_v5, 4 }
 0x46b   : > { %v2035_v14 = vsel %vm2034_vm12, %v2033_v6, %v2032_v5  ;;  %v2039_v1 = vmul.f32 %v2033_v6, %v2022_v50  ;;  %v6613_v5 = vpop.permute.xlu1 %930  ;;  %vm2081_vm12 = vcmask 441344  }
 0x46c   : > { %v2038_v53 = vmul.f32 %v2035_v14, %v6554_v25 }
 0x46d   : > { %2049 = vst [vmem:[#allocation1 + $0x10] ss:$2 sm:$0xff] %v2039_v1  ;;  %v2069_v1 = vld [vmem:[#allocation2 + $0x8] sm:$0xf] }
 0x46e   : > { %2047 = vst [vmem:[#allocation1] ss:$2 sm:$0xff] %v2038_v53 }
 0x474   : > { %v2052_v22 = vld.sshfl [vmem:[#allocation1 + $0x10] sm:$0xff pattern:$0x75316420] }
 0x475   : > { %v2051_v63 = vld.sshfl [vmem:[#allocation1 + $0x8] sm:$0xff pattern:$0x75316420]  ;;  %v2050_v7 = vld.sshfl [vmem:[#allocation1] sm:$0xff pattern:$0x75316420] }
 0x476   : > { %2055 = vrot.lane.b32.xlu2 %v2051_v63, %s5813_s4  ;;  %2053 = vrot.lane.b32.xlu1 %v2050_v7, %s5813_s4  ;;  %v6618_v7 = vpop.permute.xlu1 %977 }
 0x47e   : > { %2078 = vrot.lane.b32.xlu2 %v2077_v23, %s5814_s0  ;;  %2057 = vrot.lane.b32.xlu1 %v2052_v22, %s5813_s4  ;;  %s5815_s0 = smov 74   ;;  %v2121_v23 = vperm.slane %v2119_v12, 0  ;;  %v2123_v22 = vrot.slane %v2122_v13, 4  ;;  %s8334_s4 = smov 64  }
 0x47f   : > { %v2165_v13 = vld [vmem:[#allocation9 + $0x35] ss:$8 sm:$0x3] }
 0x480   : > { %v2124_v11 = vsel %vm828_vm0, %v2121_v23, %v2123_v22 }
 0x4d0   : > { %v6615_v6 = vpop.permute.xlu2 %2055 }
 0x4d1   : > { %8468 = vst [vmem:[#allocation50_spill] sm:$0xff] %v6615_v6 }
 0x4d8   : > { %v2079_v50 = vpop.permute.xlu2 %2078 }
 0x4d9   : > { %v2080_v14 = vrot.slane %v2079_v50, 4 }
 0x4db   : > { %v2082_v53 = vsel %vm2081_vm12, %v2080_v14, %v2079_v50  ;;  %v2086_v32 = vmul.f32 %v2080_v14, %v2069_v1  ;;  %v6621_v50 = vpop.permute.xlu1 %926  ;;  %vm8274_vm12 = vcmask 523264  }
 0x4dc   : > { %v2085_v63 = vmul.f32 %v2082_v53, %v6554_v25  ;;  %v2116_v53 = vld [vmem:[#allocation2 + $0x8] sm:$0xf] }
 0x4dd   : > { %2096 = vst [vmem:[#allocation1 + $0x10] ss:$2 sm:$0xff] %v2086_v32 }
 0x4de   : > { %2094 = vst [vmem:[#allocation1] ss:$2 sm:$0xff] %v2085_v63 }
 0x4e3   : > { %v6628_v23 = vpop.permute.xlu1 %1024 }
 0x4e4   : > { %v2099_v58 = vld.sshfl [vmem:[#allocation1 + $0x10] sm:$0xff pattern:$0x75316420]  ;;  %8470 = vst [vmem:[#allocation52_spill] sm:$0xff] %v6628_v23 }
 0x4e5   : > { %v2098_v3 = vld.sshfl [vmem:[#allocation1 + $0x8] sm:$0xff pattern:$0x75316420]  ;;  %v2097_v21 = vld.sshfl [vmem:[#allocation1] sm:$0xff pattern:$0x75316420] }
 0x4e6   : > { %2102 = vrot.lane.b32.xlu2 %v2098_v3, %s5815_s0  ;;  %2100 = vrot.lane.b32.xlu1 %v2097_v21, %s5815_s0  ;;  %v2168_v21 = vperm.slane %v2165_v13, 1 }
 0x4e8   : > { %v2169_v35 = vrot.slane %v2168_v21, 4 }
 0x4ee   : > { %2125 = vrot.lane.b32.xlu2 %v2124_v11, %s8334_s4  ;;  %2104 = vrot.lane.b32.xlu1 %v2099_v58, %s5815_s0  ;;  %v2167_v58 = vperm.slane %v2165_v13, 0  ;;  %s8333_s0 = smov 65  }
 0x4f0   : > { %v2170_v17 = vsel %vm828_vm0, %v2167_v58, %v2169_v35  ;;  %v2212_v35 = vld [vmem:[#allocation9 + $0x36] ss:$8 sm:$0x3] }
 0x540   : > { %v6624_v32 = vpop.permute.xlu2 %2102 }
 0x541   : > { %8469 = vst [vmem:[#allocation51_spill] sm:$0xff] %v6624_v32 }
 0x548   : > { %v2126_v14 = vpop.permute.xlu2 %2125 }
 0x549   : > { %v2127_v1 = vrot.slane %v2126_v14, 4 }
 0x54b   : > { %v2129_v63 = vsel %vm8274_vm12, %v2127_v1, %v2126_v14  ;;  %v2133_v3 = vmul.f32 %v2127_v1, %v2116_v53  ;;  %v6633_v1 = vpop.permute.xlu1 %973  ;;  %vm8280_vm12 = vcmask 531456  }
 0x54c   : > { %v2132_v12 = vmul.f32 %v2129_v63, %v6554_v25 }
 0x54d   : > { %2143 = vst [vmem:[#allocation1 + $0x10] ss:$2 sm:$0xff] %v2133_v3 }
 0x54e   : > { %2141 = vst [vmem:[#allocation1] ss:$2 sm:$0xff] %v2132_v12  ;;  %v2162_v12 = vld [vmem:[#allocation2 + $0x8] sm:$0xf] }
 0x553   : > { %v6641_v58 = vpop.permute.xlu1 %1071 }
 0x554   : > { %v2146_v14 = vld.sshfl [vmem:[#allocation1 + $0x10] sm:$0xff pattern:$0x75316420]  ;;  %8472 = vst [vmem:[#allocation54_spill] sm:$0xff] %v6641_v58 }
 0x555   : > { %v2145_v22 = vld.sshfl [vmem:[#allocation1 + $0x8] sm:$0xff pattern:$0x75316420]  ;;  %v2144_v11 = vld.sshfl [vmem:[#allocation1] sm:$0xff pattern:$0x75316420] }
 0x556   : > { %2149 = vrot.lane.b32.xlu2 %v2145_v22, %s8334_s4  ;;  %2147 = vrot.lane.b32.xlu1 %v2144_v11, %s8334_s4  ;;  %v2215_v11 = vperm.slane %v2212_v35, 1 }
 0x558   : > { %v2216_v26 = vrot.slane %v2215_v11, 4 }
 0x55e   : > { %2171 = vrot.lane.b32.xlu2 %v2170_v17, %s8333_s0  ;;  %2151 = vrot.lane.b32.xlu1 %v2146_v14, %s8334_s4  ;;  %v2214_v14 = vperm.slane %v2212_v35, 0  ;;  %s8538_s0 = sld [smem:[#allocation155_spill]] }
 0x5b0   : > { %v6637_v53 = vpop.permute.xlu2 %2149 }
 0x5b1   : > { %8471 = vst [vmem:[#allocation53_spill] sm:$0xff] %v6637_v53 }
 0x5b8   : > { %v2172_v63 = vpop.permute.xlu2 %2171 }
 0x5b9   : > { %v2173_v3 = vrot.slane %v2172_v63, 4 }
 0x5bb   : > { %v2175_v22 = vsel %vm8280_vm12, %v2173_v3, %v2172_v63  ;;  %v2179_v13 = vmul.f32 %v2173_v3, %v2162_v12  ;;  %v2217_v63 = vsel %vm828_vm0, %v2214_v14, %v2216_v26  ;;  %v6646_v12 = vpop.permute.xlu1 %1020  ;;  %vm8294_vm12 = vcmask 539648  }
 0x5bc   : > { %v2178_v21 = vmul.f32 %v2175_v22, %v6554_v25  ;;  %8473 = vst [vmem:[#allocation55_spill] sm:$0xff] %v6646_v12 }
 0x5bd   : > { %2189 = vst [vmem:[#allocation1 + $0x10] ss:$2 sm:$0xff] %v2179_v13 }
 0x5be   : > { %2187 = vst [vmem:[#allocation1] ss:$2 sm:$0xff] %v2178_v21 }
 0x5c3   : > { %v6650_v22 = vpop.permute.xlu1 %1118 }
 0x5c4   : > { %v2192_v3 = vld.sshfl [vmem:[#allocation1 + $0x10] sm:$0xff pattern:$0x75316420]  ;;  %8474 = vst [vmem:[#allocation56_spill] sm:$0xff] %v6650_v22  ;;  %v8607_v22 = vmov 21  }
 0x5c5   : > { %v2191_v17 = vld.sshfl [vmem:[#allocation1 + $0x8] sm:$0xff pattern:$0x75316420]  ;;  %v2190_v36 = vld.sshfl [vmem:[#allocation1] sm:$0xff pattern:$0x75316420] }
 0x5c6   : > { %2195 = vrot.lane.b32.xlu2 %v2191_v17, %s8290_s26  ;;  %2193 = vrot.lane.b32.xlu1 %v2190_v36, %s8290_s26 }
 0x5cb   : > { %v6652_v13 = vpop.permute.xlu1 %1067 }
 0x5cc   : > { %8475 = vst [vmem:[#allocation57_spill] sm:$0xff] %v6652_v13 }
 0x5ce   : > { %2218 = vrot.lane.b32.xlu2 %v2217_v63, %s8332_s25  ;;  %2197 = vrot.lane.b32.xlu1 %v2192_v3, %s8290_s26  ;;  %v2209_v3 = vld [vmem:[#allocation2 + $0x8] sm:$0xf]  ;;  %s8305_s26 = smov 62   ;;  %s8575_s25 = smov 49  }
 0x5d3   : > { %v6654_v21 = vpop.permute.xlu1 %1165 }
 0x5d4   : > { %8476 = vst [vmem:[#allocation58_spill] sm:$0xff] %v6654_v21 }
 0x5db   : > { %v6656_v17 = vpop.permute.xlu1 %1114 }
 0x5dc   : > { %8477 = vst [vmem:[#allocation59_spill] sm:$0xff] %v6656_v17 }
 0x5e3   : > { %v6658_v36 = vpop.permute.xlu1 %1212 }
 0x5e4   : > { %8478 = vst [vmem:[#allocation60_spill] sm:$0xff] %v6658_v36  ;;  %v2536_v36 = vld [vmem:[#allocation2 + $0x8] sm:$0xf] }
 0x5eb   : > { %v6660_v35 = vpop.permute.xlu1 %1161 }
 0x5ec   : > { %8479 = vst [vmem:[#allocation61_spill] sm:$0xff] %v6660_v35 }
 0x5f3   : > { %v6664_v11 = vpop.permute.xlu1 %1259 }
 0x5f4   : > { %8481 = vst [vmem:[#allocation63_spill] sm:$0xff] %v6664_v11 }
 0x5fb   : > { %v6668_v15 = vpop.permute.xlu1 %1208 }
 0x5fc   : > { %8482 = vst [vmem:[#allocation64_spill] sm:$0xff] %v6668_v15 }
 0x620   : > { %v6662_v26 = vpop.permute.xlu2 %2195 }
 0x621   : > { %8480 = vst [vmem:[#allocation62_spill] sm:$0xff] %v6662_v26 }
 0x628   : > { %v2219_v14 = vpop.permute.xlu2 %2218 }
 0x629   : > { %v2220_v63 = vrot.slane %v2219_v14, 4 }
 0x62b   : > { %v2222_v16 = vsel %vm8294_vm12, %v2220_v63, %v2219_v14  ;;  %v2226_v54 = vmul.f32 %v2220_v63, %v2209_v3  ;;  %v2264_v14 = vsel %vm828_vm0, %v2261_v45, %v2263_v9  ;;  %v6673_v63 = vpop.permute.xlu1 %1306  ;;  %vm8311_vm12 = vcmask 547840  }
 0x62c   : > { %v2225_v0 = vmul.f32 %v2222_v16, %v6554_v25  ;;  %8483 = vst [vmem:[#allocation65_spill] sm:$0xff] %v6673_v63  ;;  %v8599_v63 = vmov 15  }
 0x62d   : > { %2236 = vst [vmem:[#allocation1 + $0x10] ss:$2 sm:$0xff] %v2226_v54 }
 0x62e   : > { %2234 = vst [vmem:[#allocation1] ss:$2 sm:$0xff] %v2225_v0 }
 0x633   : > { %v6677_v0 = vpop.permute.xlu1 %1255 }
 0x634   : > { %v2239_v16 = vld.sshfl [vmem:[#allocation1 + $0x10] sm:$0xff pattern:$0x75316420]  ;;  %8484 = vst [vmem:[#allocation66_spill] sm:$0xff] %v6677_v0 }
 0x635   : > { %v2238_v59 = vld.sshfl [vmem:[#allocation1 + $0x8] sm:$0xff pattern:$0x75316420]  ;;  %v2237_v27 = vld.sshfl [vmem:[#allocation1] sm:$0xff pattern:$0x75316420] }
 0x636   : > { %2242 = vrot.lane.b32.xlu2 %v2238_v59, %s8305_s26  ;;  %2240 = vrot.lane.b32.xlu1 %v2237_v27, %s8305_s26 }
 0x63b   : > { %v6679_v54 = vpop.permute.xlu1 %1353 }
 0x63c   : > { %8485 = vst [vmem:[#allocation67_spill] sm:$0xff] %v6679_v54 }
 0x63e   : > { %2265 = vrot.lane.b32.xlu2 %v2264_v14, %s5821_s3  ;;  %2244 = vrot.lane.b32.xlu1 %v2239_v16, %s8305_s26  ;;  %s8316_s26 = smov 61  }
 0x643   : > { %v6681_v25 = vpop.permute.xlu1 %1302 }
 0x644   : > { %8486 = vst [vmem:[#allocation68_spill] sm:$0xff] %v6681_v25 }
 0x64b   : > { %v6683_v59 = vpop.permute.xlu1 %1400 }
 0x64c   : > { %8487 = vst [vmem:[#allocation69_spill] sm:$0xff] %v6683_v59 }
 0x653   : > { %v6685_v27 = vpop.permute.xlu1 %1349 }
 0x654   : > { %8488 = vst [vmem:[#allocation70_spill] sm:$0xff] %v6685_v27 }
 0x65b   : > { %v6687_v48 = vpop.permute.xlu1 %1447 }
 0x65c   : > { %8489 = vst [vmem:[#allocation71_spill] sm:$0xff] %v6687_v48 }
 0x663   : > { %v6689_v57 = vpop.permute.xlu1 %1396 }
 0x664   : > { %8490 = vst [vmem:[#allocation72_spill] sm:$0xff] %v6689_v57 }
 0x66b   : > { %v6691_v9 = vpop.permute.xlu1 %1494 }
 0x66c   : > { %8491 = vst [vmem:[#allocation73_spill] sm:$0xff] %v6691_v9 }
 0x673   : > { %v6695_v3 = vpop.permute.xlu1 %1443 }
 0x674   : > { %8493 = vst [vmem:[#allocation75_spill] sm:$0xff] %v6695_v3 }
 0x67b   : > { %v6701_v6 = vpop.permute.xlu1 %1541 }
 0x67c   : > { %8494 = vst [vmem:[#allocation76_spill] sm:$0xff] %v6701_v6 }
 0x683   : > { %v6705_v24 = vpop.permute.xlu1 %1490 }
 0x684   : > { %8495 = vst [vmem:[#allocation77_spill] sm:$0xff] %v6705_v24 }
 0x690   : > { %v6693_v45 = vpop.permute.xlu2 %2242 }
 0x691   : > { %8492 = vst [vmem:[#allocation74_spill] sm:$0xff] %v6693_v45 }
 0x698   : > { %v2266_v14 = vpop.permute.xlu2 %2265 }
 0x699   : > { %v2267_v16 = vrot.slane %v2266_v14, 4 }
 0x69b   : > { %v2269_v26 = vsel %vm8311_vm12, %v2267_v16, %v2266_v14  ;;  %v2273_v53 = vmul.f32 %v2267_v16, %v2256_v41  ;;  %v2311_v41 = vsel %vm828_vm0, %v2308_v19, %v2310_v51  ;;  %v6726_v19 = vpop.permute.xlu0 %962  ;;  %vm8320_vm12 = vcmask 556032  }
 0x69c   : > { %v2272_v32 = vmul.f32 %v2269_v26, %v6697_v4  ;;  %8503 = vst [vmem:[#allocation85_spill] sm:$0xff] %v6726_v19 }
 0x69d   : > { %2283 = vst [vmem:[#allocation1 + $0x10] ss:$2 sm:$0xff] %v2273_v53 }
 0x69e   : > { %2281 = vst [vmem:[#allocation1] ss:$2 sm:$0xff] %v2272_v32  ;;  %v6710_v32 = vpop.permute.xlu1 %1588 }
 0x69f   : > { %8496 = vst [vmem:[#allocation78_spill] sm:$0xff] %v6710_v32 }
 0x6a4   : > { %v2286_v26 = vld.sshfl [vmem:[#allocation1 + $0x10] sm:$0xff pattern:$0x75316420] }
 0x6a5   : > { %v2285_v45 = vld.sshfl [vmem:[#allocation1 + $0x8] sm:$0xff pattern:$0x75316420]  ;;  %v2284_v30 = vld.sshfl [vmem:[#allocation1] sm:$0xff pattern:$0x75316420] }
 0x6a6   : > { %2289 = vrot.lane.b32.xlu2 %v2285_v45, %s8316_s26  ;;  %2287 = vrot.lane.b32.xlu1 %v2284_v30, %s8316_s26  ;;  %v6712_v53 = vpop.permute.xlu1 %1537 }
 0x6a7   : > { %8497 = vst [vmem:[#allocation79_spill] sm:$0xff] %v6712_v53 }
 0x6ae   : > { %2312 = vrot.lane.b32.xlu2 %v2311_v41, %s8331_s6  ;;  %2291 = vrot.lane.b32.xlu1 %v2286_v26, %s8316_s26  ;;  %v6714_v14 = vpop.permute.xlu1 %1635  ;;  %v6732_v26 = vpop.permute.xlu0 %1009  ;;  %s8329_s26 = smov 60   ;;  %s8574_s6 = smov 2  }
 0x6af   : > { %8498 = vst [vmem:[#allocation80_spill] sm:$0xff] %v6714_v14 }
 0x6b0   : > { %8506 = vst [vmem:[#allocation88_spill] sm:$0xff] %v6732_v26 }
 0x6b6   : > { %v6716_v45 = vpop.permute.xlu1 %1584 }
 0x6b7   : > { %8499 = vst [vmem:[#allocation81_spill] sm:$0xff] %v6716_v45 }
 0x6be   : > { %v6718_v30 = vpop.permute.xlu1 %1682 }
 0x6bf   : > { %8500 = vst [vmem:[#allocation82_spill] sm:$0xff] %v6718_v30  ;;  %v2303_v30 = vld [vmem:[#allocation2 + $0x8] sm:$0xf] }
 0x6c6   : > { %v6720_v52 = vpop.permute.xlu1 %1631 }
 0x6c7   : > { %8501 = vst [vmem:[#allocation83_spill] sm:$0xff] %v6720_v52 }
 0x6ce   : > { %v6724_v51 = vpop.permute.xlu1 %1678 }
 0x6cf   : > { %8502 = vst [vmem:[#allocation84_spill] sm:$0xff] %v6724_v51  ;;  %v6738_v51 = vpop.permute.xlu0 %1056 }
 0x6d0   : > { %8508 = vst [vmem:[#allocation90_spill] sm:$0xff] %v6738_v51 }
 0x6d6   : > { %v6728_v16 = vpop.permute.xlu1 %1725 }
 0x6d7   : > { %8504 = vst [vmem:[#allocation86_spill] sm:$0xff] %v6728_v16 }
 0x6de   : > { %v6734_v43 = vpop.permute.xlu1 %1729 }
 0x6df   : > { %8507 = vst [vmem:[#allocation89_spill] sm:$0xff] %v6734_v43  ;;  %v6744_v43 = vpop.permute.xlu0 %1150 }
 0x6e0   : > { %8510 = vst [vmem:[#allocation92_spill] sm:$0xff] %v6744_v43 }
 0x6e6   : > { %v6740_v45 = vpop.permute.xlu1 %1772 }
 0x6e7   : > { %8509 = vst [vmem:[#allocation91_spill] sm:$0xff] %v6740_v45  ;;  %v6752_v45 = vpop.permute.xlu0 %1197 }
 0x6e8   : > { %8513 = vst [vmem:[#allocation95_spill] sm:$0xff] %v6752_v45  ;;  %v8606_v45 = vmov 20  }
 0x700   : > { %v6730_v41 = vpop.permute.xlu2 %2289 }
 0x701   : > { %8505 = vst [vmem:[#allocation87_spill] sm:$0xff] %v6730_v41  ;;  %v2353_v41 = vld [vmem:[#allocation9 + $0x41] ss:$8 sm:$0x3] }
 0x702   : > { %v2356_v16 = vperm.slane %v2353_v41, 1 }
 0x708   : > { %v2313_v28 = vpop.permute.xlu2 %2312 }
 0x709   : > { %v2314_v14 = vrot.slane %v2313_v28, 4 }
 0x70b   : > { %v2316_v52 = vsel %vm8320_vm12, %v2314_v14, %v2313_v28  ;;  %v2320_v2 = vmul.f32 %v2314_v14, %v2303_v30  ;;  %v2355_v28 = vperm.slane %v2353_v41, 0  ;;  %v2357_v14 = vrot.slane %v2356_v16, 4  ;;  %v6746_v30 = vpop.permute.xlu1 %1776 }
 0x70c   : > { %v2319_v32 = vmul.f32 %v2316_v52, %v6697_v4  ;;  %8511 = vst [vmem:[#allocation93_spill] sm:$0xff] %v6746_v30  ;;  %vm2362_vm12 = vcmask 564224  }
 0x70d   : > { %2330 = vst [vmem:[#allocation1 + $0x10] ss:$2 sm:$0xff] %v2320_v2  ;;  %v2358_v2 = vsel %vm828_vm0, %v2355_v28, %v2357_v14 }
 0x70e   : > { %2328 = vst [vmem:[#allocation1] ss:$2 sm:$0xff] %v2319_v32 }
 0x713   : > { %v6750_v32 = vpop.permute.xlu1 %1819 }
 0x714   : > { %v2333_v52 = vld.sshfl [vmem:[#allocation1 + $0x10] sm:$0xff pattern:$0x75316420]  ;;  %8512 = vst [vmem:[#allocation94_spill] sm:$0xff] %v6750_v32 }
 0x715   : > { %v2332_v33 = vld.sshfl [vmem:[#allocation1 + $0x8] sm:$0xff pattern:$0x75316420]  ;;  %v2331_v6 = vld.sshfl [vmem:[#allocation1] sm:$0xff pattern:$0x75316420] }
 0x716   : > { %2336 = vrot.lane.b32.xlu2 %v2332_v33, %s8329_s26  ;;  %2334 = vrot.lane.b32.xlu1 %v2331_v6, %s8329_s26  ;;  %v6756_v6 = vpop.permute.xlu0 %1244 }
 0x717   : > { %8515 = vst [vmem:[#allocation97_spill] sm:$0xff] %v6756_v6 }
 0x71b   : > { %v6754_v33 = vpop.permute.xlu1 %1823 }
 0x71c   : > { %8514 = vst [vmem:[#allocation96_spill] sm:$0xff] %v6754_v33 }
 0x71e   : > { %2359 = vrot.lane.b32.xlu2 %v2358_v2, %s5825_s30  ;;  %2338 = vrot.lane.b32.xlu1 %v2333_v52, %s8329_s26  ;;  %v6760_v16 = vpop.permute.xlu0 %1291  ;;  %s5826_s30 = smov 59   ;;  %s5135_s26 = sshll.u32 %s6069_s27, 1 }
 0x71f   : > { %8517 = vst [vmem:[#allocation99_spill] sm:$0xff] %v6760_v16  ;;  %s802_s4 = scalar_lea.vmem %s8538_s0, %s5135_s26  ;;  %s8548_s26 = smov 4  }
 0x720   : > { %s8559_s0 = smov 20   ;;  %s8642_s27 = smov 58  }
 0x723   : > { %v6758_v53 = vpop.permute.xlu1 %1866 }
 0x724   : > { %8516 = vst [vmem:[#allocation98_spill] sm:$0xff] %v6758_v53 }
 0x726   : > { %v6764_v28 = vpop.permute.xlu0 %1385 }
 0x727   : > { %8519 = vst [vmem:[#allocation101_spill] sm:$0xff] %v6764_v28 }
 0x72b   : > { %v6762_v41 = vpop.permute.xlu1 %1870 }
 0x72c   : > { %8518 = vst [vmem:[#allocation100_spill] sm:$0xff] %v6762_v41 }
 0x72e   : > { %v6768_v2 = vpop.permute.xlu0 %1479 }
 0x72f   : > { %8521 = vst [vmem:[#allocation103_spill] sm:$0xff] %v6768_v2 }
 0x733   : > { %v6766_v14 = vpop.permute.xlu1 %1913 }
 0x734   : > { %8520 = vst [vmem:[#allocation102_spill] sm:$0xff] %v6766_v14 }
 0x736   : > { %v6772_v32 = vpop.permute.xlu0 %1526 }
 0x737   : > { %8523 = vst [vmem:[#allocation105_spill] sm:$0xff] %v6772_v32 }
 0x73b   : > { %v6770_v52 = vpop.permute.xlu1 %1917 }
 0x73c   : > { %8522 = vst [vmem:[#allocation104_spill] sm:$0xff] %v6770_v52 }
 0x73e   : > { %v6776_v33 = vpop.permute.xlu0 %1573 }
 0x73f   : > { %8525 = vst [vmem:[#allocation107_spill] sm:$0xff] %v6776_v33 }
 0x743   : > { %v6774_v30 = vpop.permute.xlu1 %1959 }
 0x744   : > { %8524 = vst [vmem:[#allocation106_spill] sm:$0xff] %v6774_v30  ;;  %v2350_v30 = vld [vmem:[#allocation2 + $0x8] sm:$0xf] }
 0x746   : > { %v6780_v53 = vpop.permute.xlu0 %1620 }
 0x747   : > { %8527 = vst [vmem:[#allocation109_spill] sm:$0xff] %v6780_v53 }
 0x74b   : > { %v6778_v18 = vpop.permute.xlu1 %1963 }
 0x74c   : > { %8526 = vst [vmem:[#allocation108_spill] sm:$0xff] %v6778_v18 }
 0x74e   : > { %v6786_v48 = vpop.permute.xlu0 %1714 }
 0x74f   : > { %8530 = vst [vmem:[#allocation112_spill] sm:$0xff] %v6786_v48 }
 0x753   : > { %v6782_v9 = vpop.permute.xlu1 %2006 }
 0x754   : > { %8528 = vst [vmem:[#allocation110_spill] sm:$0xff] %v6782_v9 }
 0x756   : > { %v6792_v24 = vpop.permute.xlu0 %1761 }
 0x757   : > { %8533 = vst [vmem:[#allocation115_spill] sm:$0xff] %v6792_v24 }
 0x75b   : > { %v6788_v14 = vpop.permute.xlu1 %2010 }
 0x75c   : > { %8531 = vst [vmem:[#allocation113_spill] sm:$0xff] %v6788_v14 }
 0x75e   : > { %v6797_v14 = vpop.permute.xlu0 %1808 }
 0x75f   : > { %8535 = vst [vmem:[#allocation117_spill] sm:$0xff] %v6797_v14  ;;  %v2397_v14 = vld [vmem:[#allocation2 + $0x8] sm:$0xf] }
 0x763   : > { %v6790_v32 = vpop.permute.xlu1 %2053 }
 0x764   : > { %8532 = vst [vmem:[#allocation114_spill] sm:$0xff] %v6790_v32 }
 0x76b   : > { %v6795_v48 = vpop.permute.xlu1 %2057 }
 0x76c   : > { %8534 = vst [vmem:[#allocation116_spill] sm:$0xff] %v6795_v48 }
 0x770   : > { %v6784_v41 = vpop.permute.xlu2 %2336 }
 0x771   : > { %8529 = vst [vmem:[#allocation111_spill] sm:$0xff] %v6784_v41  ;;  %v2400_v41 = vld [vmem:[#allocation9 + $0x42] ss:$8 sm:$0x3] }
 0x772   : > { %v2403_v9 = vperm.slane %v2400_v41, 1  ;;  %v2402_v32 = vperm.slane %v2400_v41, 0  ;;  %v3200_v41 = vld [vmem:[#allocation12 + $0x3] ss:$8 sm:$0x3] }
 0x774   : > { %v2404_v24 = vrot.slane %v2403_v9, 4 }
 0x778   : > { %v2360_v52 = vpop.permute.xlu2 %2359 }
 0x779   : > { %v2361_v2 = vrot.slane %v2360_v52, 4 }
 0x77b   : > { %v2363_v33 = vsel %vm2362_vm12, %v2361_v2, %v2360_v52  ;;  %v2367_v18 = vmul.f32 %v2361_v2, %v2350_v30  ;;  %v2405_v30 = vsel %vm828_vm0, %v2402_v32, %v2404_v24  ;;  %v6800_v2 = vpop.permute.xlu1 %2100  ;;  %v3156_v24 = vld [vmem:[#allocation12 + $0x1] ss:$8 sm:$0x3]  ;;  %vm2409_vm12 = vcmask 572416  }
 0x77c   : > { %v2366_v53 = vmul.f32 %v2363_v33, %v6697_v4  ;;  %8536 = vst [vmem:[#allocation118_spill] sm:$0xff] %v6800_v2  ;;  %v3131_v33 = vld [vmem:[%s802_s4] sm:$0x3]  ;;  %s8555_s4 = smov 19   ;;  %v8556_v2 = vmov 10  }
 0x77d   : > { %2377 = vst [vmem:[#allocation1 + $0x10] ss:$2 sm:$0xff] %v2367_v18 }
 0x77e   : > { %2375 = vst [vmem:[#allocation1] ss:$2 sm:$0xff] %v2366_v53  ;;  %v6803_v53 = vpop.permute.xlu0 %1855 }
 0x77f   : > { %8537 = vst [vmem:[#allocation119_spill] sm:$0xff] %v6803_v53  ;;  %v8568_v53 = vmov 16  }
 0x784   : > { %v2380_v18 = vld.sshfl [vmem:[#allocation1 + $0x10] sm:$0xff pattern:$0x75316420] }
 0x785   : > { %v2379_v37 = vld.sshfl [vmem:[#allocation1 + $0x8] sm:$0xff pattern:$0x75316420]  ;;  %v2378_v3 = vld.sshfl [vmem:[#allocation1] sm:$0xff pattern:$0x75316420] }
 0x786   : > { %2383 = vrot.lane.b32.xlu2 %v2379_v37, %s5826_s30  ;;  %2381 = vrot.lane.b32.xlu1 %v2378_v3, %s5826_s30  ;;  %v6808_v37 = vpop.permute.xlu1 %2104  ;;  %v6811_v9 = vpop.permute.xlu0 %1902 }
 0x787   : > { %8539 = vst [vmem:[#allocation120_spill] sm:$0xff] %v6808_v37 }
 0x788   : > { %8541 = vst [vmem:[#allocation121_spill] sm:$0xff] %v6811_v9 }
 0x78e   : > { %2406 = vrot.lane.b32.xlu2 %v2405_v30, %s5827_s7  ;;  %2385 = vrot.lane.b32.xlu1 %v2380_v18, %s5826_s30  ;;  %v6813_v3 = vpop.permute.xlu1 %2147  ;;  %v6816_v32 = vpop.permute.xlu0 %1948  ;;  %s8545_s7 = smov 3   ;;  %v3222_v30 = vld [vmem:[#allocation12 + $0x4] ss:$8 sm:$0x3]  ;;  %s8562_s30 = smov 32  }
 0x78f   : > { %8542 = vst [vmem:[#allocation122_spill] sm:$0xff] %v6813_v3  ;;  %v6829_v3 = vld [vmem:[%s8443_s10] sm:$0x1]  ;;  %s8603_s10 = smov 52  }
 0x790   : > { %8544 = vst [vmem:[#allocation123_spill] sm:$0xff] %v6816_v32 }
 0x796   : > { %3133 = vrot.lane.b32.xlu1 %v3131_v33, %s8540_s8  ;;  %v6819_v52 = vpop.permute.xlu1 %2151  ;;  %v6821_v18 = vpop.permute.xlu0 %1995 }
 0x797   : > { %8546 = vst [vmem:[#allocation124_spill] sm:$0xff] %v6819_v52 }
 0x798   : > { %8547 = vst [vmem:[#allocation125_spill] sm:$0xff] %v6821_v18 }
 0x79e   : > { %3158 = vrot.lane.b32.xlu1 %v3156_v24, %s8543_s29  ;;  %v6824_v33 = vpop.permute.xlu1 %2193  ;;  %v6832_v24 = vpop.permute.xlu0 %2042 }
 0x79f   : > { %8549 = vst [vmem:[#allocation126_spill] sm:$0xff] %v6824_v33  ;;  %v3310_v33 = vld [vmem:[#allocation12 + $0x10] ss:$8 sm:$0x3] }
 0x7a0   : > { %8550 = vst [vmem:[#allocation127_spill] sm:$0xff] %v6832_v24  ;;  %v3332_v24 = vld [vmem:[#allocation12 + $0x11] ss:$8 sm:$0x3] }
 0x7a6   : > { %3202 = vrot.lane.b32.xlu1 %v3200_v41, %s8545_s7  ;;  %v6834_v37 = vpop.permute.xlu1 %2197  ;;  %v8552_v41 = vmov 5   ;;  %v6838_v52 = vpop.permute.xlu0 %2089  ;;  %s8567_s7 = smov 35  }
 0x7a7   : > { %8551 = vst [vmem:[#allocation128_spill] sm:$0xff] %v6834_v37 }
 0x7a8   : > { %8553 = vst [vmem:[#allocation129_spill] sm:$0xff] %v6838_v52  ;;  %v3640_v52 = vld [vmem:[#allocation12 + $0x27] ss:$8 sm:$0x3] }
 0x7a9   : > { %3642 = vrot.lane.b32.xlu0 %v3640_v52, %s5821_s3  ;;  %s5828_s3 = smov 82  }
 0x7ae   : > { %3224 = vrot.lane.b32.xlu1 %v3222_v30, %s8548_s26  ;;  %v6840_v30 = vpop.permute.xlu1 %2240  ;;  %v6844_v48 = vpop.permute.xlu0 %2136  ;;  %s8360_s26 = smov 58  }
 0x7af   : > { %8554 = vst [vmem:[#allocation130_spill] sm:$0xff] %v6840_v30  ;;  %v2539_v30 = vld [vmem:[#allocation9 + $0x45] ss:$8 sm:$0x3] }
 0x7b0   : > { %8557 = vst [vmem:[#allocation131_spill] sm:$0xff] %v6844_v48  ;;  %v2542_v48 = vperm.slane %v2539_v30, 1  ;;  %v2541_v9 = vperm.slane %v2539_v30, 0  ;;  %v3464_v30 = vld [vmem:[#allocation12 + $0x17] ss:$8 sm:$0x3] }
 0x7b2   : > { %v2543_v52 = vrot.slane %v2542_v48, 4 }
 0x7b6   : > { %3231 = vperm.xlu1 %5408, %v6829_v3   ;;  %v6846_v18 = vpop.permute.xlu1 %2244  ;;  %v6851_v32 = vpop.permute.xlu0 %2182 }
 0x7b7   : > { %8558 = vst [vmem:[#allocation132_spill] sm:$0xff] %v6846_v18 }
 0x7b8   : > { %8561 = vst [vmem:[#allocation134_spill] sm:$0xff] %v6851_v32  ;;  %v3126_v32 = vlaneseq }
 0x7ba   : > { %vm3128_vm4 = vcmp.lt.s32.totalorder %v3126_v32, 324 }
 0x7be   : > { %5409 = vset.pattern.permute.xlu1 %v8552_v41  ;;  %v6849_v37 = vpop.permute.xlu1 %2287  ;;  %v3354_v41 = vld [vmem:[#allocation12 + $0x12] ss:$8 sm:$0x3] }
 0x7bf   : > { %3253 = vperm.xlu1 %5409, %v6829_v3   ;;  %8560 = vst [vmem:[#allocation133_spill] sm:$0xff] %v6849_v37 }
 0x7c7   : > { %3312 = vrot.lane.b32.xlu1 %v3310_v33, %s8555_s4  ;;  %v6855_v33 = vpop.permute.xlu1 %2291  ;;  %s8580_s4 = smov 80  }
 0x7c8   : > { %5414 = vset.pattern.permute.xlu1 %v8556_v2  ;;  %8563 = vst [vmem:[#allocation135_spill] sm:$0xff] %v6855_v33  ;;  %v6857_v2 = vpop.permute.xlu0 %2229 }
 0x7c9   : > { %8564 = vst [vmem:[#allocation136_spill] sm:$0xff] %v6857_v2 }
 0x7cf   : > { %3334 = vrot.lane.b32.xlu1 %v3332_v24, %s8559_s0  ;;  %v3420_v24 = vld [vmem:[#allocation12 + $0x15] ss:$8 sm:$0x3]  ;;  %v6862_v37 = vpop.permute.xlu1 %2334  ;;  %s8581_s0 = smov 64  }
 0x7d0   : > { %8566 = vst [vmem:[#allocation138_spill] sm:$0xff] %v6862_v37  ;;  %v6866_v33 = vpop.permute.xlu0 %2276 }
 0x7d1   : > { %8569 = vst [vmem:[#allocation139_spill] sm:$0xff] %v6866_v33 }
 0x7d7   : > { %3356 = vrot.lane.b32.xlu1 %v3354_v41, %s8562_s30  ;;  %v6870_v48 = vpop.permute.xlu1 %2338 }
 0x7d8   : > { %8570 = vst [vmem:[#allocation140_spill] sm:$0xff] %v6870_v48  ;;  %v8582_v48 = vmov 7  }
 0x7df   : > { %3363 = vperm.xlu1 %5414, %v6829_v3  }
 0x7e0   : > { %v6860_v18 = vpop.permute.xlu2 %2383 }
 0x7e1   : > { %8565 = vst [vmem:[#allocation137_spill] sm:$0xff] %v6860_v18  ;;  %v5584_v18 = vld [vmem:[#allocation4] sm:$0xff] }
 0x7e2   : > { %3130 = vst.msk [vmem:[#allocation3] sm:$0x7] %vm3128_vm4, %v5584_v18  ;;  %v3486_v18 = vld [vmem:[#allocation12 + $0x20] ss:$8 sm:$0x3]  ;;  %vm3138_vm4 = vcmp.ge.s32.totalorder %v3126_v32, 34 }
 0x7e7   : > { %3422 = vrot.lane.b32.xlu1 %v3420_v24, %s8567_s7  ;;  %v2544_v24 = vsel %vm828_vm0, %v2541_v9, %v2543_v52  ;;  %s8584_s7 = smov 127  }
 0x7e8   : > { %v2407_v41 = vpop.permute.xlu2 %2406  ;;  %5420 = vset.pattern.permute.xlu1 %v8568_v53  ;;  %v6872_v53 = vpop.permute.xlu0 %2323 }
 0x7e9   : > { %v2408_v2 = vrot.slane %v2407_v41, 4  ;;  %8571 = vst [vmem:[#allocation141_spill] sm:$0xff] %v6872_v53 }
 0x7eb   : > { %v2410_v10 = vsel %vm2409_vm12, %v2408_v2, %v2407_v41  ;;  %v2414_v28 = vmul.f32 %v2408_v2, %v2397_v14  ;;  %vm3139_vm12 = vcmp.lt.s32.totalorder %v3126_v32, 290  ;;  %v2447_v41 = vld [vmem:[#allocation9 + $0x43] ss:$8 sm:$0x3] }
 0x7ec   : > { %v2413_v37 = vmul.f32 %v2410_v10, %v6697_v4  ;;  %v3178_v10 = vld [vmem:[#allocation12 + $0x2] ss:$8 sm:$0x3]  ;;  %vm3140_vm3 = vmand %vm3138_vm4, %vm3139_vm12  ;;  %vm2548_vm4 = vcmask 670720   ;;  %vm8621_vm12 = vcmask 392192  }
 0x7ed   : > { %2424 = vst [vmem:[#allocation1 + $0x10] ss:$2 sm:$0xff] %v2414_v28 }
 0x7ee   : > { %2422 = vst [vmem:[#allocation1] ss:$2 sm:$0xff] %v2413_v37 }
 0x7ef   : > { %2545 = vrot.lane.b32.xlu1 %v2544_v24, %s5828_s3  ;;  %v2450_v24 = vperm.slane %v2447_v41, 1  ;;  %s8585_s3 = smov 18  }
 0x7f0   : > { %v6878_v9 = vpop.permute.xlu0 %2370 }
 0x7f1   : > { %8573 = vst [vmem:[#allocation143_spill] sm:$0xff] %v6878_v9 }
 0x7f5   : > { %v2425_v33 = vld.sshfl [vmem:[#allocation1] sm:$0xff pattern:$0x75316420] }
 0x7f6   : > { %2428 = vrot.lane.b32.xlu2 %v2425_v33, %s8360_s26  ;;  %s8590_s26 = smov 68  }
 0x7f7   : > { %3466 = vrot.lane.b32.xlu1 %v3464_v30, %s8358_s1  ;;  %v8578_v30 = vmov 3   ;;  %s8587_s1 = smov 66  }
 0x7f8   : > { %v6876_v14 = vpop.permute.xlu1 %2381  ;;  %v6885_v37 = vpop.permute.xlu0 %2417 }
 0x7f9   : > { %8572 = vst [vmem:[#allocation142_spill] sm:$0xff] %v6876_v14 }
 0x7fa   : > { %8577 = vst [vmem:[#allocation145_spill] sm:$0xff] %v6885_v37  ;;  %v2451_v37 = vrot.slane %v2450_v24, 4  ;;  %v3596_v24 = vld [vmem:[#allocation12 + $0x25] ss:$8 sm:$0x3] }
 0x7fe   : > { %3180 = vrot.lane.b32.xlu2 %v3178_v10, %s8574_s6  ;;  %v8579_v10 = vmov 17  }
 0x7ff   : > { %3488 = vrot.lane.b32.xlu1 %v3486_v18, %s8575_s25  ;;  %v2449_v18 = vperm.slane %v2447_v41, 0  ;;  %v8583_v41 = vmov 0   ;;  %s8586_s25 = smov 65  }
 0x800   : > { %v6882_v28 = vpop.permute.xlu1 %2385  ;;  %v3166_v9 = vpop.permute.xlu0 %3165 }
 0x801   : > { %8576 = vst [vmem:[#allocation144_spill] sm:$0xff] %v6882_v28  ;;  %v3168_v53 = vperm.slane %v3166_v9, 0  ;;  %v3288_v9 = vld [vmem:[#allocation12 + $0x7] ss:$8 sm:$0x3] }
 0x806   : > { %3187 = vperm.xlu2 %5406, %v6829_v3  }
 0x807   : > { %3495 = vperm.xlu1 %5420, %v6829_v3  }
 0x808   : > { %v3134_v33 = vpop.permute.xlu1 %3133 }
 0x809   : > { %v3135_v2 = vrot.slane %v3134_v33, 7 }
 0x80b   : > { %v3136_v52 = vsel %vm8387_vm14, %v3135_v2, %v3134_v33 }
 0x80c   : > { %3141 = vst.msk [vmem:[#allocation3] sm:$0x7] %vm3140_vm3, %v3136_v52  ;;  %v2452_v52 = vsel %vm828_vm0, %v2449_v18, %v2451_v37  ;;  %v3618_v37 = vld [vmem:[#allocation12 + $0x26] ss:$8 sm:$0x3]  ;;  %vm8396_vm3 = vcmask 654336  }
 0x80e   : > { %5407 = vset.pattern.permute.xlu2 %v8578_v30  ;;  %v3574_v30 = vld [vmem:[#allocation12 + $0x24] ss:$8 sm:$0x3] }
 0x80f   : > { %5421 = vset.pattern.permute.xlu1 %v8579_v10  ;;  %3209 = vperm.xlu2 %5407, %v6829_v3  }
 0x810   : > { %3517 = vperm.xlu1 %5421, %v6829_v3   ;;  %v3159_v32 = vpop.permute.xlu1 %3158 }
 0x811   : > { %v3160_v28 = vrot.slane %v3159_v32, 7 }
 0x813   : > { %v6893_v14 = vld [vmem:[#allocation3] sm:$0x7]  ;;  %v3161_v33 = vsel %vm8392_vm7, %v3160_v28, %v3159_v32  ;;  %v8588_v32 = vmov 8   ;;  %vm1637_vm7 = vcmask 760832  }
 0x814   : > { %v3163_v2 = vmul.f32 %v3161_v33, %v6893_v14  ;;  %v3662_v33 = vld [vmem:[#allocation12 + $0x30] ss:$8 sm:$0x3] }
 0x816   : > { %v3169_v10 = vmul.f32 %v3168_v53, %v3163_v2  ;;  %v8591_v2 = vmov 9  }
 0x817   : > { %2453 = vrot.lane.b32.xlu2 %v2452_v52, %s8580_s4 }
 0x818   : > { %3576 = vrot.lane.b32.xlu1 %v3574_v30, %s8581_s0  ;;  %5411 = vset.pattern.permute.xlu2 %v8582_v48  ;;  %v6904_v28 = vpop.permute.xlu1 %3202  ;;  %v6912_v48 = vpop.permute.xlu0 %1103  ;;  %v8592_v30 = vmov 24  }
 0x819   : > { %5426 = vset.pattern.permute.xlu1 %v8583_v41  ;;  %3171 = vrot.lane.b32.xlu0 %v3169_v10, %s8584_s7  ;;  %8589 = vst [vmem:[#allocation146_spill] sm:$0xff] %v6912_v48  ;;  %v8610_v48 = vmov 22  }
 0x81f   : > { %3290 = vrot.lane.b32.xlu2 %v3288_v9, %s8585_s3 }
 0x820   : > { %3598 = vrot.lane.b32.xlu1 %v3596_v24, %s8586_s25  ;;  %v3225_v53 = vpop.permute.xlu1 %3224  ;;  %v6918_v10 = vpop.permute.xlu0 %3246  ;;  %s8596_s25 = smov 36  }
 0x821   : > { %v3226_v52 = vrot.slane %v3225_v53, 7 }
 0x823   : > { %v3227_v9 = vsel %vm8386_vm10, %v3226_v52, %v3225_v53  ;;  %vm2875_vm10 = vcmask 801792  }
 0x827   : > { %3297 = vperm.xlu2 %5411, %v6829_v3  }
 0x828   : > { %3620 = vrot.lane.b32.xlu1 %v3618_v37, %s8587_s1  ;;  %v3232_v18 = vpop.permute.xlu1 %3231  ;;  %v3398_v37 = vld [vmem:[#allocation12 + $0x14] ss:$8 sm:$0x3]  ;;  %s8594_s1 = smov 124  }
 0x829   : > { %v3234_v59 = vperm.slane %v3232_v18, 0 }
 0x82f   : > { %5412 = vset.pattern.permute.xlu2 %v8588_v32  ;;  %v3229_v32 = vmul.f32 %v3227_v9, %v6893_v14  ;;  %v3442_v9 = vld [vmem:[#allocation12 + $0x16] ss:$8 sm:$0x3] }
 0x830   : > { %3148 = vperm.xlu1 %5426, %v6829_v3   ;;  %3319 = vperm.xlu2 %5412, %v6829_v3  }
 0x831   : > { %v6921_v24 = vpop.permute.xlu1 %3253  ;;  %v3235_v54 = vmul.f32 %v3234_v59, %v3229_v32  ;;  %v8597_v32 = vmov 14  }
 0x838   : > { %3664 = vrot.lane.b32.xlu1 %v3662_v33, %s8590_s26  ;;  %5413 = vset.pattern.permute.xlu2 %v8591_v2  ;;  %v8593_v33 = vmov 12   ;;  %v2727_v2 = vld [vmem:[#allocation9 + $0x51] ss:$8 sm:$0x3]  ;;  %s5830_s26 = smov 86  }
 0x839   : > { %3341 = vperm.xlu2 %5413, %v6829_v3   ;;  %5429 = vset.pattern.permute.xlu1 %v8592_v30  ;;  %v2730_v57 = vperm.slane %v2727_v2, 1  ;;  %v3269_v30 = vpop.permute.xlu0 %3268  ;;  %v6927_v20 = vpop.permute.xlu1 %3312  ;;  %v2729_v53 = vperm.slane %v2727_v2, 0 }
 0x83b   : > { %v2731_v52 = vrot.slane %v2730_v57, 4 }
 0x83d   : > { %v2732_v18 = vsel %vm828_vm0, %v2729_v53, %v2731_v52  ;;  %v2586_v53 = vld [vmem:[#allocation9 + $0x46] ss:$8 sm:$0x3] }
 0x83e   : > { %v2588_v25 = vperm.slane %v2586_v53, 0 }
 0x840   : > { %3671 = vperm.xlu1 %5429, %v6829_v3  }
 0x841   : > { %3400 = vrot.lane.b32.xlu2 %v3398_v37, %s8540_s8  ;;  %v3276_v27 = vpop.permute.xlu0 %3275  ;;  %v6935_v59 = vpop.permute.xlu1 %3334 }
 0x842   : > { %5416 = vset.pattern.permute.xlu2 %v8593_v33 }
 0x848   : > { %3237 = vrot.lane.b32.xlu1 %v3235_v54, %s8594_s1  ;;  %s8600_s1 = smov 126  }
 0x849   : > { %3407 = vperm.xlu2 %5416, %v6829_v3   ;;  %v6939_v54 = vpop.permute.xlu0 %1338  ;;  %v6941_v2 = vpop.permute.xlu1 %3356 }
 0x84a   : > { %8598 = vst [vmem:[#allocation148_spill] sm:$0xff] %v6939_v54 }
 0x850   : > { %2733 = vrot.lane.b32.xlu1 %v2732_v18, %s5830_s26  ;;  %v6932_v37 = vpop.permute.xlu2 %2428  ;;  %v2589_v18 = vperm.slane %v2586_v53, 1  ;;  %s5831_s26 = smov 83  }
 0x851   : > { %8595 = vst [vmem:[#allocation147_spill] sm:$0xff] %v6932_v37  ;;  %3444 = vrot.lane.b32.xlu2 %v3442_v9, %s8596_s25  ;;  %v3204_v37 = vrot.slane %v6904_v28, 7  ;;  %v2499_v56 = vpop.permute.xlu0 %2498  ;;  %s8602_s25 = smov 125  }
 0x852   : > { %5418 = vset.pattern.permute.xlu2 %v8597_v32  ;;  %v2590_v54 = vrot.slane %v2589_v18, 4 }
 0x853   : > { %v3205_v6 = vsel %vm954_vm9, %v3204_v37, %v6904_v28  ;;  %v3552_v28 = vld [vmem:[#allocation12 + $0x23] ss:$8 sm:$0x3]  ;;  %v3278_v37 = vperm.slane %v3276_v27, 0  ;;  %vm2501_vm9 = vcmask 662528  }
 0x854   : > { %v6969_v27 = vld.sshfl [vmem:[#allocation1 + $0x8] sm:$0xff pattern:$0x75316420] }
 0x858   : > { %v3181_v33 = vpop.permute.xlu2 %3180 }
 0x859   : > { %3451 = vperm.xlu2 %5418, %v6829_v3   ;;  %v3182_v57 = vrot.slane %v3181_v33, 7 }
 0x85b   : > { %v3183_v52 = vsel %vm8391_vm8, %v3182_v57, %v3181_v33  ;;  %v6951_v33 = vpop.permute.xlu1 %3363  ;;  %v2591_v57 = vsel %vm828_vm0, %v2588_v25, %v2590_v54  ;;  %vm8394_vm8 = vcmask 769024  }
 0x85c   : > { %v3185_v9 = vmul.f32 %v3183_v52, %v6893_v14  ;;  %v3207_v52 = vmul.f32 %v3205_v6, %v6893_v14 }
 0x860   : > { %v3188_v47 = vpop.permute.xlu2 %3187 }
 0x861   : > { %v3190_v16 = vperm.slane %v3188_v47, 0  ;;  %5419 = vset.pattern.permute.xlu2 %v8599_v63  ;;  %v3270_v47 = vrot.slane %v3269_v30, 7 }
 0x862   : > { %3473 = vperm.xlu2 %5419, %v6829_v3  }
 0x863   : > { %v3191_v32 = vmul.f32 %v3190_v16, %v3185_v9  ;;  %v8601_v16 = vmov 19   ;;  %v3271_v18 = vsel %vm8393_vm15, %v3270_v47, %v3269_v30  ;;  %v6957_v9 = vpop.permute.xlu0 %3378  ;;  %vm8397_vm15 = vcmask 752640  }
 0x864   : > { %v3273_v25 = vmul.f32 %v3271_v18, %v6893_v14 }
 0x865   : > { %3193 = vrot.lane.b32.xlu0 %v3191_v32, %s8600_s1  ;;  %v6960_v32 = vpop.permute.xlu1 %3422 }
 0x866   : > { %v3279_v30 = vmul.f32 %v3278_v37, %v3273_v25  ;;  %v2489_v37 = vld [vmem:[#allocation2 + $0x8] sm:$0xf]  ;;  %v6976_v25 = vld [vmem:[#allocation2] sm:$0xff] }
 0x869   : > { %v3210_v11 = vpop.permute.xlu2 %3209 }
 0x86a   : > { %v3212_v63 = vperm.slane %v3210_v11, 0  ;;  %2592 = vrot.lane.b32.xlu2 %v2591_v57, %s5831_s26  ;;  %v2444_v11 = vld [vmem:[#allocation2 + $0x8] sm:$0xf]  ;;  %s8604_s26 = smov 111  }
 0x86b   : > { %5423 = vset.pattern.permute.xlu2 %v8601_v16  ;;  %v2500_v16 = vrot.slane %v2499_v56, 4 }
 0x86c   : > { %v3213_v53 = vmul.f32 %v3212_v63, %v3207_v52  ;;  %v6966_v63 = vld.sshfl [vmem:[#allocation1 + $0x10] sm:$0xff pattern:$0x75316420] }
 0x86e   : > { %3215 = vrot.lane.b32.xlu0 %v3213_v53, %s8602_s25  ;;  %v6971_v53 = vpop.permute.xlu0 %3385  ;;  %s8611_s25 = smov 96  }
 0x871   : > { %v2454_v6 = vpop.permute.xlu2 %2453 }
 0x872   : > { %v2455_v54 = vrot.slane %v2454_v6, 4  ;;  %3554 = vrot.lane.b32.xlu2 %v3552_v28, %s8603_s10  ;;  %v2502_v28 = vsel %vm2501_vm9, %v2500_v16, %v2499_v56  ;;  %s8608_s10 = smov 109   ;;  %vm8622_vm9 = vcmask 416768  }
 0x874   : > { %v2456_v57 = vsel %vm8396_vm3, %v2455_v54, %v2454_v6  ;;  %v2460_v52 = vmul.f32 %v2455_v54, %v2444_v11  ;;  %v2546_v6 = vpop.permute.xlu1 %2545  ;;  %v2505_v54 = vmul.f32 %v6976_v25, %v2502_v28  ;;  %v3314_v28 = vrot.slane %v6927_v20, 7 }
 0x875   : > { %v2459_v47 = vmul.f32 %v2456_v57, %v6697_v4  ;;  %v2547_v11 = vrot.slane %v2546_v6, 4 }
 0x876   : > { %3281 = vrot.lane.b32.xlu0 %v3279_v30, %s8604_s26  ;;  %2470 = vst [vmem:[#allocation1 + $0x10] ss:$2 sm:$0xff] %v2460_v52  ;;  %v2506_v30 = vmul.f32 %v2500_v16, %v2489_v37  ;;  %v6987_v0 = vpop.permute.xlu0 %1432 }
 0x877   : > { %2468 = vst [vmem:[#allocation1] ss:$2 sm:$0xff] %v2459_v47  ;;  %v2549_v60 = vsel %vm2548_vm4, %v2547_v11, %v2546_v6  ;;  %v2774_v6 = vld [vmem:[#allocation9 + $0x52] ss:$8 sm:$0x3]  ;;  %vm2595_vm4 = vcmask 678912  }
 0x878   : > { %8605 = vst [vmem:[#allocation149_spill] sm:$0xff] %v6987_v0  ;;  %v2552_v16 = vmul.f32 %v2549_v60, %v6697_v4  ;;  %v2777_v60 = vperm.slane %v2774_v6, 1 }
 0x879   : > { %v6973_v18 = vpop.permute.xlu2 %3290 }
 0x87a   : > { %3561 = vperm.xlu2 %5423, %v6829_v3  }
 0x87d   : > { %v6979_v57 = vld.sshfl [vmem:[#allocation1 + $0x10] sm:$0xff pattern:$0x75316420] }
 0x87e   : > { %v6981_v52 = vld.sshfl [vmem:[#allocation1] sm:$0xff pattern:$0x75316420]  ;;  %v6983_v47 = vld.sshfl [vmem:[#allocation1 + $0x8] sm:$0xff pattern:$0x75316420] }
 0x87f   : > { %2514 = vst [vmem:[#allocation1] ss:$2 sm:$0xff] %v2505_v54  ;;  %v2553_v54 = vmul.f32 %v2547_v11, %v2536_v36  ;;  %v3336_v36 = vrot.slane %v6935_v59, 7 }
 0x880   : > { %2516 = vst [vmem:[#allocation1 + $0x10] ss:$2 sm:$0xff] %v2506_v30  ;;  %v3315_v30 = vsel %vm1283_vm2, %v3314_v28, %v6927_v20  ;;  %v2776_v20 = vperm.slane %v2774_v6, 0  ;;  %v2778_v28 = vrot.slane %v2777_v60, 4  ;;  %vm8616_vm2 = vcmask 293888  }
 0x881   : > { %v6985_v56 = vpop.permute.xlu2 %3297  ;;  %v3317_v43 = vmul.f32 %v3315_v30, %v6893_v14  ;;  %v3380_v30 = vrot.slane %v6957_v9, 7 }
 0x882   : > { %5424 = vset.pattern.permute.xlu2 %v8606_v45  ;;  %v3430_v45 = vpop.permute.xlu0 %3429 }
 0x883   : > { %3583 = vperm.xlu2 %5424, %v6829_v3   ;;  %v3381_v60 = vsel %vm8388_vm6, %v3380_v30, %v6957_v9  ;;  %vm1261_vm6 = vcmask 900096  }
 0x886   : > { %v6993_v37 = vld.sshfl [vmem:[#allocation1] sm:$0xff pattern:$0x75316420]  ;;  %v6995_v15 = vld.sshfl [vmem:[#allocation1 + $0x8] sm:$0xff pattern:$0x75316420] }
 0x887   : > { %2561 = vst [vmem:[#allocation1] ss:$2 sm:$0xff] %v2552_v16  ;;  %v6999_v0 = vld.sshfl [vmem:[#allocation1 + $0x10] sm:$0xff pattern:$0x75316420]  ;;  %v3337_v16 = vsel %vm1330_vm5, %v3336_v36, %v6935_v59  ;;  %vm8617_vm5 = vcmask 261120  }
 0x888   : > { %2563 = vst [vmem:[#allocation1 + $0x10] ss:$2 sm:$0xff] %v2553_v54  ;;  %v3424_v54 = vrot.slane %v6960_v32, 7  ;;  %v2680_v36 = vld [vmem:[#allocation9 + $0x50] ss:$8 sm:$0x3] }
 0x88a   : > { %v3320_v49 = vpop.permute.xlu2 %3319  ;;  %v7010_v35 = vpop.permute.xlu0 %1667  ;;  %v3425_v59 = vsel %vm1612_vm11, %v3424_v54, %v6960_v32  ;;  %vm8620_vm11 = vcmask 400384  }
 0x88b   : > { %v3322_v21 = vperm.slane %v3320_v49, 0  ;;  %5425 = vset.pattern.permute.xlu2 %v8607_v22  ;;  %8609 = vst [vmem:[#allocation150_spill] sm:$0xff] %v7010_v35  ;;  %v3339_v22 = vmul.f32 %v3337_v16, %v6893_v14 }
 0x88c   : > { %3605 = vperm.xlu2 %5425, %v6829_v3  }
 0x88d   : > { %v3323_v11 = vmul.f32 %v3322_v21, %v3317_v43  ;;  %v2779_v43 = vsel %vm828_vm0, %v2776_v20, %v2778_v28  ;;  %v3467_v21 = vpop.permute.xlu1 %3466  ;;  %v3388_v20 = vperm.slane %v6971_v53, 0  ;;  %v3383_v28 = vmul.f32 %v3381_v60, %v6893_v14 }
 0x88e   : > { %v3248_v53 = vrot.slane %v6918_v10, 7 }
 0x88f   : > { %3325 = vrot.lane.b32.xlu0 %v3323_v11, %s8608_s10  ;;  %s8612_s10 = smov 108   ;;  %v3432_v11 = vperm.slane %v3430_v45, 0  ;;  %v3389_v9 = vmul.f32 %v3388_v20, %v3383_v28  ;;  %v2682_v45 = vperm.slane %v2680_v36, 0 }
 0x892   : > { %v7028_v54 = vpop.permute.xlu0 %3510 }
 0x893   : > { %v3342_v49 = vpop.permute.xlu2 %3341 }
 0x894   : > { %v3344_v29 = vperm.slane %v3342_v49, 0  ;;  %5427 = vset.pattern.permute.xlu2 %v8610_v48  ;;  %v3427_v48 = vmul.f32 %v3425_v59, %v6893_v14  ;;  %v2683_v49 = vperm.slane %v2680_v36, 1 }
 0x895   : > { %3627 = vperm.xlu2 %5427, %v6829_v3   ;;  %v3489_v30 = vpop.permute.xlu1 %3488 }
 0x896   : > { %v3345_v6 = vmul.f32 %v3344_v29, %v3339_v22  ;;  %v3433_v32 = vmul.f32 %v3432_v11, %v3427_v48  ;;  %v8613_v29 = vmov 23   ;;  %v2684_v22 = vrot.slane %v2683_v49, 4 }
 0x897   : > { %2780 = vrot.lane.b32.xlu0 %v2779_v43, %s8611_s25  ;;  %v3256_v11 = vperm.slane %v6921_v24, 0  ;;  %v3292_v48 = vrot.slane %v6973_v18, 7 }
 0x898   : > { %3347 = vrot.lane.b32.xlu1 %v3345_v6, %s8612_s10  ;;  %s8614_s10 = smov 93   ;;  %v2685_v59 = vsel %vm828_vm0, %v2682_v45, %v2684_v22  ;;  %v3249_v6 = vsel %vm8390_vm13, %v3248_v53, %v6918_v10  ;;  %v3300_v10 = vperm.slane %v6985_v56, 0  ;;  %vm8395_vm13 = vcmask 777216  }
 0x899   : > { %v3251_v60 = vmul.f32 %v3249_v6, %v6893_v14 }
 0x89b   : > { %v7025_v16 = vpop.permute.xlu2 %3400  ;;  %v3257_v28 = vmul.f32 %v3256_v11, %v3251_v60 }
 0x89d   : > { %5428 = vset.pattern.permute.xlu2 %v8613_v29  ;;  %v3496_v36 = vpop.permute.xlu1 %3495  ;;  %v3358_v29 = vrot.slane %v6941_v2, 7 }
 0x89e   : > { %3649 = vperm.xlu2 %5428, %v6829_v3   ;;  %v3533_v3 = vpop.permute.xlu0 %3532 }
 0x89f   : > { %3435 = vrot.lane.b32.xlu0 %v3433_v32, %s8614_s10  ;;  %s8615_s10 = smov 112   ;;  %v3293_v32 = vsel %vm8389_vm1, %v3292_v48, %v6973_v18  ;;  %v3359_v11 = vsel %vm8617_vm5, %v3358_v29, %v6941_v2  ;;  %v3490_v18 = vrot.slane %v3489_v30, 7  ;;  %v3468_v48 = vrot.slane %v3467_v21, 7 }
 0x8a0   : > { %3391 = vrot.lane.b32.xlu1 %v3389_v9, %s8454_s2  ;;  %v3295_v24 = vmul.f32 %v3293_v32, %v6893_v14  ;;  %v3402_v2 = vrot.slane %v7025_v16, 7  ;;  %vm8626_vm5 = vcmask 408576   ;;  %vm1355_vm1 = vcmask 883712  }
 0x8a1   : > { %v3469_v32 = vsel %vm8621_vm12, %v3468_v48, %v3467_v21  ;;  %vm8630_vm12 = vcmask 523264  }
 0x8a3   : > { %v7034_v43 = vpop.permute.xlu2 %3407 }
 0x8a4   : > { %v3410_v48 = vperm.slane %v7034_v43, 0  ;;  %v2583_v43 = vld [vmem:[#allocation2 + $0x8] sm:$0xf] }
 0x8a5   : > { %v7049_v22 = vpop.permute.xlu1 %3517 }
 0x8a6   : > { %2686 = vrot.lane.b32.xlu2 %v2685_v59, %s5832_s24  ;;  %v3540_v45 = vpop.permute.xlu0 %3539  ;;  %v3301_v59 = vmul.f32 %v3300_v10, %v3295_v24  ;;  %s8618_s24 = smov 110   ;;  %v3498_v10 = vperm.slane %v3496_v36, 0  ;;  %v3534_v24 = vrot.slane %v3533_v3, 7  ;;  %v3403_v36 = vsel %vm8387_vm14, %v3402_v2, %v7025_v16 }
 0x8a7   : > { %vm1214_vm14 = vcmask 908288  }
 0x8a8   : > { %v3535_v21 = vsel %vm8622_vm9, %v3534_v24, %v3533_v3  ;;  %vm8632_vm9 = vcmask 531456  }
 0x8ab   : > { %v3445_v20 = vpop.permute.xlu2 %3444 }
 0x8ac   : > { %v3446_v49 = vrot.slane %v3445_v20, 7 }
 0x8ae   : > { %3259 = vrot.lane.b32.xlu2 %v3257_v28, %s8615_s10  ;;  %v3447_v9 = vsel %vm8616_vm2, %v3446_v49, %v3445_v20  ;;  %v3361_v20 = vmul.f32 %v3359_v11, %v6893_v14  ;;  %v3366_v28 = vperm.slane %v6951_v33, 0  ;;  %v3491_v49 = vsel %vm8620_vm11, %v3490_v18, %v3489_v30  ;;  %v7065_v33 = vpop.permute.xlu1 %3576 }
 0x8af   : > { %v3449_v6 = vmul.f32 %v3447_v9, %v6893_v14  ;;  %v2866_v9 = vld [vmem:[#allocation9 + $0x54] ss:$8 sm:$0x3]  ;;  %vm2642_vm2 = vcmask 687104   ;;  %vm8629_vm11 = vcmask 424960  }
 0x8b0   : > { %v3367_v29 = vmul.f32 %v3366_v28, %v3361_v20  ;;  %v2819_v20 = vld [vmem:[#allocation9 + $0x53] ss:$8 sm:$0x3]  ;;  %v2868_v28 = vperm.slane %v2866_v9, 0 }
 0x8b3   : > { %v3452_v53 = vpop.permute.xlu2 %3451 }
 0x8b4   : > { %v3454_v60 = vperm.slane %v3452_v53, 0  ;;  %v3493_v53 = vmul.f32 %v3491_v49, %v6893_v14 }
 0x8b6   : > { %v3455_v56 = vmul.f32 %v3454_v60, %v3449_v6  ;;  %3303 = vrot.lane.b32.xlu2 %v3301_v59, %s8618_s24  ;;  %v7062_v59 = vpop.permute.xlu0 %834  ;;  %v3471_v60 = vmul.f32 %v3469_v32, %v6893_v14  ;;  %v3499_v30 = vmul.f32 %v3498_v10, %v3493_v53  ;;  %v3542_v32 = vperm.slane %v3540_v45, 0 }
 0x8b7   : > { %v3405_v10 = vmul.f32 %v3403_v36, %v6893_v14  ;;  %v2822_v53 = vperm.slane %v2819_v20, 1  ;;  %v2821_v45 = vperm.slane %v2819_v20, 0 }
 0x8b8   : > { %3457 = vrot.lane.b32.xlu1 %v3455_v56, %s8619_s22  ;;  %v2869_v56 = vperm.slane %v2866_v9, 1  ;;  %s8623_s22 = smov 79  }
 0x8b9   : > { %v3411_v3 = vmul.f32 %v3410_v48, %v3405_v10  ;;  %v7084_v48 = vld.sshfl [vmem:[#allocation1 + $0x8] sm:$0xff pattern:$0x75316420] }
 0x8ba   : > { %v2870_v49 = vrot.slane %v2869_v56, 4 }
 0x8bc   : > { %v3474_v6 = vpop.permute.xlu2 %3473  ;;  %v2871_v2 = vsel %vm828_vm0, %v2868_v28, %v2870_v49  ;;  %v3512_v49 = vrot.slane %v7028_v54, 7 }
 0x8bd   : > { %v3476_v11 = vperm.slane %v3474_v6, 0 }
 0x8be   : > { %3369 = vrot.lane.b32.xlu2 %v3367_v29, %s8611_s25  ;;  %v3537_v29 = vmul.f32 %v3535_v21, %v6893_v14  ;;  %v7079_v21 = vld.sshfl [vmem:[#allocation1] sm:$0xff pattern:$0x75316420] }
 0x8bf   : > { %v3477_v18 = vmul.f32 %v3476_v11, %v3471_v60  ;;  %v2640_v60 = vpop.permute.xlu0 %2639  ;;  %v3599_v11 = vpop.permute.xlu1 %3598 }
 0x8c0   : > { %3501 = vrot.lane.b32.xlu1 %v3499_v30, %s8623_s22  ;;  %v3543_v6 = vmul.f32 %v3542_v32, %v3537_v29  ;;  %v2823_v30 = vrot.slane %v2822_v53, 4  ;;  %s8625_s22 = smov 77   ;;  %v2641_v28 = vrot.slane %v2640_v60, 4  ;;  %v3513_v29 = vsel %vm8626_vm5, %v3512_v49, %v7028_v54 }
 0x8c1   : > { %3479 = vrot.lane.b32.xlu0 %v3477_v18, %s8580_s4  ;;  %s5833_s4 = smov 98   ;;  %v7081_v18 = vld.sshfl [vmem:[#allocation1 + $0x10] sm:$0xff pattern:$0x75316420]  ;;  %vm8637_vm5 = vcmask 547840  }
 0x8c2   : > { %v2824_v20 = vsel %vm828_vm0, %v2821_v45, %v2823_v30  ;;  %v2643_v10 = vsel %vm2642_vm2, %v2641_v28, %v2640_v60  ;;  %vm8636_vm2 = vcmask 556032  }
 0x8c4   : > { %v2593_v24 = vpop.permute.xlu2 %2592 }
 0x8c5   : > { %v2594_v16 = vrot.slane %v2593_v24, 4 }
 0x8c6   : > { %3413 = vrot.lane.b32.xlu2 %v3411_v3, %s8624_s11  ;;  %v3520_v3 = vperm.slane %v7049_v22, 0  ;;  %v3578_v22 = vrot.slane %v7065_v33, 7 }
 0x8c7   : > { %v2596_v9 = vsel %vm2595_vm4, %v2594_v16, %v2593_v24  ;;  %v2600_v56 = vmul.f32 %v2594_v16, %v2583_v43  ;;  %v2646_v16 = vmul.f32 %v6976_v25, %v2643_v10  ;;  %v3643_v54 = vpop.permute.xlu0 %3642  ;;  %vm8634_vm4 = vcmask 539648  }
 0x8c8   : > { %v2599_v36 = vmul.f32 %v2596_v9, %v6697_v4  ;;  %2872 = vrot.lane.b32.xlu1 %v2871_v2, %s5833_s4  ;;  %v2630_v4 = vld [vmem:[#allocation2 + $0x8] sm:$0xf]  ;;  %s5834_s4 = smov 97   ;;  %v3621_v2 = vpop.permute.xlu1 %3620 }
 0x8c9   : > { %3545 = vrot.lane.b32.xlu0 %v3543_v6, %s8625_s22  ;;  %2610 = vst [vmem:[#allocation1 + $0x10] ss:$2 sm:$0xff] %v2600_v56  ;;  %v2647_v53 = vmul.f32 %v2641_v28, %v2630_v4  ;;  %v3515_v6 = vmul.f32 %v3513_v29, %v6893_v14  ;;  %s8628_s22 = smov 78   ;;  %v3579_v28 = vsel %vm8630_vm12, %v3578_v22, %v7065_v33  ;;  %v2913_v4 = vld [vmem:[#allocation9 + $0x55] ss:$8 sm:$0x3] }
 0x8ca   : > { %2608 = vst [vmem:[#allocation1] ss:$2 sm:$0xff] %v2599_v36  ;;  %v3581_v29 = vmul.f32 %v3579_v28, %v6893_v14  ;;  %vm2736_vm12 = vcmask 703488  }
 0x8cb   : > { %v3521_v56 = vmul.f32 %v3520_v3, %v3515_v6 }
 0x8cc   : > { %v3555_v32 = vpop.permute.xlu2 %3554 }
 0x8cd   : > { %v3556_v60 = vrot.slane %v3555_v32, 7 }
 0x8ce   : > { %2825 = vrot.lane.b32.xlu2 %v2824_v20, %s5834_s4  ;;  %s8631_s4 = smov 76  }
 0x8cf   : > { %v3557_v30 = vsel %vm8629_vm11, %v3556_v60, %v3555_v32  ;;  %v3600_v32 = vrot.slane %v3599_v11, 7  ;;  %v2915_v60 = vperm.slane %v2913_v4, 0  ;;  %vm2689_vm11 = vcmask 695296  }
 0x8d0   : > { %v7091_v24 = vld.sshfl [vmem:[#allocation1 + $0x10] sm:$0xff pattern:$0x75316420]  ;;  %v3559_v36 = vmul.f32 %v3557_v30, %v6893_v14  ;;  %v7105_v49 = vpop.permute.xlu1 %3148 }
 0x8d1   : > { %2657 = vst [vmem:[#allocation1 + $0x10] ss:$2 sm:$0xff] %v2647_v53  ;;  %v7094_v43 = vld.sshfl [vmem:[#allocation1] sm:$0xff pattern:$0x75316420]  ;;  %v7108_v53 = vpop.permute.xlu0 %3171  ;;  %v3601_v33 = vsel %vm8632_vm9, %v3600_v32, %v3599_v11  ;;  %vm1496_vm9 = vcmask 785408  }
 0x8d2   : > { %8627 = vst [vmem:[#allocation151_spill] sm:$0xff] %v7094_v43  ;;  %v7097_v9 = vld.sshfl [vmem:[#allocation1 + $0x8] sm:$0xff pattern:$0x75316420]  ;;  %v3173_v43 = vrot.slane %v7108_v53, 1 }
 0x8d3   : > { %2655 = vst [vmem:[#allocation1] ss:$2 sm:$0xff] %v2646_v16  ;;  %v2916_v16 = vperm.slane %v2913_v4, 1 }
 0x8d4   : > { %v3562_v45 = vpop.permute.xlu2 %3561 }
 0x8d5   : > { %v3564_v25 = vperm.slane %v3562_v45, 0 }
 0x8d6   : > { %3523 = vrot.lane.b32.xlu2 %v3521_v56, %s8628_s22  ;;  %v2917_v56 = vrot.slane %v2916_v16, 4  ;;  %s5835_s22 = smov 99  }
 0x8d7   : > { %v3565_v20 = vmul.f32 %v3564_v25, %v3559_v36  ;;  %v3603_v25 = vmul.f32 %v3601_v33, %v6893_v14 }
 0x8d8   : > { %v3665_v45 = vpop.permute.xlu1 %3664  ;;  %v2918_v28 = vsel %vm828_vm0, %v2915_v60, %v2917_v56 }
 0x8d9   : > { %v7113_v22 = vpop.permute.xlu0 %3193  ;;  %v3666_v33 = vrot.slane %v3665_v45, 7 }
 0x8da   : > { %v7143_v51 = vld.sshfl [vmem:[#allocation1 + $0x8] sm:$0xff pattern:$0x75316420] }
 0x8db   : > { %v3667_v60 = vsel %vm8636_vm2, %v3666_v33, %v3665_v45  ;;  %v3054_v33 = vld [vmem:[#allocation9 + $0x60] ss:$8 sm:$0x3]  ;;  %vm2828_vm2 = vcmask 793600  }
 0x8dd   : > { %v3584_v10 = vpop.permute.xlu2 %3583 }
 0x8de   : > { %v3586_v3 = vperm.slane %v3584_v10, 0  ;;  %3567 = vrot.lane.b32.xlu2 %v3565_v20, %s8631_s4  ;;  %v3622_v10 = vrot.slane %v3621_v2, 7  ;;  %s8633_s4 = smov 63  }
 0x8e0   : > { %v3587_v6 = vmul.f32 %v3586_v3, %v3581_v29  ;;  %v3623_v4 = vsel %vm8634_vm4, %v3622_v10, %v3621_v2  ;;  %v3683_v3 = vld [vmem:[#allocation8] sm:$0x1]  ;;  %v3672_v16 = vpop.permute.xlu1 %3671  ;;  %vm3120_vm4 = vcmask 60416  }
 0x8e1   : > { %v3625_v11 = vmul.f32 %v3623_v4, %v6893_v14  ;;  %v7120_v32 = vpop.permute.xlu0 %3215  ;;  %v3007_v2 = vld [vmem:[#allocation9 + $0x57] ss:$8 sm:$0x3] }
 0x8e2   : > { %3589 = vrot.lane.b32.xlu0 %v3587_v6, %s8581_s0  ;;  %s8635_s0 = smov 62  }
 0x8e6   : > { %v3606_v30 = vpop.permute.xlu2 %3605 }
 0x8e7   : > { %v3608_v36 = vperm.slane %v3606_v30, 0  ;;  %v3644_v30 = vrot.slane %v3643_v54, 7 }
 0x8e9   : > { %v3609_v20 = vmul.f32 %v3608_v36, %v3603_v25  ;;  %v3645_v56 = vsel %vm8637_vm5, %v3644_v30, %v3643_v54  ;;  %v3674_v25 = vperm.slane %v3672_v16, 0  ;;  %v2960_v36 = vld [vmem:[#allocation9 + $0x56] ss:$8 sm:$0x3]  ;;  %v3009_v54 = vperm.slane %v3007_v2, 0 }
 0x8ea   : > { %2919 = vrot.lane.b32.xlu0 %v2918_v28, %s5835_s22  ;;  %v3669_v28 = vmul.f32 %v3667_v60, %v6893_v14  ;;  %s8638_s22 = smov 60   ;;  %v3106_v60 = vld [vmem:[%s798_s23] sm:$0x1]  ;;  %s5837_s23 = smov 100   ;;  %vm885_vm5 = vcmask 1039360  }
 0x8eb   : > { %3611 = vrot.lane.b32.xlu1 %v3609_v20, %s8633_s4  ;;  %v3647_v20 = vmul.f32 %v3645_v56, %v6893_v14  ;;  %s8639_s4 = smov 61   ;;  %v2962_v14 = vperm.slane %v2960_v36, 0  ;;  %v3108_v31 = vmul.f32 0.044715, %v3106_v60 }
 0x8ec   : > { %v3675_v17 = vmul.f32 %v3674_v25, %v3669_v28  ;;  %v2677_v28 = vld [vmem:[#allocation2 + $0x8] sm:$0xf] }
 0x8ef   : > { %v3628_v29 = vpop.permute.xlu2 %3627 }
 0x8f0   : > { %v3630_v6 = vperm.slane %v3628_v29, 0  ;;  %v3010_v29 = vperm.slane %v3007_v2, 1  ;;  %v3057_v2 = vperm.slane %v3054_v33, 1 }
 0x8f2   : > { %v3631_v35 = vmul.f32 %v3630_v6, %v3625_v11  ;;  %3686 = vperm.xlu0 %5422, %v3683_v3   ;;  %v7127_v11 = vpop.permute.xlu1 %3237  ;;  %v7129_v3 = vpop.permute.xlu0 %3281  ;;  %v3011_v16 = vrot.slane %v3010_v29, 4  ;;  %v7141_v29 = vld.sshfl [vmem:[#allocation1 + $0x10] sm:$0xff pattern:$0x75316420] }
 0x8f4   : > { %3633 = vrot.lane.b32.xlu2 %v3631_v35, %s8635_s0  ;;  %v2963_v35 = vperm.slane %v2960_v36, 1  ;;  %v3012_v25 = vsel %vm828_vm0, %v3009_v54, %v3011_v16  ;;  %v5586_v36 = vld [vmem:[#allocation2] sm:$0xff]  ;;  %v7145_v54 = vld.sshfl [vmem:[#allocation1] sm:$0xff pattern:$0x75316420]  ;;  %v3056_v16 = vperm.slane %v3054_v33, 0 }
 0x8f5   : > { %s8643_s0 = sld [smem:[#allocation161_spill]] }
 0x8f6   : > { %v2964_v6 = vrot.slane %v2963_v35, 4 }
 0x8f8   : > { %v3650_v10 = vpop.permute.xlu2 %3649 }
 0x8f9   : > { %v3652_v4 = vperm.slane %v3650_v10, 0 }
 0x8fb   : > { %v3653_v45 = vmul.f32 %v3652_v4, %v3647_v20 }
 0x8fc   : > { %3677 = vrot.lane.b32.xlu2 %v3675_v17, %s8638_s22  ;;  %v2965_v17 = vsel %vm828_vm0, %v2962_v14, %v2964_v6  ;;  %v3058_v14 = vrot.slane %v3057_v2, 4  ;;  %v3109_v6 = vmul.f32 %v3108_v31, %v3106_v60  ;;  %s5846_s22 = smov 44  }
 0x8fd   : > { %3655 = vrot.lane.b32.xlu1 %v3653_v45, %s8639_s4  ;;  %v2734_v45 = vpop.permute.xlu1 %2733  ;;  %s5852_s4 = smov 30  }
 0x900   : > { %v2687_v30 = vpop.permute.xlu2 %2686 }
 0x901   : > { %v2688_v56 = vrot.slane %v2687_v30, 4  ;;  %v7138_v10 = vpop.permute.xlu0 %3325 }
 0x903   : > { %v2690_v20 = vsel %vm2689_vm11, %v2688_v56, %v2687_v30  ;;  %v2694_v4 = vmul.f32 %v2688_v56, %v2677_v28  ;;  %v2735_v30 = vrot.slane %v2734_v45, 4  ;;  %v3110_v28 = vmul.f32 %v3109_v6, %v3106_v60  ;;  %v7161_v6 = vld [vmem:[#allocation2] sm:$0xff] }
 0x904   : > { %v2693_v35 = vmul.f32 %v5586_v36, %v2690_v20  ;;  %3013 = vrot.lane.b32.xlu2 %v3012_v25, %s5836_s20  ;;  %v2724_v20 = vld [vmem:[#allocation2 + $0x8] sm:$0xf]  ;;  %v3059_v25 = vsel %vm828_vm0, %v3056_v16, %v3058_v14  ;;  %s8644_s20 = smov 48   ;;  %vm932_vm11 = vcmask 1031168  }
 0x905   : > { %2966 = vrot.lane.b32.xlu1 %v2965_v17, %s5837_s23  ;;  %2704 = vst [vmem:[#allocation1 + $0x10] ss:$2 sm:$0xff] %v2694_v4  ;;  %v3111_v58 = vadd.f32 %v3110_v28, %v3106_v60  ;;  %v2737_v13 = vsel %vm2736_vm12, %v2735_v30, %v2734_v45  ;;  %v2741_v42 = vmul.f32 %v2735_v30, %v2724_v20  ;;  %v2771_v45 = vld [vmem:[#allocation2 + $0x8] sm:$0xf]  ;;  %vm979_vm12 = vcmask 1022976   ;;  %s5841_s23 = smov 47  }
 0x906   : > { %2702 = vst [vmem:[#allocation1] ss:$2 sm:$0xff] %v2693_v35  ;;  %v2740_v31 = vmul.f32 %v5586_v36, %v2737_v13 }
 0x907   : > { %v3112_v17 = vmul.f32 0.7978846, %v3111_v58 }
 0x908   : > { %v7147_v56 = vpop.permute.xlu2 %3259 }
 0x909   : > { %v2781_v26 = vpop.permute.xlu0 %2780  ;;  %5567 = vtanh.f32 %v3112_v17 }
 0x90a   : > { %v2782_v2 = vrot.slane %v2781_v26, 4  ;;  %v7170_v28 = vpop.permute.xlu1 %3347 }
 0x90c   : > { %v7150_v23 = vld.sshfl [vmem:[#allocation1 + $0x10] sm:$0xff pattern:$0x75316420]  ;;  %v2783_v16 = vsel %vm1496_vm9, %v2782_v2, %v2781_v26  ;;  %v2787_v58 = vmul.f32 %v2782_v2, %v2771_v45  ;;  %v3107_v26 = vmul.f32 0.5, %v3106_v60 }
 0x90d   : > { %3060 = vrot.lane.b32.xlu1 %v3059_v25, %s5838_s28  ;;  %v7152_v33 = vld.sshfl [vmem:[#allocation1] sm:$0xff pattern:$0x75316420]  ;;  %2751 = vst [vmem:[#allocation1 + $0x10] ss:$2 sm:$0xff] %v2741_v42  ;;  %v2786_v42 = vmul.f32 %v2783_v16, %v7161_v6  ;;  %s8404_s28 = smov 43  }
 0x90e   : > { %8641 = vst [vmem:[#allocation152_spill] sm:$0xff] %v7152_v33  ;;  %v7154_v4 = vld.sshfl [vmem:[#allocation1 + $0x8] sm:$0xff pattern:$0x75316420]  ;;  %v3105_v16 = vld [vmem:[%s8643_s0] sm:$0xf] }
 0x90f   : > { %2749 = vst [vmem:[#allocation1] ss:$2 sm:$0xff] %v2740_v31  ;;  %v5568_v13 = vpop.eup %5567  ;;  %v5839_v31 = vmov 35   ;;  %v3151_v33 = vperm.slane %v7105_v49, 0  ;;  %v3195_v49 = vrot.slane %v7113_v22, 1  ;;  %s5842_s0 = smov 46  }
 0x910   : > { %v7156_v35 = vpop.permute.xlu2 %3303  ;;  %v3114_v25 = vadd.f32 1.0, %v5568_v13  ;;  %5430 = vset.pattern.permute.xlu2 %v5839_v31 }
 0x912   : > { %v3115_v17 = vmul.f32 %v3114_v25, %v3107_v26  ;;  %v7178_v2 = vpop.permute.xlu1 %3391  ;;  %v3142_v26 = vld [vmem:[#allocation3] sm:$0x3] }
 0x913   : > { %v3144_v25 = vld [vmem:[#allocation12] ss:$8 sm:$0x3] }
 0x914   : > { %v7159_v14 = vld.sshfl [vmem:[#allocation1 + $0x10] sm:$0xff pattern:$0x75316420]  ;;  %v3117_v45 = vperm.slane %v3115_v17, 0 }
 0x915   : > { %2430 = vrot.lane.b32.xlu1 %v6969_v27, %s8642_s27  ;;  %2797 = vst [vmem:[#allocation1 + $0x10] ss:$2 sm:$0xff] %v2787_v58  ;;  %v5840_v58 = vmov 36  }
 0x916   : > { %v7166_v36 = vld.sshfl [vmem:[#allocation1 + $0x8] sm:$0xff pattern:$0x75316420]  ;;  %v7168_v30 = vld.sshfl [vmem:[#allocation1] sm:$0xff pattern:$0x75316420]  ;;  %v3119_v60 = vmul.f32 %v3117_v45, %v3105_v16  ;;  %5431 = vset.pattern.permute.xlu1 %v5840_v58  ;;  %v3145_v58 = vmul.f32 %v3144_v25, %v3142_v26 }
 0x917   : > { %2795 = vst [vmem:[#allocation1] ss:$2 sm:$0xff] %v2786_v42  ;;  %v2816_v42 = vld [vmem:[#allocation2 + $0x8] sm:$0xf] }
 0x918   : > { %v7172_v20 = vpop.permute.xlu2 %3369  ;;  %v3121_v17 = vsel %vm3120_vm4, %v3119_v60, 0.0  ;;  %v3152_v60 = vmul.f32 %v3151_v33, %v3145_v58  ;;  %vm1026_vm4 = vcmask 1014784  }
 0x91c   : > { %v7190_v45 = vld.sshfl [vmem:[#allocation1 + $0x10] sm:$0xff pattern:$0x75316420] }
 0x91d   : > { %2432 = vrot.lane.b32.xlu1 %v6966_v63, %s8642_s27  ;;  %s5844_s27 = smov 45  }
 0x91e   : > { %v7192_v16 = vld.sshfl [vmem:[#allocation1 + $0x8] sm:$0xff pattern:$0x75316420]  ;;  %v7196_v19 = vld.sshfl [vmem:[#allocation1] sm:$0xff pattern:$0x75316420] }
 0x920   : > { %v7176_v27 = vpop.permute.xlu2 %3413 }
 0x925   : > { %2474 = vrot.lane.b32.xlu1 %v6981_v52, %s8644_s20 }
 0x928   : > { %v2826_v63 = vpop.permute.xlu2 %2825 }
 0x929   : > { %v2827_v13 = vrot.slane %v2826_v63, 4 }
 0x92a   : > { %v7185_v31 = vpop.permute.xlu1 %3457 }
 0x92b   : > { %v2829_v12 = vsel %vm2828_vm2, %v2827_v13, %v2826_v63  ;;  %v2833_v34 = vmul.f32 %v2827_v13, %v2816_v42  ;;  %v3217_v63 = vrot.slane %v7120_v32, 1  ;;  %v3196_v42 = vsel %vm932_vm11, %v7113_v22, %v3195_v49 }
 0x92c   : > { %v2832_v52 = vmul.f32 %v2829_v12, %v7161_v6  ;;  %v3174_v12 = vsel %vm885_vm5, %v7108_v53, %v3173_v43  ;;  %v3261_v43 = vrot.slane %v7147_v56, 1  ;;  %vm1167_vm2 = vcmask 916480  }
 0x92d   : > { %3122 = vadd.xlane.f32.xlu2 %v3121_v17  ;;  %2476 = vrot.lane.b32.xlu1 %v6983_v47, %s8644_s20  ;;  %2843 = vst [vmem:[#allocation1 + $0x10] ss:$2 sm:$0xff] %v2833_v34  ;;  %v3176_v34 = vadd.f32 %v3174_v12, %v3152_v60  ;;  %v3239_v47 = vrot.slane %v7127_v11, 1  ;;  %v3218_v26 = vsel %vm979_vm12, %v7120_v32, %v3217_v63  ;;  %v7216_v17 = vpop.permute.xlu0 %3435  ;;  %v3283_v49 = vrot.slane %v7129_v3, 1  ;;  %v2863_v60 = vld [vmem:[#allocation2 + $0x8] sm:$0xf] }
 0x92e   : > { %2841 = vst [vmem:[#allocation1] ss:$2 sm:$0xff] %v2832_v52  ;;  %v3262_v33 = vsel %vm1167_vm2, %v7147_v56, %v3261_v43 }
 0x92f   : > { %v3198_v25 = vadd.f32 %v3196_v42, %v3176_v34  ;;  %v3240_v22 = vsel %vm1026_vm4, %v7127_v11, %v3239_v47 }
 0x931   : > { %v3220_v53 = vadd.f32 %v3218_v26, %v3198_v25  ;;  %v3284_v26 = vsel %vm1214_vm14, %v7129_v3, %v3283_v49 }
 0x932   : > { %v7204_v13 = vpop.permute.xlu1 %3501 }
 0x933   : > { %v3242_v32 = vadd.f32 %v3240_v22, %v3220_v53  ;;  %v2445_v22 = vld [vmem:[%s8441_s5] sm:$0xf] }
 0x934   : > { %v7225_v34 = vld.sshfl [vmem:[#allocation1 + $0x10] sm:$0xff pattern:$0x75316420] }
 0x935   : > { %2478 = vrot.lane.b32.xlu1 %v6979_v57, %s8644_s20  ;;  %v3305_v57 = vrot.slane %v7156_v35, 1  ;;  %v3264_v12 = vadd.f32 %v3262_v33, %v3242_v32  ;;  %v7223_v56 = vld.sshfl [vmem:[#allocation1 + $0x8] sm:$0xff pattern:$0x75316420]  ;;  %v3480_v53 = vpop.permute.xlu0 %3479  ;;  %s5851_s20 = smov 31  }
 0x936   : > { %v7227_v47 = vld.sshfl [vmem:[#allocation1] sm:$0xff pattern:$0x75316420] }
 0x937   : > { %v3306_v25 = vsel %vm1261_vm6, %v7156_v35, %v3305_v57  ;;  %v3286_v43 = vadd.f32 %v3284_v26, %v3264_v12  ;;  %v3349_v35 = vrot.slane %v7170_v28, 1  ;;  %v2490_v57 = vld [vmem:[%s8441_s5] sm:$0xf]  ;;  %v3524_v26 = vpop.permute.xlu2 %3523 }
 0x939   : > { %v3308_v33 = vadd.f32 %v3306_v25, %v3286_v43  ;;  %v3437_v25 = vrot.slane %v7216_v17, 1  ;;  %v3459_v43 = vrot.slane %v7185_v31, 1 }
 0x93a   : > { %v2873_v52 = vpop.permute.xlu1 %2872 }
 0x93b   : > { %v2874_v58 = vrot.slane %v2873_v52, 4 }
 0x93d   : > { %v2876_v63 = vsel %vm2875_vm10, %v2874_v58, %v2873_v52  ;;  %v2880_v42 = vmul.f32 %v2874_v58, %v2863_v60  ;;  %2520 = vrot.lane.b32.xlu1 %v6993_v37, %s5841_s23  ;;  %v3327_v37 = vrot.slane %v7138_v10, 1  ;;  %vm1308_vm10 = vcmask 891904   ;;  %v3546_v12 = vpop.permute.xlu0 %3545 }
 0x93e   : > { %v2879_v11 = vmul.f32 %v2876_v63, %v7161_v6  ;;  %v3371_v52 = vrot.slane %v7172_v20, 1  ;;  %v3350_v58 = vsel %vm1355_vm1, %v7170_v28, %v3349_v35  ;;  %v3393_v60 = vrot.slane %v7178_v2, 1 }
 0x93f   : > { %2890 = vst [vmem:[#allocation1 + $0x10] ss:$2 sm:$0xff] %v2880_v42  ;;  %v3328_v3 = vsel %vm1308_vm10, %v7138_v10, %v3327_v37  ;;  %v3415_v10 = vrot.slane %v7176_v27, 1  ;;  %v5843_v28 = vmov 37  }
 0x940   : > { %2888 = vst [vmem:[#allocation1] ss:$2 sm:$0xff] %v2879_v11  ;;  %v3330_v32 = vadd.f32 %v3328_v3, %v3308_v33  ;;  %v3372_v49 = vsel %vm1496_vm9, %v7172_v20, %v3371_v52  ;;  %v3394_v20 = vsel %vm8395_vm13, %v7178_v2, %v3393_v60  ;;  %v3460_v2 = vsel %vm8397_vm15, %v7185_v31, %v3459_v43 }
 0x941   : > { %v3416_v42 = vsel %vm8394_vm8, %v7176_v27, %v3415_v10  ;;  %v3438_v27 = vsel %vm1637_vm7, %v7216_v17, %v3437_v25  ;;  %vm2922_vm8 = vcmask 809984   ;;  %vm8398_vm13 = vcmask 646144  }
 0x942   : > { %v3525_v31 = vrot.slane %v3524_v26, 1  ;;  %v5845_v60 = vmov 39   ;;  %vm8400_vm15 = vcmask 629760  }
 0x945   : > { %2463 = vperm.xlu2 %5430, %v2445_v22   ;;  %2524 = vrot.lane.b32.xlu1 %v6999_v0, %s5841_s23  ;;  %v3352_v0 = vadd.f32 %v3350_v58, %v3330_v32  ;;  %v3481_v22 = vrot.slane %v3480_v53, 1  ;;  %v3503_v32 = vrot.slane %v7204_v13, 1 }
 0x947   : > { %v3374_v63 = vadd.f32 %v3372_v49, %v3352_v0  ;;  %v3482_v35 = vsel %vm8396_vm3, %v3480_v53, %v3481_v22  ;;  %v3568_v49 = vpop.permute.xlu2 %3567  ;;  %v3504_v17 = vsel %vm8398_vm13, %v7204_v13, %v3503_v32  ;;  %v3547_v53 = vrot.slane %v3546_v12, 1  ;;  %v2910_v0 = vld [vmem:[#allocation2 + $0x8] sm:$0xf] }
 0x948   : > { %vm8399_vm3 = vcmask 637952   ;;  %vm8645_vm13 = vcmask 523264  }
 0x949   : > { %v3396_v11 = vadd.f32 %v3394_v20, %v3374_v63  ;;  %v3526_v13 = vsel %vm8399_vm3, %v3524_v26, %v3525_v31  ;;  %vm8401_vm3 = vcmask 515072  }
 0x94b   : > { %v3418_v37 = vadd.f32 %v3416_v42, %v3396_v11  ;;  %v7279_v42 = vld.sshfl [vmem:[#allocation1] sm:$0xff pattern:$0x75316420]  ;;  %v3548_v11 = vsel %vm8400_vm15, %v3546_v12, %v3547_v53  ;;  %vm8402_vm15 = vcmask 506880  }
 0x94d   : > { %2567 = vrot.lane.b32.xlu2 %v7079_v21, %s5842_s0  ;;  %2509 = vperm.xlu1 %5431, %v2490_v57   ;;  %v2537_v21 = vld [vmem:[%s8441_s5] sm:$0xf]  ;;  %v3440_v3 = vadd.f32 %v3438_v27, %v3418_v37  ;;  %v3569_v37 = vrot.slane %v3568_v49, 1 }
 0x94e   : > { %5432 = vset.pattern.permute.xlu2 %v5843_v28 }
 0x94f   : > { %v3462_v52 = vadd.f32 %v3460_v2, %v3440_v3  ;;  %v3634_v43 = vpop.permute.xlu2 %3633 }
 0x951   : > { %v3484_v58 = vadd.f32 %v3482_v35, %v3462_v52  ;;  %v2631_v52 = vld [vmem:[%s8441_s5] sm:$0xf] }
 0x953   : > { %v3506_v10 = vadd.f32 %v3504_v17, %v3484_v58  ;;  %v3635_v58 = vrot.slane %v3634_v43, 1 }
 0x954   : > { %v3590_v33 = vpop.permute.xlu0 %3589 }
 0x955   : > { %2556 = vperm.xlu2 %5432, %v2537_v21   ;;  %2571 = vrot.lane.b32.xlu1 %v7081_v18, %s5842_s0  ;;  %v3528_v25 = vadd.f32 %v3526_v13, %v3506_v10  ;;  %v3591_v22 = vrot.slane %v3590_v33, 1 }
 0x956   : > { %5444 = vset.pattern.permute.xlu1 %v8583_v41 }
 0x957   : > { %v3550_v27 = vadd.f32 %v3548_v11, %v3528_v25  ;;  %v3592_v26 = vsel %vm8645_vm13, %v3590_v33, %v3591_v22  ;;  %vm2293_vm13 = vcmask 498688  }
 0x95c   : > { %v2920_v57 = vpop.permute.xlu0 %2919 }
 0x95d   : > { %v2921_v18 = vrot.slane %v2920_v57, 4  ;;  %2618 = vrot.lane.b32.xlu2 %v7091_v24, %s5844_s27  ;;  %2616 = vrot.lane.b32.xlu1 %v7097_v9, %s5844_s27  ;;  %v7281_v24 = vld.sshfl [vmem:[#allocation1 + $0x10] sm:$0xff pattern:$0x75316420]  ;;  %v3612_v21 = vpop.permute.xlu1 %3611 }
 0x95e   : > { %5434 = vset.pattern.permute.xlu2 %v5845_v60  ;;  %v7283_v9 = vld.sshfl [vmem:[#allocation1 + $0x8] sm:$0xff pattern:$0x75316420]  ;;  %v3613_v2 = vrot.slane %v3612_v21, 1 }
 0x95f   : > { %v2923_v63 = vsel %vm2922_vm8, %v2921_v18, %v2920_v57  ;;  %v2927_v28 = vmul.f32 %v2921_v18, %v2910_v0  ;;  %vm2012_vm8 = vcmask 621568   ;;  %v3678_v57 = vpop.permute.xlu2 %3677 }
 0x960   : > { %v2926_v20 = vmul.f32 %v2923_v63, %v7161_v6  ;;  %v3570_v3 = vsel %vm2012_vm8, %v3568_v49, %v3569_v37  ;;  %v3614_v35 = vsel %vm8401_vm3, %v3612_v21, %v3613_v2  ;;  %v3636_v49 = vsel %vm8402_vm15, %v3634_v43, %v3635_v58  ;;  %v2957_v43 = vld [vmem:[#allocation2 + $0x8] sm:$0xf]  ;;  %v2725_v58 = vld [vmem:[%s8441_s5] sm:$0xf] }
 0x961   : > { %2937 = vst [vmem:[#allocation1 + $0x10] ss:$2 sm:$0xff] %v2927_v28  ;;  %v3572_v12 = vadd.f32 %v3570_v3, %v3550_v27  ;;  %v3679_v33 = vrot.slane %v3678_v57, 1  ;;  %vm8403_vm3 = vcmask 490496   ;;  %vm2969_vm15 = vcmask 818176  }
 0x962   : > { %2935 = vst [vmem:[#allocation1] ss:$2 sm:$0xff] %v2926_v20 }
 0x963   : > { %v3594_v32 = vadd.f32 %v3592_v26, %v3572_v12  ;;  %v3680_v60 = vsel %vm8403_vm3, %v3678_v57, %v3679_v33  ;;  %vm3016_vm3 = vcmask 826368   ;;  %v3004_v57 = vld [vmem:[#allocation2 + $0x8] sm:$0xf] }
 0x964   : > { %v3687_v17 = vpop.permute.xlu0 %3686 }
 0x965   : > { %2663 = vrot.lane.b32.xlu2 %v7143_v51, %s5846_s22  ;;  %2661 = vrot.lane.b32.xlu1 %v7145_v54, %s5846_s22  ;;  %v3616_v51 = vadd.f32 %v3614_v35, %v3594_v32  ;;  %v3689_v10 = vperm.slane %v3687_v17, 0 }
 0x967   : > { %v3638_v31 = vadd.f32 %v3636_v49, %v3616_v51  ;;  %v3014_v11 = vpop.permute.xlu2 %3013 }
 0x968   : > { %v3015_v3 = vrot.slane %v3014_v11, 4 }
 0x969   : > { %v7304_v2 = vld.sshfl [vmem:[#allocation1] sm:$0xff pattern:$0x75316420] }
 0x96a   : > { %v3021_v33 = vmul.f32 %v3015_v3, %v3004_v57 }
 0x96d   : > { %2650 = vperm.xlu2 %5434, %v2631_v52   ;;  %2665 = vrot.lane.b32.xlu1 %v7141_v29, %s5846_s22  ;;  %v5848_v29 = vmov 41   ;;  %s5849_s22 = smov 42   ;;  %v3017_v52 = vsel %vm3016_vm3, %v3015_v3, %v3014_v11  ;;  %v5850_v11 = vmov 43   ;;  %v2817_v3 = vld [vmem:[%s8441_s5] sm:$0xf]  ;;  %vm1073_vm3 = vcmask 1006592  }
 0x96e   : > { %v3020_v51 = vmul.f32 %v3017_v52, %v7161_v6 }
 0x96f   : > { %v3656_v54 = vpop.permute.xlu1 %3655 }
 0x970   : > { %v3657_v18 = vrot.slane %v3656_v54, 1 }
 0x972   : > { %v3658_v53 = vsel %vm2293_vm13, %v3656_v54, %v3657_v18 }
 0x973   : > { %v3660_v0 = vadd.f32 %v3658_v53, %v3638_v31 }
 0x975   : > { %v3682_v63 = vadd.f32 %v3680_v60, %v3660_v0  ;;  %2712 = vrot.lane.b32.xlu2 %v7150_v23, %s8404_s28  ;;  %2710 = vrot.lane.b32.xlu1 %v7154_v4, %s8404_s28  ;;  %v7306_v23 = vld.sshfl [vmem:[#allocation1 + $0x10] sm:$0xff pattern:$0x75316420]  ;;  %v7308_v4 = vld.sshfl [vmem:[#allocation1 + $0x8] sm:$0xff pattern:$0x75316420] }
 0x976   : > { %5436 = vset.pattern.permute.xlu2 %v5848_v29  ;;  %v3051_v60 = vld [vmem:[#allocation2 + $0x8] sm:$0xf]  ;;  %s5855_s28 = smov 29  }
 0x977   : > { %v3690_v28 = vadd.f32 %v3689_v10, %v3682_v63  ;;  %v2967_v20 = vpop.permute.xlu1 %2966 }
 0x978   : > { %v2968_v13 = vrot.slane %v2967_v20, 4 }
 0x979   : > { %v3693_v25 = vmul.f32 0.044715, %v3690_v28  ;;  %v3692_v53 = vmul.f32 0.5, %v3690_v28 }
 0x97a   : > { %v2970_v21 = vsel %vm2969_vm15, %v2968_v13, %v2967_v20  ;;  %v2974_v37 = vmul.f32 %v2968_v13, %v2957_v43  ;;  %vm3063_vm15 = vcmask 834560  }
 0x97b   : > { %v3694_v22 = vmul.f32 %v3693_v25, %v3690_v28  ;;  %v2973_v27 = vmul.f32 %v2970_v21, %v7161_v6  ;;  %v3691_v25 = vld [vmem:[%s8646_s12] sm:$0xff]  ;;  %s8850_s12 = sld [smem:[#allocation19_spill]] }
 0x97c   : > { %2984 = vst [vmem:[#allocation1 + $0x10] ss:$2 sm:$0xff] %v2974_v37 }
 0x97d   : > { %v3695_v26 = vmul.f32 %v3694_v22, %v3690_v28  ;;  %2757 = vrot.lane.b32.xlu2 %v7166_v36, %s5849_s22  ;;  %2755 = vrot.lane.b32.xlu1 %v7168_v30, %s5849_s22  ;;  %2982 = vst [vmem:[#allocation1] ss:$2 sm:$0xff] %v2973_v27 }
 0x97f   : > { %v3696_v12 = vadd.f32 %v3695_v26, %v3690_v28  ;;  %v3061_v35 = vpop.permute.xlu1 %3060 }
 0x980   : > { %v3062_v54 = vrot.slane %v3061_v35, 4 }
 0x981   : > { %v3697_v32 = vmul.f32 0.7978846, %v3696_v12 }
 0x982   : > { %v3064_v31 = vsel %vm3063_vm15, %v3062_v54, %v3061_v35  ;;  %v3068_v29 = vmul.f32 %v3062_v54, %v3051_v60  ;;  %v8647_v60 = vld [vmem:[#allocation85_spill] sm:$0xff]  ;;  %vm1402_vm15 = vcmask 875520  }
 0x983   : > { %5569 = vtanh.f32 %v3697_v32  ;;  %v7316_v49 = vld.sshfl [vmem:[#allocation1 + $0x10] sm:$0xff pattern:$0x75316420]  ;;  %v3067_v10 = vmul.f32 %v3064_v31, %v7161_v6  ;;  %v843_v31 = vmul.f32 %v6198_v44, %v7062_v59 }
 0x984   : > { %v7318_v36 = vld.sshfl [vmem:[#allocation1] sm:$0xff pattern:$0x75316420]  ;;  %v7320_v30 = vld.sshfl [vmem:[#allocation1 + $0x8] sm:$0xff pattern:$0x75316420] }
 0x985   : > { %2744 = vperm.xlu2 %5436, %v2725_v58   ;;  %2759 = vrot.lane.b32.xlu1 %v7159_v14, %s5849_s22  ;;  %3029 = vst [vmem:[#allocation1] ss:$2 sm:$0xff] %v3020_v51  ;;  %v5853_v58 = vmov 45   ;;  %v5854_v51 = vmov 38  }
 0x986   : > { %3031 = vst [vmem:[#allocation1 + $0x10] ss:$2 sm:$0xff] %v3021_v33  ;;  %5433 = vset.pattern.permute.xlu0 %v5854_v51 }
 0x987   : > { %v7323_v18 = vpop.permute.xlu1 %2430 }
 0x989   : > { %v5570_v17 = vpop.eup %5569 }
 0x98a   : > { %v3699_v0 = vadd.f32 1.0, %v5570_v17 }
 0x98c   : > { %v3700_v63 = vmul.f32 %v3699_v0, %v3692_v53  ;;  %v7326_v20 = vld.sshfl [vmem:[#allocation1] sm:$0xff pattern:$0x75316420]  ;;  %v7328_v13 = vld.sshfl [vmem:[#allocation1 + $0x8] sm:$0xff pattern:$0x75316420]  ;;  %v844_v53 = vmul.f32 %v6200_v46, %v7062_v59  ;;  %v980_v59 = vsel %vm979_vm12, %v6633_v1, %v6428_v40  ;;  %v981_v0 = vsel %vm979_vm12, %v6428_v40, %v6618_v7 }
 0x98d   : > { %2805 = vrot.lane.b32.xlu2 %v7190_v45, %s8562_s30  ;;  %2803 = vrot.lane.b32.xlu1 %v7192_v16, %s8562_s30  ;;  %3076 = vst [vmem:[#allocation1] ss:$2 sm:$0xff] %v3067_v10  ;;  %v7334_v14 = vld.sshfl [vmem:[#allocation1 + $0x10] sm:$0xff pattern:$0x75316420]  ;;  %v8652_v7 = vld [vmem:[#allocation88_spill] sm:$0xff] }
 0x98e   : > { %v3703_v28 = vperm.slane %v3700_v63, 1  ;;  %5438 = vset.pattern.permute.xlu2 %v5850_v11  ;;  %3078 = vst [vmem:[#allocation1 + $0x10] ss:$2 sm:$0xff] %v3068_v29  ;;  %v3702_v43 = vperm.slane %v3700_v63, 0  ;;  %v8649_v10 = vld [vmem:[#allocation55_spill] sm:$0xff]  ;;  %v8651_v11 = vld [vmem:[#allocation52_spill] sm:$0xff] }
 0x98f   : > { %v7336_v6 = vpop.permute.xlu1 %2432  ;;  %vm1120_vm12 = vcmask 998400  }
 0x990   : > { %v3704_v21 = vrot.slane %v3703_v28, 4  ;;  %v8650_v28 = vld [vmem:[#allocation151_spill] sm:$0xff] }
 0x992   : > { %v3705_v45 = vsel %vm828_vm0, %v3702_v43, %v3704_v21  ;;  %v8653_v21 = vld [vmem:[#allocation29_spill] sm:$0xff] }
 0x993   : > { %v3707_v37 = vmul.f32 %v3705_v45, %v3691_v25  ;;  %v8654_v45 = vld [vmem:[#allocation57_spill] sm:$0xff] }
 0x994   : > { %v7342_v22 = vld.sshfl [vmem:[#allocation1] sm:$0xff pattern:$0x75316420]  ;;  %v7344_v16 = vld.sshfl [vmem:[#allocation1 + $0x8] sm:$0xff pattern:$0x75316420] }
 0x995   : > { %2849 = vrot.lane.b32.xlu2 %v7223_v56, %s5851_s20  ;;  %2847 = vrot.lane.b32.xlu1 %v7227_v47, %s5851_s20  ;;  %3709 = vst [vmem:[#allocation1] ss:$2 sm:$0xff] %v3707_v37  ;;  %v1074_v37 = vsel %vm1073_vm3, %v8654_v45, %v8653_v21  ;;  %v8670_v45 = vld [vmem:[#allocation60_spill] sm:$0xff] }
 0x997   : > { %v7348_v27 = vpop.permute.xlu1 %2474 }
 0x99c   : > { %v3710_v26 = vld.sshfl [vmem:[#allocation1] sm:$0xff pattern:$0x75316420]  ;;  %v3711_v12 = vld.sshfl [vmem:[#allocation1 + $0x8] sm:$0xff pattern:$0x75316420] }
 0x99d   : > { %2836 = vperm.xlu2 %5438, %v2817_v3   ;;  %2851 = vrot.lane.b32.xlu1 %v7225_v34, %s5851_s20  ;;  %v3714_v35 = vsel %vm828_vm0, %v3710_v26, 0.0  ;;  %v3715_v52 = vsel %vm828_vm0, %v3711_v12, 0.0 }
 0x99e   : > { %v3716_v32 = vadd.f32 %v3715_v52, %v3714_v35  ;;  %v3005_v35 = vld [vmem:[%s8441_s5] sm:$0xf]  ;;  %v8655_v52 = vld [vmem:[#allocation54_spill] sm:$0xff] }
 0x99f   : > { %v7356_v56 = vpop.permute.xlu1 %2476 }
 0x9a0   : > { %v7358_v47 = vpop.xlane.xlu2 %3122  ;;  %3717 = vadd.xlane.f32.xlu0 %v3716_v32  ;;  %v1075_v32 = vsel %vm1073_vm3, %v8653_v21, %v8655_v52  ;;  %v5860_v21 = vmov 40   ;;  %vm8699_vm3 = vcmask 777216  }
 0x9a5   : > { %2898 = vrot.lane.b32.xlu2 %v7281_v24, %s5852_s4  ;;  %2896 = vrot.lane.b32.xlu1 %v7283_v9, %s5852_s4  ;;  %v2911_v24 = vld [vmem:[%s8441_s5] sm:$0xf] }
 0x9a6   : > { %5440 = vset.pattern.permute.xlu2 %v5853_v58  ;;  %v8656_v58 = vld [vmem:[#allocation90_spill] sm:$0xff] }
 0x9a7   : > { %v7364_v34 = vpop.permute.xlu1 %2478  ;;  %v1078_v51 = vmul.f32 %v1074_v37, %v8656_v58 }
 0x9a8   : > { %v7366_v57 = vpop.permute.xlu2 %2463 }
 0x9ad   : > { %2943 = vrot.lane.b32.xlu2 %v7308_v4, %s5855_s28  ;;  %2941 = vrot.lane.b32.xlu1 %v7304_v2, %s5855_s28  ;;  %v886_v2 = vsel %vm885_vm5, %v6385_v38, %v6401_v62 }
 0x9ae   : > { %v890_v17 = vmul.f32 %v886_v2, %v6168_v55 }
 0x9af   : > { %v7370_v54 = vpop.permute.xlu1 %2520 }
 0x9b0   : > { %v7372_v33 = vpop.permute.xlu2 %2567  ;;  %v892_v38 = vadd.f32 %v890_v17, %v843_v31  ;;  %v1079_v31 = vmul.f32 %v1075_v32, %v8656_v58  ;;  %v8657_v17 = vld [vmem:[#allocation30_spill] sm:$0xff] }
 0x9b4   : > { %2522 = vrot.lane.b32.xlu0 %v6995_v15, %s5841_s23  ;;  %v887_v15 = vsel %vm885_vm5, %v6401_v62, %v6610_v8  ;;  %s5856_s23 = smov 28   ;;  %v5857_v62 = vmov 47   ;;  %v934_v8 = vsel %vm932_vm11, %v6415_v61, %v6613_v5  ;;  %v8648_v5 = vld [vmem:[#allocation28_spill] sm:$0xff] }
 0x9b5   : > { %2930 = vperm.xlu2 %5440, %v2911_v24   ;;  %2945 = vrot.lane.b32.xlu1 %v7306_v23, %s5855_s28  ;;  %v933_v23 = vsel %vm932_vm11, %v6621_v50, %v6415_v61  ;;  %v891_v44 = vmul.f32 %v887_v15, %v6168_v55  ;;  %v938_v55 = vmul.f32 %v934_v8, %v6722_v39  ;;  %v8658_v15 = vld [vmem:[#allocation59_spill] sm:$0xff]  ;;  %v8661_v8 = vld [vmem:[#allocation61_spill] sm:$0xff]  ;;  %s8807_s28 = smov 17  }
 0x9b6   : > { %v937_v46 = vmul.f32 %v933_v23, %v6722_v39  ;;  %v984_v61 = vmul.f32 %v980_v59, %v8647_v60  ;;  %v1027_v63 = vsel %vm1026_vm4, %v8649_v10, %v8648_v5  ;;  %v985_v39 = vmul.f32 %v981_v0, %v8647_v60  ;;  %v8663_v60 = vld [vmem:[#allocation58_spill] sm:$0xff] }
 0x9b7   : > { %v7380_v9 = vpop.permute.xlu1 %2524  ;;  %v1028_v40 = vsel %vm1026_vm4, %v8648_v5, %v8651_v11  ;;  %v1031_v25 = vmul.f32 %v1027_v63, %v8652_v7  ;;  %v1121_v23 = vsel %vm1120_vm12, %v8658_v15, %v8657_v17  ;;  %v8664_v5 = vld [vmem:[#allocation92_spill] sm:$0xff]  ;;  %v3081_v11 = vld.sshfl [vmem:[#allocation1 + $0x10] sm:$0xff pattern:$0x75316420]  ;;  %vm2667_vm4 = vcmask 359424  }
 0x9b8   : > { %v7385_v4 = vpop.permute.xlu2 %2556  ;;  %v1032_v12 = vmul.f32 %v1028_v40, %v8652_v7  ;;  %v8665_v63 = vld [vmem:[#allocation32_spill] sm:$0xff] }
 0x9b9   : > { %v1216_v37 = vsel %vm1214_vm14, %v8665_v63, %v8670_v45 }
 0x9bc   : > { %2569 = vrot.lane.b32.xlu0 %v7084_v48, %s5842_s0  ;;  %v893_v48 = vadd.f32 %v891_v44, %v844_v53  ;;  %s5858_s0 = smov 27   ;;  %v8659_v53 = vld [vmem:[#allocation146_spill] sm:$0xff] }
 0x9bd   : > { %2992 = vrot.lane.b32.xlu2 %v7316_v49, %s5856_s23  ;;  %2990 = vrot.lane.b32.xlu1 %v7320_v30, %s5856_s23  ;;  %v939_v30 = vadd.f32 %v937_v46, %v892_v38  ;;  %v1125_v38 = vmul.f32 %v1121_v23, %v8659_v53  ;;  %v8675_v23 = vld [vmem:[#allocation97_spill] sm:$0xff] }
 0x9be   : > { %5442 = vset.pattern.permute.xlu2 %v5857_v62  ;;  %v940_v29 = vadd.f32 %v938_v55, %v893_v48  ;;  %v8660_v62 = vld [vmem:[#allocation31_spill] sm:$0xff]  ;;  %v8662_v48 = vld [vmem:[#allocation56_spill] sm:$0xff] }
 0x9bf   : > { %v7409_v50 = vpop.permute.xlu1 %2509  ;;  %v986_v1 = vadd.f32 %v984_v61, %v939_v30  ;;  %v1168_v46 = vsel %vm1167_vm2, %v8661_v8, %v8660_v62  ;;  %v1122_v30 = vsel %vm1120_vm12, %v8657_v17, %v8662_v48  ;;  %v1169_v61 = vsel %vm1167_vm2, %v8660_v62, %v8663_v60  ;;  %v8674_v17 = vld [vmem:[#allocation63_spill] sm:$0xff]  ;;  %v8677_v62 = vld [vmem:[#allocation68_spill] sm:$0xff]  ;;  %vm8701_vm12 = vmmov %vm8699_vm3 }
 0x9c0   : > { %v7414_v49 = vpop.permute.xlu2 %2618  ;;  %v987_v3 = vadd.f32 %v985_v39, %v940_v29  ;;  %v1172_v10 = vmul.f32 %v1168_v46, %v8664_v5  ;;  %v8666_v29 = vld [vmem:[#allocation64_spill] sm:$0xff]  ;;  %v1173_v7 = vmul.f32 %v1169_v61, %v8664_v5 }
 0x9c1   : > { %v8668_v39 = vld [vmem:[#allocation152_spill] sm:$0xff] }
 0x9c2   : > { %v1034_v24 = vadd.f32 %v1032_v12, %v987_v3  ;;  %v8671_v3 = vld [vmem:[#allocation95_spill] sm:$0xff]  ;;  %v8672_v12 = vld [vmem:[#allocation33_spill] sm:$0xff] }
 0x9c3   : > { %v1263_v15 = vsel %vm1261_vm6, %v8672_v12, %v8674_v17  ;;  %v8688_v17 = vld [vmem:[#allocation37_spill] sm:$0xff] }
 0x9c4   : > { %2614 = vrot.lane.b32.xlu0 %v8650_v28, %s5844_s27  ;;  %v1081_v59 = vadd.f32 %v1079_v31, %v1034_v24  ;;  %v1215_v28 = vsel %vm1214_vm14, %v8666_v29, %v8665_v63  ;;  %s8405_s27 = smov 26   ;;  %v1220_v31 = vmul.f32 %v1216_v37, %v8671_v3  ;;  %v1267_v48 = vmul.f32 %v1263_v15, %v8675_v23  ;;  %v8689_v15 = vld [vmem:[#allocation75_spill] sm:$0xff] }
 0x9c5   : > { %3037 = vrot.lane.b32.xlu2 %v7328_v13, %s5858_s0  ;;  %3035 = vrot.lane.b32.xlu1 %v7326_v20, %s5858_s0  ;;  %v1033_v13 = vadd.f32 %v1031_v25, %v986_v1  ;;  %v2584_v20 = vld [vmem:[%s8441_s5] sm:$0xf] }
 0x9c6   : > { %v3124_v25 = vld [vmem:[%s8669_s9] sm:$0xf] }
 0x9c7   : > { %v7433_v43 = vpop.permute.xlu1 %2571  ;;  %v1080_v2 = vadd.f32 %v1078_v51, %v1033_v13  ;;  %v1219_v13 = vmul.f32 %v1215_v28, %v8671_v3  ;;  %v3125_v51 = vadd.f32 %v3124_v25, %v7358_v47  ;;  %v8683_v25 = vld [vmem:[#allocation36_spill] sm:$0xff] }
 0x9c8   : > { %v7437_v26 = vpop.permute.xlu2 %2663 }
 0x9c9   : > { %v1127_v55 = vadd.f32 %v1125_v38, %v1080_v2  ;;  %v2678_v2 = vld [vmem:[%s8441_s5] sm:$0xf]  ;;  %v8676_v38 = vld [vmem:[#allocation34_spill] sm:$0xff] }
 0x9ca   : > { %v1309_v8 = vsel %vm1308_vm10, %v8677_v62, %v8676_v38  ;;  %v8691_v62 = vld [vmem:[#allocation38_spill] sm:$0xff] }
 0x9cb   : > { %v1174_v40 = vadd.f32 %v1172_v10, %v1127_v55 }
 0x9cc   : > { %2603 = vperm.xlu0 %5433, %v2584_v20  }
 0x9cd   : > { %3024 = vperm.xlu2 %5442, %v3005_v35   ;;  %3039 = vrot.lane.b32.xlu1 %v7334_v14, %s5858_s0  ;;  %v1126_v14 = vmul.f32 %v1122_v30, %v8659_v53  ;;  %s8667_s0 = smov 43   ;;  %v1221_v58 = vadd.f32 %v1219_v13, %v1174_v40  ;;  %v8678_v30 = vld [vmem:[#allocation65_spill] sm:$0xff]  ;;  %v8682_v40 = vld [vmem:[#allocation148_spill] sm:$0xff]  ;;  %v5861_v13 = vmov 42  }
 0x9ce   : > { %v1310_v55 = vsel %vm1308_vm10, %v8676_v38, %v8678_v30  ;;  %vm1449_vm10 = vcmask 867328   ;;  %v8694_v30 = vld [vmem:[#allocation71_spill] sm:$0xff] }
 0x9cf   : > { %v7454_v44 = vpop.permute.xlu1 %2616  ;;  %v1128_v1 = vadd.f32 %v1126_v14, %v1081_v59  ;;  %v8679_v14 = vld [vmem:[#allocation99_spill] sm:$0xff] }
 0x9d0   : > { %v2651_v0 = vpop.permute.xlu2 %2650  ;;  %v1313_v60 = vmul.f32 %v1309_v8, %v8679_v14  ;;  %v1314_v28 = vmul.f32 %v1310_v55, %v8679_v14  ;;  %v8692_v8 = vld [vmem:[#allocation77_spill] sm:$0xff]  ;;  %v1451_v55 = vsel %vm1449_vm10, %v8688_v17, %v8694_v30 }
 0x9d1   : > { %v1175_v52 = vadd.f32 %v1173_v7, %v1128_v1  ;;  %v8680_v1 = vld [vmem:[#allocation35_spill] sm:$0xff] }
 0x9d3   : > { %v1222_v46 = vadd.f32 %v1220_v31, %v1175_v52  ;;  %v8687_v52 = vld [vmem:[#allocation101_spill] sm:$0xff] }
 0x9d4   : > { %2708 = vrot.lane.b32.xlu0 %v8668_v39, %s8667_s0  ;;  %v8681_v39 = vld [vmem:[#allocation70_spill] sm:$0xff]  ;;  %s8772_s0 = smov 26  }
 0x9d5   : > { %3086 = vrot.lane.b32.xlu2 %v3081_v11, %s8405_s27  ;;  %3084 = vrot.lane.b32.xlu1 %v7344_v16, %s8405_s27  ;;  %v8673_v16 = vld [vmem:[#allocation66_spill] sm:$0xff]  ;;  %v1269_v5 = vadd.f32 %v1267_v48, %v1222_v46  ;;  %v1356_v11 = vsel %vm1355_vm1, %v8681_v39, %v8680_v1  ;;  %v1497_v46 = vsel %vm1496_vm9, %v8692_v8, %v8691_v62  ;;  %s8693_s27 = sld [smem:[#allocation160_spill]]  ;;  %v8698_v39 = vld [vmem:[#allocation79_spill] sm:$0xff] }
 0x9d6   : > { %5435 = vset.pattern.permute.xlu0 %v5860_v21  ;;  %5445 = vset.pattern.permute.xlu2 %v8583_v41  ;;  %v1262_v35 = vsel %vm1261_vm6, %v8673_v16, %v8672_v12  ;;  %v1360_v7 = vmul.f32 %v1356_v11, %v8682_v40  ;;  %v8684_v21 = vld [vmem:[#allocation72_spill] sm:$0xff]  ;;  %v8686_v16 = vld [vmem:[#allocation69_spill] sm:$0xff] }
 0x9d7   : > { %v2662_v20 = vpop.permute.xlu1 %2661  ;;  %v1266_v53 = vmul.f32 %v1262_v35, %v8675_v23  ;;  %v1403_v45 = vsel %vm1402_vm15, %v8684_v21, %v8683_v25  ;;  %v1316_v37 = vadd.f32 %v1314_v28, %v1269_v5  ;;  %v1404_v35 = vsel %vm1402_vm15, %v8683_v25, %v8686_v16  ;;  %v8704_v16 = vld [vmem:[#allocation81_spill] sm:$0xff] }
 0x9d8   : > { %v2668_v32 = vsel %vm2667_vm4, %v2662_v20, %v7437_v26  ;;  %v7502_v47 = vpop.permute.xlu2 %2712  ;;  %v1408_v31 = vmul.f32 %v1404_v35, %v8687_v52  ;;  %v1450_v23 = vsel %vm1449_vm10, %v8689_v15, %v8688_v17  ;;  %v8708_v17 = vld [vmem:[#allocation107_spill] sm:$0xff]  ;;  %vm8715_vm10 = vcmask 752640  }
 0x9d9   : > { %v7489_v24 = vmul.f32 %v2668_v32, %v2651_v0  ;;  %v1268_v59 = vadd.f32 %v1266_v53, %v1221_v58  ;;  %v1407_v32 = vmul.f32 %v1403_v45, %v8687_v52  ;;  %v8690_v53 = vld [vmem:[#allocation149_spill] sm:$0xff] }
 0x9da   : > { %v1454_v38 = vmul.f32 %v1450_v23, %v8690_v53 }
 0x9db   : > { %v1315_v63 = vadd.f32 %v1313_v60, %v1268_v59  ;;  %v3097_v48 = vld [vmem:[%s8693_s27] sm:$0xf]  ;;  %v1455_v60 = vmul.f32 %v1451_v55, %v8690_v53  ;;  %v8709_v53 = vld [vmem:[#allocation41_spill] sm:$0xff]  ;;  %s8805_s27 = sld [smem:[#allocation157_spill]] }
 0x9dc   : > { %2697 = vperm.xlu0 %5435, %v2678_v2   ;;  %v2772_v2 = vld [vmem:[%s8441_s5] sm:$0xf] }
 0x9dd   : > { %3723 = vperm.xlu2 %5445, %v3125_v51   ;;  %v1362_v3 = vadd.f32 %v1360_v7, %v1315_v63  ;;  %3100 = vperm.xlu1 %5444, %v3097_v48   ;;  %v2864_v48 = vld [vmem:[%s8441_s5] sm:$0xf] }
 0x9de   : > { %v8711_v55 = vld [vmem:[#allocation80_spill] sm:$0xff] }
 0x9df   : > { %v2666_v61 = vpop.permute.xlu1 %2665 }
 0x9e0   : > { %v2669_v10 = vsel %vm2667_vm4, %v7437_v26, %v2666_v61  ;;  %v8685_v26 = vld [vmem:[#allocation67_spill] sm:$0xff]  ;;  %v2758_v12 = vpop.permute.xlu2 %2757  ;;  %v8695_v61 = vld [vmem:[#allocation73_spill] sm:$0xff]  ;;  %vm8705_vm4 = vcmask 769024  }
 0x9e1   : > { %v7511_v29 = vmul.f32 %v2669_v10, %v2651_v0  ;;  %v1357_v0 = vsel %vm1355_vm1, %v8680_v1, %v8685_v26  ;;  %vm2761_vm1 = vcmask 343040   ;;  %v1498_v5 = vsel %vm1496_vm9, %v8691_v62, %v8695_v61  ;;  %v8696_v10 = vld [vmem:[#allocation103_spill] sm:$0xff]  ;;  %v8700_v26 = vld [vmem:[#allocation76_spill] sm:$0xff]  ;;  %vm8707_vm15 = vmmov %vm8705_vm4 }
 0x9e2   : > { %v1361_v20 = vmul.f32 %v1357_v0, %v8682_v40  ;;  %v1501_v63 = vmul.f32 %v1497_v46, %v8696_v10  ;;  %v8697_v1 = vld [vmem:[#allocation39_spill] sm:$0xff] }
 0x9e3   : > { %v1544_v11 = vsel %vm8699_vm3, %v8698_v39, %v8697_v1  ;;  %v1545_v0 = vsel %vm8701_vm12, %v8697_v1, %v8700_v26  ;;  %v8716_v39 = vld [vmem:[#allocation82_spill] sm:$0xff]  ;;  %vm8717_vm3 = vmmov %vm8715_vm10  ;;  %vm1778_vm12 = vcmask 736256  }
 0x9e4   : > { %2801 = vrot.lane.b32.xlu0 %v7196_v19, %s8562_s30  ;;  %v1363_v51 = vadd.f32 %v1361_v20, %v1316_v37  ;;  %v1409_v19 = vadd.f32 %v1407_v32, %v1362_v3  ;;  %v1502_v37 = vmul.f32 %v1498_v5, %v8696_v10  ;;  %v8702_v3 = vld [vmem:[#allocation105_spill] sm:$0xff]  ;;  %v8703_v20 = vld [vmem:[#allocation40_spill] sm:$0xff]  ;;  %v8713_v5 = vld [vmem:[#allocation42_spill] sm:$0xff] }
 0x9e5   : > { %5437 = vset.pattern.permute.xlu0 %v5861_v13  ;;  %v1548_v13 = vmul.f32 %v1544_v11, %v8702_v3  ;;  %v1591_v35 = vsel %vm8705_vm4, %v8704_v16, %v8703_v20  ;;  %v8714_v10 = vld [vmem:[#allocation84_spill] sm:$0xff]  ;;  %v1686_v11 = vsel %vm8717_vm3, %v8713_v5, %v8716_v39 }
 0x9e6   : > { %v1410_v59 = vadd.f32 %v1408_v31, %v1363_v51  ;;  %v1456_v14 = vadd.f32 %v1454_v38, %v1409_v19  ;;  %v5862_v51 = vmov 44   ;;  %v1549_v19 = vmul.f32 %v1545_v0, %v8702_v3  ;;  %v8710_v38 = vld [vmem:[#allocation83_spill] sm:$0xff] }
 0x9e7   : > { %v7529_v58 = vpop.permute.xlu1 %2710  ;;  %v1595_v15 = vmul.f32 %v1591_v35, %v8708_v17  ;;  %v1638_v62 = vsel %vm1637_vm7, %v8710_v38, %v8709_v53  ;;  %v8723_v35 = vld [vmem:[#allocation112_spill] sm:$0xff]  ;;  %v8729_v38 = vld [vmem:[#allocation115_spill] sm:$0xff] }
 0x9e8   : > { %v1457_v40 = vadd.f32 %v1455_v60, %v1410_v59  ;;  %v2745_v7 = vpop.permute.xlu2 %2744  ;;  %v1503_v21 = vadd.f32 %v1501_v63, %v1456_v14  ;;  %v1639_v14 = vsel %vm1637_vm7, %v8709_v53, %v8711_v55  ;;  %v8712_v60 = vld [vmem:[#allocation109_spill] sm:$0xff]  ;;  %v1685_v63 = vsel %vm8715_vm10, %v8714_v10, %v8713_v5  ;;  %v8732_v55 = vld [vmem:[#allocation46_spill] sm:$0xff] }
 0x9e9   : > { %v1642_v61 = vmul.f32 %v1638_v62, %v8712_v60  ;;  %v1643_v1 = vmul.f32 %v1639_v14, %v8712_v60  ;;  %vm8728_vm7 = vcmask 654336   ;;  %v8733_v14 = vld [vmem:[#allocation98_spill] sm:$0xff] }
 0x9ea   : > { %v1504_v52 = vadd.f32 %v1502_v37, %v1457_v40  ;;  %v1550_v32 = vadd.f32 %v1548_v13, %v1503_v21  ;;  %v8718_v40 = vld [vmem:[#allocation150_spill] sm:$0xff]  ;;  %v8721_v13 = vld [vmem:[#allocation44_spill] sm:$0xff]  ;;  %vm8731_vm4 = vmmov %vm8728_vm7 }
 0x9eb   : > { %v8720_v21 = vld [vmem:[#allocation86_spill] sm:$0xff]  ;;  %v1690_v3 = vmul.f32 %v1686_v11, %v8718_v40 }
 0x9ec   : > { %2790 = vperm.xlu0 %5437, %v2772_v2   ;;  %v8706_v2 = vld [vmem:[#allocation78_spill] sm:$0xff]  ;;  %v1551_v8 = vadd.f32 %v1549_v19, %v1504_v52  ;;  %v8725_v19 = vld [vmem:[#allocation93_spill] sm:$0xff] }
 0x9ed   : > { %v1592_v31 = vsel %vm8707_vm15, %v8703_v20, %v8706_v2  ;;  %v8722_v20 = vld [vmem:[#allocation91_spill] sm:$0xff]  ;;  %v1780_v2 = vsel %vm1778_vm12, %v8721_v13, %v8725_v19  ;;  %vm8734_vm15 = vcmask 646144  }
 0x9ee   : > { %v1596_v30 = vmul.f32 %v1592_v31, %v8708_v17  ;;  %v1779_v16 = vsel %vm1778_vm12, %v8722_v20, %v8721_v13  ;;  %v8726_v17 = vld [vmem:[#allocation45_spill] sm:$0xff]  ;;  %v1873_v60 = vsel %vm8734_vm15, %v8733_v14, %v8732_v55  ;;  %vm8737_vm10 = vmmov %vm8734_vm15  ;;  %v8745_v13 = vld [vmem:[#allocation106_spill] sm:$0xff]  ;;  %vm8746_vm12 = vcmask 629760  }
 0x9ef   : > { %v2756_v28 = vpop.permute.xlu1 %2755  ;;  %v1783_v62 = vmul.f32 %v1779_v16, %v8729_v38  ;;  %vm2106_vm15 = vcmask 605184  }
 0x9f0   : > { %v2762_v25 = vsel %vm2761_vm1, %v2756_v28, %v2758_v12 }
 0x9f1   : > { %v7555_v45 = vmul.f32 %v2762_v25, %v2745_v7  ;;  %v8719_v25 = vld [vmem:[#allocation43_spill] sm:$0xff] }
 0x9f4   : > { %2894 = vrot.lane.b32.xlu0 %v7279_v42, %s5852_s4  ;;  %v1597_v42 = vadd.f32 %v1595_v15, %v1550_v32  ;;  %v8724_v32 = vld [vmem:[#allocation89_spill] sm:$0xff]  ;;  %v8727_v15 = vld [vmem:[#allocation94_spill] sm:$0xff]  ;;  %s8809_s4 = smov 33  }
 0x9f5   : > { %5439 = vset.pattern.permute.xlu0 %v5862_v51 }
 0x9f6   : > { %v1644_v28 = vadd.f32 %v1642_v61, %v1597_v42  ;;  %v5863_v42 = vmov 46   ;;  %v8735_v61 = vld [vmem:[#allocation117_spill] sm:$0xff] }
 0x9f7   : > { %v2760_v23 = vpop.permute.xlu1 %2759 }
 0x9f8   : > { %v2763_v46 = vsel %vm2761_vm1, %v2758_v12, %v2760_v23  ;;  %v1598_v12 = vadd.f32 %v1596_v30, %v1551_v8  ;;  %vm1731_vm1 = vcmask 744448   ;;  %v1826_v23 = vsel %vm8728_vm7, %v8727_v15, %v8726_v17  ;;  %v8730_v8 = vld [vmem:[#allocation96_spill] sm:$0xff]  ;;  %vm8749_vm7 = vmmov %vm8746_vm12 }
 0x9f9   : > { %v7576_v59 = vmul.f32 %v2763_v46, %v2745_v7  ;;  %v1689_v7 = vmul.f32 %v1685_v63, %v8718_v40  ;;  %v1732_v37 = vsel %vm1731_vm1, %v8720_v21, %v8719_v25  ;;  %v1733_v51 = vsel %vm1731_vm1, %v8719_v25, %v8724_v32  ;;  %v8741_v40 = vld [vmem:[#allocation119_spill] sm:$0xff]  ;;  %v8742_v25 = vld [vmem:[#allocation104_spill] sm:$0xff] }
 0x9fa   : > { %v1645_v26 = vadd.f32 %v1643_v1, %v1598_v12  ;;  %v1736_v52 = vmul.f32 %v1732_v37, %v8723_v35  ;;  %v1827_v46 = vsel %vm8731_vm4, %v8726_v17, %v8730_v8  ;;  %v1784_v30 = vmul.f32 %v1780_v2, %v8729_v38  ;;  %v8739_v1 = vld [vmem:[#allocation102_spill] sm:$0xff]  ;;  %v2958_v37 = vld [vmem:[%s8441_s5] sm:$0xf] }
 0x9fb   : > { %v1691_v0 = vadd.f32 %v1689_v7, %v1644_v28  ;;  %v1830_v5 = vmul.f32 %v1826_v23, %v8735_v61  ;;  %v1831_v12 = vmul.f32 %v1827_v46, %v8735_v61  ;;  %v8738_v28 = vld [vmem:[#allocation47_spill] sm:$0xff]  ;;  %vm8740_vm1 = vcmask 637952   ;;  %v8748_v32 = vld [vmem:[#allocation108_spill] sm:$0xff]  ;;  %v8751_v17 = vld [vmem:[#allocation110_spill] sm:$0xff] }
 0x9fc   : > { %2883 = vperm.xlu0 %5439, %v2864_v48   ;;  %v1692_v31 = vadd.f32 %v1690_v3, %v1645_v26  ;;  %v1737_v48 = vmul.f32 %v1733_v51, %v8723_v35  ;;  %v1920_v39 = vsel %vm8740_vm1, %v8739_v1, %v8738_v28  ;;  %v1877_v7 = vmul.f32 %v1873_v60, %v8741_v40  ;;  %vm8743_vm3 = vmmov %vm8740_vm1  ;;  %v8744_v3 = vld [vmem:[#allocation48_spill] sm:$0xff]  ;;  %v8747_v35 = vld [vmem:[#allocation121_spill] sm:$0xff] }
 0x9fd   : > { %v1738_v53 = vadd.f32 %v1736_v52, %v1691_v0  ;;  %v1921_v21 = vsel %vm8743_vm3, %v8738_v28, %v8742_v25  ;;  %v1966_v20 = vsel %vm8746_vm12, %v8745_v13, %v8744_v3  ;;  %v1924_v52 = vmul.f32 %v1920_v39, %v8747_v35  ;;  %v8756_v60 = vld [vmem:[#allocation125_spill] sm:$0xff]  ;;  %v8759_v28 = vld [vmem:[#allocation118_spill] sm:$0xff] }
 0x9fe   : > { %v1739_v63 = vadd.f32 %v1737_v48, %v1692_v31  ;;  %v1967_v51 = vsel %vm8749_vm7, %v8744_v3, %v8748_v32  ;;  %vm2059_vm4 = vcmask 613376   ;;  %v1925_v2 = vmul.f32 %v1921_v21, %v8747_v35  ;;  %v8750_v31 = vld [vmem:[#allocation49_spill] sm:$0xff]  ;;  %v8754_v48 = vld [vmem:[#allocation50_spill] sm:$0xff]  ;;  %v3719_v21 = vld [vmem:[%s8762_s13] sm:$0xf]  ;;  %s8853_s13 = sld [smem:[#allocation22_spill]] }
 0x9ff   : > { %v1785_v11 = vadd.f32 %v1783_v62, %v1738_v53  ;;  %v2013_v15 = vsel %vm2012_vm8, %v8751_v17, %v8750_v31  ;;  %v8752_v53 = vld [vmem:[#allocation123_spill] sm:$0xff]  ;;  %v8753_v62 = vld [vmem:[#allocation113_spill] sm:$0xff]  ;;  %v8764_v3 = vld [vmem:[#allocation122_spill] sm:$0xff]  ;;  %vm8771_vm1 = vcmask 515072   ;;  %vm8778_vm12 = vcmask 506880  }
 0xa00   : > { %v1786_v26 = vadd.f32 %v1784_v30, %v1739_v63  ;;  %v1970_v38 = vmul.f32 %v1966_v20, %v8752_v53  ;;  %v2014_v8 = vsel %vm2012_vm8, %v8750_v31, %v8753_v62  ;;  %v8755_v30 = vld [vmem:[#allocation114_spill] sm:$0xff]  ;;  %v2017_v61 = vmul.f32 %v2013_v15, %v8756_v60  ;;  %vm8775_vm3 = vmmov %vm8771_vm1 }
 0xa01   : > { %v1832_v16 = vadd.f32 %v1830_v5, %v1785_v11  ;;  %v8757_v5 = vld [vmem:[#allocation116_spill] sm:$0xff]  ;;  %v2018_v63 = vmul.f32 %v2014_v8, %v8756_v60  ;;  %v8760_v11 = vld [vmem:[#allocation127_spill] sm:$0xff]  ;;  %vm8765_vm8 = vcmask 523264   ;;  %v8769_v31 = vld [vmem:[#allocation62_spill] sm:$0xff] }
 0xa02   : > { %v1833_v19 = vadd.f32 %v1831_v12, %v1786_v26  ;;  %v8758_v12 = vld [vmem:[#allocation51_spill] sm:$0xff]  ;;  %v8770_v17 = vld [vmem:[#allocation126_spill] sm:$0xff]  ;;  %v8774_v8 = vld [vmem:[#allocation128_spill] sm:$0xff] }
 0xa03   : > { %v1879_v23 = vadd.f32 %v1877_v7, %v1832_v16  ;;  %v2107_v1 = vsel %vm2106_vm15, %v8759_v28, %v8758_v12  ;;  %v8761_v7 = vld [vmem:[#allocation120_spill] sm:$0xff]  ;;  %v8766_v16 = vld [vmem:[#allocation129_spill] sm:$0xff]  ;;  %v2200_v15 = vsel %vm8771_vm1, %v8770_v17, %v8769_v31  ;;  %vm8781_vm7 = vmmov %vm8778_vm12 }
 0xa04   : > { %2988 = vrot.lane.b32.xlu0 %v7318_v36, %s5856_s23  ;;  %v8736_v36 = vld [vmem:[#allocation100_spill] sm:$0xff]  ;;  %v2108_v25 = vsel %vm2106_vm15, %v8758_v12, %v8761_v7  ;;  %v2111_v35 = vmul.f32 %v2107_v1, %v8766_v16  ;;  %v8782_v28 = vld [vmem:[#allocation87_spill] sm:$0xff]  ;;  %v8783_v1 = vld [vmem:[#allocation133_spill] sm:$0xff]  ;;  %vm8788_vm15 = vcmask 490496   ;;  %s8806_s23 = smov %s8805_s27 }
 0xa05   : > { %5441 = vset.pattern.permute.xlu0 %v5863_v42  ;;  %v1874_v10 = vsel %vm8737_vm10, %v8732_v55, %v8736_v36  ;;  %v1971_v42 = vmul.f32 %v1967_v51, %v8752_v53  ;;  %v2060_v55 = vsel %vm2059_vm4, %v8755_v30, %v8754_v48  ;;  %v1926_v14 = vadd.f32 %v1924_v52, %v1879_v23  ;;  %v8767_v52 = vld [vmem:[#allocation124_spill] sm:$0xff]  ;;  %vm8768_vm10 = vmmov %vm8765_vm8  ;;  %v8793_v17 = vld [vmem:[#allocation137_spill] sm:$0xff] }
 0xa06   : > { %v1878_v0 = vmul.f32 %v1874_v10, %v8741_v40  ;;  %v2061_v36 = vsel %vm2059_vm4, %v8754_v48, %v8757_v5  ;;  %v2064_v40 = vmul.f32 %v2060_v55, %v8760_v11  ;;  %v8776_v55 = vld [vmem:[#allocation74_spill] sm:$0xff]  ;;  %vm2387_vm4 = vcmask 482304  }
 0xa07   : > { %v1972_v39 = vadd.f32 %v1970_v38, %v1926_v14  ;;  %v2065_v26 = vmul.f32 %v2061_v36, %v8760_v11  ;;  %v8773_v38 = vld [vmem:[#allocation131_spill] sm:$0xff]  ;;  %v8777_v14 = vld [vmem:[#allocation130_spill] sm:$0xff]  ;;  %v8780_v36 = vld [vmem:[#allocation132_spill] sm:$0xff] }
 0xa08   : > { %v1880_v46 = vadd.f32 %v1878_v0, %v1833_v19  ;;  %v8763_v0 = vld [vmem:[#allocation53_spill] sm:$0xff]  ;;  %v2247_v60 = vsel %vm8778_vm12, %v8777_v14, %v8776_v55  ;;  %v8779_v5 = vld [vmem:[#allocation134_spill] sm:$0xff]  ;;  %vm2573_vm12 = vcmask 375808  }
 0xa09   : > { %v2153_v13 = vsel %vm8765_vm8, %v8764_v3, %v8763_v0  ;;  %v2019_v20 = vadd.f32 %v2017_v61, %v1972_v39  ;;  %v2154_v32 = vsel %vm8768_vm10, %v8763_v0, %v8767_v52  ;;  %v2294_v39 = vsel %vm2293_vm13, %v8783_v1, %v8782_v28  ;;  %v8786_v3 = vld [vmem:[#allocation111_spill] sm:$0xff]  ;;  %vm8791_vm8 = vmmov %vm8788_vm15 }
 0xa0a   : > { %v1927_v10 = vadd.f32 %v1925_v2, %v1880_v46  ;;  %v2112_v2 = vmul.f32 %v2108_v25, %v8766_v16  ;;  %v2157_v62 = vmul.f32 %v2153_v13, %v8773_v38  ;;  %v2201_v46 = vsel %vm8775_vm3, %v8769_v31, %v8774_v8  ;;  %v8785_v25 = vld [vmem:[#allocation135_spill] sm:$0xff]  ;;  %v8787_v13 = vld [vmem:[#allocation138_spill] sm:$0xff]  ;;  %v8796_v8 = vld [vmem:[#allocation144_spill] sm:$0xff] }
 0xa0b   : > { %v2066_v53 = vadd.f32 %v2064_v40, %v2019_v20  ;;  %v2158_v30 = vmul.f32 %v2154_v32, %v8773_v38  ;;  %v2205_v12 = vmul.f32 %v2201_v46, %v8779_v5  ;;  %v8784_v40 = vld [vmem:[#allocation136_spill] sm:$0xff]  ;;  %v2341_v20 = vsel %vm8788_vm15, %v8787_v13, %v8786_v3  ;;  %v8795_v38 = vld [vmem:[#allocation141_spill] sm:$0xff] }
 0xa0c   : > { %2977 = vperm.xlu0 %5441, %v2958_v37   ;;  %v1973_v37 = vadd.f32 %v1971_v42, %v1927_v10  ;;  %v5864_v42 = vmov 48   ;;  %v2248_v10 = vsel %vm8781_vm7, %v8776_v55, %v8780_v36  ;;  %v2251_v7 = vmul.f32 %v2247_v60, %v8784_v40  ;;  %v8790_v32 = vld [vmem:[#allocation140_spill] sm:$0xff]  ;;  %v8797_v55 = vld [vmem:[#allocation143_spill] sm:$0xff] }
 0xa0d   : > { %v2113_v61 = vadd.f32 %v2111_v35, %v2066_v53  ;;  %v2252_v0 = vmul.f32 %v2248_v10, %v8784_v40  ;;  %v8789_v35 = vld [vmem:[#allocation139_spill] sm:$0xff]  ;;  %v2389_v46 = vsel %vm2387_vm4, %v8793_v17, %v8796_v8  ;;  %vm8799_vm10 = vcmask 392192  }
 0xa0e   : > { %v2020_v19 = vadd.f32 %v2018_v63, %v1973_v37  ;;  %v3052_v37 = vld [vmem:[%s8441_s5] sm:$0xf]  ;;  %v2298_v52 = vmul.f32 %v2294_v39, %v8789_v35  ;;  %v8798_v60 = vld [vmem:[#allocation147_spill] sm:$0xff]  ;;  %v2393_v36 = vmul.f32 %v2389_v46, %v8797_v55  ;;  %vm8801_vm1 = vmmov %vm8799_vm10  ;;  %vm2526_vm3 = vcmask 384000  }
 0xa0f   : > { %v2159_v11 = vadd.f32 %v2157_v62, %v2113_v61  ;;  %v2345_v62 = vmul.f32 %v2341_v20, %v8795_v38  ;;  %v2480_v40 = vsel %vm8801_vm1, %v7348_v27, %v7356_v56  ;;  %v2804_v20 = vpop.permute.xlu1 %2803  ;;  %vm2620_vm7 = vcmask 367616  }
 0xa10   : > { %v2067_v48 = vadd.f32 %v2065_v26, %v2020_v19  ;;  %v3735_v19 = vld [vmem:[%s8792_s14] sm:$0xf]  ;;  %vm8803_vm15 = vcmask 261120   ;;  %vm2947_vm1 = vcmask 236544  }
 0xa12   : > { %v2114_v63 = vadd.f32 %v2112_v2, %v2067_v48 }
 0xa13   : > { %v3718_v51 = vpop.xlane.xlu0 %3717 }
 0xa14   : > { %v3720_v23 = vadd.f32 %v3719_v21, %v3718_v51  ;;  %3082 = vrot.lane.b32.xlu0 %v7342_v22, %s8772_s0  ;;  %v2204_v22 = vmul.f32 %v2200_v15, %v8779_v5  ;;  %v2295_v21 = vsel %vm2293_vm13, %v8782_v28, %v8785_v25  ;;  %v2160_v26 = vadd.f32 %v2158_v30, %v2114_v63  ;;  %v8794_v15 = vld [vmem:[#allocation142_spill] sm:$0xff]  ;;  %v8800_v28 = vld [vmem:[#allocation145_spill] sm:$0xff]  ;;  %s8808_s0 = smov 16  }
 0xa15   : > { %5443 = vset.pattern.permute.xlu0 %v5864_v42  ;;  %v2342_v51 = vsel %vm8791_vm8, %v8786_v3, %v8790_v32  ;;  %v2299_v31 = vmul.f32 %v2295_v21, %v8789_v35  ;;  %vm2434_vm13 = vcmask 474112   ;;  %v2481_v63 = vsel %vm8799_vm10, %v7356_v56, %v7364_v34  ;;  %vm8804_vm8 = vmmov %vm8803_vm15 }
 0xa16   : > { %3730 = vperm.xlu1 %5444, %v3720_v23   ;;  %v2206_v16 = vadd.f32 %v2204_v22, %v2159_v11  ;;  %v2207_v2 = vadd.f32 %v2205_v12, %v2160_v26  ;;  %v2388_v23 = vsel %vm2387_vm4, %v8794_v15, %v8793_v17  ;;  %v2346_v48 = vmul.f32 %v2342_v51, %v8795_v38 }
 0xa17   : > { %v2392_v14 = vmul.f32 %v2388_v23, %v8797_v55  ;;  %v2435_v61 = vsel %vm2434_vm13, %v8798_v60, %v7323_v18  ;;  %v2436_v5 = vsel %vm2434_vm13, %v7323_v18, %v7336_v6  ;;  %v3736_v18 = vld [vmem:[%s8802_s15] sm:$0xf]  ;;  %v2485_v25 = vmul.f32 %v2481_v63, %v7366_v57 }
 0xa18   : > { %v2253_v53 = vadd.f32 %v2251_v7, %v2206_v16  ;;  %v2254_v42 = vadd.f32 %v2252_v0, %v2207_v2  ;;  %v2439_v1 = vmul.f32 %v2435_v61, %v8800_v28  ;;  %v2440_v39 = vmul.f32 %v2436_v5, %v8800_v28  ;;  %v2848_v2 = vpop.permute.xlu1 %2847 }
 0xa19   : > { %v2484_v7 = vmul.f32 %v2480_v40, %v7366_v57  ;;  %v2622_v23 = vsel %vm2620_vm7, %v7454_v44, %v7414_v49  ;;  %vm2714_vm4 = vcmask 351232   ;;  %vm2853_vm13 = vcmask 252928  }
 0xa1a   : > { %v2300_v30 = vadd.f32 %v2298_v52, %v2253_v53  ;;  %v2301_v22 = vadd.f32 %v2299_v31, %v2254_v42  ;;  %v2716_v55 = vsel %vm2714_vm4, %v7529_v58, %v7502_v47  ;;  %vm2900_vm10 = vcmask 244736  }
 0xa1c   : > { %3071 = vperm.xlu0 %5443, %v3052_v37   ;;  %v2347_v10 = vadd.f32 %v2345_v62, %v2300_v30  ;;  %v2348_v12 = vadd.f32 %v2346_v48, %v2301_v22 }
 0xa1e   : > { %3784 = vperm.xlu1 %5444, %v3735_v19   ;;  %v2394_v11 = vadd.f32 %v2392_v14, %v2347_v10  ;;  %v2395_v6 = vadd.f32 %v2393_v36, %v2348_v12 }
 0xa20   : > { %v2442_v34 = vadd.f32 %v2440_v39, %v2395_v6  ;;  %v2441_v21 = vadd.f32 %v2439_v1, %v2394_v11  ;;  %v2852_v17 = vpop.permute.xlu1 %2851 }
 0xa22   : > { %v2486_v56 = vadd.f32 %v2484_v7, %v2441_v21  ;;  %v2487_v0 = vadd.f32 %v2485_v25, %v2442_v34 }
 0xa24   : > { %5446 = vset.pattern.permute.xlu0 %v8583_v41 }
 0xa26   : > { %3791 = vperm.xlu1 %5444, %v3736_v18   ;;  %v2523_v37 = vpop.permute.xlu0 %2522 }
 0xa27   : > { %v2527_v26 = vsel %vm2526_vm3, %v7370_v54, %v2523_v37  ;;  %v2528_v27 = vsel %vm2526_vm3, %v2523_v37, %v7380_v9  ;;  %v2806_v9 = vpop.permute.xlu2 %2805  ;;  %vm2994_vm3 = vcmask 228352  }
 0xa28   : > { %v2531_v3 = vmul.f32 %v2527_v26, %v7409_v50  ;;  %v2532_v13 = vmul.f32 %v2528_v27, %v7409_v50  ;;  %v2897_v48 = vpop.permute.xlu1 %2896  ;;  %v2808_v12 = vsel %vm8803_vm15, %v2804_v20, %v2806_v9 }
 0xa2a   : > { %v2533_v16 = vadd.f32 %v2531_v3, %v2486_v56  ;;  %v2534_v57 = vadd.f32 %v2532_v13, %v2487_v0 }
 0xa2e   : > { %v2570_v35 = vpop.permute.xlu0 %2569 }
 0xa2f   : > { %v2574_v41 = vsel %vm2573_vm12, %v7372_v33, %v2570_v35  ;;  %v2575_v52 = vsel %vm2573_vm12, %v2570_v35, %v7433_v43  ;;  %v2850_v50 = vpop.permute.xlu2 %2849  ;;  %vm3041_vm12 = vcmask 220160  }
 0xa30   : > { %v2578_v32 = vmul.f32 %v2574_v41, %v7385_v4  ;;  %v2579_v54 = vmul.f32 %v2575_v52, %v7385_v4  ;;  %v2942_v22 = vpop.permute.xlu1 %2941  ;;  %v2854_v37 = vsel %vm2853_vm13, %v2848_v2, %v2850_v50  ;;  %v2855_v26 = vsel %vm2853_vm13, %v2850_v50, %v2852_v17 }
 0xa31   : > { %vm3797_vm13 = vcmask 273408  }
 0xa32   : > { %v2580_v51 = vadd.f32 %v2578_v32, %v2533_v16  ;;  %v2581_v19 = vadd.f32 %v2579_v54, %v2534_v57 }
 0xa36   : > { %v2615_v31 = vpop.permute.xlu0 %2614 }
 0xa37   : > { %v2621_v15 = vsel %vm2620_vm7, %v2615_v31, %v7454_v44  ;;  %v2837_v46 = vpop.permute.xlu2 %2836  ;;  %vm3088_vm7 = vcmask 211968  }
 0xa38   : > { %v2946_v63 = vpop.permute.xlu1 %2945  ;;  %v2858_v3 = vmul.f32 %v2854_v37, %v2837_v46  ;;  %v2859_v13 = vmul.f32 %v2855_v26, %v2837_v46 }
 0xa3e   : > { %v2604_v33 = vpop.permute.xlu0 %2603 }
 0xa3f   : > { %v2625_v53 = vmul.f32 %v2621_v15, %v2604_v33  ;;  %v2626_v43 = vmul.f32 %v2622_v23, %v2604_v33  ;;  %v2899_v60 = vpop.permute.xlu2 %2898 }
 0xa40   : > { %v2991_v18 = vpop.permute.xlu1 %2990  ;;  %v2902_v56 = vsel %vm2900_vm10, %v2897_v48, %v2899_v60 }
 0xa41   : > { %v2627_v38 = vadd.f32 %v2625_v53, %v2580_v51  ;;  %v2628_v62 = vadd.f32 %v2626_v43, %v2581_v19 }
 0xa43   : > { %v2674_v4 = vadd.f32 %v7489_v24, %v2627_v38  ;;  %v2675_v8 = vadd.f32 %v7511_v29, %v2628_v62 }
 0xa46   : > { %v2709_v42 = vpop.permute.xlu0 %2708 }
 0xa47   : > { %v2715_v30 = vsel %vm2714_vm4, %v2709_v42, %v7529_v58  ;;  %v2944_v10 = vpop.permute.xlu2 %2943 }
 0xa48   : > { %v2948_v52 = vsel %vm2947_vm1, %v2942_v22, %v2944_v10  ;;  %v2949_v32 = vsel %vm2947_vm1, %v2944_v10, %v2946_v63  ;;  %vm3812_vm1 = vcmask 134144  }
 0xa4e   : > { %v2698_v14 = vpop.permute.xlu0 %2697 }
 0xa4f   : > { %v2719_v49 = vmul.f32 %v2715_v30, %v2698_v14  ;;  %v2720_v44 = vmul.f32 %v2716_v55, %v2698_v14  ;;  %v2931_v40 = vpop.permute.xlu2 %2930 }
 0xa50   : > { %v2952_v50 = vmul.f32 %v2948_v52, %v2931_v40  ;;  %v2953_v17 = vmul.f32 %v2949_v32, %v2931_v40 }
 0xa51   : > { %v2721_v61 = vadd.f32 %v2719_v49, %v2674_v4  ;;  %v2722_v5 = vadd.f32 %v2720_v44, %v2675_v8 }
 0xa53   : > { %v2768_v24 = vadd.f32 %v7555_v45, %v2721_v61  ;;  %v2769_v29 = vadd.f32 %v7576_v59, %v2722_v5  ;;  %v3036_v45 = vpop.permute.xlu1 %3035 }
 0xa56   : > { %v2802_v36 = vpop.permute.xlu0 %2801 }
 0xa57   : > { %v2807_v28 = vsel %vm8804_vm8, %v2802_v36, %v2804_v20  ;;  %v2993_v7 = vpop.permute.xlu2 %2992 }
 0xa58   : > { %v2996_v19 = vsel %vm2994_vm3, %v2991_v18, %v2993_v7 }
 0xa5b   : > { %v3040_v21 = vpop.permute.xlu1 %3039 }
 0xa5e   : > { %v2791_v1 = vpop.permute.xlu0 %2790 }
 0xa5f   : > { %v2811_v47 = vmul.f32 %v2807_v28, %v2791_v1  ;;  %v2812_v58 = vmul.f32 %v2808_v12, %v2791_v1  ;;  %v3038_v59 = vpop.permute.xlu2 %3037 }
 0xa60   : > { %v3042_v43 = vsel %vm3041_vm12, %v3036_v45, %v3038_v59  ;;  %v3043_v38 = vsel %vm3041_vm12, %v3038_v59, %v3040_v21 }
 0xa61   : > { %v2813_v39 = vadd.f32 %v2811_v47, %v2768_v24  ;;  %v2814_v11 = vadd.f32 %v2812_v58, %v2769_v29 }
 0xa63   : > { %v2860_v35 = vadd.f32 %v2858_v3, %v2813_v39  ;;  %v2861_v41 = vadd.f32 %v2859_v13, %v2814_v11  ;;  %v3085_v54 = vpop.permute.xlu1 %3084 }
 0xa66   : > { %v2895_v6 = vpop.permute.xlu0 %2894 }
 0xa67   : > { %v2901_v0 = vsel %vm2900_vm10, %v2895_v6, %v2897_v48  ;;  %v3025_v57 = vpop.permute.xlu2 %3024  ;;  %vm3809_vm10 = vcmask 1043592  }
 0xa68   : > { %v3046_v42 = vmul.f32 %v3042_v43, %v3025_v57  ;;  %v3047_v48 = vmul.f32 %v3043_v38, %v3025_v57  ;;  %v5138_v43 = vld [vmem:[%s8806_s23 + $0x3] ss:$8 sm:$0x3] }
 0xa69   : > { %v3911_v38 = vperm.slane %v5138_v43, 0 }
 0xa6b   : > { %v3101_v46 = vpop.permute.xlu1 %3100 }
 0xa6e   : > { %v2884_v25 = vpop.permute.xlu0 %2883 }
 0xa6f   : > { %v2905_v20 = vmul.f32 %v2901_v0, %v2884_v25  ;;  %v2906_v16 = vmul.f32 %v2902_v56, %v2884_v25  ;;  %v3087_v8 = vpop.permute.xlu2 %3086 }
 0xa70   : > { %v3090_v30 = vsel %vm3088_vm7, %v3085_v54, %v3087_v8 }
 0xa71   : > { %v2907_v9 = vadd.f32 %v2905_v20, %v2860_v35  ;;  %v2908_v51 = vadd.f32 %v2906_v16, %v2861_v41 }
 0xa73   : > { %v2954_v33 = vadd.f32 %v2952_v50, %v2907_v9  ;;  %v2955_v53 = vadd.f32 %v2953_v17, %v2908_v51 }
 0xa76   : > { %v2989_v34 = vpop.permute.xlu0 %2988 }
 0xa77   : > { %v2995_v2 = vsel %vm2994_vm3, %v2989_v34, %v2991_v18  ;;  %v3724_v36 = vpop.permute.xlu2 %3723  ;;  %vm8810_vm3 = vcmask 1047556  }
 0xa78   : > { %vm3810_vm12 = vmor %vm8810_vm3, %vm3809_vm10  ;;  %vm8816_vm10 = vcmask 146432   ;;  %vm8818_vm3 = vcmask 269312  }
 0xa7e   : > { %v2978_v27 = vpop.permute.xlu0 %2977 }
 0xa7f   : > { %v2999_v15 = vmul.f32 %v2995_v2, %v2978_v27  ;;  %v3000_v23 = vmul.f32 %v2996_v19, %v2978_v27 }
 0xa81   : > { %v3001_v62 = vadd.f32 %v2999_v15, %v2954_v33  ;;  %v3002_v4 = vadd.f32 %v3000_v23, %v2955_v53 }
 0xa83   : > { %v3048_v49 = vadd.f32 %v3046_v42, %v3001_v62  ;;  %v3049_v44 = vadd.f32 %v3047_v48, %v3002_v4  ;;  %v3912_v62 = vperm.slane %v5138_v43, 1 }
 0xa85   : > { %v3913_v8 = vrot.slane %v3912_v62, 4 }
 0xa86   : > { %v3083_v31 = vpop.permute.xlu0 %3082 }
 0xa87   : > { %v3089_v55 = vsel %vm3088_vm7, %v3083_v31, %v3085_v54  ;;  %v5139_v54 = vld [vmem:[%s8805_s27 + $0x4] ss:$8 sm:$0x3]  ;;  %vm8811_vm7 = vcmask 138240   ;;  %s8858_s27 = sld [smem:[#allocation171_spill]] }
 0xa88   : > { %v3731_v12 = vpop.permute.xlu1 %3730  ;;  %v3949_v51 = vperm.slane %v5139_v54, 0  ;;  %v3950_v19 = vperm.slane %v5139_v54, 1 }
 0xa8a   : > { %v3951_v31 = vrot.slane %v3950_v19, 4 }
 0xa8c   : > { %v3952_v50 = vsel %vm828_vm0, %v3949_v51, %v3951_v31 }
 0xa8d   : > { %s8859_s5 = smov %s8858_s27 }
 0xa8e   : > { %v3072_v14 = vpop.permute.xlu0 %3071 }
 0xa8f   : > { %v3093_v60 = vmul.f32 %v3089_v55, %v3072_v14  ;;  %v3094_v61 = vmul.f32 %v3090_v30, %v3072_v14  ;;  %v3914_v30 = vsel %vm828_vm0, %v3911_v38, %v3913_v8 }
 0xa90   : > { %v3785_v33 = vpop.permute.xlu1 %3784 }
 0xa91   : > { %v3095_v5 = vadd.f32 %v3093_v60, %v3048_v49  ;;  %v3096_v22 = vadd.f32 %v3094_v61, %v3049_v44  ;;  %v5143_v44 = vld [vmem:[%s8806_s23 + $0x10] ss:$8 sm:$0x3] }
 0xa93   : > { %v3103_v24 = vadd.f32 %v3101_v46, %v3095_v5  ;;  %v3104_v29 = vadd.f32 %v3101_v46, %v3096_v22  ;;  %v4099_v5 = vperm.slane %v5143_v44, 0  ;;  %v4100_v22 = vperm.slane %v5143_v44, 1 }
 0xa95   : > { %v3726_v10 = vadd.f32 %v3724_v36, %v3103_v24  ;;  %v3727_v63 = vadd.f32 %v3724_v36, %v3104_v29  ;;  %v5136_v29 = vld [vmem:[%s8806_s23 + $0x1] ss:$8 sm:$0x3] }
 0xa97   : > { %v3733_v28 = vadd.f32 %v3731_v12, %v3726_v10  ;;  %v3734_v1 = vadd.f32 %v3731_v12, %v3727_v63  ;;  %v4101_v10 = vrot.slane %v4100_v22, 4 }
 0xa98   : > { %v3792_v24 = vpop.permute.xlu1 %3791 }
 0xa99   : > { %v3737_v47 = vsel %vm828_vm0, %v3733_v28, 0.0  ;;  %v3738_v58 = vsel %vm828_vm0, %v3734_v1, 0.0  ;;  %v3750_v39 = vmul.f32 %v3733_v28, %v3733_v28  ;;  %v3751_v11 = vmul.f32 %v3734_v1, %v3734_v1 }
 0xa9a   : > { %v3739_v40 = vadd.f32 %v3738_v58, %v3737_v47  ;;  %v3836_v58 = vperm.slane %v5136_v29, 0 }
 0xa9b   : > { %v3752_v18 = vsel %vm828_vm0, %v3750_v39, 0.0  ;;  %v3753_v6 = vsel %vm828_vm0, %v3751_v11, 0.0  ;;  %v5137_v11 = vld [vmem:[%s8806_s23 + $0x2] ss:$8 sm:$0x3] }
 0xa9c   : > { %3740 = vadd.xlane.f32.xlu2 %v3739_v40  ;;  %v3754_v7 = vadd.f32 %v3753_v6, %v3752_v18  ;;  %v3875_v18 = vperm.slane %v5137_v11, 1  ;;  %v3874_v6 = vperm.slane %v5137_v11, 0 }
 0xa9e   : > { %3755 = vadd.xlane.f32.xlu0 %v3754_v7  ;;  %v3876_v7 = vrot.slane %v3875_v18, 4 }
 0xab2   : > { %3953 = vrot.lane.b32.xlu0 %v3952_v50, %s8807_s28 }
 0xab4   : > { %3915 = vrot.lane.b32.xlu2 %v3914_v30, %s8808_s0 }
 0xb0f   : > { %v3741_v25 = vpop.xlane.xlu2 %3740 }
 0xb10   : > { %v3742_v45 = vsel %vm828_vm0, %v3741_v25, 0.0  ;;  %v5587_v25 = vld [vmem:[#allocation4] sm:$0xff] }
 0xb11   : > { %v3743_v34 = vrot.slane %v3742_v45, 4  ;;  %v3756_v59 = vpop.xlane.xlu0 %3755  ;;  %3798 = vst.msk [vmem:[#allocation4 + $0x8] sm:$0xf] %vm3797_vm13, %v5587_v25  ;;  %vm8815_vm13 = vmmov %vm8811_vm7 }
 0xb12   : > { %v3757_v21 = vsel %vm828_vm0, %v3756_v59, 0.0 }
 0xb13   : > { %v3744_v37 = vadd.f32 %v3743_v34, %v3742_v45  ;;  %v3758_v26 = vrot.slane %v3757_v21, 4  ;;  %v5140_v45 = vld [vmem:[%s8806_s23 + $0x5] ss:$8 sm:$0x3]  ;;  %v3877_v34 = vsel %vm828_vm0, %v3874_v6, %v3876_v7 }
 0xb14   : > { %v3987_v59 = vperm.slane %v5140_v45, 1 }
 0xb15   : > { %v3745_v27 = vrot.slane %v3744_v37, 2  ;;  %v3759_v56 = vadd.f32 %v3758_v26, %v3757_v21  ;;  %v3986_v21 = vperm.slane %v5140_v45, 0  ;;  %v5141_v26 = vld [vmem:[%s8806_s23 + $0x6] ss:$8 sm:$0x3] }
 0xb17   : > { %v3746_v0 = vadd.f32 %v3745_v27, %v3744_v37  ;;  %v3760_v3 = vrot.slane %v3759_v56, 2  ;;  %v3988_v37 = vrot.slane %v3987_v59, 4  ;;  %v3916_v30 = vpop.permute.xlu2 %3915 }
 0xb19   : > { %v3747_v13 = vrot.slane %v3746_v0, 1  ;;  %v3761_v20 = vadd.f32 %v3760_v3, %v3759_v56  ;;  %v3989_v27 = vsel %vm828_vm0, %v3986_v21, %v3988_v37  ;;  %v4025_v56 = vperm.slane %v5141_v26, 1 }
 0xb1b   : > { %v3748_v16 = vadd.f32 %v3747_v13, %v3746_v0  ;;  %v3762_v57 = vrot.slane %v3761_v20, 1  ;;  %v4024_v0 = vperm.slane %v5141_v26, 0  ;;  %v4026_v3 = vrot.slane %v4025_v56, 4  ;;  %v5142_v13 = vld [vmem:[%s8806_s23 + $0x7] ss:$8 sm:$0x3] }
 0xb1d   : > { %v3749_v35 = vmul.f32 0.0009765625, %v3748_v16  ;;  %v3763_v41 = vadd.f32 %v3762_v57, %v3761_v20  ;;  %v4027_v20 = vsel %vm828_vm0, %v4024_v0, %v4026_v3  ;;  %v4062_v16 = vperm.slane %v5142_v13, 1 }
 0xb1e   : > { %v4061_v57 = vperm.slane %v5142_v13, 0 }
 0xb1f   : > { %v3764_v52 = vmul.f32 0.0009765625, %v3763_v41  ;;  %v3765_v32 = vmul.f32 %v3749_v35, %v3749_v35  ;;  %v3767_v42 = vsub.f32 %v3733_v28, %v3749_v35  ;;  %v3768_v48 = vsub.f32 %v3734_v1, %v3749_v35 }
 0xb20   : > { %v3837_v28 = vperm.slane %v5136_v29, 1  ;;  %v4102_v1 = vsel %vm828_vm0, %v4099_v5, %v4101_v10  ;;  %v4063_v35 = vrot.slane %v4062_v16, 4 }
 0xb21   : > { %v3766_v9 = vsub.f32 %v3764_v52, %v3765_v32  ;;  %4103 = vrot.lane.b32.xlu2 %v4102_v1, %s8540_s8  ;;  %v3815_v52 = vld [vmem:[%s8806_s23] ss:$8 sm:$0x3] }
 0xb22   : > { %v3838_v39 = vrot.slane %v3837_v28, 4  ;;  %v4064_v41 = vsel %vm828_vm0, %v4061_v57, %v4063_v35  ;;  %v3818_v54 = vperm.slane %v3815_v52, 1  ;;  %v3817_v19 = vperm.slane %v3815_v52, 0 }
 0xb23   : > { %v3769_v2 = vadd.f32 1e-05, %v3766_v9 }
 0xb24   : > { %v3839_v40 = vsel %vm828_vm0, %v3836_v58, %v3838_v39 }
 0xb25   : > { %5571 = vrsqrt.f32 %v3769_v2  ;;  %vm3776_vm15 = vweird.f32 %v3769_v2 }
 0xb2b   : > { %v5572_v17 = vpop.eup %5571 }
 0xb2c   : > { %v3771_v15 = vmul.f32 %v5572_v17, %v3769_v2  ;;  %vm3777_vm4 = vweird.f32 %v5572_v17  ;;  %v3819_v2 = vrot.slane %v3818_v54, 4 }
 0xb2d   : > { %vm3778_vm8 = vmor %vm3776_vm15, %vm3777_vm4  ;;  %vm8812_vm4 = vcmask 7168   ;;  %vm8813_vm15 = vcmask 15360  }
 0xb2e   : > { %v3772_v23 = vmul.f32 %v5572_v17, %v3771_v15  ;;  %v3820_v50 = vsel %vm828_vm0, %v3817_v19, %v3819_v2 }
 0xb30   : > { %v3773_v53 = vmul.f32 0.5, %v3772_v23 }
 0xb32   : > { %v3774_v4 = vsub.f32 1.5, %v3773_v53 }
 0xb34   : > { %v3775_v46 = vmul.f32 %v5572_v17, %v3774_v4 }
 0xb36   : > { %v3779_v55 = vsel %vm3778_vm8, %v5572_v17, %v3775_v46  ;;  %vm8814_vm8 = vcmask 130048  }
 0xb37   : > { %v3780_v14 = vmul.f32 %v3779_v55, %v3767_v42  ;;  %v3781_v49 = vmul.f32 %v3779_v55, %v3768_v48 }
 0xb39   : > { %v3787_v60 = vmul.f32 %v3785_v33, %v3780_v14  ;;  %v3788_v61 = vmul.f32 %v3785_v33, %v3781_v49  ;;  %v3917_v14 = vrot.slane %v3916_v30, 4 }
 0xb3b   : > { %v3795_v36 = vadd.f32 %v3792_v24, %v3788_v61  ;;  %v3794_v63 = vadd.f32 %v3792_v24, %v3787_v60  ;;  %v3954_v61 = vpop.permute.xlu0 %3953 }
 0xb3d   : > { %v3801_v12 = vrot.slane %v3795_v36, 4  ;;  %v3955_v36 = vrot.slane %v3954_v61, 4 }
 0xb3f   : > { %v3802_v47 = vsel %vm828_vm0, %v3794_v63, %v3801_v12  ;;  %v3918_v12 = vsel %vm8814_vm8, %v3917_v14, %v3916_v30  ;;  %v8820_v30 = vld [vmem:[#allocation27_spill] sm:$0xff] }
 0xb40   : > { %3803 = vrot.lane.b32.xlu1 %v3802_v47, %s8807_s28 }
 0xb48   : > { %3840 = vrot.lane.b32.xlu1 %v3839_v40, %s8543_s29  ;;  %v3956_v40 = vsel %vm8815_vm13, %v3955_v36, %v3954_v61  ;;  %vm8825_vm13 = vcmask 293888  }
 0xb50   : > { %3878 = vrot.lane.b32.xlu1 %v3877_v34, %s8574_s6 }
 0xb58   : > { %3990 = vrot.lane.b32.xlu1 %v3989_v27, %s8585_s3 }
 0xb60   : > { %4028 = vrot.lane.b32.xlu1 %v4027_v20, %s8562_s30 }
 0xb68   : > { %4065 = vrot.lane.b32.xlu1 %v4064_v41, %s8809_s4 }
 0xb7b   : > { %v4104_v52 = vpop.permute.xlu2 %4103 }
 0xb7c   : > { %v4105_v19 = vrot.slane %v4104_v52, 4 }
 0xbb2   : > { %v3804_v32 = vpop.permute.xlu1 %3803 }
 0xbb3   : > { %v3805_v9 = vrot.slane %v3804_v32, 4 }
 0xbb5   : > { %v3806_v51 = vsel %vm8811_vm7, %v3805_v9, %v3804_v32  ;;  %3813 = vst.msk [vmem:[#allocation4 + $0x8] sm:$0xf] %vm3812_vm1, %v3805_v9  ;;  %vm8817_vm1 = vcmask 261120   ;;  %vm8821_vm7 = vcmask 777216  }
 0xbb6   : > { %3811 = vst.msk [vmem:[#allocation4] sm:$0xff] %vm3810_vm12, %v3806_v51  ;;  %vm8819_vm12 = vcmask 277504  }
 0xbba   : > { %v3841_v31 = vpop.permute.xlu1 %3840 }
 0xbbb   : > { %v3842_v17 = vrot.slane %v3841_v31, 4 }
 0xbbc   : > { %v3832_v15 = vld [vmem:[#allocation4 + $0x8] sm:$0xf] }
 0xbbd   : > { %v7815_v23 = vld [vmem:[#allocation4] sm:$0xff]  ;;  %v3847_v33 = vmul.f32 %v3842_v17, %v3832_v15  ;;  %v3843_v62 = vsel %vm8812_vm4, %v3842_v17, %v3841_v31  ;;  %v3870_v4 = vld [vmem:[#allocation4 + $0x8] sm:$0xf]  ;;  %vm8822_vm4 = vmmov %vm8821_vm7 }
 0xbbe   : > { %v3822_v53 = vmul.f32 %v3820_v50, %v7815_v23  ;;  %v3846_v42 = vmul.f32 %v3843_v62, %v7815_v23  ;;  %v3907_v49 = vld [vmem:[#allocation4 + $0x8] sm:$0xf]  ;;  %v3921_v47 = vmul.f32 %v3918_v12, %v7815_v23  ;;  %v3959_v45 = vmul.f32 %v3956_v40, %v7815_v23 }
 0xbbf   : > { %3853 = vst [vmem:[#allocation1 + $0x11] ss:$2 sm:$0xff] %v3847_v33  ;;  %v3922_v60 = vmul.f32 %v3917_v14, %v3907_v49  ;;  %v3945_v10 = vld [vmem:[#allocation4 + $0x8] sm:$0xf] }
 0xbc0   : > { %3824 = vst [vmem:[#allocation1] ss:$2 sm:$0xff] %v3822_v53  ;;  %v3960_v28 = vmul.f32 %v3955_v36, %v3945_v10  ;;  %v3982_v18 = vld [vmem:[#allocation4 + $0x8] sm:$0xf] }
 0xbc1   : > { %v4020_v26 = vld [vmem:[#allocation4 + $0x8] sm:$0xf] }
 0xbc2   : > { %v3879_v43 = vpop.permute.xlu1 %3878  ;;  %v4057_v35 = vld [vmem:[#allocation4 + $0x8] sm:$0xf] }
 0xbc3   : > { %v3880_v38 = vrot.slane %v3879_v43, 4  ;;  %v4095_v2 = vld [vmem:[#allocation4 + $0x8] sm:$0xf] }
 0xbc4   : > { %v4110_v50 = vmul.f32 %v4105_v19, %v4095_v2 }
 0xbc5   : > { %v3885_v8 = vmul.f32 %v3880_v38, %v3870_v4  ;;  %v3881_v44 = vsel %vm8813_vm15, %v3880_v38, %v3879_v43  ;;  %v4106_v43 = vsel %vm8819_vm12, %v4105_v19, %v4104_v52  ;;  %vm8823_vm15 = vcmask 769024  }
 0xbc6   : > { %v7819_v46 = vld.sshfl [vmem:[#allocation1 + $0x10] sm:$0xff pattern:$0x75316420]  ;;  %v3884_v22 = vmul.f32 %v3881_v44, %v7815_v23  ;;  %v4109_v62 = vmul.f32 %v4106_v43, %v7815_v23  ;;  %vm8824_vm8 = vmmov %vm8823_vm15 }
 0xbc7   : > { %3890 = vst [vmem:[#allocation1 + $0x10] ss:$2 sm:$0xff] %v3885_v8  ;;  %v3825_v48 = vld.sshfl [vmem:[#allocation1] sm:$0xff pattern:$0x75316420] }
 0xbc8   : > { %v3826_v55 = vld.sshfl [vmem:[#allocation1 + $0x8] sm:$0xff pattern:$0x75316420]  ;;  %3829 = vst [vmem:[#allocation5 + $0x30] sm:$0xf] %v3825_v48 }
 0xbc9   : > { %3851 = vst [vmem:[#allocation1 + $0x1] ss:$2 sm:$0xff] %v3846_v42 }
 0xbca   : > { %3830 = vst [vmem:[#allocation5] sm:$0xf] %v3826_v55  ;;  %v3991_v63 = vpop.permute.xlu1 %3990 }
 0xbcb   : > { %v3992_v11 = vrot.slane %v3991_v63, 4 }
 0xbcd   : > { %v3997_v7 = vmul.f32 %v3992_v11, %v3982_v18  ;;  %v3993_v37 = vsel %vm8816_vm10, %v3992_v11, %v3991_v63  ;;  %vm8826_vm10 = vmmov %vm8825_vm13 }
 0xbce   : > { %v3893_v5 = vld.sshfl [vmem:[#allocation1 + $0x10] sm:$0xff pattern:$0x75316420]  ;;  %v3996_v3 = vmul.f32 %v3993_v37, %v7815_v23  ;;  %v4143_v37 = vld [vmem:[%s8202_s17] sm:$0xff] }
 0xbcf   : > { %3898 = vrot.lane.b32.xlu2 %v3893_v5, %s8600_s1  ;;  %3928 = vst [vmem:[#allocation1 + $0x11] ss:$2 sm:$0xff] %v3922_v60 }
 0xbd0   : > { %v7825_v24 = vld.sshfl [vmem:[#allocation1] sm:$0xff pattern:$0x75316420]  ;;  %v7827_v29 = vld.sshfl [vmem:[#allocation1 + $0x8] sm:$0xff pattern:$0x75316420] }
 0xbd1   : > { %3888 = vst [vmem:[#allocation1] ss:$2 sm:$0xff] %v3884_v22 }
 0xbd2   : > { %v4029_v6 = vpop.permute.xlu1 %4028 }
 0xbd3   : > { %v4030_v21 = vrot.slane %v4029_v6, 4 }
 0xbd5   : > { %v4035_v27 = vmul.f32 %v4030_v21, %v4020_v26  ;;  %v4031_v57 = vsel %vm8817_vm1, %v4030_v21, %v4029_v6  ;;  %vm8827_vm1 = vmmov %vm8826_vm10 }
 0xbd6   : > { %v3931_v1 = vld.sshfl [vmem:[#allocation1 + $0x10] sm:$0xff pattern:$0x75316420]  ;;  %v4034_v54 = vmul.f32 %v4031_v57, %v7815_v23 }
 0xbd7   : > { %3936 = vrot.lane.b32.xlu2 %v3931_v1, %s8615_s10  ;;  %3965 = vst [vmem:[#allocation1 + $0x10] ss:$2 sm:$0xff] %v3960_v28 }
 0xbd8   : > { %v3892_v58 = vld.sshfl [vmem:[#allocation1 + $0x8] sm:$0xff pattern:$0x75316420]  ;;  %v3891_v39 = vld.sshfl [vmem:[#allocation1] sm:$0xff pattern:$0x75316420] }
 0xbd9   : > { %3896 = vrot.lane.b32.xlu1 %v3892_v58, %s8600_s1  ;;  %3894 = vrot.lane.b32.xlu0 %v3891_v39, %s8600_s1  ;;  %3926 = vst [vmem:[#allocation1 + $0x1] ss:$2 sm:$0xff] %v3921_v47 }
 0xbda   : > { %v4066_v56 = vpop.permute.xlu1 %4065 }
 0xbdb   : > { %v4067_v16 = vrot.slane %v4066_v56, 4 }
 0xbdd   : > { %v4072_v41 = vmul.f32 %v4067_v16, %v4057_v35  ;;  %v4068_v31 = vsel %vm8818_vm3, %v4067_v16, %v4066_v56  ;;  %vm8828_vm3 = vmmov %vm8827_vm1 }
 0xbde   : > { %v3968_v25 = vld.sshfl [vmem:[#allocation1 + $0x10] sm:$0xff pattern:$0x75316420]  ;;  %v4071_v15 = vmul.f32 %v4068_v31, %v7815_v23  ;;  %v4144_v23 = vld [vmem:[%s8202_s17 + $0x8] sm:$0xff]  ;;  %v4131_v31 = vld [vmem:[%s8201_s16] sm:$0xff] }
 0xbdf   : > { %3973 = vrot.lane.b32.xlu2 %v3968_v25, %s8604_s26  ;;  %4003 = vst [vmem:[#allocation1 + $0x11] ss:$2 sm:$0xff] %v3997_v7 }
 0xbe0   : > { %v3930_v34 = vld.sshfl [vmem:[#allocation1 + $0x8] sm:$0xff pattern:$0x75316420]  ;;  %v3929_v59 = vld.sshfl [vmem:[#allocation1] sm:$0xff pattern:$0x75316420] }
 0xbe1   : > { %3934 = vrot.lane.b32.xlu1 %v3930_v34, %s8615_s10  ;;  %3932 = vrot.lane.b32.xlu0 %v3929_v59, %s8615_s10  ;;  %3963 = vst [vmem:[#allocation1] ss:$2 sm:$0xff] %v3959_v45 }
 0xbe6   : > { %v4006_v0 = vld.sshfl [vmem:[#allocation1 + $0x10] sm:$0xff pattern:$0x75316420] }
 0xbe7   : > { %4011 = vrot.lane.b32.xlu2 %v4006_v0, %s8618_s24  ;;  %4040 = vst [vmem:[#allocation1 + $0x10] ss:$2 sm:$0xff] %v4035_v27 }
 0xbe8   : > { %v3967_v13 = vld.sshfl [vmem:[#allocation1 + $0x8] sm:$0xff pattern:$0x75316420]  ;;  %v3966_v20 = vld.sshfl [vmem:[#allocation1] sm:$0xff pattern:$0x75316420] }
 0xbe9   : > { %3971 = vrot.lane.b32.xlu1 %v3967_v13, %s8604_s26  ;;  %3969 = vrot.lane.b32.xlu0 %v3966_v20, %s8604_s26  ;;  %4001 = vst [vmem:[#allocation1 + $0x1] ss:$2 sm:$0xff] %v3996_v3 }
 0xbee   : > { %v4043_v32 = vld.sshfl [vmem:[#allocation1 + $0x10] sm:$0xff pattern:$0x75316420] }
 0xbef   : > { %4048 = vrot.lane.b32.xlu2 %v4043_v32, %s8611_s25  ;;  %4078 = vst [vmem:[#allocation1 + $0x11] ss:$2 sm:$0xff] %v4072_v41 }
 0xbf0   : > { %v4005_v9 = vld.sshfl [vmem:[#allocation1 + $0x8] sm:$0xff pattern:$0x75316420]  ;;  %v4004_v51 = vld.sshfl [vmem:[#allocation1] sm:$0xff pattern:$0x75316420] }
 0xbf1   : > { %4009 = vrot.lane.b32.xlu1 %v4005_v9, %s8618_s24  ;;  %4007 = vrot.lane.b32.xlu0 %v4004_v51, %s8618_s24  ;;  %4038 = vst [vmem:[#allocation1] ss:$2 sm:$0xff] %v4034_v54 }
 0xbf6   : > { %v4081_v17 = vld.sshfl [vmem:[#allocation1 + $0x10] sm:$0xff pattern:$0x75316420] }
 0xbf7   : > { %4086 = vrot.lane.b32.xlu2 %v4081_v17, %s8454_s2  ;;  %4115 = vst [vmem:[#allocation1 + $0x10] ss:$2 sm:$0xff] %v4110_v50 }
 0xbf8   : > { %v4042_v33 = vld.sshfl [vmem:[#allocation1 + $0x8] sm:$0xff pattern:$0x75316420]  ;;  %v4041_v53 = vld.sshfl [vmem:[#allocation1] sm:$0xff pattern:$0x75316420] }
 0xbf9   : > { %4046 = vrot.lane.b32.xlu1 %v4042_v33, %s8611_s25  ;;  %4044 = vrot.lane.b32.xlu0 %v4041_v53, %s8611_s25  ;;  %4076 = vst [vmem:[#allocation1 + $0x1] ss:$2 sm:$0xff] %v4071_v15  ;;  %v4132_v15 = vld [vmem:[%s8201_s16 + $0x8] sm:$0xff] }
 0xbfe   : > { %v4118_v38 = vld.sshfl [vmem:[#allocation1 + $0x10] sm:$0xff pattern:$0x75316420] }
 0xbff   : > { %4123 = vrot.lane.b32.xlu2 %v4118_v38, %s8624_s11 }
 0xc00   : > { %v4080_v4 = vld.sshfl [vmem:[#allocation1 + $0x8] sm:$0xff pattern:$0x75316420]  ;;  %v4079_v8 = vld.sshfl [vmem:[#allocation1] sm:$0xff pattern:$0x75316420] }
 0xc01   : > { %4084 = vrot.lane.b32.xlu1 %v4080_v4, %s8454_s2  ;;  %4082 = vrot.lane.b32.xlu0 %v4079_v8, %s8454_s2  ;;  %4113 = vst [vmem:[#allocation1] ss:$2 sm:$0xff] %v4109_v62 }
 0xc07   : > { %3861 = vrot.lane.b32.xlu2 %v7819_v46, %s8584_s7 }
 0xc08   : > { %v4117_v42 = vld.sshfl [vmem:[#allocation1 + $0x8] sm:$0xff pattern:$0x75316420]  ;;  %v4116_v48 = vld.sshfl [vmem:[#allocation1] sm:$0xff pattern:$0x75316420] }
 0xc09   : > { %4121 = vrot.lane.b32.xlu1 %v4117_v42, %s8624_s11  ;;  %4119 = vrot.lane.b32.xlu0 %v4116_v48, %s8624_s11  ;;  %4951 = vst [vmem:[#allocation1] ss:$2 sm:$0xff] %v8820_v30 }
 0xc11   : > { %3859 = vrot.lane.b32.xlu1 %v7827_v29, %s8584_s7  ;;  %3857 = vrot.lane.b32.xlu0 %v7825_v24, %s8584_s7 }
 0xc19   : > { %4152 = vperm.xlu1 %5444, %v4144_v23   ;;  %4147 = vperm.xlu0 %5446, %v4143_v37  }
 0xc29   : > { %v3899_v46 = vpop.permute.xlu2 %3898 }
 0xc31   : > { %v3937_v55 = vpop.permute.xlu2 %3936 }
 0xc39   : > { %v3974_v61 = vpop.permute.xlu2 %3973 }
 0xc41   : > { %v4012_v36 = vpop.permute.xlu2 %4011 }
 0xc49   : > { %v4049_v58 = vpop.permute.xlu2 %4048 }
 0xc4b   : > { %v3895_v14 = vpop.permute.xlu0 %3894  ;;  %v3897_v49 = vpop.permute.xlu1 %3896 }
 0xc4c   : > { %v3900_v44 = vsel %vm932_vm11, %v3895_v14, %v3897_v49  ;;  %v3901_v60 = vsel %vm932_vm11, %v3897_v49, %v3899_v46 }
 0xc4d   : > { %3904 = vst [vmem:[#allocation5 + $0x18] sm:$0xf] %v3900_v44 }
 0xc4e   : > { %3905 = vst [vmem:[#allocation5 + $0x10] sm:$0xf] %v3901_v60 }
 0xc51   : > { %v4087_v25 = vpop.permute.xlu2 %4086 }
 0xc53   : > { %v3935_v5 = vpop.permute.xlu1 %3934  ;;  %v3933_v22 = vpop.permute.xlu0 %3932 }
 0xc54   : > { %v3939_v24 = vsel %vm1167_vm2, %v3935_v5, %v3937_v55  ;;  %v3938_v29 = vsel %vm1167_vm2, %v3933_v22, %v3935_v5 }
 0xc55   : > { %3943 = vst [vmem:[#allocation5 + $0x10] sm:$0xf0] %v3939_v24 }
 0xc56   : > { %3942 = vst [vmem:[#allocation5 + $0x18] sm:$0xf0] %v3938_v29 }
 0xc59   : > { %v4124_v26 = vpop.permute.xlu2 %4123 }
 0xc5b   : > { %v3972_v10 = vpop.permute.xlu1 %3971  ;;  %v3970_v63 = vpop.permute.xlu0 %3969 }
 0xc5c   : > { %v3976_v12 = vsel %vm1214_vm14, %v3972_v10, %v3974_v61  ;;  %v3975_v28 = vsel %vm1214_vm14, %v3970_v63, %v3972_v10  ;;  %v4136_v19 = vld [vmem:[#allocation5 + $0x10] sm:$0xff] }
 0xc5d   : > { %3980 = vst [vmem:[#allocation5 + $0x28] sm:$0xf] %v3976_v12  ;;  %v4135_v2 = vld [vmem:[#allocation5 + $0x18] sm:$0xff] }
 0xc5e   : > { %3979 = vst [vmem:[#allocation5 + $0x48] sm:$0xf] %v3975_v28 }
 0xc61   : > { %v3862_v13 = vpop.permute.xlu2 %3861 }
 0xc63   : > { %v4010_v1 = vpop.permute.xlu1 %4009  ;;  %v4008_v47 = vpop.permute.xlu0 %4007 }
 0xc64   : > { %v4014_v39 = vsel %vm1261_vm6, %v4010_v1, %v4012_v36  ;;  %v4013_v11 = vsel %vm1261_vm6, %v4008_v47, %v4010_v1 }
 0xc65   : > { %4018 = vst [vmem:[#allocation5 + $0x28] sm:$0xf0] %v4014_v39 }
 0xc66   : > { %4017 = vst [vmem:[#allocation5 + $0x48] sm:$0xf0] %v4013_v11 }
 0xc6b   : > { %v4047_v40 = vpop.permute.xlu1 %4046  ;;  %v4045_v18 = vpop.permute.xlu0 %4044 }
 0xc6c   : > { %v4051_v6 = vsel %vm1496_vm9, %v4047_v40, %v4049_v58  ;;  %v4050_v7 = vsel %vm1496_vm9, %v4045_v18, %v4047_v40  ;;  %v4138_v9 = vld [vmem:[#allocation5 + $0x28] sm:$0xff] }
 0xc6d   : > { %4055 = vst [vmem:[#allocation5 + $0x20] sm:$0xf] %v4051_v6  ;;  %v4137_v51 = vld [vmem:[#allocation5 + $0x48] sm:$0xff] }
 0xc6e   : > { %4054 = vst [vmem:[#allocation5 + $0x8] sm:$0xf] %v4050_v7 }
 0xc73   : > { %v4085_v45 = vpop.permute.xlu1 %4084  ;;  %v4083_v34 = vpop.permute.xlu0 %4082 }
 0xc74   : > { %v4089_v59 = vsel %vm8821_vm7, %v4085_v45, %v4087_v25  ;;  %v4088_v21 = vsel %vm8822_vm4, %v4083_v34, %v4085_v45 }
 0xc75   : > { %4093 = vst [vmem:[#allocation5 + $0x20] sm:$0xf0] %v4089_v59 }
 0xc76   : > { %4092 = vst [vmem:[#allocation5 + $0x8] sm:$0xf0] %v4088_v21 }
 0xc7b   : > { %v4122_v27 = vpop.permute.xlu1 %4121  ;;  %v4120_v56 = vpop.permute.xlu0 %4119 }
 0xc7c   : > { %v4126_v0 = vsel %vm8823_vm15, %v4122_v27, %v4124_v26  ;;  %v4125_v3 = vsel %vm8824_vm8, %v4120_v56, %v4122_v27  ;;  %v4140_v32 = vld [vmem:[#allocation5 + $0x20] sm:$0xff]  ;;  %vm8829_vm15 = vcmask 138240   ;;  %vm4360_vm8 = vcmask 1047688  }
 0xc7d   : > { %4130 = vst [vmem:[#allocation5 + $0x38] sm:$0xf] %v4126_v0  ;;  %v4139_v54 = vld [vmem:[#allocation5 + $0x8] sm:$0xff] }
 0xc7e   : > { %4129 = vst [vmem:[#allocation5 + $0x40] sm:$0xf] %v4125_v3 }
 0xc83   : > { %v3860_v20 = vpop.permute.xlu1 %3859  ;;  %v3858_v16 = vpop.permute.xlu0 %3857 }
 0xc84   : > { %v3864_v57 = vsel %vm885_vm5, %v3860_v20, %v3862_v13  ;;  %v3863_v35 = vsel %vm885_vm5, %v3858_v16, %v3860_v20  ;;  %v4142_v41 = vld [vmem:[#allocation5 + $0x38] sm:$0xf] }
 0xc85   : > { %3868 = vst [vmem:[#allocation5] sm:$0xf0] %v3864_v57  ;;  %v4141_v52 = vld [vmem:[#allocation5 + $0x40] sm:$0xf]  ;;  %5147 = vmatpush.msk.msra.mxu1 %vm828_vm0, %v4142_v41 }
 0xc86   : > { %3867 = vst [vmem:[#allocation5 + $0x30] sm:$0xf0] %v3863_v35  ;;  %5144 = vmatpush.msk.msra.mxu0 %vm828_vm0, %v4141_v52 }
 0xc87   : > { %4202 = vmatpush.msra.mxu1 %v4140_v32  ;;  %v4252_v32 = vld [vmem:[%s8204_s19 + $0x8] sm:$0xff] }
 0xc88   : > { %4179 = vmatpush.msra.mxu0 %v4139_v54  ;;  %v4251_v54 = vld [vmem:[%s8204_s19] sm:$0xff] }
 0xc89   : > { %4203 = vmatpush.msra.mxu1 %v4138_v9  ;;  %v4250_v9 = vld [vmem:[%s8203_s18 + $0x8] sm:$0xff] }
 0xc8a   : > { %4180 = vmatpush.msra.mxu0 %v4137_v51  ;;  %v4249_v51 = vld [vmem:[%s8203_s18] sm:$0xff] }
 0xc8b   : > { %4204 = vmatpush.msra.mxu1 %v4136_v19  ;;  %v4148_v33 = vpop.permute.xlu0 %4147  ;;  %v4153_v23 = vpop.permute.xlu1 %4152 }
 0xc8c   : > { %4181 = vmatpush.msra.mxu0 %v4135_v2  ;;  %v4134_v50 = vld [vmem:[#allocation5] sm:$0xff] }
 0xc8d   : > { %v4133_v17 = vld [vmem:[#allocation5 + $0x30] sm:$0xff]  ;;  %4205 = vmatpush.msra.mxu1 %v4134_v50  ;;  %v5156_v2 = vld [vmem:[%s8806_s23 + $0x7] ss:$8 sm:$0x3] }
 0xc8e   : > { %4182 = vmatpush.msra.mxu0 %v4133_v17  ;;  %5148 = vmatmul.msk.f32.vlgmr.msra.gmra.mxu1 %vm8825_vm13, %v4131_v31  ;;  %v4717_v50 = vperm.slane %v5156_v2, 0  ;;  %vm8830_vm13 = vmmov %vm8829_vm15 }
 0xc8f   : > { %5145 = vmatmul.msk.f32.vlgmr.msra.gmra.mxu0 %vm8826_vm10, %v4131_v31  ;;  %v4718_v31 = vperm.slane %v5156_v2, 1  ;;  %vm8831_vm10 = vcmask 269312  }
 0xc96   : > { %5149 = vmatmul.msk.f32.gmra.mxu1 %vm8827_vm1, %v4132_v15  ;;  %vm8832_vm1 = vmmov %vm8830_vm13 }
 0xc97   : > { %5146 = vmatmul.msk.f32.gmra.mxu0 %vm8828_vm3, %v4132_v15  ;;  %vm8833_vm3 = vmmov %vm8832_vm1 }
 0xd0b   : > { %v4207_v53 = vpop.f32.mrf.mxu1 }
 0xd0c   : > { %v4184_v43 = vpop.f32.mrf.mxu0  ;;  %v4208_v38 = vadd.f32 %v4207_v53, %v4148_v33 }
 0xd0d   : > { %v4185_v62 = vadd.f32 %v4184_v43, %v4148_v33 }
 0xd0e   : > { %v4218_v4 = vmul.f32 0.044715, %v4208_v38  ;;  %v4214_v11 = vmul.f32 0.5, %v4208_v38 }
 0xd0f   : > { %v4217_v8 = vmul.f32 0.044715, %v4185_v62  ;;  %v4213_v6 = vmul.f32 0.5, %v4185_v62 }
 0xd10   : > { %v4222_v42 = vmul.f32 %v4218_v4, %v4208_v38 }
 0xd11   : > { %v4221_v48 = vmul.f32 %v4217_v8, %v4185_v62  ;;  %v5155_v8 = vld [vmem:[%s8806_s23 + $0x6] ss:$8 sm:$0x3] }
 0xd12   : > { %v4226_v30 = vmul.f32 %v4222_v42, %v4208_v38  ;;  %v4663_v42 = vperm.slane %v5155_v8, 0 }
 0xd13   : > { %v4225_v46 = vmul.f32 %v4221_v48, %v4185_v62  ;;  %v4210_v55 = vpop.f32.mrf.mxu1  ;;  %v5154_v48 = vld [vmem:[%s8806_s23 + $0x5] ss:$8 sm:$0x3] }
 0xd14   : > { %v4230_v14 = vadd.f32 %v4226_v30, %v4208_v38  ;;  %v4187_v49 = vpop.f32.mrf.mxu0  ;;  %v4211_v44 = vadd.f32 %v4210_v55, %v4153_v23  ;;  %v4664_v30 = vperm.slane %v5155_v8, 1  ;;  %v4609_v55 = vperm.slane %v5154_v48, 0 }
 0xd15   : > { %v4188_v60 = vadd.f32 %v4187_v49, %v4153_v23  ;;  %v4229_v61 = vadd.f32 %v4225_v46, %v4185_v62 }
 0xd16   : > { %v4220_v5 = vmul.f32 0.044715, %v4211_v44  ;;  %v4234_v22 = vmul.f32 0.7978846, %v4230_v14  ;;  %v4216_v56 = vmul.f32 0.5, %v4211_v44 }
 0xd17   : > { %v4219_v24 = vmul.f32 0.044715, %v4188_v60  ;;  %v4233_v29 = vmul.f32 0.7978846, %v4229_v61  ;;  %v4215_v3 = vmul.f32 0.5, %v4188_v60 }
 0xd18   : > { %v4224_v36 = vmul.f32 %v4220_v5, %v4211_v44  ;;  %5573 = vtanh.f32 %v4234_v22  ;;  %v4610_v22 = vperm.slane %v5154_v48, 1 }
 0xd19   : > { %v4223_v10 = vmul.f32 %v4219_v24, %v4188_v60  ;;  %5575 = vtanh.f32 %v4233_v29  ;;  %v5153_v24 = vld [vmem:[%s8806_s23 + $0x4] ss:$8 sm:$0x3] }
 0xd1a   : > { %v4228_v63 = vmul.f32 %v4224_v36, %v4211_v44  ;;  %v4556_v29 = vperm.slane %v5153_v24, 1  ;;  %v4555_v36 = vperm.slane %v5153_v24, 0 }
 0xd1b   : > { %v4227_v12 = vmul.f32 %v4223_v10, %v4188_v60 }
 0xd1c   : > { %v4232_v28 = vadd.f32 %v4228_v63, %v4211_v44 }
 0xd1d   : > { %v4231_v1 = vadd.f32 %v4227_v12, %v4188_v60 }
 0xd1e   : > { %v5574_v47 = vpop.eup %5573  ;;  %v4236_v58 = vmul.f32 0.7978846, %v4232_v28 }
 0xd1f   : > { %v5576_v39 = vpop.eup %5575  ;;  %v4242_v40 = vadd.f32 1.0, %v5574_v47  ;;  %v4235_v18 = vmul.f32 0.7978846, %v4231_v1  ;;  %v5152_v1 = vld [vmem:[%s8806_s23 + $0x3] ss:$8 sm:$0x3] }
 0xd20   : > { %v4241_v7 = vadd.f32 1.0, %v5576_v39  ;;  %5577 = vtanh.f32 %v4236_v58  ;;  %v4501_v58 = vperm.slane %v5152_v1, 0  ;;  %v4502_v39 = vperm.slane %v5152_v1, 1 }
 0xd21   : > { %v7902_v25 = vmul.f32 %v4242_v40, %v4214_v11  ;;  %5579 = vtanh.f32 %v4235_v18 }
 0xd22   : > { %v7904_v45 = vmul.f32 %v4241_v7, %v4213_v6 }
 0xd23   : > { %v4268_v34 = vmul.f32 %v7902_v25, %v7902_v25 }
 0xd24   : > { %v4253_v59 = vadd.f32 %v7902_v25, %v7904_v45  ;;  %v4267_v21 = vmul.f32 %v7904_v45, %v7904_v45 }
 0xd26   : > { %v5578_v37 = vpop.eup %5577  ;;  %4254 = vadd.xlane.f32.xlu2 %v4253_v59  ;;  %v4271_v26 = vadd.f32 %v4268_v34, %v4267_v21 }
 0xd27   : > { %v5580_v27 = vpop.eup %5579  ;;  %v4244_v0 = vadd.f32 1.0, %v5578_v37 }
 0xd28   : > { %4272 = vadd.xlane.f32.xlu0 %v4271_v26  ;;  %v4243_v13 = vadd.f32 1.0, %v5580_v27 }
 0xd29   : > { %v7912_v20 = vmul.f32 %v4244_v0, %v4216_v56 }
 0xd2a   : > { %v7914_v16 = vmul.f32 %v4243_v13, %v4215_v3 }
 0xd2b   : > { %v4270_v57 = vmul.f32 %v7912_v20, %v7912_v20 }
 0xd2c   : > { %v4256_v35 = vadd.f32 %v7912_v20, %v7914_v16  ;;  %v4269_v41 = vmul.f32 %v7914_v16, %v7914_v16 }
 0xd2e   : > { %4257 = vadd.xlane.f32.xlu1 %v4256_v35  ;;  %v4274_v52 = vadd.f32 %v4270_v57, %v4269_v41 }
 0xd30   : > { %4275 = vadd.xlane.f32.xlu2 %v4274_v52 }
 0xd3c   : > { %4327 = vperm.xlu0 %5446, %v4252_v32  }
 0xd44   : > { %4322 = vperm.xlu0 %5446, %v4251_v54  }
 0xd47   : > { %4313 = vperm.xlu1 %5444, %v4250_v9  }
 0xd48   : > { %4308 = vperm.xlu2 %5445, %v4249_v51  }
 0xd4c   : > { %4721 = vrot.lane.b32.xlu0 %v4718_v31, %s8809_s4 }
 0xd4f   : > { %4665 = vrot.lane.b32.xlu1 %v4663_v42, %s8562_s30 }
 0xd50   : > { %4719 = vrot.lane.b32.xlu2 %v4717_v50, %s8809_s4  ;;  %s8855_s4 = sld [smem:[#allocation169_spill]] }
 0xd54   : > { %4611 = vrot.lane.b32.xlu0 %v4609_v55, %s8585_s3 }
 0xd57   : > { %4613 = vrot.lane.b32.xlu1 %v4610_v22, %s8585_s3  ;;  %s5170_s3 = sshll.u32 %s8853_s13, 4 }
 0xd58   : > { %4667 = vrot.lane.b32.xlu2 %v4664_v30, %s8562_s30  ;;  %s788_s30 = sand.u32 1, %s8850_s12   ;;  %s5017_s9 = scalar_lea.hbm %s8858_s27, %s5170_s3 }
 0xd59   : > { %s5132_s20 = sshll.u32 %s788_s30, 4 }
 0xd5c   : > { %4559 = vrot.lane.b32.xlu0 %v4556_v29, %s8807_s28 }
 0xd5f   : > { %4503 = vrot.lane.b32.xlu1 %v4501_v58, %s8808_s0 }
 0xd60   : > { %4557 = vrot.lane.b32.xlu2 %v4555_v36, %s8807_s28 }
 0xd68   : > { %4505 = vrot.lane.b32.xlu2 %v4502_v39, %s8808_s0 }
 0xd99   : > { %v4255_v19 = vpop.xlane.xlu2 %4254 }
 0xd9b   : > { %v4273_v33 = vpop.xlane.xlu0 %4272 }
 0xda1   : > { %v4258_v17 = vpop.xlane.xlu1 %4257 }
 0xda2   : > { %v4259_v15 = vadd.f32 %v4258_v17, %v4255_v19 }
 0xda3   : > { %v4276_v53 = vpop.xlane.xlu2 %4275 }
 0xda4   : > { %v4260_v43 = vrot.slane %v4259_v15, 4  ;;  %v4277_v38 = vadd.f32 %v4276_v53, %v4273_v33 }
 0xda6   : > { %v4261_v62 = vadd.f32 %v4260_v43, %v4259_v15  ;;  %v4278_v4 = vrot.slane %v4277_v38, 4  ;;  %v5157_v15 = vld [vmem:[%s8806_s23 + $0x10] ss:$8 sm:$0x3] }
 0xda7   : > { %v4772_v33 = vperm.slane %v5157_v15, 1 }
 0xda8   : > { %v4262_v23 = vrot.slane %v4261_v62, 2  ;;  %v4279_v46 = vadd.f32 %v4278_v4, %v4277_v38  ;;  %v4771_v38 = vperm.slane %v5157_v15, 0 }
 0xdaa   : > { %v4263_v14 = vadd.f32 %v4262_v23, %v4261_v62  ;;  %v4280_v49 = vrot.slane %v4279_v46, 2 }
 0xdab   : > { %v4309_v57 = vpop.permute.xlu2 %4308 }
 0xdac   : > { %v4264_v44 = vrot.slane %v4263_v14, 1  ;;  %v4281_v60 = vadd.f32 %v4280_v49, %v4279_v46 }
 0xdae   : > { %v4265_v61 = vadd.f32 %v4264_v44, %v4263_v14  ;;  %v4282_v5 = vrot.slane %v4281_v60, 1  ;;  %v4328_v34 = vpop.permute.xlu0 %4327 }
 0xdb0   : > { %v4266_v10 = vmul.f32 0.00024414063, %v4265_v61  ;;  %v4283_v63 = vadd.f32 %v4282_v5, %v4281_v60 }
 0xdb2   : > { %v4285_v12 = vmul.f32 %v4266_v10, %v4266_v10  ;;  %v4284_v28 = vmul.f32 0.00024414063, %v4283_v63  ;;  %v4287_v37 = vsub.f32 %v7904_v45, %v4266_v10  ;;  %v4289_v26 = vsub.f32 %v7914_v16, %v4266_v10 }
 0xdb3   : > { %v4290_v27 = vsub.f32 %v7912_v20, %v4266_v10  ;;  %v4288_v41 = vsub.f32 %v7902_v25, %v4266_v10  ;;  %v5150_v20 = vld [vmem:[%s8806_s23 + $0x1] ss:$8 sm:$0x3]  ;;  %v5151_v25 = vld [vmem:[%s8806_s23 + $0x2] ss:$8 sm:$0x3]  ;;  %v4720_v62 = vpop.permute.xlu2 %4719 }
 0xdb4   : > { %v4286_v47 = vsub.f32 %v4284_v28, %v4285_v12  ;;  %v4393_v31 = vperm.slane %v5150_v20, 0  ;;  %v4447_v50 = vperm.slane %v5151_v25, 0  ;;  %v4448_v53 = vperm.slane %v5151_v25, 1 }
 0xdb5   : > { %v4394_v43 = vperm.slane %v5150_v20, 1 }
 0xdb6   : > { %v4291_v11 = vadd.f32 1e-05, %v4286_v47  ;;  %v4323_v9 = vpop.permute.xlu0 %4322 }
 0xdb8   : > { %5581 = vrsqrt.f32 %v4291_v11  ;;  %vm4298_vm7 = vweird.f32 %v4291_v11 }
 0xdb9   : > { %v4314_v35 = vpop.permute.xlu1 %4313 }
 0xdbb   : > { %v4668_v4 = vpop.permute.xlu2 %4667 }
 0xdbe   : > { %v5582_v40 = vpop.eup %5581  ;;  %v4722_v30 = vpop.permute.xlu0 %4721 }
 0xdbf   : > { %v4293_v18 = vmul.f32 %v5582_v40, %v4291_v11  ;;  %vm4299_vm12 = vweird.f32 %v5582_v40  ;;  %v4723_v5 = vsel %vm8831_vm10, %v4720_v62, %v4722_v30  ;;  %vm8840_vm10 = vcmask 277504  }
 0xdc0   : > { %vm4300_vm4 = vmor %vm4298_vm7, %vm4299_vm12  ;;  %vm8834_vm12 = vcmask 261120   ;;  %vm8835_vm7 = vcmask 146432  }
 0xdc1   : > { %v4294_v6 = vmul.f32 %v5582_v40, %v4293_v18  ;;  %v4666_v48 = vpop.permute.xlu1 %4665 }
 0xdc2   : > { %v4669_v11 = vsel %vm8834_vm12, %v4666_v48, %v4668_v4 }
 0xdc3   : > { %v4295_v7 = vmul.f32 0.5, %v4294_v6  ;;  %v4558_v8 = vpop.permute.xlu2 %4557 }
 0xdc5   : > { %v4296_v59 = vsub.f32 1.5, %v4295_v7 }
 0xdc6   : > { %v4612_v55 = vpop.permute.xlu0 %4611 }
 0xdc7   : > { %v4297_v21 = vmul.f32 %v5582_v40, %v4296_v59 }
 0xdc9   : > { %v4301_v56 = vsel %vm4300_vm4, %v5582_v40, %v4297_v21  ;;  %v4614_v46 = vpop.permute.xlu1 %4613  ;;  %vm8836_vm4 = vmmov %vm8832_vm1 }
 0xdca   : > { %v4302_v0 = vmul.f32 %v4301_v56, %v4287_v37  ;;  %v4304_v3 = vmul.f32 %v4301_v56, %v4289_v26  ;;  %v4305_v13 = vmul.f32 %v4301_v56, %v4290_v27  ;;  %v4303_v51 = vmul.f32 %v4301_v56, %v4288_v41 }
 0xdcb   : > { %v7982_v42 = vpop.permute.xlu2 %4505 }
 0xdcc   : > { %v4316_v52 = vmul.f32 %v4309_v57, %v4302_v0  ;;  %v4318_v32 = vmul.f32 %v4314_v35, %v4304_v3  ;;  %v4319_v54 = vmul.f32 %v4314_v35, %v4305_v13  ;;  %v4317_v16 = vmul.f32 %v4309_v57, %v4303_v51 }
 0xdcd   : > { %v4615_v0 = vsel %vm8835_vm7, %v4612_v55, %v4614_v46 }
 0xdce   : > { %v4330_v19 = vadd.f32 %v4323_v9, %v4316_v52  ;;  %v4332_v45 = vadd.f32 %v4328_v34, %v4318_v32  ;;  %v4333_v2 = vadd.f32 %v4328_v34, %v4319_v54  ;;  %v4331_v17 = vadd.f32 %v4323_v9, %v4317_v16  ;;  %v7987_v49 = vpop.permute.xlu0 %4559 }
 0xdcf   : > { %v4561_v51 = vsel %vm8836_vm4, %v4558_v8, %v7987_v49  ;;  %vm8856_vm4 = vcmask 31744  }
 0xdd0   : > { %4350 = vrot.lane.b32.xlu2 %v4333_v2, %s8807_s28  ;;  %4348 = vrot.lane.b32.xlu1 %v4332_v45, %s8807_s28 }
 0xdd1   : > { %4344 = vrot.lane.b32.xlu0 %v4330_v19, %s8807_s28  ;;  %v7985_v14 = vpop.permute.xlu1 %4503 }
 0xdd8   : > { %4395 = vrot.lane.b32.xlu2 %v4393_v31, %s8543_s29  ;;  %4346 = vrot.lane.b32.xlu1 %v4331_v17, %s8807_s28 }
 0xdd9   : > { %4449 = vrot.lane.b32.xlu0 %v4447_v50, %s8574_s6 }
 0xde0   : > { %4775 = vrot.lane.b32.xlu2 %v4772_v33, %s8540_s8  ;;  %4451 = vrot.lane.b32.xlu1 %v4448_v53, %s8574_s6  ;;  %s5021_s6 = sshll.u32 %s5017_s9, 4  ;;  %s5022_s6 = int_to_ptr.hbm [resolvable:$true] %s5021_s6 }
 0xde1   : > { %4397 = vrot.lane.b32.xlu0 %v4394_v43, %s8543_s29 }
 0xde8   : > { %4773 = vrot.lane.b32.xlu1 %v4771_v38, %s8540_s8 }
 0xe2a   : > { %v4351_v23 = vpop.permute.xlu2 %4350 }
 0xe2b   : > { %4366 = vst.msk [vmem:[#allocation6 + $0x28] sm:$0xff] %vm8829_vm15, %v4351_v23  ;;  %vm8837_vm15 = vcmask 130048  }
 0xe2c   : > { %v4507_v33 = vsel %vm8837_vm15, %v7985_v14, %v7982_v42 }
 0xe32   : > { %v7993_v22 = vld [vmem:[#allocation6 + $0x28] sm:$0xff] }
 0xe33   : > { %v4732_v1 = vmul.f32 %v4722_v30, %v7993_v22  ;;  %v4678_v59 = vmul.f32 %v4668_v4, %v7993_v22  ;;  %v4624_v35 = vmul.f32 %v4614_v46, %v7993_v22  ;;  %v4570_v20 = vmul.f32 %v7993_v22, %v7987_v49 }
 0xe42   : > { %v4349_v44 = vpop.permute.xlu1 %4348 }
 0xe43   : > { %v7990_v60 = vsel %vm8830_vm13, %v4349_v44, %v4351_v23  ;;  %4364 = vst.msk [vmem:[#allocation6 + $0x18] sm:$0xff] %vm4360_vm8, %v4349_v44  ;;  %v4345_v61 = vpop.permute.xlu0 %4344  ;;  %vm8839_vm13 = vcmask 7168  }
 0xe44   : > { %4361 = vst.msk [vmem:[#allocation6] sm:$0xff] %vm4360_vm8, %v4345_v61  ;;  %v4731_v63 = vmul.f32 %v4723_v5, %v7990_v60  ;;  %v4677_v34 = vmul.f32 %v4669_v11, %v7990_v60  ;;  %v4623_v57 = vmul.f32 %v4615_v0, %v7990_v60  ;;  %v4569_v2 = vmul.f32 %v4561_v51, %v7990_v60 }
 0xe45   : > { %vm8838_vm8 = vcmask 15360  }
 0xe4a   : > { %v4347_v24 = vpop.permute.xlu1 %4346  ;;  %v7995_v29 = vld [vmem:[#allocation6 + $0x18] sm:$0xff] }
 0xe4b   : > { %v7998_v36 = vsel %vm8832_vm1, %v4345_v61, %v4347_v24  ;;  %4363 = vst.msk [vmem:[#allocation6 + $0x10] sm:$0xff] %vm8833_vm3, %v4347_v24  ;;  %v4730_v10 = vmul.f32 %v4720_v62, %v7995_v29  ;;  %v8003_v12 = vld [vmem:[#allocation6] sm:$0xff]  ;;  %v4676_v39 = vmul.f32 %v4666_v48, %v7995_v29  ;;  %v4622_v56 = vmul.f32 %v4612_v55, %v7995_v29  ;;  %v4450_v50 = vpop.permute.xlu0 %4449 }
 0xe4c   : > { %v4727_v28 = vmul.f32 %v4720_v62, %v8003_v12  ;;  %v4673_v18 = vmul.f32 %v4666_v48, %v8003_v12  ;;  %v4728_v6 = vmul.f32 %v4723_v5, %v7998_v36  ;;  %v4619_v3 = vmul.f32 %v4612_v55, %v8003_v12 }
 0xe4d   : > { %v5482_v47 = vpack.i.bf16 %v4731_v63, %v4730_v10  ;;  %v5492_v37 = vpack.i.bf16 %v4677_v34, %v4676_v39  ;;  %v4674_v13 = vmul.f32 %v4669_v11, %v7998_v36  ;;  %v5502_v52 = vpack.i.bf16 %v4623_v57, %v4622_v56 }
 0xe4e   : > { %v5447_v58 = vpack.i.bf16 %v4727_v28, %v4732_v1  ;;  %v5452_v26 = vpack.i.bf16 %v4673_v18, %v4678_v59  ;;  %v5457_v32 = vpack.i.bf16 %v4619_v3, %v4624_v35  ;;  %v4568_v9 = vmul.f32 %v4558_v8, %v7995_v29 }
 0xe4f   : > { %5483 = vrot.lane.b32.xlu0 %v5482_v47, %s8454_s2  ;;  %v4565_v19 = vmul.f32 %v4558_v8, %v8003_v12  ;;  %v4620_v45 = vmul.f32 %v4615_v0, %v7998_v36  ;;  %v4514_v15 = vmul.f32 %v7985_v14, %v7995_v29  ;;  %v4511_v43 = vmul.f32 %v7985_v14, %v8003_v12  ;;  %v4396_v14 = vpop.permute.xlu2 %4395 }
 0xe50   : > { %5448 = vrot.lane.b32.xlu1 %v5447_v58, %s8454_s2  ;;  %v5512_v25 = vpack.i.bf16 %v4569_v2, %v4568_v9  ;;  %v4566_v38 = vmul.f32 %v4561_v51, %v7998_v36  ;;  %v4515_v62 = vmul.f32 %v4507_v33, %v7990_v60  ;;  %v4512_v5 = vmul.f32 %v4507_v33, %v7998_v36 }
 0xe51   : > { %v5462_v31 = vpack.i.bf16 %v4565_v19, %v4570_v20  ;;  %v4457_v24 = vmul.f32 %v4450_v50, %v8003_v12  ;;  %v4406_v39 = vmul.f32 %v7995_v29, %v4396_v14  ;;  %v4403_v34 = vmul.f32 %v8003_v12, %v4396_v14 }
 0xe52   : > { %v8011_v40 = vld [vmem:[#allocation6 + $0x10] sm:$0xff]  ;;  %v4452_v53 = vpop.permute.xlu1 %4451  ;;  %v5522_v48 = vpack.i.bf16 %v4515_v62, %v4514_v15  ;;  %vm8842_vm1 = vcmask 777216  }
 0xe53   : > { %v4729_v7 = vmul.f32 %v4722_v30, %v8011_v40  ;;  %v4675_v27 = vmul.f32 %v4668_v4, %v8011_v40  ;;  %v4621_v54 = vmul.f32 %v4614_v46, %v8011_v40  ;;  %v4567_v17 = vmul.f32 %v7987_v49, %v8011_v40  ;;  %v4398_v61 = vpop.permute.xlu0 %4397  ;;  %vm8843_vm3 = vmmov %vm8842_vm1 }
 0xe54   : > { %v4516_v4 = vmul.f32 %v7993_v22, %v7982_v42  ;;  %v4453_v30 = vsel %vm8838_vm8, %v4450_v50, %v4452_v53  ;;  %v4513_v55 = vmul.f32 %v7982_v42, %v8011_v40  ;;  %v4460_v49 = vmul.f32 %v4450_v50, %v7995_v29  ;;  %vm8844_vm12 = vmmov %vm8842_vm1 }
 0xe55   : > { %v5487_v21 = vpack.i.bf16 %v4729_v7, %v4728_v6  ;;  %v5497_v41 = vpack.i.bf16 %v4675_v27, %v4674_v13  ;;  %v5507_v16 = vpack.i.bf16 %v4621_v54, %v4620_v45  ;;  %v5517_v8 = vpack.i.bf16 %v4567_v17, %v4566_v38  ;;  %v4855_v54 = vld [vmem:[%s8206_s21] sm:$0xff]  ;;  %vm8845_vm7 = vmmov %vm8842_vm1 }
 0xe56   : > { %v5467_v23 = vpack.i.bf16 %v4511_v43, %v4516_v4  ;;  %v4461_v46 = vmul.f32 %v4453_v30, %v7990_v60  ;;  %v4462_v44 = vmul.f32 %v7993_v22, %v4452_v53  ;;  %v5527_v63 = vpack.i.bf16 %v4513_v55, %v4512_v5 }
 0xe57   : > { %5488 = vrot.lane.b32.xlu2 %v5487_v21, %s8454_s2  ;;  %5493 = vrot.lane.b32.xlu0 %v5492_v37, %s8611_s25  ;;  %v4399_v28 = vsel %vm8839_vm13, %v4396_v14, %v4398_v61  ;;  %v4458_v42 = vmul.f32 %v4453_v30, %v7998_v36  ;;  %v4459_v47 = vmul.f32 %v4452_v53, %v8011_v40  ;;  %v4776_v6 = vpop.permute.xlu2 %4775  ;;  %s790_s2 = scalar_lea.vmem [#allocation14], %s5132_s20 }
 0xe58   : > { %5453 = vrot.lane.b32.xlu1 %v5452_v26, %s8611_s25  ;;  %v5532_v10 = vpack.i.bf16 %v4461_v46, %v4460_v49  ;;  %v5472_v1 = vpack.i.bf16 %v4457_v24, %v4462_v44  ;;  %v4407_v58 = vmul.f32 %v4399_v28, %v7990_v60  ;;  %v4408_v11 = vmul.f32 %v7993_v22, %v4398_v61  ;;  %s5019_s29 = sshll.u32 %s790_s2, 4  ;;  %s5020_s29 = int_to_ptr.vmem [resolvable:$true] %s5019_s29 }
 0xe59   : > { %v5537_v7 = vpack.i.bf16 %v4459_v47, %v4458_v42  ;;  %v4405_v26 = vmul.f32 %v8011_v40, %v4398_v61  ;;  %v4404_v27 = vmul.f32 %v4399_v28, %v7998_v36  ;;  %v4786_v13 = vmul.f32 %v4776_v6, %v7993_v22 }
 0xe5a   : > { %v4774_v18 = vpop.permute.xlu1 %4773  ;;  %v5542_v59 = vpack.i.bf16 %v4407_v58, %v4406_v39  ;;  %v5477_v37 = vpack.i.bf16 %v4403_v34, %v4408_v11 }
 0xe5b   : > { %v4777_v21 = vsel %vm8840_vm10, %v4774_v18, %v4776_v6  ;;  %v4784_v56 = vmul.f32 %v4774_v18, %v7995_v29  ;;  %v4781_v3 = vmul.f32 %v4774_v18, %v8003_v12  ;;  %v5547_v57 = vpack.i.bf16 %v4405_v26, %v4404_v27 }
 0xe5c   : > { %v4785_v0 = vmul.f32 %v4777_v21, %v7990_v60 }
 0xe5e   : > { %v5552_v35 = vpack.i.bf16 %v4785_v0, %v4784_v56 }
 0xe5f   : > { %5498 = vrot.lane.b32.xlu2 %v5497_v41, %s8611_s25  ;;  %5503 = vrot.lane.b32.xlu0 %v5502_v52, %s8618_s24  ;;  %v5557_v41 = vpack.i.bf16 %v4781_v3, %v4786_v13  ;;  %v4782_v52 = vmul.f32 %v4777_v21, %v7998_v36 }
 0xe60   : > { %5458 = vrot.lane.b32.xlu1 %v5457_v32, %s8618_s24  ;;  %v4783_v32 = vmul.f32 %v4776_v6, %v8011_v40 }
 0xe62   : > { %v5562_v9 = vpack.i.bf16 %v4783_v32, %v4782_v52 }
 0xe67   : > { %5508 = vrot.lane.b32.xlu2 %v5507_v16, %s8618_s24  ;;  %5513 = vrot.lane.b32.xlu0 %v5512_v25, %s8604_s26  ;;  %s5668_s24 = scalar_lea.hbm %s8859_s5, 32 }
 0xe68   : > { %5463 = vrot.lane.b32.xlu1 %v5462_v31, %s8604_s26 }
 0xe6f   : > { %5518 = vrot.lane.b32.xlu2 %v5517_v8, %s8604_s26  ;;  %5523 = vrot.lane.b32.xlu0 %v5522_v48, %s8615_s10 }
 0xe70   : > { %5468 = vrot.lane.b32.xlu1 %v5467_v23, %s8615_s10 }
 0xe77   : > { %5528 = vrot.lane.b32.xlu2 %v5527_v63, %s8615_s10  ;;  %5533 = vrot.lane.b32.xlu0 %v5532_v10, %s8600_s1  ;;  %s8846_s10 = sld [smem:[#allocation168_spill]] }
 0xe78   : > { %5473 = vrot.lane.b32.xlu1 %v5472_v1, %s8600_s1 }
 0xe7f   : > { %5538 = vrot.lane.b32.xlu2 %v5537_v7, %s8600_s1  ;;  %5543 = vrot.lane.b32.xlu0 %v5542_v59, %s8584_s7  ;;  %s8841_s1 = sld [smem:[#allocation170_spill]] }
 0xe80   : > { %5478 = vrot.lane.b32.xlu1 %v5477_v37, %s8584_s7 }
 0xe85   : > { %v4945_v22 = vld [vmem:[%s8841_s1] sm:$0xff]  ;;  %s5006_s1 = scalar_lea.sflag [#allocation11], %s788_s30 }
 0xe87   : > { %5548 = vrot.lane.b32.xlu2 %v5547_v57, %s8584_s7  ;;  %5553 = vrot.lane.b32.xlu0 %v5552_v35, %s8624_s11 }
 0xe88   : > { %5558 = vrot.lane.b32.xlu1 %v5557_v41, %s8624_s11 }
 0xe8f   : > { %4858 = vperm.xlu0 %5446, %v4855_v54   ;;  %5563 = vrot.lane.b32.xlu2 %v5562_v9, %s8624_s11  ;;  %s5662_s11 = sshra.s32 %s5022_s6, 4  ;;  %s5663_s11 = int_to_ptr.hbm [resolvable:$true] %s5662_s11 }
 0xe90   : > { %4948 = vperm.xlu1 %5444, %v4945_v22   ;;  %s5664_s7 = scalar_lea.hbm %s5663_s11, 16  ;;  %p5669_p3 = scmp.lt.s32.totalorder %s5663_s11, %s8859_s5 }
 0xe91   : > { %p5665_p0 = scmp.ne.s32.totalorder %s5663_s11, %s5664_s7  ;;  %p5670_p4 = scmp.lt.s32.totalorder %s5668_s24, %s5664_s7 }
 0xe93   : > { %p5666_p1 = pnand %p5665_p0, %p6031_p5  ;;  %p5671_p7 = por %p5670_p4, %p5669_p3 }
 0xe95   : > { %p5667_p2 = pneg %p5666_p1 }
 0xe97   : > { %p5672_p8 = pnand %p5671_p7, %p5667_p2 }
 0xeb1   : > { %v5489_v51 = vpop.permute.xlu2 %5488 }
 0xeb2   : > { %v5491_v16 = vunpack.i.h.bf16 %v5489_v51  ;;  %v5490_v25 = vunpack.i.l.bf16 %v5489_v51 }
 0xeb4   : > { %v4752_v43 = vsel %vm8845_vm7, %v5490_v25, %v5491_v16 }
 0xeb9   : > { %v5499_v19 = vpop.permute.xlu2 %5498 }
 0xeba   : > { %v5501_v8 = vunpack.i.h.bf16 %v5499_v19  ;;  %v5500_v30 = vunpack.i.l.bf16 %v5499_v19 }
 0xebc   : > { %v4698_v61 = vsel %vm1496_vm9, %v5500_v30, %v5501_v8 }
 0xec1   : > { %v5484_v45 = vpop.permute.xlu0 %5483  ;;  %v5509_v15 = vpop.permute.xlu2 %5508 }
 0xec2   : > { %v5486_v2 = vunpack.i.h.bf16 %v5484_v45  ;;  %v5485_v20 = vunpack.i.l.bf16 %v5484_v45  ;;  %v5449_v40 = vpop.permute.xlu1 %5448  ;;  %v5511_v63 = vunpack.i.h.bf16 %v5509_v15  ;;  %v5510_v1 = vunpack.i.l.bf16 %v5509_v15 }
 0xec3   : > { %v5451_v31 = vunpack.i.h.bf16 %v5449_v40  ;;  %v5450_v50 = vunpack.i.l.bf16 %v5449_v40 }
 0xec4   : > { %v4753_v17 = vsel %vm8842_vm1, %v5485_v20, %v5486_v2  ;;  %v4644_v18 = vsel %vm1261_vm6, %v5510_v1, %v5511_v63 }
 0xec5   : > { %4864 = vmatpush.msra.mxu2 %v4753_v17  ;;  %v4754_v33 = vsel %vm8843_vm3, %v5486_v2, %v5450_v50  ;;  %v4751_v53 = vsel %vm8844_vm12, %v5451_v31, %v5490_v25 }
 0xec6   : > { %4904 = vmatpush.msra.mxu3 %v4754_v33 }
 0xec7   : > { %4865 = vmatpush.msra.mxu2 %v4751_v53 }
 0xec8   : > { %4905 = vmatpush.msra.mxu3 %v4752_v43 }
 0xec9   : > { %v5494_v38 = vpop.permute.xlu0 %5493  ;;  %v5519_v44 = vpop.permute.xlu2 %5518 }
 0xeca   : > { %v5496_v62 = vunpack.i.h.bf16 %v5494_v38  ;;  %v5495_v4 = vunpack.i.l.bf16 %v5494_v38  ;;  %v5454_v48 = vpop.permute.xlu1 %5453  ;;  %v5521_v21 = vunpack.i.h.bf16 %v5519_v44  ;;  %v5520_v26 = vunpack.i.l.bf16 %v5519_v44 }
 0xecb   : > { %v5456_v23 = vunpack.i.h.bf16 %v5454_v48  ;;  %v5455_v46 = vunpack.i.l.bf16 %v5454_v48 }
 0xecc   : > { %v4699_v55 = vsel %vm1496_vm9, %v5495_v4, %v5496_v62  ;;  %v4590_v57 = vsel %vm1214_vm14, %v5520_v26, %v5521_v21 }
 0xecd   : > { %4866 = vmatpush.msra.mxu2 %v4699_v55  ;;  %v4700_v14 = vsel %vm1496_vm9, %v5496_v62, %v5455_v46  ;;  %v4697_v49 = vsel %vm1496_vm9, %v5456_v23, %v5500_v30  ;;  %v4371_v46 = vld [vmem:[%s8806_s23] ss:$8 sm:$0x3] }
 0xece   : > { %4906 = vmatpush.msra.mxu3 %v4700_v14 }
 0xecf   : > { %4867 = vmatpush.msra.mxu2 %v4697_v49  ;;  %v4373_v49 = vperm.slane %v4371_v46, 0 }
 0xed0   : > { %4907 = vmatpush.msra.mxu3 %v4698_v61 }
 0xed1   : > { %v5504_v5 = vpop.permute.xlu0 %5503  ;;  %v5529_v7 = vpop.permute.xlu2 %5528 }
 0xed2   : > { %v5506_v24 = vunpack.i.h.bf16 %v5504_v5  ;;  %v5505_v10 = vunpack.i.l.bf16 %v5504_v5  ;;  %v5459_v28 = vpop.permute.xlu1 %5458  ;;  %v5531_v32 = vunpack.i.h.bf16 %v5529_v7  ;;  %v5530_v9 = vunpack.i.l.bf16 %v5529_v7 }
 0xed3   : > { %v5461_v42 = vunpack.i.h.bf16 %v5459_v28  ;;  %v5460_v47 = vunpack.i.l.bf16 %v5459_v28 }
 0xed4   : > { %v4645_v58 = vsel %vm1261_vm6, %v5505_v10, %v5506_v24  ;;  %v4536_v16 = vsel %vm1167_vm2, %v5530_v9, %v5531_v32  ;;  %v4374_v10 = vperm.slane %v4371_v46, 1 }
 0xed5   : > { %4868 = vmatpush.msra.mxu2 %v4645_v58  ;;  %v4646_v39 = vsel %vm1261_vm6, %v5506_v24, %v5460_v47  ;;  %v4643_v11 = vsel %vm1261_vm6, %v5461_v42, %v5510_v1  ;;  %v4379_v1 = vmul.f32 %v7995_v29, %v4373_v49 }
 0xed6   : > { %4908 = vmatpush.msra.mxu3 %v4646_v39  ;;  %v4380_v39 = vmul.f32 %v4374_v10, %v7990_v60  ;;  %v4378_v29 = vmul.f32 %v4374_v10, %v7998_v36 }
 0xed7   : > { %4869 = vmatpush.msra.mxu2 %v4643_v11  ;;  %v4377_v11 = vmul.f32 %v8003_v12, %v4373_v49  ;;  %v4818_v12 = vld [vmem:[%s8846_s10 + $0x8] sm:$0xff] }
 0xed8   : > { %4909 = vmatpush.msra.mxu3 %v4644_v18  ;;  %v4817_v18 = vld [vmem:[%s8846_s10] sm:$0xff] }
 0xed9   : > { %v5514_v6 = vpop.permute.xlu0 %5513  ;;  %v5539_v22 = vpop.permute.xlu2 %5538 }
 0xeda   : > { %v5516_v34 = vunpack.i.h.bf16 %v5514_v6  ;;  %v5515_v59 = vunpack.i.l.bf16 %v5514_v6  ;;  %v5464_v37 = vpop.permute.xlu1 %5463  ;;  %v5541_v50 = vunpack.i.h.bf16 %v5539_v22  ;;  %v5540_v15 = vunpack.i.l.bf16 %v5539_v22 }
 0xedb   : > { %v5466_v27 = vunpack.i.h.bf16 %v5464_v37  ;;  %v5465_v56 = vunpack.i.l.bf16 %v5464_v37 }
 0xedc   : > { %v4591_v0 = vsel %vm1214_vm14, %v5515_v59, %v5516_v34  ;;  %v4482_v8 = vsel %vm932_vm11, %v5540_v15, %v5541_v50 }
 0xedd   : > { %4870 = vmatpush.msra.mxu2 %v4591_v0  ;;  %v4592_v3 = vsel %vm1214_vm14, %v5516_v34, %v5465_v56  ;;  %v4589_v13 = vsel %vm1214_vm14, %v5466_v27, %v5520_v26  ;;  %vm8847_vm14 = vcmask 769024   ;;  %v4952_v0 = vld.sshfl [vmem:[#allocation1] sm:$0xff pattern:$0x75316420] }
 0xede   : > { %4910 = vmatpush.msra.mxu3 %v4592_v3  ;;  %vm8848_vm6 = vmmov %vm8847_vm14  ;;  %v4953_v3 = vld.sshfl [vmem:[#allocation1 + $0x8] sm:$0xff pattern:$0x75316420] }
 0xedf   : > { %4871 = vmatpush.msra.mxu2 %v4589_v13  ;;  %vm8849_vm9 = vmmov %vm8848_vm6  ;;  %v4944_v13 = vld [vmem:[%s8855_s4] sm:$0xff] }
 0xee0   : > { %4911 = vmatpush.msra.mxu3 %v4590_v57 }
 0xee1   : > { %v5524_v35 = vpop.permute.xlu0 %5523  ;;  %v5549_v38 = vpop.permute.xlu2 %5548 }
 0xee2   : > { %v5526_v41 = vunpack.i.h.bf16 %v5524_v35  ;;  %v5525_v52 = vunpack.i.l.bf16 %v5524_v35  ;;  %v5469_v54 = vpop.permute.xlu1 %5468  ;;  %v5551_v55 = vunpack.i.h.bf16 %v5549_v38  ;;  %v5550_v44 = vunpack.i.l.bf16 %v5549_v38 }
 0xee3   : > { %v5471_v51 = vunpack.i.h.bf16 %v5469_v54  ;;  %v5470_v19 = vunpack.i.l.bf16 %v5469_v54 }
 0xee4   : > { %v4537_v45 = vsel %vm1167_vm2, %v5525_v52, %v5526_v41  ;;  %v4428_v47 = vsel %vm885_vm5, %v5550_v44, %v5551_v55 }
 0xee5   : > { %4872 = vmatpush.msra.mxu2 %v4537_v45  ;;  %v4538_v2 = vsel %vm1167_vm2, %v5526_v41, %v5470_v19  ;;  %v4535_v20 = vsel %vm1167_vm2, %v5471_v51, %v5530_v9 }
 0xee6   : > { %4912 = vmatpush.msra.mxu3 %v4538_v2 }
 0xee7   : > { %4873 = vmatpush.msra.mxu2 %v4535_v20 }
 0xee8   : > { %4913 = vmatpush.msra.mxu3 %v4536_v16 }
 0xee9   : > { %v5534_v40 = vpop.permute.xlu0 %5533  ;;  %v5564_v42 = vpop.permute.xlu2 %5563 }
 0xeea   : > { %v5536_v25 = vunpack.i.h.bf16 %v5534_v40  ;;  %v5535_v31 = vunpack.i.l.bf16 %v5534_v40  ;;  %v5474_v17 = vpop.permute.xlu1 %5473  ;;  %v5566_v34 = vunpack.i.h.bf16 %v5564_v42  ;;  %v5565_v21 = vunpack.i.l.bf16 %v5564_v42 }
 0xeeb   : > { %v5476_v33 = vunpack.i.h.bf16 %v5474_v17  ;;  %v5475_v53 = vunpack.i.l.bf16 %v5474_v17 }
 0xeec   : > { %v4483_v43 = vsel %vm932_vm11, %v5535_v31, %v5536_v25 }
 0xeed   : > { %4874 = vmatpush.msra.mxu2 %v4483_v43  ;;  %v4484_v62 = vsel %vm932_vm11, %v5536_v25, %v5475_v53  ;;  %v4481_v4 = vsel %vm932_vm11, %v5476_v33, %v5540_v15  ;;  %vm8852_vm11 = vmmov %vm8837_vm15 }
 0xeee   : > { %4914 = vmatpush.msra.mxu3 %v4484_v62  ;;  %vm8854_vm2 = vmmov %vm8852_vm11 }
 0xeef   : > { %4875 = vmatpush.msra.mxu2 %v4481_v4  ;;  %vm8857_vm15 = vmmov %vm8856_vm4 }
 0xef0   : > { %4915 = vmatpush.msra.mxu3 %v4482_v8 }
 0xef1   : > { %v5544_v48 = vpop.permute.xlu0 %5543 }
 0xef2   : > { %v5546_v30 = vunpack.i.h.bf16 %v5544_v48  ;;  %v5545_v23 = vunpack.i.l.bf16 %v5544_v48  ;;  %v5479_v14 = vpop.permute.xlu1 %5478 }
 0xef3   : > { %v5481_v61 = vunpack.i.h.bf16 %v5479_v14  ;;  %v5480_v5 = vunpack.i.l.bf16 %v5479_v14 }
 0xef4   : > { %v4429_v24 = vsel %vm885_vm5, %v5545_v23, %v5546_v30 }
 0xef5   : > { %4876 = vmatpush.msra.mxu2 %v4429_v24  ;;  %v4430_v63 = vsel %vm885_vm5, %v5546_v30, %v5480_v5  ;;  %v4427_v28 = vsel %vm885_vm5, %v5481_v61, %v5550_v44  ;;  %vm8851_vm5 = vmmov %vm8848_vm6 }
 0xef6   : > { %4916 = vmatpush.msra.mxu3 %v4430_v63  ;;  %v4806_v36 = vsel %vm8851_vm5, %v5565_v21, %v5566_v34 }
 0xef7   : > { %4877 = vmatpush.msra.mxu2 %v4427_v28 }
 0xef8   : > { %4917 = vmatpush.msra.mxu3 %v4428_v47 }
 0xef9   : > { %v5554_v58 = vpop.permute.xlu0 %5553  ;;  %4878 = vmatpush.msra.mxu2 %v4379_v1 }
 0xefa   : > { %v5556_v6 = vunpack.i.h.bf16 %v5554_v58  ;;  %v5555_v7 = vunpack.i.l.bf16 %v5554_v58  ;;  %v5559_v59 = vpop.permute.xlu1 %5558  ;;  %4918 = vmatpush.msra.mxu3 %v4380_v39 }
 0xefb   : > { %4879 = vmatpush.msra.mxu2 %v4377_v11  ;;  %v5561_v37 = vunpack.i.h.bf16 %v5559_v59  ;;  %v5560_v26 = vunpack.i.l.bf16 %v5559_v59 }
 0xefc   : > { %4880 = vmatmul.f32.vlgmr.msra.gmra.mxu2 %v4817_v18  ;;  %v4807_v60 = vsel %vm8847_vm14, %v5555_v7, %v5556_v6  ;;  %4919 = vmatpush.msra.mxu3 %v4378_v29 }
 0xefd   : > { %4898 = vmatpush.msrb.mxu1 %v4807_v60  ;;  %4920 = vmatmul.f32.vlgmr.msra.gmra.mxu3 %v4817_v18  ;;  %v4808_v27 = vsel %vm8848_vm6, %v5556_v6, %v5560_v26  ;;  %v4805_v56 = vsel %vm8849_vm9, %v5561_v37, %v5565_v21 }
 0xefe   : > { %4938 = vmatpush.msrb.mxu0 %v4808_v27 }
 0xeff   : > { %4899 = vmatpush.msrb.mxu1 %v4805_v56 }
 0xf00   : > { %5158 = vmatmul.msk.f32.vlgmr.msrb.gmra.mxu1 %vm8852_vm11, %v4818_v12  ;;  %4939 = vmatpush.msrb.mxu0 %v4806_v36 }
 0xf01   : > { %5160 = vmatpush.msk.msra.mxu1 %vm828_vm0, %v4952_v0  ;;  %5159 = vmatmul.msk.f32.vlgmr.msrb.gmra.mxu0 %vm8854_vm2, %v4818_v12  ;;  %v4859_v52 = vpop.permute.xlu0 %4858 }
 0xf02   : > { %5162 = vmatpush.msk.msra.mxu0 %vm828_vm0, %v4953_v3  ;;  %v4949_v22 = vpop.permute.xlu1 %4948 }
 0xf08   : > { %5161 = vmatmul.msk.f32.vlgmr.msra.gmra.mxu1 %vm8856_vm4, %v4944_v13 }
 0xf09   : > { %5163 = vmatmul.msk.f32.vlgmr.msra.gmra.mxu0 %vm8857_vm15, %v4944_v13 }
 0xf7d   : > { %v4901_v57 = vpop.f32.mrf.mxu1 }
 0xf7e   : > { %v4941_v35 = vpop.f32.mrf.mxu0 }
 0xf7f   : > { %v4881_v41 = vpop.f32.mrf.mxu2 }
 0xf80   : > { %v4921_v32 = vpop.f32.mrf.mxu3  ;;  %v4882_v54 = vadd.f32 %v4881_v41, %v4859_v52 }
 0xf81   : > { %v4922_v9 = vadd.f32 %v4921_v32, %v4859_v52 }
 0xf82   : > { %v4902_v19 = vadd.f32 %v4901_v57, %v4882_v54 }
 0xf83   : > { %v4942_v20 = vadd.f32 %v4941_v35, %v4922_v9 }
 0xf85   : > { %v4978_v51 = vpop.f32.mrf.mxu1 }
 0xf86   : > { %v4979_v45 = vadd.f32 %v4978_v51, %v4949_v22  ;;  %v4998_v2 = vpop.f32.mrf.mxu0 }
 0xf87   : > { %v4999_v40 = vadd.f32 %v4998_v2, %v4949_v22 }
 0xf88   : > { %v5001_v16 = vadd.f32 %v4979_v45, %v4902_v19 }
 0xf89   : > { %v5002_v25 = vadd.f32 %v4999_v40, %v4942_v20 }
 0xf8a   : > { %5003 = vst [vmem:[%s790_s2] sm:$0xff] %v5001_v16 }
 0xf8b   : > { %5004 = vst [vmem:[%s790_s2 + $0x8] sm:$0xff] %v5002_v25 }
 0xf8c   : > { %5675 = shalt.err (!%p5672_p8)
}
 0xf8d   : > { %5179 = dma.vmem_to_hbm [thread:$0]  (%p6031_p5), %s5020_s29, 256, %s5022_s6, %s5006_s1  }
 0xf8e PF: > { %s8861_s13 = sld [smem:[#allocation21_spill]] }
 0xf8f   : > { %s8862_s14 = sld [smem:[#allocation18_spill]] }
 0xf94   : > { %p5196_p9 = scmp.ge.s32.totalorder %s8861_s13, 2 }
 0xf95   : > { %s5033_s4 = sand.u32 1, %s8862_s14  }
 0xf96   : > { %p5189_p10 = pnand %p5196_p9, %p6035_p6  ;;  %s5034_s30 = scalar_lea.sflag [#allocation11], %s5033_s4 }
 0xf98   : > { %p5190_p11 = pneg %p5189_p10 }
 0xf9a   : > { %5701 = dma.done.wait (%p5190_p11), %s5034_s30, 256  }
 0xf9b   : > { %5703 = vsyncadd (%p5190_p11), %s5034_s30, 4294967040  ;;  %s8864_s2 = sld [smem:[#allocation23_spill]] }
 0xf9c   : > { %s8865_s27 = sld [smem:[#allocation19_spill]] }
 0xf9d   : > { %s8866_s28 = sld [smem:[#allocation20_spill]] }
 0xf9e   : > { %s8867_s6 = sld [smem:[#allocation24_spill]] }
 0xfa1   : > { %p38_p12 = scmp.ge.s32.totalorder %s8864_s2, 4  }
 0xfa3   :  { %40 = sbr.rel (!%p38_p12) target bundleno = 25 (0x19), region = 306 }
 0xfa8   :  { %5040 = vsyncpa [#allocation10], 1 }
 0xfa9   :  { %5042 = vsyncpa [#allocation10 + $0x1], 1 }
 0xfaa   :  { %5043 = vsyncpa [#allocation13], 1 }
 0xfab   :  { %5044 = vsyncpa [#allocation11], 1 }
 0xfac   :  { %5046 = vsyncpa [#allocation11 + $0x1], 1 }

</bundles_post_ra>
